<compile_context>
chip_gen: v7x
topology: tpu7x:2x2x1
jax: 0.10.0
libtpu: 0.0.40
codegen_flags: <defaults>
</compile_context>

<pallas_src>
import functools

import jax
import jax.numpy as jnp
from jax.experimental import pallas as pl
from jax.experimental.pallas import tpu as pltpu


def _round_up(x, m):
    return (x + m - 1) // m * m


def _vmem_limit(block_bytes):
    """Scoped-VMEM budget: double-buffered blocks + slack, clamped for v7x."""
    est = 2 * int(block_bytes) + (4 << 20)
    return int(min(max(est, 32 << 20), 60 << 20))


# ----------------------------- Pallas kernels --------------------------------

def _linear_act_kernel(x_ref, w_ref, b_ref, o_ref, *, act, slope):
    """One tile of  act(x @ w + b);  bf16 matmul, f32 accumulate/epilogue."""
    y = jnp.dot(x_ref[...].astype(jnp.bfloat16), w_ref[...],
                preferred_element_type=jnp.float32)
    y = y + b_ref[...]
    if act == "relu":
        y = jnp.maximum(y, 0.0)
    elif act == "lrelu":
        y = jnp.maximum(y, slope * y)
    o_ref[...] = y.astype(o_ref.dtype)


def _fused_stack_kernel(*refs, acts, slope):
    """A whole stack of Linear+activation layers in one kernel.

    refs = (x, w_0..w_{L-1}, b_0..b_{L-1}, out); all weights live in VMEM.
    """
    L = len(acts)
    x_ref = refs[0]
    w_refs = refs[1:1 + L]
    b_refs = refs[1 + L:1 + 2 * L]
    o_ref = refs[1 + 2 * L]

    h = x_ref[...]
    for li in range(L):
        y = jnp.dot(h.astype(jnp.bfloat16), w_refs[li][...],
                    preferred_element_type=jnp.float32)
        y = y + b_refs[li][...]
        a = acts[li]
        if a == "relu":
            y = jnp.maximum(y, 0.0)
        elif a == "lrelu":
            y = jnp.maximum(y, slope * y)
        h = y
    o_ref[...] = h.astype(o_ref.dtype)


# ----------------------------- Pallas wrappers --------------------------------

def linear_act(x, w, b, act="none", slope=0.2):
    """y = act(x @ w + b).  x: (M, K) f32, w: (K, N) bf16, b: (1, N) f32.

    K must be a multiple of 128 (guaranteed by the NHWC im2col layout); M is
    padded to a multiple of 8 if needed and the padded result is returned.
    """
    M, K = x.shape
    K2, N = w.shape
    assert K == K2 and b.shape == (1, N) and K % 128 == 0

    Mp = _round_up(M, 8)
    if Mp != M:
        x = jnp.zeros((Mp, K), x.dtype).at[:M].set(x)

    tm = min(Mp, 1024)
    while Mp % tm != 0:          # keep tm a divisor of Mp (stays a mult. of 8)
        tm //= 2

    block_bytes = (tm * K * x.dtype.itemsize + K * N * w.dtype.itemsize
                   + N * 4 + tm * N * 4)

    return pl.pallas_call(
        functools.partial(_linear_act_kernel, act=act, slope=slope),
        out_shape=jax.ShapeDtypeStruct((Mp, N), jnp.float32),
        grid_spec=pltpu.PrefetchScalarGridSpec(
            num_scalar_prefetch=0,
            grid=(Mp // tm,),
            in_specs=[
                pl.BlockSpec((tm, K), lambda i: (i, 0)),
                pl.BlockSpec((K, N), lambda i: (0, 0)),
                pl.BlockSpec((1, N), lambda i: (0, 0)),
            ],
            out_specs=pl.BlockSpec((tm, N), lambda i: (i, 0)),
        ),
        compiler_params=pltpu.CompilerParams(
            dimension_semantics=("parallel",),
            vmem_limit_bytes=_vmem_limit(block_bytes)),
    )(x, w, b)


def fused_linear_stack(x, layers, slope=0.2):
    """Run a list of (w_bf16 (K,N), b_f32 (1,N), act) layers in ONE kernel."""
    M, D = x.shape
    Mp = _round_up(M, 8)
    if Mp != M:
        x = jnp.zeros((Mp, D), x.dtype).at[:M].set(x)

    weights = [w for (w, _, _) in layers]
    biases = [b for (_, b, _) in layers]
    acts = tuple(a for (_, _, a) in layers)
    n_out = weights[-1].shape[1]

    in_specs = [pl.BlockSpec((Mp, D), lambda i: (0, 0))]
    in_specs += [pl.BlockSpec(w.shape, lambda i: (0, 0)) for w in weights]
    in_specs += [pl.BlockSpec(b.shape, lambda i: (0, 0)) for b in biases]

    block_bytes = (Mp * D * x.dtype.itemsize
                   + sum(int(w.size) * w.dtype.itemsize for w in weights)
                   + sum(int(b.size) * b.dtype.itemsize for b in biases)
                   + Mp * n_out * 4)

    return pl.pallas_call(
        functools.partial(_fused_stack_kernel, acts=acts, slope=slope),
        out_shape=jax.ShapeDtypeStruct((Mp, n_out), jnp.float32),
        grid_spec=pltpu.PrefetchScalarGridSpec(
            num_scalar_prefetch=0,
            grid=(1,),
            in_specs=in_specs,
            out_specs=pl.BlockSpec((Mp, n_out), lambda i: (0, 0)),
        ),
        compiler_params=pltpu.CompilerParams(
            dimension_semantics=("arbitrary",),
            vmem_limit_bytes=_vmem_limit(block_bytes)),
    )(x, *weights, *biases)


# ------------------------------ im2col (NHWC) ---------------------------------

def _im2col_nhwc(x, kh=4, kw=4, stride=2, pad=1):
    """x: (N, H, W, C) -> ((N*Ho*Wo, kh*kw*C), Ho, Wo); column order (kh,kw,C)."""
    n, h, w, c = x.shape
    xp = jnp.pad(x, ((0, 0), (pad, pad), (pad, pad), (0, 0)))
    ho = (h + 2 * pad - kh) // stride + 1
    wo = (w + 2 * pad - kw) // stride + 1
    patches = [xp[:, i:i + stride * ho:stride, j:j + stride * wo:stride, :]
               for i in range(kh) for j in range(kw)]
    cols = jnp.concatenate(patches, axis=-1)          # (N, Ho, Wo, kh*kw*C)
    return cols.reshape(n * ho * wo, kh * kw * c), ho, wo


# ------------------------------ Parameters ------------------------------------

def init_params(key, num_channels=3, num_classes=2, num_layers=7,
                layer_size=1000):
    """Synthetic parameters in PyTorch layout (conv: OIHW, linear: (in, out))."""
    conv_cfg = [
        (num_channels, 32), (32, 32), (32, 64), (64, 128), (128, 256),
        (256, 256),
    ]
    params = {"conv": [], "mlp": []}
    for (cin, cout) in conv_cfg:
        key, kw_, kb_ = jax.random.split(key, 3)
        w = jax.random.normal(kw_, (cout, cin, 4, 4), jnp.float32) * 0.05
        b = jax.random.normal(kb_, (cout,), jnp.float32) * 0.01
        params["conv"].append((w, b))

    mlp_dims = [256] + [layer_size] * (num_layers - 1) + [num_classes]
    for din, dout in zip(mlp_dims[:-1], mlp_dims[1:]):
        key, kw_, kb_ = jax.random.split(key, 3)
        w = jax.random.normal(kw_, (din, dout), jnp.float32) * 0.05
        b = jax.random.normal(kb_, (dout,), jnp.float32) * 0.01
        params["mlp"].append((w, b))
    return params


def prepare_params(raw):
    """One-time: reorder to (kh,kw,Cin,Cout), pad, cast weights to bf16."""
    conv_out, mlp_out = [], []
    for (w, b) in raw["conv"]:
        cout, cin, kh, kw = w.shape
        cin_p = _round_up(cin, 8)                     # 3 -> 8 for conv1 only
        wt = jnp.zeros((kh, kw, cin_p, cout), jnp.float32)
        wt = wt.at[:, :, :cin, :].set(jnp.transpose(w, (2, 3, 1, 0)))
        conv_out.append((wt.reshape(kh * kw * cin_p, cout).astype(jnp.bfloat16),
                         b.reshape(1, cout).astype(jnp.float32)))
    for (w, b) in raw["mlp"]:
        din, dout = w.shape
        din_p, dout_p = _round_up(din, 128), _round_up(dout, 128)
        wp = jnp.zeros((din_p, dout_p), jnp.float32).at[:din, :dout].set(w)
        bp = jnp.zeros((1, dout_p), jnp.float32).at[0, :dout].set(b)
        mlp_out.append((wp.astype(jnp.bfloat16), bp))
    return {"conv": conv_out, "mlp": mlp_out}


# ------------------------------ Forward ----------------------------------------

@functools.partial(jax.jit, static_argnames=("num_classes",))
def forward(prepared, x, num_classes):
    """x: (N, num_channels, 64, 64) NCHW -> (N, num_classes)."""
    conv_p = prepared["conv"]
    mlp_p = prepared["mlp"]
    n = x.shape[0]

    # Single NCHW -> NHWC layout change + channel pad for conv1 (3 -> 8).
    cin_p = conv_p[0][0].shape[0] // 16
    h = jnp.transpose(x, (0, 2, 3, 1))
    if cin_p > h.shape[-1]:
        h = jnp.pad(h, ((0, 0), (0, 0), (0, 0), (0, cin_p - h.shape[-1])))

    # conv1..conv5: Pallas matmul + bias + ReLU per layer (im2col glue in XLA).
    for (w2d, b2d) in conv_p[:-1]:
        cols, ho, wo = _im2col_nhwc(h)
        y = linear_act(cols, w2d, b2d, act="relu")
        m = n * ho * wo
        if y.shape[0] != m:
            y = y[:m]
        h = y.reshape(n, ho, wo, w2d.shape[1])

    # conv6 (1x1 spatial output == flatten) + full MLP head: one fused kernel.
    cols, _, _ = _im2col_nhwc(h)                      # (n, 4096)
    w6, b6 = conv_p[-1]
    layers = [(w6, b6, "relu")]
    layers += [(w, b, "lrelu") for (w, b) in mlp_p[:-1]]
    layers += [(mlp_p[-1][0], mlp_p[-1][1], "none")]
    out = fused_linear_stack(cols, layers, slope=0.2)

    return out[:n, :num_classes]


if __name__ == "__main__":
    key = jax.random.PRNGKey(0)
    kx, kp = jax.random.split(key)

    # image_size is hardcoded to 64 in the module; keep everything else small.
    batch, num_channels, num_classes = 2, 3, 2
    layer_size, num_layers = 256, 7

    x = jax.random.normal(kx, (batch, num_channels, 64, 64), jnp.float32)
    raw_params = init_params(kp, num_channels=num_channels,
                             num_classes=num_classes, num_layers=num_layers,
                             layer_size=layer_size)
    params = prepare_params(raw_params)               # one-time, outside hot path

    out = forward(params, x, num_classes=num_classes)
    out = jax.block_until_ready(out)
    assert out.shape == (batch, num_classes), out.shape
    print("KERNEL_OK")
</pallas_src>

<mosaic_0001>
module attributes {stable_mosaic.version = 11 : i64} {
  func.func @_linear_act_kernel(%arg0: i32, %arg1: memref<1024x128xf32, #tpu.memory_space<vmem>>, %arg2: memref<128x32xbf16, #tpu.memory_space<vmem>>, %arg3: memref<1x32xf32, #tpu.memory_space<vmem>>, %arg4: memref<1024x32xf32, #tpu.memory_space<vmem>>) attributes {dimension_semantics = [#tpu.dimension_semantics<parallel>], iteration_bounds = array<i64: 2>, scalar_prefetch = 0 : i64, scratch_operands = 0 : i64, tpu.core_type = #tpu.core_type<tc>, window_params = [{transform_indices = @transform_0, window_bounds = array<i64: 1024, 128>}, {pipeline_mode = #tpu.pipeline_mode<synchronous>, transform_indices = @transform_1, window_bounds = array<i64: 128, 32>}, {pipeline_mode = #tpu.pipeline_mode<synchronous>, transform_indices = @transform_2, window_bounds = array<i64: 1, 32>}, {transform_indices = @transform_3, window_bounds = array<i64: 1024, 32>}]} {
    %c0 = arith.constant 0 : index
    %c0_0 = arith.constant 0 : index
    %0 = vector.load %arg1[%c0, %c0_0] : memref<1024x128xf32, #tpu.memory_space<vmem>>, vector<1024x128xf32>
    %1 = arith.truncf %0 : vector<1024x128xf32> to vector<1024x128xbf16>
    %c0_1 = arith.constant 0 : index
    %c0_2 = arith.constant 0 : index
    %2 = vector.load %arg2[%c0_1, %c0_2] : memref<128x32xbf16, #tpu.memory_space<vmem>>, vector<128x32xbf16>
    %cst = arith.constant dense<0.000000e+00> : vector<1024x32xf32>
    %3 = tpu.matmul %1, %2, %cst {dimension_numbers = #tpu.dot_dimension_numbers<[1], [0], [0], [1], [0, 0, 1, 1], [], []>} : vector<1024x128xbf16>, vector<128x32xbf16>, vector<1024x32xf32> -> vector<1024x32xf32>
    %c0_3 = arith.constant 0 : index
    %c0_4 = arith.constant 0 : index
    %4 = vector.load %arg3[%c0_3, %c0_4] : memref<1x32xf32, #tpu.memory_space<vmem>>, vector<1x32xf32>
    %5 = vector.broadcast %4 : vector<1x32xf32> to vector<1024x32xf32>
    %6 = arith.addf %3, %5 : vector<1024x32xf32>
    %cst_5 = arith.constant 0.000000e+00 : f32
    %7 = vector.broadcast %cst_5 : f32 to vector<1024x32xf32>
    %8 = arith.maximumf %6, %7 : vector<1024x32xf32>
    %c0_6 = arith.constant 0 : index
    %c0_7 = arith.constant 0 : index
    %9 = vector.load %arg4[%c0_6, %c0_7] : memref<1024x32xf32, #tpu.memory_space<vmem>>, vector<1024x32xf32>
    tpu.vector_store %arg4[%c0_6, %c0_7], %8 {strides = array<i32>} : memref<1024x32xf32, #tpu.memory_space<vmem>>, vector<1024x32xf32>,
    return
  }
  func.func @transform_0(%arg0: i32) -> (i32, i32) {
    %c0_i32 = arith.constant 0 : i32
    %c0_i32_0 = arith.constant 0 : i32
    return %arg0, %c0_i32 : i32, i32
  }
  func.func @transform_1(%arg0: i32) -> (i32, i32) {
    %c0_i32 = arith.constant 0 : i32
    %c0_i32_0 = arith.constant 0 : i32
    %c0_i32_1 = arith.constant 0 : i32
    return %c0_i32, %c0_i32_0 : i32, i32
  }
  func.func @transform_2(%arg0: i32) -> (i32, i32) {
    %c0_i32 = arith.constant 0 : i32
    %c0_i32_0 = arith.constant 0 : i32
    %c0_i32_1 = arith.constant 0 : i32
    return %c0_i32, %c0_i32_0 : i32, i32
  }
  func.func @transform_3(%arg0: i32) -> (i32, i32) {
    %c0_i32 = arith.constant 0 : i32
    %c0_i32_0 = arith.constant 0 : i32
    return %arg0, %c0_i32 : i32, i32
  }
}

module attributes {stable_mosaic.version = 11 : i64} {
  func.func @_linear_act_kernel(%arg0: i32, %arg1: memref<512x512xf32, #tpu.memory_space<vmem>>, %arg2: memref<512x32xbf16, #tpu.memory_space<vmem>>, %arg3: memref<1x32xf32, #tpu.memory_space<vmem>>, %arg4: memref<512x32xf32, #tpu.memory_space<vmem>>) attributes {dimension_semantics = [#tpu.dimension_semantics<parallel>], iteration_bounds = array<i64: 1>, scalar_prefetch = 0 : i64, scratch_operands = 0 : i64, tpu.core_type = #tpu.core_type<tc>, window_params = [{transform_indices = @transform_0, window_bounds = array<i64: 512, 512>}, {pipeline_mode = #tpu.pipeline_mode<synchronous>, transform_indices = @transform_1, window_bounds = array<i64: 512, 32>}, {pipeline_mode = #tpu.pipeline_mode<synchronous>, transform_indices = @transform_2, window_bounds = array<i64: 1, 32>}, {transform_indices = @transform_3, window_bounds = array<i64: 512, 32>}]} {
    %c0 = arith.constant 0 : index
    %c0_0 = arith.constant 0 : index
    %0 = vector.load %arg1[%c0, %c0_0] : memref<512x512xf32, #tpu.memory_space<vmem>>, vector<512x512xf32>
    %1 = arith.truncf %0 : vector<512x512xf32> to vector<512x512xbf16>
    %c0_1 = arith.constant 0 : index
    %c0_2 = arith.constant 0 : index
    %2 = vector.load %arg2[%c0_1, %c0_2] : memref<512x32xbf16, #tpu.memory_space<vmem>>, vector<512x32xbf16>
    %cst = arith.constant dense<0.000000e+00> : vector<512x32xf32>
    %3 = tpu.matmul %1, %2, %cst {dimension_numbers = #tpu.dot_dimension_numbers<[1], [0], [0], [1], [0, 0, 1, 1], [], []>} : vector<512x512xbf16>, vector<512x32xbf16>, vector<512x32xf32> -> vector<512x32xf32>
    %c0_3 = arith.constant 0 : index
    %c0_4 = arith.constant 0 : index
    %4 = vector.load %arg3[%c0_3, %c0_4] : memref<1x32xf32, #tpu.memory_space<vmem>>, vector<1x32xf32>
    %5 = vector.broadcast %4 : vector<1x32xf32> to vector<512x32xf32>
    %6 = arith.addf %3, %5 : vector<512x32xf32>
    %cst_5 = arith.constant 0.000000e+00 : f32
    %7 = vector.broadcast %cst_5 : f32 to vector<512x32xf32>
    %8 = arith.maximumf %6, %7 : vector<512x32xf32>
    %c0_6 = arith.constant 0 : index
    %c0_7 = arith.constant 0 : index
    %9 = vector.load %arg4[%c0_6, %c0_7] : memref<512x32xf32, #tpu.memory_space<vmem>>, vector<512x32xf32>
    tpu.vector_store %arg4[%c0_6, %c0_7], %8 {strides = array<i32>} : memref<512x32xf32, #tpu.memory_space<vmem>>, vector<512x32xf32>,
    return
  }
  func.func @transform_0(%arg0: i32) -> (i32, i32) {
    %c0_i32 = arith.constant 0 : i32
    %c0_i32_0 = arith.constant 0 : i32
    return %arg0, %c0_i32 : i32, i32
  }
  func.func @transform_1(%arg0: i32) -> (i32, i32) {
    %c0_i32 = arith.constant 0 : i32
    %c0_i32_0 = arith.constant 0 : i32
    %c0_i32_1 = arith.constant 0 : i32
    return %c0_i32, %c0_i32_0 : i32, i32
  }
  func.func @transform_2(%arg0: i32) -> (i32, i32) {
    %c0_i32 = arith.constant 0 : i32
    %c0_i32_0 = arith.constant 0 : i32
    %c0_i32_1 = arith.constant 0 : i32
    return %c0_i32, %c0_i32_0 : i32, i32
  }
  func.func @transform_3(%arg0: i32) -> (i32, i32) {
    %c0_i32 = arith.constant 0 : i32
    %c0_i32_0 = arith.constant 0 : i32
    return %arg0, %c0_i32 : i32, i32
  }
}

module attributes {stable_mosaic.version = 11 : i64} {
  func.func @_linear_act_kernel(%arg0: i32, %arg1: memref<128x512xf32, #tpu.memory_space<vmem>>, %arg2: memref<512x64xbf16, #tpu.memory_space<vmem>>, %arg3: memref<1x64xf32, #tpu.memory_space<vmem>>, %arg4: memref<128x64xf32, #tpu.memory_space<vmem>>) attributes {dimension_semantics = [#tpu.dimension_semantics<parallel>], iteration_bounds = array<i64: 1>, scalar_prefetch = 0 : i64, scratch_operands = 0 : i64, tpu.core_type = #tpu.core_type<tc>, window_params = [{transform_indices = @transform_0, window_bounds = array<i64: 128, 512>}, {pipeline_mode = #tpu.pipeline_mode<synchronous>, transform_indices = @transform_1, window_bounds = array<i64: 512, 64>}, {pipeline_mode = #tpu.pipeline_mode<synchronous>, transform_indices = @transform_2, window_bounds = array<i64: 1, 64>}, {transform_indices = @transform_3, window_bounds = array<i64: 128, 64>}]} {
    %c0 = arith.constant 0 : index
    %c0_0 = arith.constant 0 : index
    %0 = vector.load %arg1[%c0, %c0_0] : memref<128x512xf32, #tpu.memory_space<vmem>>, vector<128x512xf32>
    %1 = arith.truncf %0 : vector<128x512xf32> to vector<128x512xbf16>
    %c0_1 = arith.constant 0 : index
    %c0_2 = arith.constant 0 : index
    %2 = vector.load %arg2[%c0_1, %c0_2] : memref<512x64xbf16, #tpu.memory_space<vmem>>, vector<512x64xbf16>
    %cst = arith.constant dense<0.000000e+00> : vector<128x64xf32>
    %3 = tpu.matmul %1, %2, %cst {dimension_numbers = #tpu.dot_dimension_numbers<[1], [0], [0], [1], [0, 0, 1, 1], [], []>} : vector<128x512xbf16>, vector<512x64xbf16>, vector<128x64xf32> -> vector<128x64xf32>
    %c0_3 = arith.constant 0 : index
    %c0_4 = arith.constant 0 : index
    %4 = vector.load %arg3[%c0_3, %c0_4] : memref<1x64xf32, #tpu.memory_space<vmem>>, vector<1x64xf32>
    %5 = vector.broadcast %4 : vector<1x64xf32> to vector<128x64xf32>
    %6 = arith.addf %3, %5 : vector<128x64xf32>
    %cst_5 = arith.constant 0.000000e+00 : f32
    %7 = vector.broadcast %cst_5 : f32 to vector<128x64xf32>
    %8 = arith.maximumf %6, %7 : vector<128x64xf32>
    %c0_6 = arith.constant 0 : index
    %c0_7 = arith.constant 0 : index
    %9 = vector.load %arg4[%c0_6, %c0_7] : memref<128x64xf32, #tpu.memory_space<vmem>>, vector<128x64xf32>
    tpu.vector_store %arg4[%c0_6, %c0_7], %8 {strides = array<i32>} : memref<128x64xf32, #tpu.memory_space<vmem>>, vector<128x64xf32>,
    return
  }
  func.func @transform_0(%arg0: i32) -> (i32, i32) {
    %c0_i32 = arith.constant 0 : i32
    %c0_i32_0 = arith.constant 0 : i32
    return %arg0, %c0_i32 : i32, i32
  }
  func.func @transform_1(%arg0: i32) -> (i32, i32) {
    %c0_i32 = arith.constant 0 : i32
    %c0_i32_0 = arith.constant 0 : i32
    %c0_i32_1 = arith.constant 0 : i32
    return %c0_i32, %c0_i32_0 : i32, i32
  }
  func.func @transform_2(%arg0: i32) -> (i32, i32) {
    %c0_i32 = arith.constant 0 : i32
    %c0_i32_0 = arith.constant 0 : i32
    %c0_i32_1 = arith.constant 0 : i32
    return %c0_i32, %c0_i32_0 : i32, i32
  }
  func.func @transform_3(%arg0: i32) -> (i32, i32) {
    %c0_i32 = arith.constant 0 : i32
    %c0_i32_0 = arith.constant 0 : i32
    return %arg0, %c0_i32 : i32, i32
  }
}

module attributes {stable_mosaic.version = 11 : i64} {
  func.func @_linear_act_kernel(%arg0: i32, %arg1: memref<32x1024xf32, #tpu.memory_space<vmem>>, %arg2: memref<1024x128xbf16, #tpu.memory_space<vmem>>, %arg3: memref<1x128xf32, #tpu.memory_space<vmem>>, %arg4: memref<32x128xf32, #tpu.memory_space<vmem>>) attributes {dimension_semantics = [#tpu.dimension_semantics<parallel>], iteration_bounds = array<i64: 1>, scalar_prefetch = 0 : i64, scratch_operands = 0 : i64, tpu.core_type = #tpu.core_type<tc>, window_params = [{transform_indices = @transform_0, window_bounds = array<i64: 32, 1024>}, {pipeline_mode = #tpu.pipeline_mode<synchronous>, transform_indices = @transform_1, window_bounds = array<i64: 1024, 128>}, {pipeline_mode = #tpu.pipeline_mode<synchronous>, transform_indices = @transform_2, window_bounds = array<i64: 1, 128>}, {transform_indices = @transform_3, window_bounds = array<i64: 32, 128>}]} {
    %c0 = arith.constant 0 : index
    %c0_0 = arith.constant 0 : index
    %0 = vector.load %arg1[%c0, %c0_0] : memref<32x1024xf32, #tpu.memory_space<vmem>>, vector<32x1024xf32>
    %1 = arith.truncf %0 : vector<32x1024xf32> to vector<32x1024xbf16>
    %c0_1 = arith.constant 0 : index
    %c0_2 = arith.constant 0 : index
    %2 = vector.load %arg2[%c0_1, %c0_2] : memref<1024x128xbf16, #tpu.memory_space<vmem>>, vector<1024x128xbf16>
    %cst = arith.constant dense<0.000000e+00> : vector<32x128xf32>
    %3 = tpu.matmul %1, %2, %cst {dimension_numbers = #tpu.dot_dimension_numbers<[1], [0], [0], [1], [0, 0, 1, 1], [], []>} : vector<32x1024xbf16>, vector<1024x128xbf16>, vector<32x128xf32> -> vector<32x128xf32>
    %c0_3 = arith.constant 0 : index
    %c0_4 = arith.constant 0 : index
    %4 = vector.load %arg3[%c0_3, %c0_4] : memref<1x128xf32, #tpu.memory_space<vmem>>, vector<1x128xf32>
    %5 = vector.broadcast %4 : vector<1x128xf32> to vector<32x128xf32>
    %6 = arith.addf %3, %5 : vector<32x128xf32>
    %cst_5 = arith.constant 0.000000e+00 : f32
    %7 = vector.broadcast %cst_5 : f32 to vector<32x128xf32>
    %8 = arith.maximumf %6, %7 : vector<32x128xf32>
    %c0_6 = arith.constant 0 : index
    %c0_7 = arith.constant 0 : index
    %9 = vector.load %arg4[%c0_6, %c0_7] : memref<32x128xf32, #tpu.memory_space<vmem>>, vector<32x128xf32>
    tpu.vector_store %arg4[%c0_6, %c0_7], %8 {strides = array<i32>} : memref<32x128xf32, #tpu.memory_space<vmem>>, vector<32x128xf32>,
    return
  }
  func.func @transform_0(%arg0: i32) -> (i32, i32) {
    %c0_i32 = arith.constant 0 : i32
    %c0_i32_0 = arith.constant 0 : i32
    return %arg0, %c0_i32 : i32, i32
  }
  func.func @transform_1(%arg0: i32) -> (i32, i32) {
    %c0_i32 = arith.constant 0 : i32
    %c0_i32_0 = arith.constant 0 : i32
    %c0_i32_1 = arith.constant 0 : i32
    return %c0_i32, %c0_i32_0 : i32, i32
  }
  func.func @transform_2(%arg0: i32) -> (i32, i32) {
    %c0_i32 = arith.constant 0 : i32
    %c0_i32_0 = arith.constant 0 : i32
    %c0_i32_1 = arith.constant 0 : i32
    return %c0_i32, %c0_i32_0 : i32, i32
  }
  func.func @transform_3(%arg0: i32) -> (i32, i32) {
    %c0_i32 = arith.constant 0 : i32
    %c0_i32_0 = arith.constant 0 : i32
    return %arg0, %c0_i32 : i32, i32
  }
}

module attributes {stable_mosaic.version = 11 : i64} {
  func.func @_linear_act_kernel(%arg0: i32, %arg1: memref<8x2048xf32, #tpu.memory_space<vmem>>, %arg2: memref<2048x256xbf16, #tpu.memory_space<vmem>>, %arg3: memref<1x256xf32, #tpu.memory_space<vmem>>, %arg4: memref<8x256xf32, #tpu.memory_space<vmem>>) attributes {dimension_semantics = [#tpu.dimension_semantics<parallel>], iteration_bounds = array<i64: 1>, scalar_prefetch = 0 : i64, scratch_operands = 0 : i64, tpu.core_type = #tpu.core_type<tc>, window_params = [{transform_indices = @transform_0, window_bounds = array<i64: 8, 2048>}, {pipeline_mode = #tpu.pipeline_mode<synchronous>, transform_indices = @transform_1, window_bounds = array<i64: 2048, 256>}, {pipeline_mode = #tpu.pipeline_mode<synchronous>, transform_indices = @transform_2, window_bounds = array<i64: 1, 256>}, {transform_indices = @transform_3, window_bounds = array<i64: 8, 256>}]} {
    %c0 = arith.constant 0 : index
    %c0_0 = arith.constant 0 : index
    %0 = vector.load %arg1[%c0, %c0_0] : memref<8x2048xf32, #tpu.memory_space<vmem>>, vector<8x2048xf32>
    %1 = arith.truncf %0 : vector<8x2048xf32> to vector<8x2048xbf16>
    %c0_1 = arith.constant 0 : index
    %c0_2 = arith.constant 0 : index
    %2 = vector.load %arg2[%c0_1, %c0_2] : memref<2048x256xbf16, #tpu.memory_space<vmem>>, vector<2048x256xbf16>
    %cst = arith.constant dense<0.000000e+00> : vector<8x256xf32>
    %3 = tpu.matmul %1, %2, %cst {dimension_numbers = #tpu.dot_dimension_numbers<[1], [0], [0], [1], [0, 0, 1, 1], [], []>} : vector<8x2048xbf16>, vector<2048x256xbf16>, vector<8x256xf32> -> vector<8x256xf32>
    %c0_3 = arith.constant 0 : index
    %c0_4 = arith.constant 0 : index
    %4 = vector.load %arg3[%c0_3, %c0_4] : memref<1x256xf32, #tpu.memory_space<vmem>>, vector<1x256xf32>
    %5 = vector.broadcast %4 : vector<1x256xf32> to vector<8x256xf32>
    %6 = arith.addf %3, %5 : vector<8x256xf32>
    %cst_5 = arith.constant 0.000000e+00 : f32
    %7 = vector.broadcast %cst_5 : f32 to vector<8x256xf32>
    %8 = arith.maximumf %6, %7 : vector<8x256xf32>
    %c0_6 = arith.constant 0 : index
    %c0_7 = arith.constant 0 : index
    %9 = vector.load %arg4[%c0_6, %c0_7] : memref<8x256xf32, #tpu.memory_space<vmem>>, vector<8x256xf32>
    tpu.vector_store %arg4[%c0_6, %c0_7], %8 {strides = array<i32>} : memref<8x256xf32, #tpu.memory_space<vmem>>, vector<8x256xf32>,
    return
  }
  func.func @transform_0(%arg0: i32) -> (i32, i32) {
    %c0_i32 = arith.constant 0 : i32
    %c0_i32_0 = arith.constant 0 : i32
    return %arg0, %c0_i32 : i32, i32
  }
  func.func @transform_1(%arg0: i32) -> (i32, i32) {
    %c0_i32 = arith.constant 0 : i32
    %c0_i32_0 = arith.constant 0 : i32
    %c0_i32_1 = arith.constant 0 : i32
    return %c0_i32, %c0_i32_0 : i32, i32
  }
  func.func @transform_2(%arg0: i32) -> (i32, i32) {
    %c0_i32 = arith.constant 0 : i32
    %c0_i32_0 = arith.constant 0 : i32
    %c0_i32_1 = arith.constant 0 : i32
    return %c0_i32, %c0_i32_0 : i32, i32
  }
  func.func @transform_3(%arg0: i32) -> (i32, i32) {
    %c0_i32 = arith.constant 0 : i32
    %c0_i32_0 = arith.constant 0 : i32
    return %arg0, %c0_i32 : i32, i32
  }
}

module attributes {stable_mosaic.version = 11 : i64} {
  func.func @_fused_stack_kernel(%arg0: i32, %arg1: memref<8x4096xf32, #tpu.memory_space<vmem>>, %arg2: memref<4096x256xbf16, #tpu.memory_space<vmem>>, %arg3: memref<256x256xbf16, #tpu.memory_space<vmem>>, %arg4: memref<256x256xbf16, #tpu.memory_space<vmem>>, %arg5: memref<256x256xbf16, #tpu.memory_space<vmem>>, %arg6: memref<256x256xbf16, #tpu.memory_space<vmem>>, %arg7: memref<256x256xbf16, #tpu.memory_space<vmem>>, %arg8: memref<256x256xbf16, #tpu.memory_space<vmem>>, %arg9: memref<256x128xbf16, #tpu.memory_space<vmem>>, %arg10: memref<1x256xf32, #tpu.memory_space<vmem>>, %arg11: memref<1x256xf32, #tpu.memory_space<vmem>>, %arg12: memref<1x256xf32, #tpu.memory_space<vmem>>, %arg13: memref<1x256xf32, #tpu.memory_space<vmem>>, %arg14: memref<1x256xf32, #tpu.memory_space<vmem>>, %arg15: memref<1x256xf32, #tpu.memory_space<vmem>>, %arg16: memref<1x256xf32, #tpu.memory_space<vmem>>, %arg17: memref<1x128xf32, #tpu.memory_space<vmem>>, %arg18: memref<8x128xf32, #tpu.memory_space<vmem>>) attributes {dimension_semantics = [#tpu.dimension_semantics<arbitrary>], iteration_bounds = array<i64: 1>, scalar_prefetch = 0 : i64, scratch_operands = 0 : i64, tpu.core_type = #tpu.core_type<tc>, window_params = [{pipeline_mode = #tpu.pipeline_mode<synchronous>, transform_indices = @transform_0, window_bounds = array<i64: 8, 4096>}, {pipeline_mode = #tpu.pipeline_mode<synchronous>, transform_indices = @transform_1, window_bounds = array<i64: 4096, 256>}, {pipeline_mode = #tpu.pipeline_mode<synchronous>, transform_indices = @transform_2, window_bounds = array<i64: 256, 256>}, {pipeline_mode = #tpu.pipeline_mode<synchronous>, transform_indices = @transform_3, window_bounds = array<i64: 256, 256>}, {pipeline_mode = #tpu.pipeline_mode<synchronous>, transform_indices = @transform_4, window_bounds = array<i64: 256, 256>}, {pipeline_mode = #tpu.pipeline_mode<synchronous>, transform_indices = @transform_5, window_bounds = array<i64: 256, 256>}, {pipeline_mode = #tpu.pipeline_mode<synchronous>, transform_indices = @transform_6, window_bounds = array<i64: 256, 256>}, {pipeline_mode = #tpu.pipeline_mode<synchronous>, transform_indices = @transform_7, window_bounds = array<i64: 256, 256>}, {pipeline_mode = #tpu.pipeline_mode<synchronous>, transform_indices = @transform_8, window_bounds = array<i64: 256, 128>}, {pipeline_mode = #tpu.pipeline_mode<synchronous>, transform_indices = @transform_9, window_bounds = array<i64: 1, 256>}, {pipeline_mode = #tpu.pipeline_mode<synchronous>, transform_indices = @transform_10, window_bounds = array<i64: 1, 256>}, {pipeline_mode = #tpu.pipeline_mode<synchronous>, transform_indices = @transform_11, window_bounds = array<i64: 1, 256>}, {pipeline_mode = #tpu.pipeline_mode<synchronous>, transform_indices = @transform_12, window_bounds = array<i64: 1, 256>}, {pipeline_mode = #tpu.pipeline_mode<synchronous>, transform_indices = @transform_13, window_bounds = array<i64: 1, 256>}, {pipeline_mode = #tpu.pipeline_mode<synchronous>, transform_indices = @transform_14, window_bounds = array<i64: 1, 256>}, {pipeline_mode = #tpu.pipeline_mode<synchronous>, transform_indices = @transform_15, window_bounds = array<i64: 1, 256>}, {pipeline_mode = #tpu.pipeline_mode<synchronous>, transform_indices = @transform_16, window_bounds = array<i64: 1, 128>}, {pipeline_mode = #tpu.pipeline_mode<synchronous>, transform_indices = @transform_17, window_bounds = array<i64: 8, 128>}]} {
    %c0 = arith.constant 0 : index
    %c0_0 = arith.constant 0 : index
    %0 = vector.load %arg1[%c0, %c0_0] : memref<8x4096xf32, #tpu.memory_space<vmem>>, vector<8x4096xf32>
    %1 = arith.truncf %0 : vector<8x4096xf32> to vector<8x4096xbf16>
    %c0_1 = arith.constant 0 : index
    %c0_2 = arith.constant 0 : index
    %2 = vector.load %arg2[%c0_1, %c0_2] : memref<4096x256xbf16, #tpu.memory_space<vmem>>, vector<4096x256xbf16>
    %cst = arith.constant dense<0.000000e+00> : vector<8x256xf32>
    %3 = tpu.matmul %1, %2, %cst {dimension_numbers = #tpu.dot_dimension_numbers<[1], [0], [0], [1], [0, 0, 1, 1], [], []>} : vector<8x4096xbf16>, vector<4096x256xbf16>, vector<8x256xf32> -> vector<8x256xf32>
    %c0_3 = arith.constant 0 : index
    %c0_4 = arith.constant 0 : index
    %4 = vector.load %arg10[%c0_3, %c0_4] : memref<1x256xf32, #tpu.memory_space<vmem>>, vector<1x256xf32>
    %5 = vector.broadcast %4 : vector<1x256xf32> to vector<8x256xf32>
    %6 = arith.addf %3, %5 : vector<8x256xf32>
    %cst_5 = arith.constant 0.000000e+00 : f32
    %7 = vector.broadcast %cst_5 : f32 to vector<8x256xf32>
    %8 = arith.maximumf %6, %7 : vector<8x256xf32>
    %9 = arith.truncf %8 : vector<8x256xf32> to vector<8x256xbf16>
    %c0_6 = arith.constant 0 : index
    %c0_7 = arith.constant 0 : index
    %10 = vector.load %arg3[%c0_6, %c0_7] : memref<256x256xbf16, #tpu.memory_space<vmem>>, vector<256x256xbf16>
    %cst_8 = arith.constant dense<0.000000e+00> : vector<8x256xf32>
    %11 = tpu.matmul %9, %10, %cst_8 {dimension_numbers = #tpu.dot_dimension_numbers<[1], [0], [0], [1], [0, 0, 1, 1], [], []>} : vector<8x256xbf16>, vector<256x256xbf16>, vector<8x256xf32> -> vector<8x256xf32>
    %c0_9 = arith.constant 0 : index
    %c0_10 = arith.constant 0 : index
    %12 = vector.load %arg11[%c0_9, %c0_10] : memref<1x256xf32, #tpu.memory_space<vmem>>, vector<1x256xf32>
    %13 = vector.broadcast %12 : vector<1x256xf32> to vector<8x256xf32>
    %14 = arith.addf %11, %13 : vector<8x256xf32>
    %cst_11 = arith.constant 2.000000e-01 : f32
    %15 = vector.broadcast %cst_11 : f32 to vector<8x256xf32>
    %16 = arith.mulf %15, %14 : vector<8x256xf32>
    %17 = arith.maximumf %14, %16 : vector<8x256xf32>
    %18 = arith.truncf %17 : vector<8x256xf32> to vector<8x256xbf16>
    %c0_12 = arith.constant 0 : index
    %c0_13 = arith.constant 0 : index
    %19 = vector.load %arg4[%c0_12, %c0_13] : memref<256x256xbf16, #tpu.memory_space<vmem>>, vector<256x256xbf16>
    %cst_14 = arith.constant dense<0.000000e+00> : vector<8x256xf32>
    %20 = tpu.matmul %18, %19, %cst_14 {dimension_numbers = #tpu.dot_dimension_numbers<[1], [0], [0], [1], [0, 0, 1, 1], [], []>} : vector<8x256xbf16>, vector<256x256xbf16>, vector<8x256xf32> -> vector<8x256xf32>
    %c0_15 = arith.constant 0 : index
    %c0_16 = arith.constant 0 : index
    %21 = vector.load %arg12[%c0_15, %c0_16] : memref<1x256xf32, #tpu.memory_space<vmem>>, vector<1x256xf32>
    %22 = vector.broadcast %21 : vector<1x256xf32> to vector<8x256xf32>
    %23 = arith.addf %20, %22 : vector<8x256xf32>
    %cst_17 = arith.constant 2.000000e-01 : f32
    %24 = vector.broadcast %cst_17 : f32 to vector<8x256xf32>
    %25 = arith.mulf %24, %23 : vector<8x256xf32>
    %26 = arith.maximumf %23, %25 : vector<8x256xf32>
    %27 = arith.truncf %26 : vector<8x256xf32> to vector<8x256xbf16>
    %c0_18 = arith.constant 0 : index
    %c0_19 = arith.constant 0 : index
    %28 = vector.load %arg5[%c0_18, %c0_19] : memref<256x256xbf16, #tpu.memory_space<vmem>>, vector<256x256xbf16>
    %cst_20 = arith.constant dense<0.000000e+00> : vector<8x256xf32>
    %29 = tpu.matmul %27, %28, %cst_20 {dimension_numbers = #tpu.dot_dimension_numbers<[1], [0], [0], [1], [0, 0, 1, 1], [], []>} : vector<8x256xbf16>, vector<256x256xbf16>, vector<8x256xf32> -> vector<8x256xf32>
    %c0_21 = arith.constant 0 : index
    %c0_22 = arith.constant 0 : index
    %30 = vector.load %arg13[%c0_21, %c0_22] : memref<1x256xf32, #tpu.memory_space<vmem>>, vector<1x256xf32>
    %31 = vector.broadcast %30 : vector<1x256xf32> to vector<8x256xf32>
    %32 = arith.addf %29, %31 : vector<8x256xf32>
    %cst_23 = arith.constant 2.000000e-01 : f32
    %33 = vector.broadcast %cst_23 : f32 to vector<8x256xf32>
    %34 = arith.mulf %33, %32 : vector<8x256xf32>
    %35 = arith.maximumf %32, %34 : vector<8x256xf32>
    %36 = arith.truncf %35 : vector<8x256xf32> to vector<8x256xbf16>
    %c0_24 = arith.constant 0 : index
    %c0_25 = arith.constant 0 : index
    %37 = vector.load %arg6[%c0_24, %c0_25] : memref<256x256xbf16, #tpu.memory_space<vmem>>, vector<256x256xbf16>
    %cst_26 = arith.constant dense<0.000000e+00> : vector<8x256xf32>
    %38 = tpu.matmul %36, %37, %cst_26 {dimension_numbers = #tpu.dot_dimension_numbers<[1], [0], [0], [1], [0, 0, 1, 1], [], []>} : vector<8x256xbf16>, vector<256x256xbf16>, vector<8x256xf32> -> vector<8x256xf32>
    %c0_27 = arith.constant 0 : index
    %c0_28 = arith.constant 0 : index
    %39 = vector.load %arg14[%c0_27, %c0_28] : memref<1x256xf32, #tpu.memory_space<vmem>>, vector<1x256xf32>
    %40 = vector.broadcast %39 : vector<1x256xf32> to vector<8x256xf32>
    %41 = arith.addf %38, %40 : vector<8x256xf32>
    %cst_29 = arith.constant 2.000000e-01 : f32
    %42 = vector.broadcast %cst_29 : f32 to vector<8x256xf32>
    %43 = arith.mulf %42, %41 : vector<8x256xf32>
    %44 = arith.maximumf %41, %43 : vector<8x256xf32>
    %45 = arith.truncf %44 : vector<8x256xf32> to vector<8x256xbf16>
    %c0_30 = arith.constant 0 : index
    %c0_31 = arith.constant 0 : index
    %46 = vector.load %arg7[%c0_30, %c0_31] : memref<256x256xbf16, #tpu.memory_space<vmem>>, vector<256x256xbf16>
    %cst_32 = arith.constant dense<0.000000e+00> : vector<8x256xf32>
    %47 = tpu.matmul %45, %46, %cst_32 {dimension_numbers = #tpu.dot_dimension_numbers<[1], [0], [0], [1], [0, 0, 1, 1], [], []>} : vector<8x256xbf16>, vector<256x256xbf16>, vector<8x256xf32> -> vector<8x256xf32>
    %c0_33 = arith.constant 0 : index
    %c0_34 = arith.constant 0 : index
    %48 = vector.load %arg15[%c0_33, %c0_34] : memref<1x256xf32, #tpu.memory_space<vmem>>, vector<1x256xf32>
    %49 = vector.broadcast %48 : vector<1x256xf32> to vector<8x256xf32>
    %50 = arith.addf %47, %49 : vector<8x256xf32>
    %cst_35 = arith.constant 2.000000e-01 : f32
    %51 = vector.broadcast %cst_35 : f32 to vector<8x256xf32>
    %52 = arith.mulf %51, %50 : vector<8x256xf32>
    %53 = arith.maximumf %50, %52 : vector<8x256xf32>
    %54 = arith.truncf %53 : vector<8x256xf32> to vector<8x256xbf16>
    %c0_36 = arith.constant 0 : index
    %c0_37 = arith.constant 0 : index
    %55 = vector.load %arg8[%c0_36, %c0_37] : memref<256x256xbf16, #tpu.memory_space<vmem>>, vector<256x256xbf16>
    %cst_38 = arith.constant dense<0.000000e+00> : vector<8x256xf32>
    %56 = tpu.matmul %54, %55, %cst_38 {dimension_numbers = #tpu.dot_dimension_numbers<[1], [0], [0], [1], [0, 0, 1, 1], [], []>} : vector<8x256xbf16>, vector<256x256xbf16>, vector<8x256xf32> -> vector<8x256xf32>
    %c0_39 = arith.constant 0 : index
    %c0_40 = arith.constant 0 : index
    %57 = vector.load %arg16[%c0_39, %c0_40] : memref<1x256xf32, #tpu.memory_space<vmem>>, vector<1x256xf32>
    %58 = vector.broadcast %57 : vector<1x256xf32> to vector<8x256xf32>
    %59 = arith.addf %56, %58 : vector<8x256xf32>
    %cst_41 = arith.constant 2.000000e-01 : f32
    %60 = vector.broadcast %cst_41 : f32 to vector<8x256xf32>
    %61 = arith.mulf %60, %59 : vector<8x256xf32>
    %62 = arith.maximumf %59, %61 : vector<8x256xf32>
    %63 = arith.truncf %62 : vector<8x256xf32> to vector<8x256xbf16>
    %c0_42 = arith.constant 0 : index
    %c0_43 = arith.constant 0 : index
    %64 = vector.load %arg9[%c0_42, %c0_43] : memref<256x128xbf16, #tpu.memory_space<vmem>>, vector<256x128xbf16>
    %cst_44 = arith.constant dense<0.000000e+00> : vector<8x128xf32>
    %65 = tpu.matmul %63, %64, %cst_44 {dimension_numbers = #tpu.dot_dimension_numbers<[1], [0], [0], [1], [0, 0, 1, 1], [], []>} : vector<8x256xbf16>, vector<256x128xbf16>, vector<8x128xf32> -> vector<8x128xf32>
    %c0_45 = arith.constant 0 : index
    %c0_46 = arith.constant 0 : index
    %66 = vector.load %arg17[%c0_45, %c0_46] : memref<1x128xf32, #tpu.memory_space<vmem>>, vector<1x128xf32>
    %67 = vector.broadcast %66 : vector<1x128xf32> to vector<8x128xf32>
    %68 = arith.addf %65, %67 : vector<8x128xf32>
    %c0_47 = arith.constant 0 : index
    %c0_48 = arith.constant 0 : index
    %69 = vector.load %arg18[%c0_47, %c0_48] : memref<8x128xf32, #tpu.memory_space<vmem>>, vector<8x128xf32>
    tpu.vector_store %arg18[%c0_47, %c0_48], %68 {strides = array<i32>} : memref<8x128xf32, #tpu.memory_space<vmem>>, vector<8x128xf32>,
    return
  }
  func.func @transform_0(%arg0: i32) -> (i32, i32) {
    %c0_i32 = arith.constant 0 : i32
    %c0_i32_0 = arith.constant 0 : i32
    %c0_i32_1 = arith.constant 0 : i32
    return %c0_i32, %c0_i32_0 : i32, i32
  }
  func.func @transform_1(%arg0: i32) -> (i32, i32) {
    %c0_i32 = arith.constant 0 : i32
    %c0_i32_0 = arith.constant 0 : i32
    %c0_i32_1 = arith.constant 0 : i32
    return %c0_i32, %c0_i32_0 : i32, i32
  }
  func.func @transform_2(%arg0: i32) -> (i32, i32) {
    %c0_i32 = arith.constant 0 : i32
    %c0_i32_0 = arith.constant 0 : i32
    %c0_i32_1 = arith.constant 0 : i32
    return %c0_i32, %c0_i32_0 : i32, i32
  }
  func.func @transform_3(%arg0: i32) -> (i32, i32) {
    %c0_i32 = arith.constant 0 : i32
    %c0_i32_0 = arith.constant 0 : i32
    %c0_i32_1 = arith.constant 0 : i32
    return %c0_i32, %c0_i32_0 : i32, i32
  }
  func.func @transform_4(%arg0: i32) -> (i32, i32) {
    %c0_i32 = arith.constant 0 : i32
    %c0_i32_0 = arith.constant 0 : i32
    %c0_i32_1 = arith.constant 0 : i32
    return %c0_i32, %c0_i32_0 : i32, i32
  }
  func.func @transform_5(%arg0: i32) -> (i32, i32) {
    %c0_i32 = arith.constant 0 : i32
    %c0_i32_0 = arith.constant 0 : i32
    %c0_i32_1 = arith.constant 0 : i32
    return %c0_i32, %c0_i32_0 : i32, i32
  }
  func.func @transform_6(%arg0: i32) -> (i32, i32) {
    %c0_i32 = arith.constant 0 : i32
    %c0_i32_0 = arith.constant 0 : i32
    %c0_i32_1 = arith.constant 0 : i32
    return %c0_i32, %c0_i32_0 : i32, i32
  }
  func.func @transform_7(%arg0: i32) -> (i32, i32) {
    %c0_i32 = arith.constant 0 : i32
    %c0_i32_0 = arith.constant 0 : i32
    %c0_i32_1 = arith.constant 0 : i32
    return %c0_i32, %c0_i32_0 : i32, i32
  }
  func.func @transform_8(%arg0: i32) -> (i32, i32) {
    %c0_i32 = arith.constant 0 : i32
    %c0_i32_0 = arith.constant 0 : i32
    %c0_i32_1 = arith.constant 0 : i32
    return %c0_i32, %c0_i32_0 : i32, i32
  }
  func.func @transform_9(%arg0: i32) -> (i32, i32) {
    %c0_i32 = arith.constant 0 : i32
    %c0_i32_0 = arith.constant 0 : i32
    %c0_i32_1 = arith.constant 0 : i32
    return %c0_i32, %c0_i32_0 : i32, i32
  }
  func.func @transform_10(%arg0: i32) -> (i32, i32) {
    %c0_i32 = arith.constant 0 : i32
    %c0_i32_0 = arith.constant 0 : i32
    %c0_i32_1 = arith.constant 0 : i32
    return %c0_i32, %c0_i32_0 : i32, i32
  }
  func.func @transform_11(%arg0: i32) -> (i32, i32) {
    %c0_i32 = arith.constant 0 : i32
    %c0_i32_0 = arith.constant 0 : i32
    %c0_i32_1 = arith.constant 0 : i32
    return %c0_i32, %c0_i32_0 : i32, i32
  }
  func.func @transform_12(%arg0: i32) -> (i32, i32) {
    %c0_i32 = arith.constant 0 : i32
    %c0_i32_0 = arith.constant 0 : i32
    %c0_i32_1 = arith.constant 0 : i32
    return %c0_i32, %c0_i32_0 : i32, i32
  }
  func.func @transform_13(%arg0: i32) -> (i32, i32) {
    %c0_i32 = arith.constant 0 : i32
    %c0_i32_0 = arith.constant 0 : i32
    %c0_i32_1 = arith.constant 0 : i32
    return %c0_i32, %c0_i32_0 : i32, i32
  }
  func.func @transform_14(%arg0: i32) -> (i32, i32) {
    %c0_i32 = arith.constant 0 : i32
    %c0_i32_0 = arith.constant 0 : i32
    %c0_i32_1 = arith.constant 0 : i32
    return %c0_i32, %c0_i32_0 : i32, i32
  }
  func.func @transform_15(%arg0: i32) -> (i32, i32) {
    %c0_i32 = arith.constant 0 : i32
    %c0_i32_0 = arith.constant 0 : i32
    %c0_i32_1 = arith.constant 0 : i32
    return %c0_i32, %c0_i32_0 : i32, i32
  }
  func.func @transform_16(%arg0: i32) -> (i32, i32) {
    %c0_i32 = arith.constant 0 : i32
    %c0_i32_0 = arith.constant 0 : i32
    %c0_i32_1 = arith.constant 0 : i32
    return %c0_i32, %c0_i32_0 : i32, i32
  }
  func.func @transform_17(%arg0: i32) -> (i32, i32) {
    %c0_i32 = arith.constant 0 : i32
    %c0_i32_0 = arith.constant 0 : i32
    %c0_i32_1 = arith.constant 0 : i32
    return %c0_i32, %c0_i32_0 : i32, i32
  }
}

</mosaic_0001>

<bundles_post_ra>
// kernel: forward.6
= control target key start
LH: loop header
LB: loop body
LE: loop exit
PB: predicated region body
PF: predicated region fallthrough
CT: control target
= control target key end

     0   :  { %s1592_s12 = smov 0   ;;  %s2161_s0 = inlined_call_operand.vmem [shape: f32[2048,128], index: 0, kind: input, shape index: {}]   ;;  %s2162_s1 = inlined_call_operand.vmem [shape: bf16[128,32], index: 1, kind: input, shape index: {}]   ;;  %s2163_s2 = inlined_call_operand.vmem [shape: f32[1,32], index: 2, kind: input, shape index: {}]   ;;  %s2164_s3 = inlined_call_operand.vmem [shape: f32[2048,32], index: 3, kind: output, shape index: {}]  }
   0x1 LB: > { %s1296_s13 = sadd.s32 4294967295, %s1570_s12   ;;  %p1300_p0 = scmp.ge.s32.totalorder %s1570_s12, 1  ;;  %s1570_s12 = sphi %s1592_s12, %s13_s12  }
   0x2   : > { %p138_p1 = scmp.lt.s32.totalorder %s1570_s12, 3 }
   0x4   : > { %p139_p2 = pnand %p1300_p0, %p138_p1 }
   0x5   : > { %v1556_v0 = vld [vmem:[%s2162_s1] sm:$0xff] (!%p139_p2)   ;;  %s1301_s16 = sshll.u32 (!%p139_p2), %s1296_s13, 7  ;;  %v1557_v1 = vld [vmem:[%s2162_s1 + $0x8] sm:$0xff] (!%p139_p2)   ;;  %v1558_v2 = vld [vmem:[%s2162_s1 + $0x10] sm:$0xff] (!%p139_p2)   ;;  %vm1111_vm0 = vcmask (!%p139_p2), 261120  }
   0x6   : > { %142 = sbr.rel (%p139_p2) target bundleno = 379 (0x17b), region = 32  ;;  %p163_p3 = scmp.lt.s32.totalorder (!%p139_p2), %s1301_s16, 255  ;;  %1388 = vmatprep.subr.bf16.mxu0 (!%p139_p2), %v1556_v0  ;;  %1532 = vmatprep.subr.bf16.mxu1 (!%p139_p2), %v1556_v0  ;;  %v1559_v3 = vld [vmem:[%s2162_s1 + $0x18] sm:$0xff] (!%p139_p2)   ;;  %v1560_v10 = vld [vmem:[%s2162_s1 + $0x20] sm:$0xff] (!%p139_p2)   ;;  %v1561_v11 = vld [vmem:[%s2162_s1 + $0x28] sm:$0xff] (!%p139_p2)  }
   0x7   : > { %1389 = vmatpush3.bf16.msra.mxu0 (!%p139_p2), %v1556_v0  ;;  %1540 = vmatpush3.bf16.msra.mxu1 (!%p139_p2), %v1556_v0  ;;  %v1562_v12 = vld [vmem:[%s2162_s1 + $0x30] sm:$0xff] (!%p139_p2)   ;;  %v1563_v13 = vld [vmem:[%s2162_s1 + $0x38] sm:$0xff] (!%p139_p2)  }
   0x8   : > { %1390 = vmatprep.subr.bf16.mxu0 (!%p139_p2), %v1557_v1  ;;  %1533 = vmatprep.subr.bf16.mxu1 (!%p139_p2), %v1557_v1 }
   0xb   : > { %1391 = vmatpush3.bf16.msra.mxu0 (!%p139_p2), %v1557_v1  ;;  %1541 = vmatpush3.bf16.msra.mxu1 (!%p139_p2), %v1557_v1 }
   0xc   : > { %1392 = vmatprep.subr.bf16.mxu0 (!%p139_p2), %v1558_v2  ;;  %1534 = vmatprep.subr.bf16.mxu1 (!%p139_p2), %v1558_v2 }
   0xd   : > { %s2166_s16 = smov (!%p163_p3, %s1301_s16), 255 }
   0xe   : > { %s1302_s21 = sshll.u32 %s2166_s16, 3 }
   0xf   : > { %s1617_s24 = scalar_lea.vmem %s2161_s0, %s1302_s21  ;;  %1393 = vmatpush3.bf16.msra.mxu0 %v1558_v2  ;;  %1542 = vmatpush3.bf16.msra.mxu1 %v1558_v2  ;;  %s1774_s13 = scalar_lea.vmem %s2164_s3, %s1302_s21 }
  0x10   : > { %v175_v4 = vld [vmem:[%s1617_s24] sm:$0xff]  ;;  %v176_v5 = vld [vmem:[%s1617_s24 + $0x8] sm:$0xff]  ;;  %1394 = vmatprep.subr.bf16.mxu0 %v1559_v3  ;;  %1535 = vmatprep.subr.bf16.mxu1 %v1559_v3  ;;  %v177_v14 = vld [vmem:[%s1617_s24 + $0x10] sm:$0xff] }
  0x11   : > { %v239_v6 = vld [vmem:[%s1617_s24 + $0x200] sm:$0xff]  ;;  %v303_v7 = vpack.c.bf16 %v176_v5, %v175_v4  ;;  %v240_v8 = vld [vmem:[%s1617_s24 + $0x208] sm:$0xff]  ;;  %v178_v15 = vld [vmem:[%s1617_s24 + $0x18] sm:$0xff] }
  0x12   : > { %v335_v9 = vpack.c.bf16 %v240_v8, %v239_v6  ;;  %v241_v16 = vld [vmem:[%s1617_s24 + $0x210] sm:$0xff]  ;;  %v242_v17 = vld [vmem:[%s1617_s24 + $0x218] sm:$0xff]  ;;  %v179_v18 = vld [vmem:[%s1617_s24 + $0x20] sm:$0xff]  ;;  %v304_v22 = vpack.c.bf16 %v178_v15, %v177_v14 }
  0x13   : > { %1404 = vmatprep.mubr.bf16.mxu0 %v303_v7  ;;  %1395 = vmatpush3.bf16.msra.mxu0 %v1559_v3  ;;  %v180_v19 = vld [vmem:[%s1617_s24 + $0x28] sm:$0xff]  ;;  %v243_v20 = vld [vmem:[%s1617_s24 + $0x220] sm:$0xff]  ;;  %v336_v23 = vpack.c.bf16 %v242_v17, %v241_v16  ;;  %v181_v26 = vld [vmem:[%s1617_s24 + $0x30] sm:$0xff] }
  0x14   : > { %1468 = vmatprep.mubr.bf16.mxu1 %v335_v9  ;;  %1543 = vmatpush3.bf16.msra.mxu1 %v1559_v3  ;;  %v244_v21 = vld [vmem:[%s1617_s24 + $0x228] sm:$0xff]  ;;  %v305_v24 = vpack.c.bf16 %v180_v19, %v179_v18  ;;  %v182_v27 = vld [vmem:[%s1617_s24 + $0x38] sm:$0xff]  ;;  %v245_v28 = vld [vmem:[%s1617_s24 + $0x230] sm:$0xff] }
  0x15   : > { %1396 = vmatprep.subr.bf16.mxu0 %v1560_v10  ;;  %1536 = vmatprep.subr.bf16.mxu1 %v1560_v10  ;;  %v337_v25 = vpack.c.bf16 %v244_v21, %v243_v20  ;;  %v246_v29 = vld [vmem:[%s1617_s24 + $0x238] sm:$0xff]  ;;  %v183_v30 = vld [vmem:[%s1617_s24 + $0x40] sm:$0xff]  ;;  %v184_v31 = vld [vmem:[%s1617_s24 + $0x48] sm:$0xff]  ;;  %v306_v34 = vpack.c.bf16 %v182_v27, %v181_v26 }
  0x16   : > { %v247_v32 = vld [vmem:[%s1617_s24 + $0x240] sm:$0xff]  ;;  %v248_v33 = vld [vmem:[%s1617_s24 + $0x248] sm:$0xff]  ;;  %v338_v35 = vpack.c.bf16 %v246_v29, %v245_v28  ;;  %v307_v36 = vpack.c.bf16 %v184_v31, %v183_v30  ;;  %v185_v38 = vld [vmem:[%s1617_s24 + $0x50] sm:$0xff] }
  0x17   : > { %1397 = vmatpush3.bf16.msra.mxu0 %v1560_v10  ;;  %v339_v37 = vpack.c.bf16 %v248_v33, %v247_v32  ;;  %v186_v39 = vld [vmem:[%s1617_s24 + $0x58] sm:$0xff]  ;;  %v249_v40 = vld [vmem:[%s1617_s24 + $0x250] sm:$0xff]  ;;  %v187_v42 = vld [vmem:[%s1617_s24 + $0x60] sm:$0xff] }
  0x18   : > { %1544 = vmatpush3.bf16.msra.mxu1 %v1560_v10  ;;  %1398 = vmatprep.subr.bf16.mxu0 %v1561_v11  ;;  %v250_v41 = vld [vmem:[%s1617_s24 + $0x258] sm:$0xff]  ;;  %v188_v43 = vld [vmem:[%s1617_s24 + $0x68] sm:$0xff]  ;;  %v251_v44 = vld [vmem:[%s1617_s24 + $0x260] sm:$0xff]  ;;  %v308_v46 = vpack.c.bf16 %v186_v39, %v185_v38 }
  0x19   : > { %1537 = vmatprep.subr.bf16.mxu1 %v1561_v11  ;;  %v252_v45 = vld [vmem:[%s1617_s24 + $0x268] sm:$0xff]  ;;  %v340_v47 = vpack.c.bf16 %v250_v41, %v249_v40  ;;  %v309_v48 = vpack.c.bf16 %v188_v43, %v187_v42  ;;  %v189_v50 = vld [vmem:[%s1617_s24 + $0x70] sm:$0xff]  ;;  %v190_v51 = vld [vmem:[%s1617_s24 + $0x78] sm:$0xff] }
  0x1a   : > { %v341_v49 = vpack.c.bf16 %v252_v45, %v251_v44  ;;  %v253_v52 = vld [vmem:[%s1617_s24 + $0x270] sm:$0xff]  ;;  %v254_v53 = vld [vmem:[%s1617_s24 + $0x278] sm:$0xff]  ;;  %v191_v54 = vld [vmem:[%s1617_s24 + $0x80] sm:$0xff]  ;;  %v310_v58 = vpack.c.bf16 %v190_v51, %v189_v50 }
  0x1b   : > { %1399 = vmatpush3.bf16.msra.mxu0 %v1561_v11  ;;  %v192_v55 = vld [vmem:[%s1617_s24 + $0x88] sm:$0xff]  ;;  %v255_v56 = vld [vmem:[%s1617_s24 + $0x280] sm:$0xff]  ;;  %v342_v59 = vpack.c.bf16 %v254_v53, %v253_v52  ;;  %v193_v62 = vld [vmem:[%s1617_s24 + $0x90] sm:$0xff] }
  0x1c   : > { %1545 = vmatpush3.bf16.msra.mxu1 %v1561_v11  ;;  %1400 = vmatprep.subr.bf16.mxu0 %v1562_v12  ;;  %v256_v57 = vld [vmem:[%s1617_s24 + $0x288] sm:$0xff]  ;;  %v311_v60 = vpack.c.bf16 %v192_v55, %v191_v54  ;;  %v194_v63 = vld [vmem:[%s1617_s24 + $0x98] sm:$0xff]  ;;  %v257_v0 = vld [vmem:[%s1617_s24 + $0x290] sm:$0xff] }
  0x1d   : > { %1538 = vmatprep.subr.bf16.mxu1 %v1562_v12  ;;  %v343_v61 = vpack.c.bf16 %v256_v57, %v255_v56  ;;  %v258_v1 = vld [vmem:[%s1617_s24 + $0x298] sm:$0xff]  ;;  %v195_v2 = vld [vmem:[%s1617_s24 + $0xa0] sm:$0xff]  ;;  %v196_v3 = vld [vmem:[%s1617_s24 + $0xa8] sm:$0xff]  ;;  %v312_v6 = vpack.c.bf16 %v194_v63, %v193_v62 }
  0x1e   : > { %v259_v4 = vld [vmem:[%s1617_s24 + $0x2a0] sm:$0xff]  ;;  %v260_v5 = vld [vmem:[%s1617_s24 + $0x2a8] sm:$0xff]  ;;  %v344_v7 = vpack.c.bf16 %v258_v1, %v257_v0  ;;  %v313_v8 = vpack.c.bf16 %v196_v3, %v195_v2  ;;  %v197_v10 = vld [vmem:[%s1617_s24 + $0xb0] sm:$0xff] }
  0x1f   : > { %1401 = vmatpush3.bf16.msra.mxu0 %v1562_v12  ;;  %v345_v9 = vpack.c.bf16 %v260_v5, %v259_v4  ;;  %v198_v11 = vld [vmem:[%s1617_s24 + $0xb8] sm:$0xff]  ;;  %v199_v14 = vld [vmem:[%s1617_s24 + $0xc0] sm:$0xff]  ;;  %v200_v15 = vld [vmem:[%s1617_s24 + $0xc8] sm:$0xff] }
  0x20   : > { %1546 = vmatpush3.bf16.msra.mxu1 %v1562_v12  ;;  %1402 = vmatprep.subr.bf16.mxu0 %v1563_v13  ;;  %v261_v12 = vld [vmem:[%s1617_s24 + $0x2b0] sm:$0xff]  ;;  %v263_v16 = vld [vmem:[%s1617_s24 + $0x2c0] sm:$0xff]  ;;  %v264_v17 = vld [vmem:[%s1617_s24 + $0x2c8] sm:$0xff]  ;;  %v314_v18 = vpack.c.bf16 %v198_v11, %v197_v10  ;;  %v315_v20 = vpack.c.bf16 %v200_v15, %v199_v14 }
  0x21   : > { %1539 = vmatprep.subr.bf16.mxu1 %v1563_v13  ;;  %v347_v21 = vpack.c.bf16 %v264_v17, %v263_v16  ;;  %v203_v26 = vld [vmem:[%s1617_s24 + $0xe0] sm:$0xff]  ;;  %v204_v27 = vld [vmem:[%s1617_s24 + $0xe8] sm:$0xff] }
  0x22   : > { %v267_v28 = vld [vmem:[%s1617_s24 + $0x2e0] sm:$0xff]  ;;  %v268_v29 = vld [vmem:[%s1617_s24 + $0x2e8] sm:$0xff]  ;;  %v317_v32 = vpack.c.bf16 %v204_v27, %v203_v26 }
  0x23   : > { %1403 = vmatpush3.bf16.msra.mxu0 %v1563_v13  ;;  %v349_v33 = vpack.c.bf16 %v268_v29, %v267_v28  ;;  %v207_v38 = vld [vmem:[%s1617_s24 + $0x100] sm:$0xff]  ;;  %v208_v39 = vld [vmem:[%s1617_s24 + $0x108] sm:$0xff] }
  0x24   : > { %1547 = vmatpush3.bf16.msra.mxu1 %v1563_v13  ;;  %v262_v13 = vld [vmem:[%s1617_s24 + $0x2b8] sm:$0xff]  ;;  %v271_v40 = vld [vmem:[%s1617_s24 + $0x300] sm:$0xff]  ;;  %v272_v41 = vld [vmem:[%s1617_s24 + $0x308] sm:$0xff]  ;;  %v319_v44 = vpack.c.bf16 %v208_v39, %v207_v38 }
  0x25   : > { %v346_v19 = vpack.c.bf16 %v262_v13, %v261_v12  ;;  %v351_v45 = vpack.c.bf16 %v272_v41, %v271_v40  ;;  %v211_v50 = vld [vmem:[%s1617_s24 + $0x120] sm:$0xff]  ;;  %v212_v51 = vld [vmem:[%s1617_s24 + $0x128] sm:$0xff] }
  0x26   : > { %1405 = vmatmul.mubr.bf16.vlgmr.msra.gmra.mrb[0].mxu0 %v304_v22  ;;  %v201_v22 = vld [vmem:[%s1617_s24 + $0xd0] sm:$0xff]  ;;  %v275_v52 = vld [vmem:[%s1617_s24 + $0x320] sm:$0xff]  ;;  %v276_v53 = vld [vmem:[%s1617_s24 + $0x328] sm:$0xff]  ;;  %v321_v56 = vpack.c.bf16 %v212_v51, %v211_v50 }
  0x27   : > { %1469 = vmatmul.mubr.bf16.vlgmr.msra.gmra.mrb[0].mxu1 %v336_v23  ;;  %1408 = vmatprep.mubr.bf16.mxu0 %v305_v24  ;;  %v202_v23 = vld [vmem:[%s1617_s24 + $0xd8] sm:$0xff]  ;;  %v265_v24 = vld [vmem:[%s1617_s24 + $0x2d0] sm:$0xff]  ;;  %v353_v57 = vpack.c.bf16 %v276_v53, %v275_v52  ;;  %v215_v62 = vld [vmem:[%s1617_s24 + $0x140] sm:$0xff] }
  0x28   : > { %1472 = vmatprep.mubr.bf16.mxu1 %v337_v25  ;;  %v266_v25 = vld [vmem:[%s1617_s24 + $0x2d8] sm:$0xff]  ;;  %v316_v30 = vpack.c.bf16 %v202_v23, %v201_v22  ;;  %v216_v63 = vld [vmem:[%s1617_s24 + $0x148] sm:$0xff]  ;;  %v279_v0 = vld [vmem:[%s1617_s24 + $0x340] sm:$0xff] }
  0x29   : > { %v348_v31 = vpack.c.bf16 %v266_v25, %v265_v24  ;;  %v280_v1 = vld [vmem:[%s1617_s24 + $0x348] sm:$0xff]  ;;  %v323_v4 = vpack.c.bf16 %v216_v63, %v215_v62  ;;  %v219_v10 = vld [vmem:[%s1617_s24 + $0x160] sm:$0xff] }
  0x2a   : > { %v355_v5 = vpack.c.bf16 %v280_v1, %v279_v0  ;;  %v220_v11 = vld [vmem:[%s1617_s24 + $0x168] sm:$0xff]  ;;  %v283_v12 = vld [vmem:[%s1617_s24 + $0x360] sm:$0xff] }
  0x2b   : > { %v284_v13 = vld [vmem:[%s1617_s24 + $0x368] sm:$0xff]  ;;  %v325_v16 = vpack.c.bf16 %v220_v11, %v219_v10  ;;  %v223_v22 = vld [vmem:[%s1617_s24 + $0x180] sm:$0xff] }
  0x2c   : > { %v357_v17 = vpack.c.bf16 %v284_v13, %v283_v12  ;;  %v224_v23 = vld [vmem:[%s1617_s24 + $0x188] sm:$0xff]  ;;  %v287_v24 = vld [vmem:[%s1617_s24 + $0x380] sm:$0xff] }
  0x2d   : > { %v288_v25 = vld [vmem:[%s1617_s24 + $0x388] sm:$0xff]  ;;  %v327_v28 = vpack.c.bf16 %v224_v23, %v223_v22 }
  0x2e   : > { %1409 = vmatmul.mubr.bf16.gmra.mrb[4].mxu0 %v306_v34  ;;  %v205_v34 = vld [vmem:[%s1617_s24 + $0xf0] sm:$0xff]  ;;  %v359_v29 = vpack.c.bf16 %v288_v25, %v287_v24 }
  0x2f   : > { %1473 = vmatmul.mubr.bf16.gmra.mrb[4].mxu1 %v338_v35  ;;  %1412 = vmatprep.mubr.bf16.mxu0 %v307_v36  ;;  %v206_v35 = vld [vmem:[%s1617_s24 + $0xf8] sm:$0xff]  ;;  %v269_v36 = vld [vmem:[%s1617_s24 + $0x2f0] sm:$0xff] }
  0x30   : > { %1476 = vmatprep.mubr.bf16.mxu1 %v339_v37  ;;  %v270_v37 = vld [vmem:[%s1617_s24 + $0x2f8] sm:$0xff]  ;;  %v318_v42 = vpack.c.bf16 %v206_v35, %v205_v34  ;;  %v227_v34 = vld [vmem:[%s1617_s24 + $0x1a0] sm:$0xff]  ;;  %v228_v35 = vld [vmem:[%s1617_s24 + $0x1a8] sm:$0xff] }
  0x31   : > { %v350_v43 = vpack.c.bf16 %v270_v37, %v269_v36  ;;  %v291_v36 = vld [vmem:[%s1617_s24 + $0x3a0] sm:$0xff]  ;;  %v292_v37 = vld [vmem:[%s1617_s24 + $0x3a8] sm:$0xff]  ;;  %v329_v40 = vpack.c.bf16 %v228_v35, %v227_v34 }
  0x32   : > { %v361_v41 = vpack.c.bf16 %v292_v37, %v291_v36 }
  0x36   : > { %1413 = vmatmul.mubr.bf16.gmra.mrb[8].mxu0 %v308_v46  ;;  %v209_v46 = vld [vmem:[%s1617_s24 + $0x110] sm:$0xff] }
  0x37   : > { %1477 = vmatmul.mubr.bf16.gmra.mrb[8].mxu1 %v340_v47  ;;  %1416 = vmatprep.mubr.bf16.mxu0 %v309_v48  ;;  %v210_v47 = vld [vmem:[%s1617_s24 + $0x118] sm:$0xff]  ;;  %v273_v48 = vld [vmem:[%s1617_s24 + $0x310] sm:$0xff] }
  0x38   : > { %1480 = vmatprep.mubr.bf16.mxu1 %v341_v49  ;;  %v274_v49 = vld [vmem:[%s1617_s24 + $0x318] sm:$0xff]  ;;  %v320_v54 = vpack.c.bf16 %v210_v47, %v209_v46  ;;  %v231_v46 = vld [vmem:[%s1617_s24 + $0x1c0] sm:$0xff]  ;;  %v232_v47 = vld [vmem:[%s1617_s24 + $0x1c8] sm:$0xff] }
  0x39   : > { %v352_v55 = vpack.c.bf16 %v274_v49, %v273_v48  ;;  %v295_v48 = vld [vmem:[%s1617_s24 + $0x3c0] sm:$0xff]  ;;  %v296_v49 = vld [vmem:[%s1617_s24 + $0x3c8] sm:$0xff]  ;;  %v331_v52 = vpack.c.bf16 %v232_v47, %v231_v46 }
  0x3a   : > { %v363_v53 = vpack.c.bf16 %v296_v49, %v295_v48 }
  0x3e   : > { %1417 = vmatmul.mubr.bf16.gmra.mrb[12].mxu0 %v310_v58  ;;  %v213_v58 = vld [vmem:[%s1617_s24 + $0x130] sm:$0xff] }
  0x3f   : > { %1481 = vmatmul.mubr.bf16.gmra.mrb[12].mxu1 %v342_v59  ;;  %1420 = vmatprep.mubr.bf16.mxu0 %v311_v60  ;;  %v214_v59 = vld [vmem:[%s1617_s24 + $0x138] sm:$0xff]  ;;  %v277_v60 = vld [vmem:[%s1617_s24 + $0x330] sm:$0xff] }
  0x40   : > { %1484 = vmatprep.mubr.bf16.mxu1 %v343_v61  ;;  %v278_v61 = vld [vmem:[%s1617_s24 + $0x338] sm:$0xff]  ;;  %v322_v2 = vpack.c.bf16 %v214_v59, %v213_v58  ;;  %v235_v58 = vld [vmem:[%s1617_s24 + $0x1e0] sm:$0xff]  ;;  %v236_v59 = vld [vmem:[%s1617_s24 + $0x1e8] sm:$0xff] }
  0x41   : > { %v354_v3 = vpack.c.bf16 %v278_v61, %v277_v60  ;;  %v299_v60 = vld [vmem:[%s1617_s24 + $0x3e0] sm:$0xff]  ;;  %v300_v61 = vld [vmem:[%s1617_s24 + $0x3e8] sm:$0xff]  ;;  %v333_v0 = vpack.c.bf16 %v236_v59, %v235_v58 }
  0x42   : > { %v365_v1 = vpack.c.bf16 %v300_v61, %v299_v60 }
  0x46   : > { %1421 = vmatmul.mubr.bf16.gmra.mrb[16].mxu0 %v312_v6  ;;  %v217_v6 = vld [vmem:[%s1617_s24 + $0x150] sm:$0xff] }
  0x47   : > { %1485 = vmatmul.mubr.bf16.gmra.mrb[16].mxu1 %v344_v7  ;;  %1424 = vmatprep.mubr.bf16.mxu0 %v313_v8  ;;  %v218_v7 = vld [vmem:[%s1617_s24 + $0x158] sm:$0xff]  ;;  %v281_v8 = vld [vmem:[%s1617_s24 + $0x350] sm:$0xff] }
  0x48   : > { %1488 = vmatprep.mubr.bf16.mxu1 %v345_v9  ;;  %v282_v9 = vld [vmem:[%s1617_s24 + $0x358] sm:$0xff]  ;;  %v324_v14 = vpack.c.bf16 %v218_v7, %v217_v6 }
  0x49   : > { %v356_v15 = vpack.c.bf16 %v282_v9, %v281_v8  ;;  %v1765_v8 = vld [vmem:[%s2163_s2] ss:$0 sm:$0xff] }
  0x4e   : > { %1425 = vmatmul.mubr.bf16.gmra.mrb[20].mxu0 %v314_v18  ;;  %v221_v18 = vld [vmem:[%s1617_s24 + $0x170] sm:$0xff] }
  0x4f   : > { %1489 = vmatmul.mubr.bf16.gmra.mrb[20].mxu1 %v346_v19  ;;  %1428 = vmatprep.mubr.bf16.mxu0 %v315_v20  ;;  %v222_v19 = vld [vmem:[%s1617_s24 + $0x178] sm:$0xff]  ;;  %v285_v20 = vld [vmem:[%s1617_s24 + $0x370] sm:$0xff] }
  0x50   : > { %1492 = vmatprep.mubr.bf16.mxu1 %v347_v21  ;;  %v286_v21 = vld [vmem:[%s1617_s24 + $0x378] sm:$0xff]  ;;  %v326_v26 = vpack.c.bf16 %v222_v19, %v221_v18 }
  0x51   : > { %v358_v27 = vpack.c.bf16 %v286_v21, %v285_v20 }
  0x56   : > { %1429 = vmatmul.mubr.bf16.gmra.mrb[24].mxu0 %v316_v30  ;;  %v225_v30 = vld [vmem:[%s1617_s24 + $0x190] sm:$0xff] }
  0x57   : > { %1493 = vmatmul.mubr.bf16.gmra.mrb[24].mxu1 %v348_v31  ;;  %1432 = vmatprep.mubr.bf16.mxu0 %v317_v32  ;;  %v226_v31 = vld [vmem:[%s1617_s24 + $0x198] sm:$0xff]  ;;  %v289_v32 = vld [vmem:[%s1617_s24 + $0x390] sm:$0xff] }
  0x58   : > { %1496 = vmatprep.mubr.bf16.mxu1 %v349_v33  ;;  %v290_v33 = vld [vmem:[%s1617_s24 + $0x398] sm:$0xff]  ;;  %v328_v38 = vpack.c.bf16 %v226_v31, %v225_v30 }
  0x59   : > { %v360_v39 = vpack.c.bf16 %v290_v33, %v289_v32 }
  0x5e   : > { %1433 = vmatmul.mubr.bf16.gmra.mrb[28].mxu0 %v318_v42  ;;  %v229_v42 = vld [vmem:[%s1617_s24 + $0x1b0] sm:$0xff] }
  0x5f   : > { %1497 = vmatmul.mubr.bf16.gmra.mrb[28].mxu1 %v350_v43  ;;  %1436 = vmatprep.mubr.bf16.mxu0 %v319_v44  ;;  %v230_v43 = vld [vmem:[%s1617_s24 + $0x1b8] sm:$0xff]  ;;  %v293_v44 = vld [vmem:[%s1617_s24 + $0x3b0] sm:$0xff] }
  0x60   : > { %1500 = vmatprep.mubr.bf16.mxu1 %v351_v45  ;;  %v294_v45 = vld [vmem:[%s1617_s24 + $0x3b8] sm:$0xff]  ;;  %v330_v50 = vpack.c.bf16 %v230_v43, %v229_v42 }
  0x61   : > { %v362_v51 = vpack.c.bf16 %v294_v45, %v293_v44 }
  0x66   : > { %1437 = vmatmul.mubr.bf16.gmra.mrb[32].mxu0 %v320_v54  ;;  %v233_v54 = vld [vmem:[%s1617_s24 + $0x1d0] sm:$0xff] }
  0x67   : > { %1501 = vmatmul.mubr.bf16.gmra.mrb[32].mxu1 %v352_v55  ;;  %1440 = vmatprep.mubr.bf16.mxu0 %v321_v56  ;;  %v234_v55 = vld [vmem:[%s1617_s24 + $0x1d8] sm:$0xff]  ;;  %v297_v56 = vld [vmem:[%s1617_s24 + $0x3d0] sm:$0xff] }
  0x68   : > { %1504 = vmatprep.mubr.bf16.mxu1 %v353_v57  ;;  %v298_v57 = vld [vmem:[%s1617_s24 + $0x3d8] sm:$0xff]  ;;  %v332_v62 = vpack.c.bf16 %v234_v55, %v233_v54 }
  0x69   : > { %v364_v63 = vpack.c.bf16 %v298_v57, %v297_v56 }
  0x6e   : > { %1441 = vmatmul.mubr.bf16.gmra.mrb[36].mxu0 %v322_v2  ;;  %v237_v2 = vld [vmem:[%s1617_s24 + $0x1f0] sm:$0xff] }
  0x6f   : > { %1505 = vmatmul.mubr.bf16.gmra.mrb[36].mxu1 %v354_v3  ;;  %1444 = vmatprep.mubr.bf16.mxu0 %v323_v4  ;;  %v238_v3 = vld [vmem:[%s1617_s24 + $0x1f8] sm:$0xff]  ;;  %v301_v4 = vld [vmem:[%s1617_s24 + $0x3f0] sm:$0xff] }
  0x70   : > { %1508 = vmatprep.mubr.bf16.mxu1 %v355_v5  ;;  %v302_v5 = vld [vmem:[%s1617_s24 + $0x3f8] sm:$0xff]  ;;  %v334_v6 = vpack.c.bf16 %v238_v3, %v237_v2 }
  0x71   : > { %v366_v7 = vpack.c.bf16 %v302_v5, %v301_v4 }
  0x76   : > { %1445 = vmatmul.mubr.bf16.gmra.mrb[40].mxu0 %v324_v14 }
  0x77   : > { %1509 = vmatmul.mubr.bf16.gmra.mrb[40].mxu1 %v356_v15  ;;  %1448 = vmatprep.mubr.bf16.mxu0 %v325_v16 }
  0x78   : > { %1512 = vmatprep.mubr.bf16.mxu1 %v357_v17 }
  0x7e   : > { %1449 = vmatmul.mubr.bf16.gmra.mrb[44].mxu0 %v326_v26 }
  0x7f   : > { %1513 = vmatmul.mubr.bf16.gmra.mrb[44].mxu1 %v358_v27  ;;  %1452 = vmatprep.mubr.bf16.mxu0 %v327_v28 }
  0x80   : > { %1516 = vmatprep.mubr.bf16.mxu1 %v359_v29 }
  0x86   : > { %1453 = vmatmul.mubr.bf16.gmra.mrb[48].mxu0 %v328_v38 }
  0x87   : > { %1517 = vmatmul.mubr.bf16.gmra.mrb[48].mxu1 %v360_v39  ;;  %1456 = vmatprep.mubr.bf16.mxu0 %v329_v40 }
  0x88   : > { %1520 = vmatprep.mubr.bf16.mxu1 %v361_v41 }
  0x8e   : > { %1457 = vmatmul.mubr.bf16.gmra.mrb[52].mxu0 %v330_v50 }
  0x8f   : > { %1521 = vmatmul.mubr.bf16.gmra.mrb[52].mxu1 %v362_v51  ;;  %1460 = vmatprep.mubr.bf16.mxu0 %v331_v52 }
  0x90   : > { %1524 = vmatprep.mubr.bf16.mxu1 %v363_v53 }
  0x96   : > { %1461 = vmatmul.mubr.bf16.gmra.mrb[56].mxu0 %v332_v62 }
  0x97   : > { %1525 = vmatmul.mubr.bf16.gmra.mrb[56].mxu1 %v364_v63  ;;  %1464 = vmatprep.mubr.bf16.mxu0 %v333_v0 }
  0x98   : > { %1528 = vmatprep.mubr.bf16.mxu1 %v365_v1 }
  0x9e   : > { %1465 = vmatmul.mubr.bf16.gmra.mrb[60].mxu0 %v334_v6 }
  0x9f   : > { %1529 = vmatmul.mubr.bf16.gmra.mrb[60].mxu1 %v366_v7 }
  0xf9   : > { %v1406_v9 = vpop.f32.mrb[0].mxu0 }
  0xfa   : > { %v1470_v10 = vpop.f32.mrb[0].mxu1  ;;  %v481_v11 = vadd.f32 %v1406_v9, %v1765_v8  ;;  %v472_v13 = vpop.f32.mrb[1].mxu0 }
  0xfb   : > { %v737_v12 = vadd.f32 %v1470_v10, %v1765_v8  ;;  %v728_v14 = vpop.f32.mrb[1].mxu1  ;;  %v473_v15 = vadd.f32 %v1765_v8, %v472_v13  ;;  %v1407_v17 = vpop.f32.mrb[2].mxu0 }
  0xfc   : > { %v729_v16 = vadd.f32 %v1765_v8, %v728_v14  ;;  %v1471_v18 = vpop.f32.mrb[2].mxu1  ;;  %v985_v19 = vmax.f32 %v481_v11, 0.0  ;;  %v484_v21 = vadd.f32 %v1407_v17, %v1765_v8  ;;  %v475_v23 = vpop.f32.mrb[3].mxu0 }
  0xfd   : > { %v1049_v20 = vmax.f32 %v737_v12, 0.0  ;;  %v740_v22 = vadd.f32 %v1471_v18, %v1765_v8  ;;  %v731_v24 = vpop.f32.mrb[3].mxu1  ;;  %v983_v25 = vmax.f32 %v473_v15, 0.0  ;;  %v476_v27 = vadd.f32 %v1765_v8, %v475_v23 }
  0xfe   : > { %v1047_v26 = vmax.f32 %v729_v16, 0.0  ;;  %v732_v28 = vadd.f32 %v1765_v8, %v731_v24  ;;  %1114 = vst.msk [vmem:[%s1774_s13 + $0x10] sm:$0xff] %vm1111_vm0, %v985_v19  ;;  %v986_v29 = vmax.f32 %v484_v21, 0.0 }
  0xff   : > { %1178 = vst.msk [vmem:[%s1774_s13 + $0x210] sm:$0xff] %vm1111_vm0, %v1049_v20  ;;  %v1050_v30 = vmax.f32 %v740_v22, 0.0  ;;  %1112 = vst.msk [vmem:[%s1774_s13] sm:$0xff] %vm1111_vm0, %v983_v25  ;;  %v984_v31 = vmax.f32 %v476_v27, 0.0 }
 0x100   : > { %1176 = vst.msk [vmem:[%s1774_s13 + $0x200] sm:$0xff] %vm1111_vm0, %v1047_v26  ;;  %v1048_v32 = vmax.f32 %v732_v28, 0.0  ;;  %1115 = vst.msk [vmem:[%s1774_s13 + $0x18] sm:$0xff] %vm1111_vm0, %v986_v29 }
 0x101   : > { %1179 = vst.msk [vmem:[%s1774_s13 + $0x218] sm:$0xff] %vm1111_vm0, %v1050_v30  ;;  %1113 = vst.msk [vmem:[%s1774_s13 + $0x8] sm:$0xff] %vm1111_vm0, %v984_v31  ;;  %v1410_v33 = vpop.f32.mrb[4].mxu0 }
 0x102   : > { %1177 = vst.msk [vmem:[%s1774_s13 + $0x208] sm:$0xff] %vm1111_vm0, %v1048_v32  ;;  %v1474_v34 = vpop.f32.mrb[4].mxu1  ;;  %v497_v35 = vadd.f32 %v1410_v33, %v1765_v8  ;;  %v488_v37 = vpop.f32.mrb[5].mxu0 }
 0x103   : > { %v753_v36 = vadd.f32 %v1474_v34, %v1765_v8  ;;  %v744_v38 = vpop.f32.mrb[5].mxu1  ;;  %v489_v39 = vadd.f32 %v1765_v8, %v488_v37  ;;  %v1411_v41 = vpop.f32.mrb[6].mxu0 }
 0x104   : > { %v745_v40 = vadd.f32 %v1765_v8, %v744_v38  ;;  %v1475_v42 = vpop.f32.mrb[6].mxu1  ;;  %v989_v43 = vmax.f32 %v497_v35, 0.0  ;;  %v500_v45 = vadd.f32 %v1411_v41, %v1765_v8  ;;  %v491_v47 = vpop.f32.mrb[7].mxu0 }
 0x105   : > { %v1053_v44 = vmax.f32 %v753_v36, 0.0  ;;  %v756_v46 = vadd.f32 %v1475_v42, %v1765_v8  ;;  %v747_v48 = vpop.f32.mrb[7].mxu1  ;;  %v987_v49 = vmax.f32 %v489_v39, 0.0  ;;  %v492_v51 = vadd.f32 %v1765_v8, %v491_v47 }
 0x106   : > { %v1051_v50 = vmax.f32 %v745_v40, 0.0  ;;  %v748_v52 = vadd.f32 %v1765_v8, %v747_v48  ;;  %1118 = vst.msk [vmem:[%s1774_s13 + $0x30] sm:$0xff] %vm1111_vm0, %v989_v43  ;;  %v990_v53 = vmax.f32 %v500_v45, 0.0 }
 0x107   : > { %1182 = vst.msk [vmem:[%s1774_s13 + $0x230] sm:$0xff] %vm1111_vm0, %v1053_v44  ;;  %v1054_v54 = vmax.f32 %v756_v46, 0.0  ;;  %1116 = vst.msk [vmem:[%s1774_s13 + $0x20] sm:$0xff] %vm1111_vm0, %v987_v49  ;;  %v988_v55 = vmax.f32 %v492_v51, 0.0 }
 0x108   : > { %1180 = vst.msk [vmem:[%s1774_s13 + $0x220] sm:$0xff] %vm1111_vm0, %v1051_v50  ;;  %v1052_v56 = vmax.f32 %v748_v52, 0.0  ;;  %1119 = vst.msk [vmem:[%s1774_s13 + $0x38] sm:$0xff] %vm1111_vm0, %v990_v53 }
 0x109   : > { %1183 = vst.msk [vmem:[%s1774_s13 + $0x238] sm:$0xff] %vm1111_vm0, %v1054_v54  ;;  %1117 = vst.msk [vmem:[%s1774_s13 + $0x28] sm:$0xff] %vm1111_vm0, %v988_v55  ;;  %v1414_v57 = vpop.f32.mrb[8].mxu0 }
 0x10a   : > { %1181 = vst.msk [vmem:[%s1774_s13 + $0x228] sm:$0xff] %vm1111_vm0, %v1052_v56  ;;  %v1478_v58 = vpop.f32.mrb[8].mxu1  ;;  %v513_v59 = vadd.f32 %v1414_v57, %v1765_v8  ;;  %v504_v61 = vpop.f32.mrb[9].mxu0 }
 0x10b   : > { %v769_v60 = vadd.f32 %v1478_v58, %v1765_v8  ;;  %v760_v62 = vpop.f32.mrb[9].mxu1  ;;  %v505_v63 = vadd.f32 %v1765_v8, %v504_v61  ;;  %v1415_v1 = vpop.f32.mrb[10].mxu0 }
 0x10c   : > { %v761_v0 = vadd.f32 %v1765_v8, %v760_v62  ;;  %v1479_v2 = vpop.f32.mrb[10].mxu1  ;;  %v993_v3 = vmax.f32 %v513_v59, 0.0  ;;  %v516_v5 = vadd.f32 %v1415_v1, %v1765_v8  ;;  %v507_v7 = vpop.f32.mrb[11].mxu0 }
 0x10d   : > { %v1057_v4 = vmax.f32 %v769_v60, 0.0  ;;  %v772_v6 = vadd.f32 %v1479_v2, %v1765_v8  ;;  %v763_v9 = vpop.f32.mrb[11].mxu1  ;;  %v991_v10 = vmax.f32 %v505_v63, 0.0  ;;  %v508_v12 = vadd.f32 %v1765_v8, %v507_v7 }
 0x10e   : > { %v1055_v11 = vmax.f32 %v761_v0, 0.0  ;;  %v764_v13 = vadd.f32 %v1765_v8, %v763_v9  ;;  %1122 = vst.msk [vmem:[%s1774_s13 + $0x50] sm:$0xff] %vm1111_vm0, %v993_v3  ;;  %v994_v14 = vmax.f32 %v516_v5, 0.0 }
 0x10f   : > { %1186 = vst.msk [vmem:[%s1774_s13 + $0x250] sm:$0xff] %vm1111_vm0, %v1057_v4  ;;  %v1058_v15 = vmax.f32 %v772_v6, 0.0  ;;  %1120 = vst.msk [vmem:[%s1774_s13 + $0x40] sm:$0xff] %vm1111_vm0, %v991_v10  ;;  %v992_v16 = vmax.f32 %v508_v12, 0.0 }
 0x110   : > { %1184 = vst.msk [vmem:[%s1774_s13 + $0x240] sm:$0xff] %vm1111_vm0, %v1055_v11  ;;  %v1056_v17 = vmax.f32 %v764_v13, 0.0  ;;  %1123 = vst.msk [vmem:[%s1774_s13 + $0x58] sm:$0xff] %vm1111_vm0, %v994_v14 }
 0x111   : > { %1187 = vst.msk [vmem:[%s1774_s13 + $0x258] sm:$0xff] %vm1111_vm0, %v1058_v15  ;;  %1121 = vst.msk [vmem:[%s1774_s13 + $0x48] sm:$0xff] %vm1111_vm0, %v992_v16  ;;  %v1418_v18 = vpop.f32.mrb[12].mxu0 }
 0x112   : > { %1185 = vst.msk [vmem:[%s1774_s13 + $0x248] sm:$0xff] %vm1111_vm0, %v1056_v17  ;;  %v1482_v19 = vpop.f32.mrb[12].mxu1  ;;  %v529_v20 = vadd.f32 %v1418_v18, %v1765_v8  ;;  %v520_v22 = vpop.f32.mrb[13].mxu0 }
 0x113   : > { %v785_v21 = vadd.f32 %v1482_v19, %v1765_v8  ;;  %v776_v23 = vpop.f32.mrb[13].mxu1  ;;  %v521_v24 = vadd.f32 %v1765_v8, %v520_v22  ;;  %v1419_v26 = vpop.f32.mrb[14].mxu0 }
 0x114   : > { %v777_v25 = vadd.f32 %v1765_v8, %v776_v23  ;;  %v1483_v27 = vpop.f32.mrb[14].mxu1  ;;  %v997_v28 = vmax.f32 %v529_v20, 0.0  ;;  %v532_v30 = vadd.f32 %v1419_v26, %v1765_v8  ;;  %v523_v32 = vpop.f32.mrb[15].mxu0 }
 0x115   : > { %v1061_v29 = vmax.f32 %v785_v21, 0.0  ;;  %v788_v31 = vadd.f32 %v1483_v27, %v1765_v8  ;;  %v779_v33 = vpop.f32.mrb[15].mxu1  ;;  %v995_v34 = vmax.f32 %v521_v24, 0.0  ;;  %v524_v36 = vadd.f32 %v1765_v8, %v523_v32 }
 0x116   : > { %v1059_v35 = vmax.f32 %v777_v25, 0.0  ;;  %v780_v37 = vadd.f32 %v1765_v8, %v779_v33  ;;  %1126 = vst.msk [vmem:[%s1774_s13 + $0x70] sm:$0xff] %vm1111_vm0, %v997_v28  ;;  %v998_v38 = vmax.f32 %v532_v30, 0.0 }
 0x117   : > { %1190 = vst.msk [vmem:[%s1774_s13 + $0x270] sm:$0xff] %vm1111_vm0, %v1061_v29  ;;  %v1062_v39 = vmax.f32 %v788_v31, 0.0  ;;  %1124 = vst.msk [vmem:[%s1774_s13 + $0x60] sm:$0xff] %vm1111_vm0, %v995_v34  ;;  %v996_v40 = vmax.f32 %v524_v36, 0.0 }
 0x118   : > { %1188 = vst.msk [vmem:[%s1774_s13 + $0x260] sm:$0xff] %vm1111_vm0, %v1059_v35  ;;  %v1060_v41 = vmax.f32 %v780_v37, 0.0  ;;  %1127 = vst.msk [vmem:[%s1774_s13 + $0x78] sm:$0xff] %vm1111_vm0, %v998_v38 }
 0x119   : > { %1191 = vst.msk [vmem:[%s1774_s13 + $0x278] sm:$0xff] %vm1111_vm0, %v1062_v39  ;;  %1125 = vst.msk [vmem:[%s1774_s13 + $0x68] sm:$0xff] %vm1111_vm0, %v996_v40  ;;  %v1422_v42 = vpop.f32.mrb[16].mxu0 }
 0x11a   : > { %1189 = vst.msk [vmem:[%s1774_s13 + $0x268] sm:$0xff] %vm1111_vm0, %v1060_v41  ;;  %v1486_v43 = vpop.f32.mrb[16].mxu1  ;;  %v545_v44 = vadd.f32 %v1422_v42, %v1765_v8  ;;  %v536_v46 = vpop.f32.mrb[17].mxu0 }
 0x11b   : > { %v801_v45 = vadd.f32 %v1486_v43, %v1765_v8  ;;  %v792_v47 = vpop.f32.mrb[17].mxu1  ;;  %v537_v48 = vadd.f32 %v1765_v8, %v536_v46  ;;  %v1423_v50 = vpop.f32.mrb[18].mxu0 }
 0x11c   : > { %v793_v49 = vadd.f32 %v1765_v8, %v792_v47  ;;  %v1487_v51 = vpop.f32.mrb[18].mxu1  ;;  %v1001_v52 = vmax.f32 %v545_v44, 0.0  ;;  %v548_v54 = vadd.f32 %v1423_v50, %v1765_v8  ;;  %v539_v56 = vpop.f32.mrb[19].mxu0 }
 0x11d   : > { %v1065_v53 = vmax.f32 %v801_v45, 0.0  ;;  %v804_v55 = vadd.f32 %v1487_v51, %v1765_v8  ;;  %v795_v57 = vpop.f32.mrb[19].mxu1  ;;  %v999_v58 = vmax.f32 %v537_v48, 0.0  ;;  %v540_v60 = vadd.f32 %v1765_v8, %v539_v56 }
 0x11e   : > { %v1063_v59 = vmax.f32 %v793_v49, 0.0  ;;  %v796_v61 = vadd.f32 %v1765_v8, %v795_v57  ;;  %1130 = vst.msk [vmem:[%s1774_s13 + $0x90] sm:$0xff] %vm1111_vm0, %v1001_v52  ;;  %v1002_v62 = vmax.f32 %v548_v54, 0.0 }
 0x11f   : > { %1194 = vst.msk [vmem:[%s1774_s13 + $0x290] sm:$0xff] %vm1111_vm0, %v1065_v53  ;;  %v1066_v63 = vmax.f32 %v804_v55, 0.0  ;;  %1128 = vst.msk [vmem:[%s1774_s13 + $0x80] sm:$0xff] %vm1111_vm0, %v999_v58  ;;  %v1000_v0 = vmax.f32 %v540_v60, 0.0 }
 0x120   : > { %1192 = vst.msk [vmem:[%s1774_s13 + $0x280] sm:$0xff] %vm1111_vm0, %v1063_v59  ;;  %v1064_v1 = vmax.f32 %v796_v61, 0.0  ;;  %1131 = vst.msk [vmem:[%s1774_s13 + $0x98] sm:$0xff] %vm1111_vm0, %v1002_v62 }
 0x121   : > { %1195 = vst.msk [vmem:[%s1774_s13 + $0x298] sm:$0xff] %vm1111_vm0, %v1066_v63  ;;  %1129 = vst.msk [vmem:[%s1774_s13 + $0x88] sm:$0xff] %vm1111_vm0, %v1000_v0  ;;  %v1426_v2 = vpop.f32.mrb[20].mxu0 }
 0x122   : > { %1193 = vst.msk [vmem:[%s1774_s13 + $0x288] sm:$0xff] %vm1111_vm0, %v1064_v1  ;;  %v1490_v3 = vpop.f32.mrb[20].mxu1  ;;  %v561_v4 = vadd.f32 %v1426_v2, %v1765_v8  ;;  %v552_v6 = vpop.f32.mrb[21].mxu0 }
 0x123   : > { %v817_v5 = vadd.f32 %v1490_v3, %v1765_v8  ;;  %v808_v7 = vpop.f32.mrb[21].mxu1  ;;  %v553_v9 = vadd.f32 %v1765_v8, %v552_v6  ;;  %v1427_v11 = vpop.f32.mrb[22].mxu0 }
 0x124   : > { %v809_v10 = vadd.f32 %v1765_v8, %v808_v7  ;;  %v1491_v12 = vpop.f32.mrb[22].mxu1  ;;  %v1005_v13 = vmax.f32 %v561_v4, 0.0  ;;  %v564_v15 = vadd.f32 %v1427_v11, %v1765_v8  ;;  %v555_v17 = vpop.f32.mrb[23].mxu0 }
 0x125   : > { %v1069_v14 = vmax.f32 %v817_v5, 0.0  ;;  %v820_v16 = vadd.f32 %v1491_v12, %v1765_v8  ;;  %v811_v18 = vpop.f32.mrb[23].mxu1  ;;  %v1003_v19 = vmax.f32 %v553_v9, 0.0  ;;  %v556_v21 = vadd.f32 %v1765_v8, %v555_v17 }
 0x126   : > { %v1067_v20 = vmax.f32 %v809_v10, 0.0  ;;  %v812_v22 = vadd.f32 %v1765_v8, %v811_v18  ;;  %1134 = vst.msk [vmem:[%s1774_s13 + $0xb0] sm:$0xff] %vm1111_vm0, %v1005_v13  ;;  %v1006_v23 = vmax.f32 %v564_v15, 0.0 }
 0x127   : > { %1198 = vst.msk [vmem:[%s1774_s13 + $0x2b0] sm:$0xff] %vm1111_vm0, %v1069_v14  ;;  %v1070_v24 = vmax.f32 %v820_v16, 0.0  ;;  %1132 = vst.msk [vmem:[%s1774_s13 + $0xa0] sm:$0xff] %vm1111_vm0, %v1003_v19  ;;  %v1004_v25 = vmax.f32 %v556_v21, 0.0 }
 0x128   : > { %1196 = vst.msk [vmem:[%s1774_s13 + $0x2a0] sm:$0xff] %vm1111_vm0, %v1067_v20  ;;  %v1068_v26 = vmax.f32 %v812_v22, 0.0  ;;  %1135 = vst.msk [vmem:[%s1774_s13 + $0xb8] sm:$0xff] %vm1111_vm0, %v1006_v23 }
 0x129   : > { %1199 = vst.msk [vmem:[%s1774_s13 + $0x2b8] sm:$0xff] %vm1111_vm0, %v1070_v24  ;;  %1133 = vst.msk [vmem:[%s1774_s13 + $0xa8] sm:$0xff] %vm1111_vm0, %v1004_v25  ;;  %v1430_v27 = vpop.f32.mrb[24].mxu0 }
 0x12a   : > { %1197 = vst.msk [vmem:[%s1774_s13 + $0x2a8] sm:$0xff] %vm1111_vm0, %v1068_v26  ;;  %v1494_v28 = vpop.f32.mrb[24].mxu1  ;;  %v577_v29 = vadd.f32 %v1430_v27, %v1765_v8  ;;  %v568_v31 = vpop.f32.mrb[25].mxu0 }
 0x12b   : > { %v833_v30 = vadd.f32 %v1494_v28, %v1765_v8  ;;  %v824_v32 = vpop.f32.mrb[25].mxu1  ;;  %v569_v33 = vadd.f32 %v1765_v8, %v568_v31  ;;  %v1431_v35 = vpop.f32.mrb[26].mxu0 }
 0x12c   : > { %v825_v34 = vadd.f32 %v1765_v8, %v824_v32  ;;  %v1495_v36 = vpop.f32.mrb[26].mxu1  ;;  %v1009_v37 = vmax.f32 %v577_v29, 0.0  ;;  %v580_v39 = vadd.f32 %v1431_v35, %v1765_v8  ;;  %v571_v41 = vpop.f32.mrb[27].mxu0 }
 0x12d   : > { %v1073_v38 = vmax.f32 %v833_v30, 0.0  ;;  %v836_v40 = vadd.f32 %v1495_v36, %v1765_v8  ;;  %v827_v42 = vpop.f32.mrb[27].mxu1  ;;  %v1007_v43 = vmax.f32 %v569_v33, 0.0  ;;  %v572_v45 = vadd.f32 %v1765_v8, %v571_v41 }
 0x12e   : > { %v1071_v44 = vmax.f32 %v825_v34, 0.0  ;;  %v828_v46 = vadd.f32 %v1765_v8, %v827_v42  ;;  %1138 = vst.msk [vmem:[%s1774_s13 + $0xd0] sm:$0xff] %vm1111_vm0, %v1009_v37  ;;  %v1010_v47 = vmax.f32 %v580_v39, 0.0 }
 0x12f   : > { %1202 = vst.msk [vmem:[%s1774_s13 + $0x2d0] sm:$0xff] %vm1111_vm0, %v1073_v38  ;;  %v1074_v48 = vmax.f32 %v836_v40, 0.0  ;;  %1136 = vst.msk [vmem:[%s1774_s13 + $0xc0] sm:$0xff] %vm1111_vm0, %v1007_v43  ;;  %v1008_v49 = vmax.f32 %v572_v45, 0.0 }
 0x130   : > { %1200 = vst.msk [vmem:[%s1774_s13 + $0x2c0] sm:$0xff] %vm1111_vm0, %v1071_v44  ;;  %v1072_v50 = vmax.f32 %v828_v46, 0.0  ;;  %1139 = vst.msk [vmem:[%s1774_s13 + $0xd8] sm:$0xff] %vm1111_vm0, %v1010_v47 }
 0x131   : > { %1203 = vst.msk [vmem:[%s1774_s13 + $0x2d8] sm:$0xff] %vm1111_vm0, %v1074_v48  ;;  %1137 = vst.msk [vmem:[%s1774_s13 + $0xc8] sm:$0xff] %vm1111_vm0, %v1008_v49  ;;  %v1434_v51 = vpop.f32.mrb[28].mxu0 }
 0x132   : > { %1201 = vst.msk [vmem:[%s1774_s13 + $0x2c8] sm:$0xff] %vm1111_vm0, %v1072_v50  ;;  %v1498_v52 = vpop.f32.mrb[28].mxu1  ;;  %v593_v53 = vadd.f32 %v1434_v51, %v1765_v8  ;;  %v584_v55 = vpop.f32.mrb[29].mxu0 }
 0x133   : > { %v849_v54 = vadd.f32 %v1498_v52, %v1765_v8  ;;  %v840_v56 = vpop.f32.mrb[29].mxu1  ;;  %v585_v57 = vadd.f32 %v1765_v8, %v584_v55  ;;  %v1435_v59 = vpop.f32.mrb[30].mxu0 }
 0x134   : > { %v841_v58 = vadd.f32 %v1765_v8, %v840_v56  ;;  %v1499_v60 = vpop.f32.mrb[30].mxu1  ;;  %v1013_v61 = vmax.f32 %v593_v53, 0.0  ;;  %v596_v63 = vadd.f32 %v1435_v59, %v1765_v8  ;;  %v587_v1 = vpop.f32.mrb[31].mxu0 }
 0x135   : > { %v1077_v62 = vmax.f32 %v849_v54, 0.0  ;;  %v852_v0 = vadd.f32 %v1499_v60, %v1765_v8  ;;  %v843_v2 = vpop.f32.mrb[31].mxu1  ;;  %v1011_v3 = vmax.f32 %v585_v57, 0.0  ;;  %v588_v5 = vadd.f32 %v1765_v8, %v587_v1 }
 0x136   : > { %v1075_v4 = vmax.f32 %v841_v58, 0.0  ;;  %v844_v6 = vadd.f32 %v1765_v8, %v843_v2  ;;  %1142 = vst.msk [vmem:[%s1774_s13 + $0xf0] sm:$0xff] %vm1111_vm0, %v1013_v61  ;;  %v1014_v7 = vmax.f32 %v596_v63, 0.0 }
 0x137   : > { %1206 = vst.msk [vmem:[%s1774_s13 + $0x2f0] sm:$0xff] %vm1111_vm0, %v1077_v62  ;;  %v1078_v9 = vmax.f32 %v852_v0, 0.0  ;;  %1140 = vst.msk [vmem:[%s1774_s13 + $0xe0] sm:$0xff] %vm1111_vm0, %v1011_v3  ;;  %v1012_v10 = vmax.f32 %v588_v5, 0.0 }
 0x138   : > { %1204 = vst.msk [vmem:[%s1774_s13 + $0x2e0] sm:$0xff] %vm1111_vm0, %v1075_v4  ;;  %v1076_v11 = vmax.f32 %v844_v6, 0.0  ;;  %1143 = vst.msk [vmem:[%s1774_s13 + $0xf8] sm:$0xff] %vm1111_vm0, %v1014_v7 }
 0x139   : > { %1207 = vst.msk [vmem:[%s1774_s13 + $0x2f8] sm:$0xff] %vm1111_vm0, %v1078_v9  ;;  %1141 = vst.msk [vmem:[%s1774_s13 + $0xe8] sm:$0xff] %vm1111_vm0, %v1012_v10  ;;  %v1438_v12 = vpop.f32.mrb[32].mxu0 }
 0x13a   : > { %1205 = vst.msk [vmem:[%s1774_s13 + $0x2e8] sm:$0xff] %vm1111_vm0, %v1076_v11  ;;  %v1502_v13 = vpop.f32.mrb[32].mxu1  ;;  %v609_v14 = vadd.f32 %v1438_v12, %v1765_v8  ;;  %v600_v16 = vpop.f32.mrb[33].mxu0 }
 0x13b   : > { %v865_v15 = vadd.f32 %v1502_v13, %v1765_v8  ;;  %v856_v17 = vpop.f32.mrb[33].mxu1  ;;  %v601_v18 = vadd.f32 %v1765_v8, %v600_v16  ;;  %v1439_v20 = vpop.f32.mrb[34].mxu0 }
 0x13c   : > { %v857_v19 = vadd.f32 %v1765_v8, %v856_v17  ;;  %v1503_v21 = vpop.f32.mrb[34].mxu1  ;;  %v1017_v22 = vmax.f32 %v609_v14, 0.0  ;;  %v612_v24 = vadd.f32 %v1439_v20, %v1765_v8  ;;  %v603_v26 = vpop.f32.mrb[35].mxu0 }
 0x13d   : > { %v1081_v23 = vmax.f32 %v865_v15, 0.0  ;;  %v868_v25 = vadd.f32 %v1503_v21, %v1765_v8  ;;  %v859_v27 = vpop.f32.mrb[35].mxu1  ;;  %v1015_v28 = vmax.f32 %v601_v18, 0.0  ;;  %v604_v30 = vadd.f32 %v1765_v8, %v603_v26 }
 0x13e   : > { %v1079_v29 = vmax.f32 %v857_v19, 0.0  ;;  %v860_v31 = vadd.f32 %v1765_v8, %v859_v27  ;;  %1146 = vst.msk [vmem:[%s1774_s13 + $0x110] sm:$0xff] %vm1111_vm0, %v1017_v22  ;;  %v1018_v32 = vmax.f32 %v612_v24, 0.0 }
 0x13f   : > { %1210 = vst.msk [vmem:[%s1774_s13 + $0x310] sm:$0xff] %vm1111_vm0, %v1081_v23  ;;  %v1082_v33 = vmax.f32 %v868_v25, 0.0  ;;  %1144 = vst.msk [vmem:[%s1774_s13 + $0x100] sm:$0xff] %vm1111_vm0, %v1015_v28  ;;  %v1016_v34 = vmax.f32 %v604_v30, 0.0 }
 0x140   : > { %1208 = vst.msk [vmem:[%s1774_s13 + $0x300] sm:$0xff] %vm1111_vm0, %v1079_v29  ;;  %v1080_v35 = vmax.f32 %v860_v31, 0.0  ;;  %1147 = vst.msk [vmem:[%s1774_s13 + $0x118] sm:$0xff] %vm1111_vm0, %v1018_v32 }
 0x141   : > { %1211 = vst.msk [vmem:[%s1774_s13 + $0x318] sm:$0xff] %vm1111_vm0, %v1082_v33  ;;  %1145 = vst.msk [vmem:[%s1774_s13 + $0x108] sm:$0xff] %vm1111_vm0, %v1016_v34  ;;  %v1442_v36 = vpop.f32.mrb[36].mxu0 }
 0x142   : > { %1209 = vst.msk [vmem:[%s1774_s13 + $0x308] sm:$0xff] %vm1111_vm0, %v1080_v35  ;;  %v1506_v37 = vpop.f32.mrb[36].mxu1  ;;  %v625_v38 = vadd.f32 %v1442_v36, %v1765_v8  ;;  %v616_v40 = vpop.f32.mrb[37].mxu0 }
 0x143   : > { %v881_v39 = vadd.f32 %v1506_v37, %v1765_v8  ;;  %v872_v41 = vpop.f32.mrb[37].mxu1  ;;  %v617_v42 = vadd.f32 %v1765_v8, %v616_v40  ;;  %v1443_v44 = vpop.f32.mrb[38].mxu0 }
 0x144   : > { %v873_v43 = vadd.f32 %v1765_v8, %v872_v41  ;;  %v1507_v45 = vpop.f32.mrb[38].mxu1  ;;  %v1021_v46 = vmax.f32 %v625_v38, 0.0  ;;  %v628_v48 = vadd.f32 %v1443_v44, %v1765_v8  ;;  %v619_v50 = vpop.f32.mrb[39].mxu0 }
 0x145   : > { %v1085_v47 = vmax.f32 %v881_v39, 0.0  ;;  %v884_v49 = vadd.f32 %v1507_v45, %v1765_v8  ;;  %v875_v51 = vpop.f32.mrb[39].mxu1  ;;  %v1019_v52 = vmax.f32 %v617_v42, 0.0  ;;  %v620_v54 = vadd.f32 %v1765_v8, %v619_v50 }
 0x146   : > { %v1083_v53 = vmax.f32 %v873_v43, 0.0  ;;  %v876_v55 = vadd.f32 %v1765_v8, %v875_v51  ;;  %1150 = vst.msk [vmem:[%s1774_s13 + $0x130] sm:$0xff] %vm1111_vm0, %v1021_v46  ;;  %v1022_v56 = vmax.f32 %v628_v48, 0.0 }
 0x147   : > { %1214 = vst.msk [vmem:[%s1774_s13 + $0x330] sm:$0xff] %vm1111_vm0, %v1085_v47  ;;  %v1086_v57 = vmax.f32 %v884_v49, 0.0  ;;  %1148 = vst.msk [vmem:[%s1774_s13 + $0x120] sm:$0xff] %vm1111_vm0, %v1019_v52  ;;  %v1020_v58 = vmax.f32 %v620_v54, 0.0 }
 0x148   : > { %1212 = vst.msk [vmem:[%s1774_s13 + $0x320] sm:$0xff] %vm1111_vm0, %v1083_v53  ;;  %v1084_v59 = vmax.f32 %v876_v55, 0.0  ;;  %1151 = vst.msk [vmem:[%s1774_s13 + $0x138] sm:$0xff] %vm1111_vm0, %v1022_v56 }
 0x149   : > { %1215 = vst.msk [vmem:[%s1774_s13 + $0x338] sm:$0xff] %vm1111_vm0, %v1086_v57  ;;  %1149 = vst.msk [vmem:[%s1774_s13 + $0x128] sm:$0xff] %vm1111_vm0, %v1020_v58  ;;  %v1446_v60 = vpop.f32.mrb[40].mxu0 }
 0x14a   : > { %1213 = vst.msk [vmem:[%s1774_s13 + $0x328] sm:$0xff] %vm1111_vm0, %v1084_v59  ;;  %v1510_v61 = vpop.f32.mrb[40].mxu1  ;;  %v641_v62 = vadd.f32 %v1446_v60, %v1765_v8  ;;  %v632_v0 = vpop.f32.mrb[41].mxu0 }
 0x14b   : > { %v897_v63 = vadd.f32 %v1510_v61, %v1765_v8  ;;  %v888_v1 = vpop.f32.mrb[41].mxu1  ;;  %v633_v2 = vadd.f32 %v1765_v8, %v632_v0  ;;  %v1447_v4 = vpop.f32.mrb[42].mxu0 }
 0x14c   : > { %v889_v3 = vadd.f32 %v1765_v8, %v888_v1  ;;  %v1511_v5 = vpop.f32.mrb[42].mxu1  ;;  %v1025_v6 = vmax.f32 %v641_v62, 0.0  ;;  %v644_v9 = vadd.f32 %v1447_v4, %v1765_v8  ;;  %v635_v11 = vpop.f32.mrb[43].mxu0 }
 0x14d   : > { %v1089_v7 = vmax.f32 %v897_v63, 0.0  ;;  %v900_v10 = vadd.f32 %v1511_v5, %v1765_v8  ;;  %v891_v12 = vpop.f32.mrb[43].mxu1  ;;  %v1023_v13 = vmax.f32 %v633_v2, 0.0  ;;  %v636_v15 = vadd.f32 %v1765_v8, %v635_v11 }
 0x14e   : > { %v1087_v14 = vmax.f32 %v889_v3, 0.0  ;;  %v892_v16 = vadd.f32 %v1765_v8, %v891_v12  ;;  %1154 = vst.msk [vmem:[%s1774_s13 + $0x150] sm:$0xff] %vm1111_vm0, %v1025_v6  ;;  %v1026_v17 = vmax.f32 %v644_v9, 0.0 }
 0x14f   : > { %1218 = vst.msk [vmem:[%s1774_s13 + $0x350] sm:$0xff] %vm1111_vm0, %v1089_v7  ;;  %v1090_v18 = vmax.f32 %v900_v10, 0.0  ;;  %1152 = vst.msk [vmem:[%s1774_s13 + $0x140] sm:$0xff] %vm1111_vm0, %v1023_v13  ;;  %v1024_v19 = vmax.f32 %v636_v15, 0.0 }
 0x150   : > { %1216 = vst.msk [vmem:[%s1774_s13 + $0x340] sm:$0xff] %vm1111_vm0, %v1087_v14  ;;  %v1088_v20 = vmax.f32 %v892_v16, 0.0  ;;  %1155 = vst.msk [vmem:[%s1774_s13 + $0x158] sm:$0xff] %vm1111_vm0, %v1026_v17 }
 0x151   : > { %1219 = vst.msk [vmem:[%s1774_s13 + $0x358] sm:$0xff] %vm1111_vm0, %v1090_v18  ;;  %1153 = vst.msk [vmem:[%s1774_s13 + $0x148] sm:$0xff] %vm1111_vm0, %v1024_v19  ;;  %v1450_v21 = vpop.f32.mrb[44].mxu0 }
 0x152   : > { %1217 = vst.msk [vmem:[%s1774_s13 + $0x348] sm:$0xff] %vm1111_vm0, %v1088_v20  ;;  %v1514_v22 = vpop.f32.mrb[44].mxu1  ;;  %v657_v23 = vadd.f32 %v1450_v21, %v1765_v8  ;;  %v648_v25 = vpop.f32.mrb[45].mxu0 }
 0x153   : > { %v913_v24 = vadd.f32 %v1514_v22, %v1765_v8  ;;  %v904_v26 = vpop.f32.mrb[45].mxu1  ;;  %v649_v27 = vadd.f32 %v1765_v8, %v648_v25  ;;  %v1451_v29 = vpop.f32.mrb[46].mxu0 }
 0x154   : > { %v905_v28 = vadd.f32 %v1765_v8, %v904_v26  ;;  %v1515_v30 = vpop.f32.mrb[46].mxu1  ;;  %v1029_v31 = vmax.f32 %v657_v23, 0.0  ;;  %v660_v33 = vadd.f32 %v1451_v29, %v1765_v8  ;;  %v651_v35 = vpop.f32.mrb[47].mxu0 }
 0x155   : > { %v1093_v32 = vmax.f32 %v913_v24, 0.0  ;;  %v916_v34 = vadd.f32 %v1515_v30, %v1765_v8  ;;  %v907_v36 = vpop.f32.mrb[47].mxu1  ;;  %v1027_v37 = vmax.f32 %v649_v27, 0.0  ;;  %v652_v39 = vadd.f32 %v1765_v8, %v651_v35 }
 0x156   : > { %v1091_v38 = vmax.f32 %v905_v28, 0.0  ;;  %v908_v40 = vadd.f32 %v1765_v8, %v907_v36  ;;  %1158 = vst.msk [vmem:[%s1774_s13 + $0x170] sm:$0xff] %vm1111_vm0, %v1029_v31  ;;  %v1030_v41 = vmax.f32 %v660_v33, 0.0 }
 0x157   : > { %1222 = vst.msk [vmem:[%s1774_s13 + $0x370] sm:$0xff] %vm1111_vm0, %v1093_v32  ;;  %v1094_v42 = vmax.f32 %v916_v34, 0.0  ;;  %1156 = vst.msk [vmem:[%s1774_s13 + $0x160] sm:$0xff] %vm1111_vm0, %v1027_v37  ;;  %v1028_v43 = vmax.f32 %v652_v39, 0.0 }
 0x158   : > { %1220 = vst.msk [vmem:[%s1774_s13 + $0x360] sm:$0xff] %vm1111_vm0, %v1091_v38  ;;  %v1092_v44 = vmax.f32 %v908_v40, 0.0  ;;  %1159 = vst.msk [vmem:[%s1774_s13 + $0x178] sm:$0xff] %vm1111_vm0, %v1030_v41 }
 0x159   : > { %1223 = vst.msk [vmem:[%s1774_s13 + $0x378] sm:$0xff] %vm1111_vm0, %v1094_v42  ;;  %1157 = vst.msk [vmem:[%s1774_s13 + $0x168] sm:$0xff] %vm1111_vm0, %v1028_v43  ;;  %v1454_v45 = vpop.f32.mrb[48].mxu0 }
 0x15a   : > { %1221 = vst.msk [vmem:[%s1774_s13 + $0x368] sm:$0xff] %vm1111_vm0, %v1092_v44  ;;  %v1518_v46 = vpop.f32.mrb[48].mxu1  ;;  %v673_v47 = vadd.f32 %v1454_v45, %v1765_v8  ;;  %v664_v49 = vpop.f32.mrb[49].mxu0 }
 0x15b   : > { %v929_v48 = vadd.f32 %v1518_v46, %v1765_v8  ;;  %v920_v50 = vpop.f32.mrb[49].mxu1  ;;  %v665_v51 = vadd.f32 %v1765_v8, %v664_v49  ;;  %v1455_v53 = vpop.f32.mrb[50].mxu0 }
 0x15c   : > { %v921_v52 = vadd.f32 %v1765_v8, %v920_v50  ;;  %v1519_v54 = vpop.f32.mrb[50].mxu1  ;;  %v1033_v55 = vmax.f32 %v673_v47, 0.0  ;;  %v676_v57 = vadd.f32 %v1455_v53, %v1765_v8  ;;  %v667_v59 = vpop.f32.mrb[51].mxu0 }
 0x15d   : > { %v1097_v56 = vmax.f32 %v929_v48, 0.0  ;;  %v932_v58 = vadd.f32 %v1519_v54, %v1765_v8  ;;  %v923_v60 = vpop.f32.mrb[51].mxu1  ;;  %v1031_v61 = vmax.f32 %v665_v51, 0.0  ;;  %v668_v63 = vadd.f32 %v1765_v8, %v667_v59 }
 0x15e   : > { %v1095_v62 = vmax.f32 %v921_v52, 0.0  ;;  %v924_v0 = vadd.f32 %v1765_v8, %v923_v60  ;;  %1162 = vst.msk [vmem:[%s1774_s13 + $0x190] sm:$0xff] %vm1111_vm0, %v1033_v55  ;;  %v1034_v1 = vmax.f32 %v676_v57, 0.0 }
 0x15f   : > { %1226 = vst.msk [vmem:[%s1774_s13 + $0x390] sm:$0xff] %vm1111_vm0, %v1097_v56  ;;  %v1098_v2 = vmax.f32 %v932_v58, 0.0  ;;  %1160 = vst.msk [vmem:[%s1774_s13 + $0x180] sm:$0xff] %vm1111_vm0, %v1031_v61  ;;  %v1032_v3 = vmax.f32 %v668_v63, 0.0 }
 0x160   : > { %1224 = vst.msk [vmem:[%s1774_s13 + $0x380] sm:$0xff] %vm1111_vm0, %v1095_v62  ;;  %v1096_v4 = vmax.f32 %v924_v0, 0.0  ;;  %1163 = vst.msk [vmem:[%s1774_s13 + $0x198] sm:$0xff] %vm1111_vm0, %v1034_v1 }
 0x161   : > { %1227 = vst.msk [vmem:[%s1774_s13 + $0x398] sm:$0xff] %vm1111_vm0, %v1098_v2  ;;  %1161 = vst.msk [vmem:[%s1774_s13 + $0x188] sm:$0xff] %vm1111_vm0, %v1032_v3  ;;  %v1458_v5 = vpop.f32.mrb[52].mxu0 }
 0x162   : > { %1225 = vst.msk [vmem:[%s1774_s13 + $0x388] sm:$0xff] %vm1111_vm0, %v1096_v4  ;;  %v1522_v6 = vpop.f32.mrb[52].mxu1  ;;  %v689_v7 = vadd.f32 %v1458_v5, %v1765_v8  ;;  %v680_v10 = vpop.f32.mrb[53].mxu0 }
 0x163   : > { %v945_v9 = vadd.f32 %v1522_v6, %v1765_v8  ;;  %v936_v11 = vpop.f32.mrb[53].mxu1  ;;  %v681_v12 = vadd.f32 %v1765_v8, %v680_v10  ;;  %v1459_v14 = vpop.f32.mrb[54].mxu0 }
 0x164   : > { %v937_v13 = vadd.f32 %v1765_v8, %v936_v11  ;;  %v1523_v15 = vpop.f32.mrb[54].mxu1  ;;  %v1037_v16 = vmax.f32 %v689_v7, 0.0  ;;  %v692_v18 = vadd.f32 %v1459_v14, %v1765_v8  ;;  %v683_v20 = vpop.f32.mrb[55].mxu0 }
 0x165   : > { %v1101_v17 = vmax.f32 %v945_v9, 0.0  ;;  %v948_v19 = vadd.f32 %v1523_v15, %v1765_v8  ;;  %v939_v21 = vpop.f32.mrb[55].mxu1  ;;  %v1035_v22 = vmax.f32 %v681_v12, 0.0  ;;  %v684_v24 = vadd.f32 %v1765_v8, %v683_v20 }
 0x166   : > { %v1099_v23 = vmax.f32 %v937_v13, 0.0  ;;  %v940_v25 = vadd.f32 %v1765_v8, %v939_v21  ;;  %1166 = vst.msk [vmem:[%s1774_s13 + $0x1b0] sm:$0xff] %vm1111_vm0, %v1037_v16  ;;  %v1038_v26 = vmax.f32 %v692_v18, 0.0 }
 0x167   : > { %1230 = vst.msk [vmem:[%s1774_s13 + $0x3b0] sm:$0xff] %vm1111_vm0, %v1101_v17  ;;  %v1102_v27 = vmax.f32 %v948_v19, 0.0  ;;  %1164 = vst.msk [vmem:[%s1774_s13 + $0x1a0] sm:$0xff] %vm1111_vm0, %v1035_v22  ;;  %v1036_v28 = vmax.f32 %v684_v24, 0.0 }
 0x168   : > { %1228 = vst.msk [vmem:[%s1774_s13 + $0x3a0] sm:$0xff] %vm1111_vm0, %v1099_v23  ;;  %v1100_v29 = vmax.f32 %v940_v25, 0.0  ;;  %1167 = vst.msk [vmem:[%s1774_s13 + $0x1b8] sm:$0xff] %vm1111_vm0, %v1038_v26 }
 0x169   : > { %1231 = vst.msk [vmem:[%s1774_s13 + $0x3b8] sm:$0xff] %vm1111_vm0, %v1102_v27  ;;  %1165 = vst.msk [vmem:[%s1774_s13 + $0x1a8] sm:$0xff] %vm1111_vm0, %v1036_v28  ;;  %v1462_v30 = vpop.f32.mrb[56].mxu0 }
 0x16a   : > { %1229 = vst.msk [vmem:[%s1774_s13 + $0x3a8] sm:$0xff] %vm1111_vm0, %v1100_v29  ;;  %v1526_v31 = vpop.f32.mrb[56].mxu1  ;;  %v705_v32 = vadd.f32 %v1462_v30, %v1765_v8  ;;  %v696_v34 = vpop.f32.mrb[57].mxu0 }
 0x16b   : > { %v961_v33 = vadd.f32 %v1526_v31, %v1765_v8  ;;  %v952_v35 = vpop.f32.mrb[57].mxu1  ;;  %v697_v36 = vadd.f32 %v1765_v8, %v696_v34  ;;  %v1463_v38 = vpop.f32.mrb[58].mxu0 }
 0x16c   : > { %v953_v37 = vadd.f32 %v1765_v8, %v952_v35  ;;  %v1527_v39 = vpop.f32.mrb[58].mxu1  ;;  %v1041_v40 = vmax.f32 %v705_v32, 0.0  ;;  %v708_v42 = vadd.f32 %v1463_v38, %v1765_v8  ;;  %v699_v44 = vpop.f32.mrb[59].mxu0 }
 0x16d   : > { %v1105_v41 = vmax.f32 %v961_v33, 0.0  ;;  %v964_v43 = vadd.f32 %v1527_v39, %v1765_v8  ;;  %v955_v45 = vpop.f32.mrb[59].mxu1  ;;  %v1039_v46 = vmax.f32 %v697_v36, 0.0  ;;  %v700_v48 = vadd.f32 %v1765_v8, %v699_v44 }
 0x16e   : > { %v1103_v47 = vmax.f32 %v953_v37, 0.0  ;;  %v956_v49 = vadd.f32 %v1765_v8, %v955_v45  ;;  %1170 = vst.msk [vmem:[%s1774_s13 + $0x1d0] sm:$0xff] %vm1111_vm0, %v1041_v40  ;;  %v1042_v50 = vmax.f32 %v708_v42, 0.0 }
 0x16f   : > { %1234 = vst.msk [vmem:[%s1774_s13 + $0x3d0] sm:$0xff] %vm1111_vm0, %v1105_v41  ;;  %v1106_v51 = vmax.f32 %v964_v43, 0.0  ;;  %1168 = vst.msk [vmem:[%s1774_s13 + $0x1c0] sm:$0xff] %vm1111_vm0, %v1039_v46  ;;  %v1040_v52 = vmax.f32 %v700_v48, 0.0 }
 0x170   : > { %1232 = vst.msk [vmem:[%s1774_s13 + $0x3c0] sm:$0xff] %vm1111_vm0, %v1103_v47  ;;  %v1104_v53 = vmax.f32 %v956_v49, 0.0  ;;  %1171 = vst.msk [vmem:[%s1774_s13 + $0x1d8] sm:$0xff] %vm1111_vm0, %v1042_v50 }
 0x171   : > { %1235 = vst.msk [vmem:[%s1774_s13 + $0x3d8] sm:$0xff] %vm1111_vm0, %v1106_v51  ;;  %1169 = vst.msk [vmem:[%s1774_s13 + $0x1c8] sm:$0xff] %vm1111_vm0, %v1040_v52  ;;  %v1466_v54 = vpop.f32.mrb[60].mxu0 }
 0x172   : > { %1233 = vst.msk [vmem:[%s1774_s13 + $0x3c8] sm:$0xff] %vm1111_vm0, %v1104_v53  ;;  %v1530_v55 = vpop.f32.mrb[60].mxu1  ;;  %v721_v56 = vadd.f32 %v1466_v54, %v1765_v8  ;;  %v712_v58 = vpop.f32.mrb[61].mxu0 }
 0x173   : > { %v977_v57 = vadd.f32 %v1530_v55, %v1765_v8  ;;  %v968_v59 = vpop.f32.mrb[61].mxu1  ;;  %v713_v60 = vadd.f32 %v1765_v8, %v712_v58  ;;  %v1467_v62 = vpop.f32.mrb[62].mxu0 }
 0x174   : > { %v969_v61 = vadd.f32 %v1765_v8, %v968_v59  ;;  %v1531_v63 = vpop.f32.mrb[62].mxu1  ;;  %v1045_v0 = vmax.f32 %v721_v56, 0.0  ;;  %v724_v2 = vadd.f32 %v1467_v62, %v1765_v8  ;;  %v715_v4 = vpop.f32.mrb[63].mxu0 }
 0x175   : > { %v1109_v1 = vmax.f32 %v977_v57, 0.0  ;;  %v980_v3 = vadd.f32 %v1531_v63, %v1765_v8  ;;  %v971_v5 = vpop.f32.mrb[63].mxu1  ;;  %v1043_v6 = vmax.f32 %v713_v60, 0.0  ;;  %v716_v9 = vadd.f32 %v1765_v8, %v715_v4 }
 0x176   : > { %v1107_v7 = vmax.f32 %v969_v61, 0.0  ;;  %v972_v10 = vadd.f32 %v1765_v8, %v971_v5  ;;  %1174 = vst.msk [vmem:[%s1774_s13 + $0x1f0] sm:$0xff] %vm1111_vm0, %v1045_v0  ;;  %v1046_v11 = vmax.f32 %v724_v2, 0.0 }
 0x177   : > { %1238 = vst.msk [vmem:[%s1774_s13 + $0x3f0] sm:$0xff] %vm1111_vm0, %v1109_v1  ;;  %v1110_v12 = vmax.f32 %v980_v3, 0.0  ;;  %1172 = vst.msk [vmem:[%s1774_s13 + $0x1e0] sm:$0xff] %vm1111_vm0, %v1043_v6  ;;  %v1044_v13 = vmax.f32 %v716_v9, 0.0 }
 0x178   : > { %1236 = vst.msk [vmem:[%s1774_s13 + $0x3e0] sm:$0xff] %vm1111_vm0, %v1107_v7  ;;  %v1108_v14 = vmax.f32 %v972_v10, 0.0  ;;  %1175 = vst.msk [vmem:[%s1774_s13 + $0x1f8] sm:$0xff] %vm1111_vm0, %v1046_v11 }
 0x179   : > { %1239 = vst.msk [vmem:[%s1774_s13 + $0x3f8] sm:$0xff] %vm1111_vm0, %v1110_v12  ;;  %1173 = vst.msk [vmem:[%s1774_s13 + $0x1e8] sm:$0xff] %vm1111_vm0, %v1044_v13 }
 0x17a   : > { %1237 = vst.msk [vmem:[%s1774_s13 + $0x3e8] sm:$0xff] %vm1111_vm0, %v1108_v14 }
 0x17b PF: > { %s13_s12 = sadd.s32 1, %s1570_s12  }
 0x17c   : > { %p10_p4 = scmp.ge.s32.totalorder %s13_s12, 4  }
 0x17e   :  { %12 = sbr.rel (!%p10_p4) target bundleno = 1 (0x1), region = 62 }

// kernel: forward.7
= control target key start
LH: loop header
LB: loop body
LE: loop exit
PB: predicated region body
PF: predicated region fallthrough
CT: control target
= control target key end

     0   :  { %v1568_v0 = vmov 0   ;;  %vm1304_vm0 = vcmask 261120   ;;  %s2815_s1 = inlined_call_operand.vmem [shape: bf16[512,32], index: 1, kind: input, shape index: {}]   ;;  %s2816_s0 = inlined_call_operand.vmem [shape: f32[512,512], index: 0, kind: input, shape index: {}]   ;;  %s2817_s2 = inlined_call_operand.vmem [shape: f32[1,32], index: 2, kind: input, shape index: {}]   ;;  %s2818_s3 = inlined_call_operand.vmem [shape: f32[512,32], index: 3, kind: output, shape index: {}]  }
   0x1   :  { %662 = vmatprep.subr.bf16.mxu1 %v1568_v0  ;;  %951 = vmatprep.subr.bf16.mxu0 %v1568_v0  ;;  %v1535_v1 = vld [vmem:[%s2815_s1] sm:$0xff]   ;;  %v1537_v3 = vld [vmem:[%s2815_s1 + $0x8] sm:$0xff]   ;;  %v1539_v5 = vld [vmem:[%s2815_s1 + $0x10] sm:$0xff]  }
   0x2   :  { %v1536_v2 = vld [vmem:[%s2815_s1 + $0x80] sm:$0xff]   ;;  %663 = vmatpush1.bf16.msra.mxu1 %v1535_v1  ;;  %v1538_v4 = vld [vmem:[%s2815_s1 + $0x88] sm:$0xff]   ;;  %v1540_v6 = vld [vmem:[%s2815_s1 + $0x90] sm:$0xff]  }
   0x3   :  { %952 = vmatpush1.bf16.msra.mxu0 %v1536_v2  ;;  %664 = vmatprep.subr.bf16.mxu1 %v1568_v0  ;;  %v1541_v7 = vld [vmem:[%s2815_s1 + $0x18] sm:$0xff]   ;;  %v1543_v9 = vld [vmem:[%s2815_s1 + $0x20] sm:$0xff]   ;;  %v1545_v11 = vld [vmem:[%s2815_s1 + $0x28] sm:$0xff]  }
   0x4   :  { %953 = vmatprep.subr.bf16.mxu0 %v1568_v0  ;;  %v1542_v8 = vld [vmem:[%s2815_s1 + $0x98] sm:$0xff]   ;;  %v1544_v10 = vld [vmem:[%s2815_s1 + $0xa0] sm:$0xff]   ;;  %v1546_v12 = vld [vmem:[%s2815_s1 + $0xa8] sm:$0xff]  }
   0x5   :  { %v1547_v13 = vld [vmem:[%s2815_s1 + $0x30] sm:$0xff]   ;;  %v1549_v15 = vld [vmem:[%s2815_s1 + $0x38] sm:$0xff]   ;;  %v1551_v17 = vld [vmem:[%s2815_s1 + $0x40] sm:$0xff]  }
   0x6   :  { %665 = vmatpush1.bf16.msra.mxu1 %v1537_v3  ;;  %v1548_v14 = vld [vmem:[%s2815_s1 + $0xb0] sm:$0xff]   ;;  %v1550_v16 = vld [vmem:[%s2815_s1 + $0xb8] sm:$0xff]   ;;  %v1552_v18 = vld [vmem:[%s2815_s1 + $0xc0] sm:$0xff]  }
   0x7   :  { %954 = vmatpush1.bf16.msra.mxu0 %v1538_v4  ;;  %666 = vmatprep.subr.bf16.mxu1 %v1568_v0  ;;  %v16_v19 = vld [vmem:[%s2816_s0 + $0x8] sm:$0xff]  ;;  %v18_v21 = vld [vmem:[%s2816_s0 + $0x18] sm:$0xff]  ;;  %v1555_v27 = vld [vmem:[%s2815_s1 + $0x50] sm:$0xff]  }
   0x8   :  { %955 = vmatprep.subr.bf16.mxu0 %v1568_v0  ;;  %v20_v20 = vld [vmem:[%s2816_s0 + $0x28] sm:$0xff]  ;;  %v22_v23 = vld [vmem:[%s2816_s0 + $0x38] sm:$0xff]  ;;  %v1556_v28 = vld [vmem:[%s2815_s1 + $0xd0] sm:$0xff]  }
   0x9   :  { %v272_v22 = vpack.c.bf16 %v20_v20, %v16_v19  ;;  %v1553_v24 = vld [vmem:[%s2815_s1 + $0x48] sm:$0xff]   ;;  %v274_v25 = vpack.c.bf16 %v22_v23, %v18_v21  ;;  %v1557_v29 = vld [vmem:[%s2815_s1 + $0x58] sm:$0xff]   ;;  %v1559_v31 = vld [vmem:[%s2815_s1 + $0x60] sm:$0xff]  }
   0xa   :  { %667 = vmatpush1.bf16.msra.mxu1 %v1539_v5  ;;  %v1554_v26 = vld [vmem:[%s2815_s1 + $0xc8] sm:$0xff]   ;;  %v1558_v30 = vld [vmem:[%s2815_s1 + $0xd8] sm:$0xff]   ;;  %v1560_v32 = vld [vmem:[%s2815_s1 + $0xe0] sm:$0xff]  }
   0xb   :  { %956 = vmatpush1.bf16.msra.mxu0 %v1540_v6  ;;  %668 = vmatprep.subr.bf16.mxu1 %v1568_v0  ;;  %v1561_v33 = vld [vmem:[%s2815_s1 + $0x68] sm:$0xff]   ;;  %v1563_v35 = vld [vmem:[%s2815_s1 + $0x70] sm:$0xff]   ;;  %v1565_v37 = vld [vmem:[%s2815_s1 + $0x78] sm:$0xff]  }
   0xc   :  { %957 = vmatprep.subr.bf16.mxu0 %v1568_v0  ;;  %694 = vmatprep.mubr.bf16.mxu1 %v272_v22  ;;  %v1562_v34 = vld [vmem:[%s2815_s1 + $0xe8] sm:$0xff]   ;;  %v1564_v36 = vld [vmem:[%s2815_s1 + $0xf0] sm:$0xff]   ;;  %v1566_v38 = vld [vmem:[%s2815_s1 + $0xf8] sm:$0xff]  }
   0xd   :  { %983 = vmatprep.mubr.bf16.mxu0 %v274_v25  ;;  %v15_v39 = vld [vmem:[%s2816_s0] sm:$0xff]  ;;  %v17_v41 = vld [vmem:[%s2816_s0 + $0x10] sm:$0xff]  ;;  %v24_v43 = vld [vmem:[%s2816_s0 + $0x48] sm:$0xff] }
   0xe   :  { %669 = vmatpush1.bf16.msra.mxu1 %v1541_v7  ;;  %v19_v40 = vld [vmem:[%s2816_s0 + $0x20] sm:$0xff]  ;;  %v21_v42 = vld [vmem:[%s2816_s0 + $0x30] sm:$0xff]  ;;  %v28_v44 = vld [vmem:[%s2816_s0 + $0x68] sm:$0xff] }
   0xf   :  { %958 = vmatpush1.bf16.msra.mxu0 %v1542_v8  ;;  %670 = vmatprep.subr.bf16.mxu1 %v1568_v0  ;;  %v26_v45 = vld [vmem:[%s2816_s0 + $0x58] sm:$0xff]  ;;  %v271_v47 = vpack.c.bf16 %v19_v40, %v15_v39  ;;  %v273_v48 = vpack.c.bf16 %v21_v42, %v17_v41  ;;  %v276_v49 = vpack.c.bf16 %v28_v44, %v24_v43  ;;  %v23_v51 = vld [vmem:[%s2816_s0 + $0x40] sm:$0xff]  ;;  %v25_v53 = vld [vmem:[%s2816_s0 + $0x50] sm:$0xff] }
  0x10   :  { %959 = vmatprep.subr.bf16.mxu0 %v1568_v0  ;;  %v30_v46 = vld [vmem:[%s2816_s0 + $0x78] sm:$0xff]  ;;  %v27_v52 = vld [vmem:[%s2816_s0 + $0x60] sm:$0xff]  ;;  %v29_v54 = vld [vmem:[%s2816_s0 + $0x70] sm:$0xff] }
  0x11   :  { %v278_v50 = vpack.c.bf16 %v30_v46, %v26_v45  ;;  %v32_v55 = vld [vmem:[%s2816_s0 + $0x88] sm:$0xff]  ;;  %v34_v57 = vld [vmem:[%s2816_s0 + $0x98] sm:$0xff]  ;;  %v275_v59 = vpack.c.bf16 %v27_v52, %v23_v51  ;;  %v277_v60 = vpack.c.bf16 %v29_v54, %v25_v53  ;;  %v31_v63 = vld [vmem:[%s2816_s0 + $0x80] sm:$0xff] }
  0x12   :  { %671 = vmatpush1.bf16.msra.mxu1 %v1543_v9  ;;  %v36_v56 = vld [vmem:[%s2816_s0 + $0xa8] sm:$0xff]  ;;  %v38_v58 = vld [vmem:[%s2816_s0 + $0xb8] sm:$0xff]  ;;  %v33_v1 = vld [vmem:[%s2816_s0 + $0x90] sm:$0xff] }
  0x13   :  { %960 = vmatpush1.bf16.msra.mxu0 %v1544_v10  ;;  %672 = vmatprep.subr.bf16.mxu1 %v1568_v0  ;;  %v280_v61 = vpack.c.bf16 %v36_v56, %v32_v55  ;;  %v282_v62 = vpack.c.bf16 %v38_v58, %v34_v57  ;;  %v37_v2 = vld [vmem:[%s2816_s0 + $0xb0] sm:$0xff]  ;;  %v40_v3 = vld [vmem:[%s2816_s0 + $0xc8] sm:$0xff]  ;;  %v42_v5 = vld [vmem:[%s2816_s0 + $0xd8] sm:$0xff] }
  0x14   :  { %961 = vmatprep.subr.bf16.mxu0 %v1568_v0  ;;  %v44_v4 = vld [vmem:[%s2816_s0 + $0xe8] sm:$0xff]  ;;  %v46_v6 = vld [vmem:[%s2816_s0 + $0xf8] sm:$0xff]  ;;  %v281_v8 = vpack.c.bf16 %v37_v2, %v33_v1  ;;  %v47_v23 = vld [vmem:[%s2816_s0 + $0x100] sm:$0xff] }
  0x15   :  { %v284_v9 = vpack.c.bf16 %v44_v4, %v40_v3  ;;  %v286_v10 = vpack.c.bf16 %v46_v6, %v42_v5  ;;  %v49_v25 = vld [vmem:[%s2816_s0 + $0x110] sm:$0xff]  ;;  %v64_v39 = vld [vmem:[%s2816_s0 + $0x188] sm:$0xff]  ;;  %v66_v41 = vld [vmem:[%s2816_s0 + $0x198] sm:$0xff] }
  0x16   :  { %673 = vmatpush1.bf16.msra.mxu1 %v1545_v11  ;;  %v39_v11 = vld [vmem:[%s2816_s0 + $0xc0] sm:$0xff]  ;;  %v68_v40 = vld [vmem:[%s2816_s0 + $0x1a8] sm:$0xff]  ;;  %v70_v42 = vld [vmem:[%s2816_s0 + $0x1b8] sm:$0xff] }
  0x17   :  { %962 = vmatpush1.bf16.msra.mxu0 %v1546_v12  ;;  %674 = vmatprep.subr.bf16.mxu1 %v1568_v0  ;;  %v43_v12 = vld [vmem:[%s2816_s0 + $0xe0] sm:$0xff]  ;;  %v296_v45 = vpack.c.bf16 %v68_v40, %v64_v39  ;;  %v298_v46 = vpack.c.bf16 %v70_v42, %v66_v41  ;;  %v72_v51 = vld [vmem:[%s2816_s0 + $0x1c8] sm:$0xff]  ;;  %v74_v53 = vld [vmem:[%s2816_s0 + $0x1d8] sm:$0xff] }
  0x18   :  { %963 = vmatprep.subr.bf16.mxu0 %v1568_v0  ;;  %v283_v19 = vpack.c.bf16 %v43_v12, %v39_v11  ;;  %v76_v52 = vld [vmem:[%s2816_s0 + $0x1e8] sm:$0xff]  ;;  %v78_v54 = vld [vmem:[%s2816_s0 + $0x1f8] sm:$0xff] }
  0x19   :  { %v300_v57 = vpack.c.bf16 %v76_v52, %v72_v51  ;;  %v302_v58 = vpack.c.bf16 %v78_v54, %v74_v53  ;;  %v82_v1 = vld [vmem:[%s2816_s0 + $0x218] sm:$0xff]  ;;  %v88_v11 = vld [vmem:[%s2816_s0 + $0x248] sm:$0xff] }
  0x1a   :  { %675 = vmatpush1.bf16.msra.mxu1 %v1547_v13  ;;  %v41_v13 = vld [vmem:[%s2816_s0 + $0xd0] sm:$0xff]  ;;  %v86_v2 = vld [vmem:[%s2816_s0 + $0x238] sm:$0xff]  ;;  %v92_v12 = vld [vmem:[%s2816_s0 + $0x268] sm:$0xff] }
  0x1b   :  { %964 = vmatpush1.bf16.msra.mxu0 %v1548_v14  ;;  %676 = vmatprep.subr.bf16.mxu1 %v1568_v0  ;;  %v45_v14 = vld [vmem:[%s2816_s0 + $0xf0] sm:$0xff]  ;;  %v306_v6 = vpack.c.bf16 %v86_v2, %v82_v1 }
  0x1c   :  { %965 = vmatprep.subr.bf16.mxu0 %v1568_v0  ;;  %v285_v20 = vpack.c.bf16 %v45_v14, %v41_v13  ;;  %v90_v13 = vld [vmem:[%s2816_s0 + $0x258] sm:$0xff] }
  0x1d   :  { %v94_v14 = vld [vmem:[%s2816_s0 + $0x278] sm:$0xff] }
  0x1e   :  { %677 = vmatpush1.bf16.msra.mxu1 %v1549_v15  ;;  %v48_v15 = vld [vmem:[%s2816_s0 + $0x108] sm:$0xff] }
  0x1f   :  { %966 = vmatpush1.bf16.msra.mxu0 %v1550_v16  ;;  %678 = vmatprep.subr.bf16.mxu1 %v1568_v0  ;;  %v52_v16 = vld [vmem:[%s2816_s0 + $0x128] sm:$0xff] }
  0x20   :  { %967 = vmatprep.subr.bf16.mxu0 %v1568_v0  ;;  %v288_v21 = vpack.c.bf16 %v52_v16, %v48_v15 }
  0x22   :  { %679 = vmatpush1.bf16.msra.mxu1 %v1551_v17  ;;  %v50_v17 = vld [vmem:[%s2816_s0 + $0x118] sm:$0xff] }
  0x23   :  { %968 = vmatpush1.bf16.msra.mxu0 %v1552_v18  ;;  %680 = vmatprep.subr.bf16.mxu1 %v1568_v0  ;;  %v54_v18 = vld [vmem:[%s2816_s0 + $0x138] sm:$0xff] }
  0x24   :  { %969 = vmatprep.subr.bf16.mxu0 %v1568_v0  ;;  %v290_v22 = vpack.c.bf16 %v54_v18, %v50_v17  ;;  %v308_v17 = vpack.c.bf16 %v92_v12, %v88_v11  ;;  %v310_v18 = vpack.c.bf16 %v94_v14, %v90_v13 }
  0x26   :  { %681 = vmatpush1.bf16.msra.mxu1 %v1553_v24  ;;  %v51_v24 = vld [vmem:[%s2816_s0 + $0x120] sm:$0xff] }
  0x27   :  { %970 = vmatpush1.bf16.msra.mxu0 %v1554_v26  ;;  %682 = vmatprep.subr.bf16.mxu1 %v1568_v0  ;;  %v53_v26 = vld [vmem:[%s2816_s0 + $0x130] sm:$0xff] }
  0x28   :  { %971 = vmatprep.subr.bf16.mxu0 %v1568_v0 }
  0x2a   :  { %683 = vmatpush1.bf16.msra.mxu1 %v1555_v27  ;;  %v56_v27 = vld [vmem:[%s2816_s0 + $0x148] sm:$0xff] }
  0x2b   :  { %972 = vmatpush1.bf16.msra.mxu0 %v1556_v28  ;;  %684 = vmatprep.subr.bf16.mxu1 %v1568_v0  ;;  %v60_v28 = vld [vmem:[%s2816_s0 + $0x168] sm:$0xff] }
  0x2c   :  { %973 = vmatprep.subr.bf16.mxu0 %v1568_v0 }
  0x2e   :  { %685 = vmatpush1.bf16.msra.mxu1 %v1557_v29  ;;  %v58_v29 = vld [vmem:[%s2816_s0 + $0x158] sm:$0xff] }
  0x2f   :  { %974 = vmatpush1.bf16.msra.mxu0 %v1558_v30  ;;  %686 = vmatprep.subr.bf16.mxu1 %v1568_v0  ;;  %v62_v30 = vld [vmem:[%s2816_s0 + $0x178] sm:$0xff] }
  0x30   :  { %975 = vmatprep.subr.bf16.mxu0 %v1568_v0 }
  0x32   :  { %687 = vmatpush1.bf16.msra.mxu1 %v1559_v31  ;;  %v287_v31 = vpack.c.bf16 %v51_v24, %v47_v23  ;;  %v96_v23 = vld [vmem:[%s2816_s0 + $0x288] sm:$0xff] }
  0x33   :  { %976 = vmatpush1.bf16.msra.mxu0 %v1560_v32  ;;  %688 = vmatprep.subr.bf16.mxu1 %v1568_v0  ;;  %v289_v32 = vpack.c.bf16 %v53_v26, %v49_v25  ;;  %v100_v24 = vld [vmem:[%s2816_s0 + $0x2a8] sm:$0xff]  ;;  %v98_v25 = vld [vmem:[%s2816_s0 + $0x298] sm:$0xff] }
  0x34   :  { %977 = vmatprep.subr.bf16.mxu0 %v1568_v0  ;;  %v102_v26 = vld [vmem:[%s2816_s0 + $0x2b8] sm:$0xff] }
  0x36   :  { %689 = vmatpush1.bf16.msra.mxu1 %v1561_v33  ;;  %v292_v33 = vpack.c.bf16 %v60_v28, %v56_v27 }
  0x37   :  { %978 = vmatpush1.bf16.msra.mxu0 %v1562_v34  ;;  %690 = vmatprep.subr.bf16.mxu1 %v1568_v0  ;;  %v294_v34 = vpack.c.bf16 %v62_v30, %v58_v29  ;;  %v312_v29 = vpack.c.bf16 %v100_v24, %v96_v23  ;;  %v314_v30 = vpack.c.bf16 %v102_v26, %v98_v25 }
  0x38   :  { %979 = vmatprep.subr.bf16.mxu0 %v1568_v0 }
  0x3a   :  { %691 = vmatpush1.bf16.msra.mxu1 %v1563_v35  ;;  %v55_v35 = vld [vmem:[%s2816_s0 + $0x140] sm:$0xff] }
  0x3b   :  { %980 = vmatpush1.bf16.msra.mxu0 %v1564_v36  ;;  %692 = vmatprep.subr.bf16.mxu1 %v1568_v0  ;;  %v59_v36 = vld [vmem:[%s2816_s0 + $0x160] sm:$0xff] }
  0x3c   :  { %981 = vmatprep.subr.bf16.mxu0 %v1568_v0  ;;  %v35_v0 = vld [vmem:[%s2816_s0 + $0xa0] sm:$0xff]  ;;  %v291_v43 = vpack.c.bf16 %v59_v36, %v55_v35  ;;  %v104_v35 = vld [vmem:[%s2816_s0 + $0x2c8] sm:$0xff] }
  0x3d   :  { %v279_v7 = vpack.c.bf16 %v35_v0, %v31_v63  ;;  %v80_v63 = vld [vmem:[%s2816_s0 + $0x208] sm:$0xff] }
  0x3e   :  { %693 = vmatpush1.bf16.msra.mxu1 %v1565_v37  ;;  %v57_v37 = vld [vmem:[%s2816_s0 + $0x150] sm:$0xff]  ;;  %v84_v0 = vld [vmem:[%s2816_s0 + $0x228] sm:$0xff] }
  0x3f   :  { %982 = vmatpush1.bf16.msra.mxu0 %v1566_v38  ;;  %v61_v38 = vld [vmem:[%s2816_s0 + $0x170] sm:$0xff]  ;;  %v304_v5 = vpack.c.bf16 %v84_v0, %v80_v63  ;;  %v108_v36 = vld [vmem:[%s2816_s0 + $0x2e8] sm:$0xff] }
  0x40   :  { %v293_v44 = vpack.c.bf16 %v61_v38, %v57_v37  ;;  %v106_v37 = vld [vmem:[%s2816_s0 + $0x2d8] sm:$0xff]  ;;  %v316_v41 = vpack.c.bf16 %v108_v36, %v104_v35 }
  0x41   :  { %695 = vmatmul.mubr.bf16.vlgmr.msra.gmra.mrb[0].mxu1 %v271_v47  ;;  %v63_v47 = vld [vmem:[%s2816_s0 + $0x180] sm:$0xff]  ;;  %v110_v38 = vld [vmem:[%s2816_s0 + $0x2f8] sm:$0xff] }
  0x42   :  { %984 = vmatmul.mubr.bf16.vlgmr.msra.gmra.mrb[0].mxu0 %v273_v48  ;;  %702 = vmatprep.mubr.bf16.mxu1 %v276_v49  ;;  %v67_v48 = vld [vmem:[%s2816_s0 + $0x1a0] sm:$0xff]  ;;  %v65_v49 = vld [vmem:[%s2816_s0 + $0x190] sm:$0xff]  ;;  %v318_v42 = vpack.c.bf16 %v110_v38, %v106_v37 }
  0x43   :  { %991 = vmatprep.mubr.bf16.mxu0 %v278_v50  ;;  %v69_v50 = vld [vmem:[%s2816_s0 + $0x1b0] sm:$0xff]  ;;  %v295_v55 = vpack.c.bf16 %v67_v48, %v63_v47  ;;  %v112_v47 = vld [vmem:[%s2816_s0 + $0x308] sm:$0xff] }
  0x44   :  { %v297_v56 = vpack.c.bf16 %v69_v50, %v65_v49  ;;  %v116_v48 = vld [vmem:[%s2816_s0 + $0x328] sm:$0xff]  ;;  %v114_v49 = vld [vmem:[%s2816_s0 + $0x318] sm:$0xff] }
  0x45   :  { %v118_v50 = vld [vmem:[%s2816_s0 + $0x338] sm:$0xff]  ;;  %v320_v53 = vpack.c.bf16 %v116_v48, %v112_v47 }
  0x46   :  { %v322_v54 = vpack.c.bf16 %v118_v50, %v114_v49 }
  0x49   :  { %703 = vmatmul.mubr.bf16.gmra.mrb[4].mxu1 %v275_v59  ;;  %v71_v59 = vld [vmem:[%s2816_s0 + $0x1c0] sm:$0xff] }
  0x4a   :  { %992 = vmatmul.mubr.bf16.gmra.mrb[4].mxu0 %v277_v60  ;;  %710 = vmatprep.mubr.bf16.mxu1 %v280_v61  ;;  %v75_v60 = vld [vmem:[%s2816_s0 + $0x1e0] sm:$0xff]  ;;  %v73_v61 = vld [vmem:[%s2816_s0 + $0x1d0] sm:$0xff] }
  0x4b   :  { %999 = vmatprep.mubr.bf16.mxu0 %v282_v62  ;;  %v77_v62 = vld [vmem:[%s2816_s0 + $0x1f0] sm:$0xff]  ;;  %v299_v3 = vpack.c.bf16 %v75_v60, %v71_v59  ;;  %v120_v59 = vld [vmem:[%s2816_s0 + $0x348] sm:$0xff] }
  0x4c   :  { %v301_v4 = vpack.c.bf16 %v77_v62, %v73_v61  ;;  %v124_v60 = vld [vmem:[%s2816_s0 + $0x368] sm:$0xff]  ;;  %v122_v61 = vld [vmem:[%s2816_s0 + $0x358] sm:$0xff] }
  0x4d   :  { %v126_v62 = vld [vmem:[%s2816_s0 + $0x378] sm:$0xff]  ;;  %v324_v1 = vpack.c.bf16 %v124_v60, %v120_v59 }
  0x4e   :  { %v326_v2 = vpack.c.bf16 %v126_v62, %v122_v61 }
  0x51   :  { %711 = vmatmul.mubr.bf16.gmra.mrb[8].mxu1 %v279_v7  ;;  %v79_v7 = vld [vmem:[%s2816_s0 + $0x200] sm:$0xff] }
  0x52   :  { %1000 = vmatmul.mubr.bf16.gmra.mrb[8].mxu0 %v281_v8  ;;  %718 = vmatprep.mubr.bf16.mxu1 %v284_v9  ;;  %v83_v8 = vld [vmem:[%s2816_s0 + $0x220] sm:$0xff]  ;;  %v81_v9 = vld [vmem:[%s2816_s0 + $0x210] sm:$0xff] }
  0x53   :  { %1007 = vmatprep.mubr.bf16.mxu0 %v286_v10  ;;  %v85_v10 = vld [vmem:[%s2816_s0 + $0x230] sm:$0xff]  ;;  %v303_v15 = vpack.c.bf16 %v83_v8, %v79_v7  ;;  %v128_v7 = vld [vmem:[%s2816_s0 + $0x388] sm:$0xff] }
  0x54   :  { %v305_v16 = vpack.c.bf16 %v85_v10, %v81_v9  ;;  %v132_v8 = vld [vmem:[%s2816_s0 + $0x3a8] sm:$0xff]  ;;  %v130_v9 = vld [vmem:[%s2816_s0 + $0x398] sm:$0xff] }
  0x55   :  { %v134_v10 = vld [vmem:[%s2816_s0 + $0x3b8] sm:$0xff]  ;;  %v328_v13 = vpack.c.bf16 %v132_v8, %v128_v7 }
  0x56   :  { %v330_v14 = vpack.c.bf16 %v134_v10, %v130_v9 }
  0x59   :  { %719 = vmatmul.mubr.bf16.gmra.mrb[12].mxu1 %v283_v19  ;;  %v87_v19 = vld [vmem:[%s2816_s0 + $0x240] sm:$0xff] }
  0x5a   :  { %1008 = vmatmul.mubr.bf16.gmra.mrb[12].mxu0 %v285_v20  ;;  %726 = vmatprep.mubr.bf16.mxu1 %v288_v21  ;;  %v91_v20 = vld [vmem:[%s2816_s0 + $0x260] sm:$0xff]  ;;  %v89_v21 = vld [vmem:[%s2816_s0 + $0x250] sm:$0xff] }
  0x5b   :  { %1015 = vmatprep.mubr.bf16.mxu0 %v290_v22  ;;  %v93_v22 = vld [vmem:[%s2816_s0 + $0x270] sm:$0xff]  ;;  %v307_v27 = vpack.c.bf16 %v91_v20, %v87_v19  ;;  %v136_v19 = vld [vmem:[%s2816_s0 + $0x3c8] sm:$0xff] }
  0x5c   :  { %v309_v28 = vpack.c.bf16 %v93_v22, %v89_v21  ;;  %v140_v20 = vld [vmem:[%s2816_s0 + $0x3e8] sm:$0xff]  ;;  %v138_v21 = vld [vmem:[%s2816_s0 + $0x3d8] sm:$0xff] }
  0x5d   :  { %v142_v22 = vld [vmem:[%s2816_s0 + $0x3f8] sm:$0xff]  ;;  %v332_v25 = vpack.c.bf16 %v140_v20, %v136_v19 }
  0x5e   :  { %v334_v26 = vpack.c.bf16 %v142_v22, %v138_v21 }
  0x61   :  { %727 = vmatmul.mubr.bf16.gmra.mrb[16].mxu1 %v287_v31  ;;  %v95_v31 = vld [vmem:[%s2816_s0 + $0x280] sm:$0xff] }
  0x62   :  { %1016 = vmatmul.mubr.bf16.gmra.mrb[16].mxu0 %v289_v32  ;;  %734 = vmatprep.mubr.bf16.mxu1 %v292_v33  ;;  %v99_v32 = vld [vmem:[%s2816_s0 + $0x2a0] sm:$0xff]  ;;  %v97_v33 = vld [vmem:[%s2816_s0 + $0x290] sm:$0xff] }
  0x63   :  { %1023 = vmatprep.mubr.bf16.mxu0 %v294_v34  ;;  %v101_v34 = vld [vmem:[%s2816_s0 + $0x2b0] sm:$0xff]  ;;  %v311_v39 = vpack.c.bf16 %v99_v32, %v95_v31  ;;  %v144_v31 = vld [vmem:[%s2816_s0 + $0x408] sm:$0xff] }
  0x64   :  { %v313_v40 = vpack.c.bf16 %v101_v34, %v97_v33  ;;  %v148_v32 = vld [vmem:[%s2816_s0 + $0x428] sm:$0xff]  ;;  %v146_v33 = vld [vmem:[%s2816_s0 + $0x418] sm:$0xff] }
  0x65   :  { %v150_v34 = vld [vmem:[%s2816_s0 + $0x438] sm:$0xff]  ;;  %v336_v37 = vpack.c.bf16 %v148_v32, %v144_v31 }
  0x66   :  { %v338_v38 = vpack.c.bf16 %v150_v34, %v146_v33 }
  0x69   :  { %735 = vmatmul.mubr.bf16.gmra.mrb[20].mxu1 %v291_v43  ;;  %v103_v43 = vld [vmem:[%s2816_s0 + $0x2c0] sm:$0xff] }
  0x6a   :  { %1024 = vmatmul.mubr.bf16.gmra.mrb[20].mxu0 %v293_v44  ;;  %742 = vmatprep.mubr.bf16.mxu1 %v296_v45  ;;  %v107_v44 = vld [vmem:[%s2816_s0 + $0x2e0] sm:$0xff]  ;;  %v105_v45 = vld [vmem:[%s2816_s0 + $0x2d0] sm:$0xff] }
  0x6b   :  { %1031 = vmatprep.mubr.bf16.mxu0 %v298_v46  ;;  %v109_v46 = vld [vmem:[%s2816_s0 + $0x2f0] sm:$0xff]  ;;  %v315_v51 = vpack.c.bf16 %v107_v44, %v103_v43  ;;  %v152_v43 = vld [vmem:[%s2816_s0 + $0x448] sm:$0xff] }
  0x6c   :  { %v317_v52 = vpack.c.bf16 %v109_v46, %v105_v45  ;;  %v156_v44 = vld [vmem:[%s2816_s0 + $0x468] sm:$0xff]  ;;  %v154_v45 = vld [vmem:[%s2816_s0 + $0x458] sm:$0xff] }
  0x6d   :  { %v158_v46 = vld [vmem:[%s2816_s0 + $0x478] sm:$0xff]  ;;  %v340_v49 = vpack.c.bf16 %v156_v44, %v152_v43 }
  0x6e   :  { %v342_v50 = vpack.c.bf16 %v158_v46, %v154_v45 }
  0x71   :  { %743 = vmatmul.mubr.bf16.gmra.mrb[24].mxu1 %v295_v55  ;;  %v111_v55 = vld [vmem:[%s2816_s0 + $0x300] sm:$0xff] }
  0x72   :  { %1032 = vmatmul.mubr.bf16.gmra.mrb[24].mxu0 %v297_v56  ;;  %750 = vmatprep.mubr.bf16.mxu1 %v300_v57  ;;  %v115_v56 = vld [vmem:[%s2816_s0 + $0x320] sm:$0xff]  ;;  %v113_v57 = vld [vmem:[%s2816_s0 + $0x310] sm:$0xff] }
  0x73   :  { %1039 = vmatprep.mubr.bf16.mxu0 %v302_v58  ;;  %v117_v58 = vld [vmem:[%s2816_s0 + $0x330] sm:$0xff]  ;;  %v319_v63 = vpack.c.bf16 %v115_v56, %v111_v55  ;;  %v160_v55 = vld [vmem:[%s2816_s0 + $0x488] sm:$0xff] }
  0x74   :  { %v321_v0 = vpack.c.bf16 %v117_v58, %v113_v57  ;;  %v164_v56 = vld [vmem:[%s2816_s0 + $0x4a8] sm:$0xff]  ;;  %v162_v57 = vld [vmem:[%s2816_s0 + $0x498] sm:$0xff] }
  0x75   :  { %v166_v58 = vld [vmem:[%s2816_s0 + $0x4b8] sm:$0xff]  ;;  %v344_v61 = vpack.c.bf16 %v164_v56, %v160_v55 }
  0x76   :  { %v346_v62 = vpack.c.bf16 %v166_v58, %v162_v57 }
  0x79   :  { %751 = vmatmul.mubr.bf16.gmra.mrb[28].mxu1 %v299_v3  ;;  %v119_v3 = vld [vmem:[%s2816_s0 + $0x340] sm:$0xff] }
  0x7a   :  { %1040 = vmatmul.mubr.bf16.gmra.mrb[28].mxu0 %v301_v4  ;;  %758 = vmatprep.mubr.bf16.mxu1 %v304_v5  ;;  %v123_v4 = vld [vmem:[%s2816_s0 + $0x360] sm:$0xff]  ;;  %v121_v5 = vld [vmem:[%s2816_s0 + $0x350] sm:$0xff] }
  0x7b   :  { %1047 = vmatprep.mubr.bf16.mxu0 %v306_v6  ;;  %v125_v6 = vld [vmem:[%s2816_s0 + $0x370] sm:$0xff]  ;;  %v323_v11 = vpack.c.bf16 %v123_v4, %v119_v3  ;;  %v168_v3 = vld [vmem:[%s2816_s0 + $0x4c8] sm:$0xff] }
  0x7c   :  { %v325_v12 = vpack.c.bf16 %v125_v6, %v121_v5  ;;  %v172_v4 = vld [vmem:[%s2816_s0 + $0x4e8] sm:$0xff]  ;;  %v170_v5 = vld [vmem:[%s2816_s0 + $0x4d8] sm:$0xff] }
  0x7d   :  { %v174_v6 = vld [vmem:[%s2816_s0 + $0x4f8] sm:$0xff]  ;;  %v348_v9 = vpack.c.bf16 %v172_v4, %v168_v3 }
  0x7e   :  { %v350_v10 = vpack.c.bf16 %v174_v6, %v170_v5 }
  0x81   :  { %759 = vmatmul.mubr.bf16.gmra.mrb[32].mxu1 %v303_v15  ;;  %v127_v15 = vld [vmem:[%s2816_s0 + $0x380] sm:$0xff] }
  0x82   :  { %1048 = vmatmul.mubr.bf16.gmra.mrb[32].mxu0 %v305_v16  ;;  %766 = vmatprep.mubr.bf16.mxu1 %v308_v17  ;;  %v131_v16 = vld [vmem:[%s2816_s0 + $0x3a0] sm:$0xff]  ;;  %v129_v17 = vld [vmem:[%s2816_s0 + $0x390] sm:$0xff] }
  0x83   :  { %1055 = vmatprep.mubr.bf16.mxu0 %v310_v18  ;;  %v133_v18 = vld [vmem:[%s2816_s0 + $0x3b0] sm:$0xff]  ;;  %v327_v23 = vpack.c.bf16 %v131_v16, %v127_v15  ;;  %v176_v15 = vld [vmem:[%s2816_s0 + $0x508] sm:$0xff] }
  0x84   :  { %v329_v24 = vpack.c.bf16 %v133_v18, %v129_v17  ;;  %v180_v16 = vld [vmem:[%s2816_s0 + $0x528] sm:$0xff]  ;;  %v178_v17 = vld [vmem:[%s2816_s0 + $0x518] sm:$0xff] }
  0x85   :  { %v182_v18 = vld [vmem:[%s2816_s0 + $0x538] sm:$0xff]  ;;  %v352_v21 = vpack.c.bf16 %v180_v16, %v176_v15 }
  0x86   :  { %v354_v22 = vpack.c.bf16 %v182_v18, %v178_v17 }
  0x89   :  { %767 = vmatmul.mubr.bf16.gmra.mrb[36].mxu1 %v307_v27  ;;  %v135_v27 = vld [vmem:[%s2816_s0 + $0x3c0] sm:$0xff] }
  0x8a   :  { %1056 = vmatmul.mubr.bf16.gmra.mrb[36].mxu0 %v309_v28  ;;  %774 = vmatprep.mubr.bf16.mxu1 %v312_v29  ;;  %v139_v28 = vld [vmem:[%s2816_s0 + $0x3e0] sm:$0xff]  ;;  %v137_v29 = vld [vmem:[%s2816_s0 + $0x3d0] sm:$0xff] }
  0x8b   :  { %1063 = vmatprep.mubr.bf16.mxu0 %v314_v30  ;;  %v141_v30 = vld [vmem:[%s2816_s0 + $0x3f0] sm:$0xff]  ;;  %v331_v35 = vpack.c.bf16 %v139_v28, %v135_v27  ;;  %v184_v27 = vld [vmem:[%s2816_s0 + $0x548] sm:$0xff] }
  0x8c   :  { %v333_v36 = vpack.c.bf16 %v141_v30, %v137_v29  ;;  %v188_v28 = vld [vmem:[%s2816_s0 + $0x568] sm:$0xff]  ;;  %v186_v29 = vld [vmem:[%s2816_s0 + $0x558] sm:$0xff] }
  0x8d   :  { %v190_v30 = vld [vmem:[%s2816_s0 + $0x578] sm:$0xff]  ;;  %v356_v33 = vpack.c.bf16 %v188_v28, %v184_v27 }
  0x8e   :  { %v358_v34 = vpack.c.bf16 %v190_v30, %v186_v29 }
  0x91   :  { %775 = vmatmul.mubr.bf16.gmra.mrb[40].mxu1 %v311_v39  ;;  %v143_v39 = vld [vmem:[%s2816_s0 + $0x400] sm:$0xff] }
  0x92   :  { %1064 = vmatmul.mubr.bf16.gmra.mrb[40].mxu0 %v313_v40  ;;  %782 = vmatprep.mubr.bf16.mxu1 %v316_v41  ;;  %v147_v40 = vld [vmem:[%s2816_s0 + $0x420] sm:$0xff]  ;;  %v145_v41 = vld [vmem:[%s2816_s0 + $0x410] sm:$0xff] }
  0x93   :  { %1071 = vmatprep.mubr.bf16.mxu0 %v318_v42  ;;  %v149_v42 = vld [vmem:[%s2816_s0 + $0x430] sm:$0xff]  ;;  %v335_v47 = vpack.c.bf16 %v147_v40, %v143_v39  ;;  %v192_v39 = vld [vmem:[%s2816_s0 + $0x588] sm:$0xff] }
  0x94   :  { %v337_v48 = vpack.c.bf16 %v149_v42, %v145_v41  ;;  %v196_v40 = vld [vmem:[%s2816_s0 + $0x5a8] sm:$0xff]  ;;  %v194_v41 = vld [vmem:[%s2816_s0 + $0x598] sm:$0xff] }
  0x95   :  { %v198_v42 = vld [vmem:[%s2816_s0 + $0x5b8] sm:$0xff]  ;;  %v360_v45 = vpack.c.bf16 %v196_v40, %v192_v39 }
  0x96   :  { %v362_v46 = vpack.c.bf16 %v198_v42, %v194_v41 }
  0x99   :  { %783 = vmatmul.mubr.bf16.gmra.mrb[44].mxu1 %v315_v51  ;;  %v151_v51 = vld [vmem:[%s2816_s0 + $0x440] sm:$0xff] }
  0x9a   :  { %1072 = vmatmul.mubr.bf16.gmra.mrb[44].mxu0 %v317_v52  ;;  %790 = vmatprep.mubr.bf16.mxu1 %v320_v53  ;;  %v155_v52 = vld [vmem:[%s2816_s0 + $0x460] sm:$0xff]  ;;  %v153_v53 = vld [vmem:[%s2816_s0 + $0x450] sm:$0xff] }
  0x9b   :  { %1079 = vmatprep.mubr.bf16.mxu0 %v322_v54  ;;  %v157_v54 = vld [vmem:[%s2816_s0 + $0x470] sm:$0xff]  ;;  %v339_v59 = vpack.c.bf16 %v155_v52, %v151_v51  ;;  %v200_v51 = vld [vmem:[%s2816_s0 + $0x5c8] sm:$0xff] }
  0x9c   :  { %v341_v60 = vpack.c.bf16 %v157_v54, %v153_v53  ;;  %v204_v52 = vld [vmem:[%s2816_s0 + $0x5e8] sm:$0xff]  ;;  %v202_v53 = vld [vmem:[%s2816_s0 + $0x5d8] sm:$0xff] }
  0x9d   :  { %v206_v54 = vld [vmem:[%s2816_s0 + $0x5f8] sm:$0xff]  ;;  %v364_v57 = vpack.c.bf16 %v204_v52, %v200_v51 }
  0x9e   :  { %v366_v58 = vpack.c.bf16 %v206_v54, %v202_v53  ;;  %v242_v51 = vld [vmem:[%s2816_s0 + $0x718] sm:$0xff] }
  0x9f   :  { %v246_v52 = vld [vmem:[%s2816_s0 + $0x738] sm:$0xff] }
  0xa1   :  { %791 = vmatmul.mubr.bf16.gmra.mrb[48].mxu1 %v319_v63  ;;  %v159_v63 = vld [vmem:[%s2816_s0 + $0x480] sm:$0xff] }
  0xa2   :  { %1080 = vmatmul.mubr.bf16.gmra.mrb[48].mxu0 %v321_v0  ;;  %798 = vmatprep.mubr.bf16.mxu1 %v324_v1  ;;  %v163_v0 = vld [vmem:[%s2816_s0 + $0x4a0] sm:$0xff]  ;;  %v161_v1 = vld [vmem:[%s2816_s0 + $0x490] sm:$0xff] }
  0xa3   :  { %1087 = vmatprep.mubr.bf16.mxu0 %v326_v2  ;;  %v165_v2 = vld [vmem:[%s2816_s0 + $0x4b0] sm:$0xff]  ;;  %v343_v7 = vpack.c.bf16 %v163_v0, %v159_v63  ;;  %v208_v63 = vld [vmem:[%s2816_s0 + $0x608] sm:$0xff] }
  0xa4   :  { %v345_v8 = vpack.c.bf16 %v165_v2, %v161_v1  ;;  %v212_v0 = vld [vmem:[%s2816_s0 + $0x628] sm:$0xff]  ;;  %v210_v1 = vld [vmem:[%s2816_s0 + $0x618] sm:$0xff] }
  0xa5   :  { %v214_v2 = vld [vmem:[%s2816_s0 + $0x638] sm:$0xff]  ;;  %v368_v5 = vpack.c.bf16 %v212_v0, %v208_v63 }
  0xa6   :  { %v370_v6 = vpack.c.bf16 %v214_v2, %v210_v1  ;;  %v386_v1 = vpack.c.bf16 %v246_v52, %v242_v51 }
  0xa9   :  { %799 = vmatmul.mubr.bf16.gmra.mrb[52].mxu1 %v323_v11  ;;  %v167_v11 = vld [vmem:[%s2816_s0 + $0x4c0] sm:$0xff] }
  0xaa   :  { %1088 = vmatmul.mubr.bf16.gmra.mrb[52].mxu0 %v325_v12  ;;  %806 = vmatprep.mubr.bf16.mxu1 %v328_v13  ;;  %v171_v12 = vld [vmem:[%s2816_s0 + $0x4e0] sm:$0xff]  ;;  %v169_v13 = vld [vmem:[%s2816_s0 + $0x4d0] sm:$0xff] }
  0xab   :  { %1095 = vmatprep.mubr.bf16.mxu0 %v330_v14  ;;  %v173_v14 = vld [vmem:[%s2816_s0 + $0x4f0] sm:$0xff]  ;;  %v347_v19 = vpack.c.bf16 %v171_v12, %v167_v11  ;;  %v216_v11 = vld [vmem:[%s2816_s0 + $0x648] sm:$0xff] }
  0xac   :  { %v349_v20 = vpack.c.bf16 %v173_v14, %v169_v13  ;;  %v220_v12 = vld [vmem:[%s2816_s0 + $0x668] sm:$0xff]  ;;  %v218_v13 = vld [vmem:[%s2816_s0 + $0x658] sm:$0xff] }
  0xad   :  { %v222_v14 = vld [vmem:[%s2816_s0 + $0x678] sm:$0xff]  ;;  %v372_v17 = vpack.c.bf16 %v220_v12, %v216_v11  ;;  %v252_v11 = vld [vmem:[%s2816_s0 + $0x768] sm:$0xff] }
  0xae   :  { %v374_v18 = vpack.c.bf16 %v222_v14, %v218_v13  ;;  %v250_v13 = vld [vmem:[%s2816_s0 + $0x758] sm:$0xff] }
  0xaf   :  { %v254_v14 = vld [vmem:[%s2816_s0 + $0x778] sm:$0xff] }
  0xb1   :  { %807 = vmatmul.mubr.bf16.gmra.mrb[56].mxu1 %v327_v23  ;;  %v175_v23 = vld [vmem:[%s2816_s0 + $0x500] sm:$0xff] }
  0xb2   :  { %1096 = vmatmul.mubr.bf16.gmra.mrb[56].mxu0 %v329_v24  ;;  %814 = vmatprep.mubr.bf16.mxu1 %v332_v25  ;;  %v179_v24 = vld [vmem:[%s2816_s0 + $0x520] sm:$0xff]  ;;  %v177_v25 = vld [vmem:[%s2816_s0 + $0x510] sm:$0xff] }
  0xb3   :  { %1103 = vmatprep.mubr.bf16.mxu0 %v334_v26  ;;  %v181_v26 = vld [vmem:[%s2816_s0 + $0x530] sm:$0xff]  ;;  %v351_v31 = vpack.c.bf16 %v179_v24, %v175_v23  ;;  %v224_v23 = vld [vmem:[%s2816_s0 + $0x688] sm:$0xff] }
  0xb4   :  { %v353_v32 = vpack.c.bf16 %v181_v26, %v177_v25  ;;  %v228_v24 = vld [vmem:[%s2816_s0 + $0x6a8] sm:$0xff]  ;;  %v226_v25 = vld [vmem:[%s2816_s0 + $0x698] sm:$0xff] }
  0xb5   :  { %v230_v26 = vld [vmem:[%s2816_s0 + $0x6b8] sm:$0xff]  ;;  %v376_v29 = vpack.c.bf16 %v228_v24, %v224_v23 }
  0xb6   :  { %v378_v30 = vpack.c.bf16 %v230_v26, %v226_v25 }
  0xb9   :  { %815 = vmatmul.mubr.bf16.gmra.mrb[60].mxu1 %v331_v35  ;;  %v183_v35 = vld [vmem:[%s2816_s0 + $0x540] sm:$0xff] }
  0xba   :  { %1104 = vmatmul.mubr.bf16.gmra.mrb[60].mxu0 %v333_v36  ;;  %822 = vmatprep.mubr.bf16.mxu1 %v336_v37  ;;  %v187_v36 = vld [vmem:[%s2816_s0 + $0x560] sm:$0xff]  ;;  %v185_v37 = vld [vmem:[%s2816_s0 + $0x550] sm:$0xff] }
  0xbb   :  { %1111 = vmatprep.mubr.bf16.mxu0 %v338_v38  ;;  %v189_v38 = vld [vmem:[%s2816_s0 + $0x570] sm:$0xff]  ;;  %v355_v43 = vpack.c.bf16 %v187_v36, %v183_v35  ;;  %v232_v35 = vld [vmem:[%s2816_s0 + $0x6c8] sm:$0xff] }
  0xbc   :  { %v357_v44 = vpack.c.bf16 %v189_v38, %v185_v37  ;;  %v236_v36 = vld [vmem:[%s2816_s0 + $0x6e8] sm:$0xff]  ;;  %v234_v37 = vld [vmem:[%s2816_s0 + $0x6d8] sm:$0xff] }
  0xbd   :  { %v238_v38 = vld [vmem:[%s2816_s0 + $0x6f8] sm:$0xff]  ;;  %v380_v41 = vpack.c.bf16 %v236_v36, %v232_v35  ;;  %v253_v35 = vld [vmem:[%s2816_s0 + $0x770] sm:$0xff]  ;;  %v256_v36 = vld [vmem:[%s2816_s0 + $0x788] sm:$0xff] }
  0xbe   :  { %v382_v42 = vpack.c.bf16 %v238_v38, %v234_v37  ;;  %v260_v37 = vld [vmem:[%s2816_s0 + $0x7a8] sm:$0xff] }
  0xc1   :  { %823 = vmatmul.mubr.bf16.gmra.mrb[64].mxu1 %v335_v47  ;;  %v191_v47 = vld [vmem:[%s2816_s0 + $0x580] sm:$0xff] }
  0xc2   :  { %1112 = vmatmul.mubr.bf16.gmra.mrb[64].mxu0 %v337_v48  ;;  %830 = vmatprep.mubr.bf16.mxu1 %v340_v49  ;;  %v195_v48 = vld [vmem:[%s2816_s0 + $0x5a0] sm:$0xff]  ;;  %v193_v49 = vld [vmem:[%s2816_s0 + $0x590] sm:$0xff] }
  0xc3   :  { %1119 = vmatprep.mubr.bf16.mxu0 %v342_v50  ;;  %v197_v50 = vld [vmem:[%s2816_s0 + $0x5b0] sm:$0xff]  ;;  %v359_v55 = vpack.c.bf16 %v195_v48, %v191_v47  ;;  %v240_v48 = vld [vmem:[%s2816_s0 + $0x708] sm:$0xff] }
  0xc4   :  { %v361_v56 = vpack.c.bf16 %v197_v50, %v193_v49  ;;  %v237_v47 = vld [vmem:[%s2816_s0 + $0x6f0] sm:$0xff]  ;;  %v244_v49 = vld [vmem:[%s2816_s0 + $0x728] sm:$0xff] }
  0xc9   :  { %831 = vmatmul.mubr.bf16.gmra.mrb[68].mxu1 %v339_v59  ;;  %v199_v59 = vld [vmem:[%s2816_s0 + $0x5c0] sm:$0xff] }
  0xca   :  { %1120 = vmatmul.mubr.bf16.gmra.mrb[68].mxu0 %v341_v60  ;;  %838 = vmatprep.mubr.bf16.mxu1 %v344_v61  ;;  %v203_v60 = vld [vmem:[%s2816_s0 + $0x5e0] sm:$0xff]  ;;  %v201_v61 = vld [vmem:[%s2816_s0 + $0x5d0] sm:$0xff] }
  0xcb   :  { %1127 = vmatprep.mubr.bf16.mxu0 %v346_v62  ;;  %v205_v62 = vld [vmem:[%s2816_s0 + $0x5f0] sm:$0xff]  ;;  %v363_v3 = vpack.c.bf16 %v203_v60, %v199_v59  ;;  %v384_v60 = vpack.c.bf16 %v244_v49, %v240_v48  ;;  %v392_v49 = vpack.c.bf16 %v260_v37, %v256_v36 }
  0xcc   :  { %v365_v4 = vpack.c.bf16 %v205_v62, %v201_v61 }
  0xd1   :  { %839 = vmatmul.mubr.bf16.gmra.mrb[72].mxu1 %v343_v7  ;;  %v207_v7 = vld [vmem:[%s2816_s0 + $0x600] sm:$0xff] }
  0xd2   :  { %1128 = vmatmul.mubr.bf16.gmra.mrb[72].mxu0 %v345_v8  ;;  %846 = vmatprep.mubr.bf16.mxu1 %v348_v9  ;;  %v211_v8 = vld [vmem:[%s2816_s0 + $0x620] sm:$0xff]  ;;  %v209_v9 = vld [vmem:[%s2816_s0 + $0x610] sm:$0xff] }
  0xd3   :  { %1135 = vmatprep.mubr.bf16.mxu0 %v350_v10  ;;  %v213_v10 = vld [vmem:[%s2816_s0 + $0x630] sm:$0xff]  ;;  %v367_v15 = vpack.c.bf16 %v211_v8, %v207_v7 }
  0xd4   :  { %v369_v16 = vpack.c.bf16 %v213_v10, %v209_v9  ;;  %v241_v7 = vld [vmem:[%s2816_s0 + $0x710] sm:$0xff]  ;;  %v248_v10 = vld [vmem:[%s2816_s0 + $0x748] sm:$0xff] }
  0xd5   :  { %v245_v9 = vld [vmem:[%s2816_s0 + $0x730] sm:$0xff] }
  0xd9   :  { %847 = vmatmul.mubr.bf16.gmra.mrb[76].mxu1 %v347_v19  ;;  %v215_v19 = vld [vmem:[%s2816_s0 + $0x640] sm:$0xff] }
  0xda   :  { %1136 = vmatmul.mubr.bf16.gmra.mrb[76].mxu0 %v349_v20  ;;  %854 = vmatprep.mubr.bf16.mxu1 %v352_v21  ;;  %v219_v20 = vld [vmem:[%s2816_s0 + $0x660] sm:$0xff]  ;;  %v217_v21 = vld [vmem:[%s2816_s0 + $0x650] sm:$0xff] }
  0xdb   :  { %1143 = vmatprep.mubr.bf16.mxu0 %v354_v22  ;;  %v221_v22 = vld [vmem:[%s2816_s0 + $0x670] sm:$0xff]  ;;  %v371_v27 = vpack.c.bf16 %v219_v20, %v215_v19 }
  0xdc   :  { %v373_v28 = vpack.c.bf16 %v221_v22, %v217_v21  ;;  %v385_v21 = vpack.c.bf16 %v245_v9, %v241_v7  ;;  %v388_v22 = vpack.c.bf16 %v252_v11, %v248_v10 }
  0xe1   :  { %855 = vmatmul.mubr.bf16.gmra.mrb[80].mxu1 %v351_v31  ;;  %v223_v31 = vld [vmem:[%s2816_s0 + $0x680] sm:$0xff] }
  0xe2   :  { %1144 = vmatmul.mubr.bf16.gmra.mrb[80].mxu0 %v353_v32  ;;  %862 = vmatprep.mubr.bf16.mxu1 %v356_v33  ;;  %v227_v32 = vld [vmem:[%s2816_s0 + $0x6a0] sm:$0xff]  ;;  %v225_v33 = vld [vmem:[%s2816_s0 + $0x690] sm:$0xff] }
  0xe3   :  { %1151 = vmatprep.mubr.bf16.mxu0 %v358_v34  ;;  %v229_v34 = vld [vmem:[%s2816_s0 + $0x6b0] sm:$0xff]  ;;  %v375_v39 = vpack.c.bf16 %v227_v32, %v223_v31  ;;  %v247_v31 = vld [vmem:[%s2816_s0 + $0x740] sm:$0xff] }
  0xe4   :  { %v377_v40 = vpack.c.bf16 %v229_v34, %v225_v33  ;;  %v251_v32 = vld [vmem:[%s2816_s0 + $0x760] sm:$0xff]  ;;  %v249_v33 = vld [vmem:[%s2816_s0 + $0x750] sm:$0xff] }
  0xe5   :  { %v389_v48 = vpack.c.bf16 %v253_v35, %v249_v33 }
  0xe9   :  { %863 = vmatmul.mubr.bf16.gmra.mrb[84].mxu1 %v355_v43  ;;  %v2380_v43 = vld [vmem:[%s2817_s2] ss:$0 sm:$0xff] }
  0xea   :  { %1152 = vmatmul.mubr.bf16.gmra.mrb[84].mxu0 %v357_v44  ;;  %870 = vmatprep.mubr.bf16.mxu1 %v360_v45  ;;  %v231_v44 = vld [vmem:[%s2816_s0 + $0x6c0] sm:$0xff] }
  0xeb   :  { %1159 = vmatprep.mubr.bf16.mxu0 %v362_v46  ;;  %v235_v45 = vld [vmem:[%s2816_s0 + $0x6e0] sm:$0xff]  ;;  %v233_v46 = vld [vmem:[%s2816_s0 + $0x6d0] sm:$0xff] }
  0xec   :  { %v381_v59 = vpack.c.bf16 %v237_v47, %v233_v46 }
  0xf1   :  { %871 = vmatmul.mubr.bf16.gmra.mrb[88].mxu1 %v359_v55 }
  0xf2   :  { %1160 = vmatmul.mubr.bf16.gmra.mrb[88].mxu0 %v361_v56  ;;  %878 = vmatprep.mubr.bf16.mxu1 %v364_v57  ;;  %v379_v56 = vpack.c.bf16 %v235_v45, %v231_v44  ;;  %v387_v45 = vpack.c.bf16 %v251_v32, %v247_v31 }
  0xf3   :  { %1167 = vmatprep.mubr.bf16.mxu0 %v366_v58 }
  0xf9   :  { %879 = vmatmul.mubr.bf16.gmra.mrb[92].mxu1 %v363_v3 }
  0xfa   :  { %1168 = vmatmul.mubr.bf16.gmra.mrb[92].mxu0 %v365_v4  ;;  %886 = vmatprep.mubr.bf16.mxu1 %v368_v5  ;;  %v239_v5 = vld [vmem:[%s2816_s0 + $0x700] sm:$0xff] }
  0xfb   :  { %1175 = vmatprep.mubr.bf16.mxu0 %v370_v6  ;;  %v243_v6 = vld [vmem:[%s2816_s0 + $0x720] sm:$0xff] }
 0x101   :  { %887 = vmatmul.mubr.bf16.gmra.mrb[96].mxu1 %v367_v15 }
 0x102   :  { %1176 = vmatmul.mubr.bf16.gmra.mrb[96].mxu0 %v369_v16  ;;  %894 = vmatprep.mubr.bf16.mxu1 %v372_v17 }
 0x103   :  { %1183 = vmatprep.mubr.bf16.mxu0 %v374_v18  ;;  %v383_v18 = vpack.c.bf16 %v243_v6, %v239_v5 }
 0x109   :  { %895 = vmatmul.mubr.bf16.gmra.mrb[100].mxu1 %v371_v27  ;;  %v390_v27 = vpack.c.bf16 %v254_v14, %v250_v13 }
 0x10a   :  { %1184 = vmatmul.mubr.bf16.gmra.mrb[100].mxu0 %v373_v28  ;;  %902 = vmatprep.mubr.bf16.mxu1 %v376_v29 }
 0x10b   :  { %1191 = vmatprep.mubr.bf16.mxu0 %v378_v30 }
 0x111   :  { %903 = vmatmul.mubr.bf16.gmra.mrb[104].mxu1 %v375_v39  ;;  %v258_v39 = vld [vmem:[%s2816_s0 + $0x798] sm:$0xff] }
 0x112   :  { %1192 = vmatmul.mubr.bf16.gmra.mrb[104].mxu0 %v377_v40  ;;  %910 = vmatprep.mubr.bf16.mxu1 %v380_v41  ;;  %v262_v40 = vld [vmem:[%s2816_s0 + $0x7b8] sm:$0xff] }
 0x113   :  { %1199 = vmatprep.mubr.bf16.mxu0 %v382_v42 }
 0x114   :  { %v696_v50 = vpop.f32.mrb[0].mxu1 }
 0x115   :  { %v697_v53 = vadd.f32 %v2380_v43, %v696_v50  ;;  %v985_v54 = vpop.f32.mrb[0].mxu0  ;;  %v698_v55 = vpop.f32.mrb[1].mxu1 }
 0x116   :  { %v987_v57 = vpop.f32.mrb[1].mxu0  ;;  %v699_v58 = vpop.f32.mrb[2].mxu1 }
 0x117   :  { %v986_v61 = vadd.f32 %v985_v54, %v697_v53  ;;  %v700_v62 = vadd.f32 %v2380_v43, %v699_v58  ;;  %v988_v63 = vpop.f32.mrb[2].mxu0  ;;  %v701_v0 = vpop.f32.mrb[3].mxu1  ;;  %v394_v54 = vpack.c.bf16 %v262_v40, %v258_v39  ;;  %v255_v58 = vld [vmem:[%s2816_s0 + $0x780] sm:$0xff] }
 0x118   :  { %v990_v2 = vpop.f32.mrb[3].mxu0  ;;  %v268_v0 = vld [vmem:[%s2816_s0 + $0x7e8] sm:$0xff] }
 0x119   :  { %v1240_v3 = vmax.f32 %v986_v61, 0.0  ;;  %v989_v4 = vadd.f32 %v988_v63, %v700_v62  ;;  %911 = vmatmul.mubr.bf16.gmra.mrb[108].mxu1 %v379_v56  ;;  %v261_v62 = vld [vmem:[%s2816_s0 + $0x7b0] sm:$0xff]  ;;  %v264_v63 = vld [vmem:[%s2816_s0 + $0x7c8] sm:$0xff]  ;;  %v266_v2 = vld [vmem:[%s2816_s0 + $0x7d8] sm:$0xff] }
 0x11a   :  { %1200 = vmatmul.mubr.bf16.gmra.mrb[108].mxu0 %v381_v59  ;;  %918 = vmatprep.mubr.bf16.mxu1 %v384_v60  ;;  %v259_v59 = vld [vmem:[%s2816_s0 + $0x7a0] sm:$0xff]  ;;  %v257_v60 = vld [vmem:[%s2816_s0 + $0x790] sm:$0xff]  ;;  %v396_v11 = vpack.c.bf16 %v268_v0, %v264_v63 }
 0x11b   :  { %1305 = vst.msk [vmem:[%s2818_s3] sm:$0xff] %vm1304_vm0, %v1240_v3  ;;  %v1241_v8 = vmax.f32 %v989_v4, 0.0  ;;  %1207 = vmatprep.mubr.bf16.mxu0 %v386_v1  ;;  %v270_v3 = vld [vmem:[%s2816_s0 + $0x7f8] sm:$0xff]  ;;  %v391_v7 = vpack.c.bf16 %v259_v59, %v255_v58  ;;  %v393_v10 = vpack.c.bf16 %v261_v62, %v257_v60 }
 0x11c   :  { %v704_v12 = vpop.f32.mrb[4].mxu1 }
 0x11d   :  { %1306 = vst.msk [vmem:[%s2818_s3 + $0x8] sm:$0xff] %vm1304_vm0, %v1241_v8  ;;  %v705_v15 = vadd.f32 %v2380_v43, %v704_v12  ;;  %v993_v16 = vpop.f32.mrb[4].mxu0  ;;  %v706_v17 = vpop.f32.mrb[5].mxu1 }
 0x11e   :  { %v995_v19 = vpop.f32.mrb[5].mxu0  ;;  %v707_v20 = vpop.f32.mrb[6].mxu1 }
 0x11f   :  { %v994_v23 = vadd.f32 %v993_v16, %v705_v15  ;;  %v708_v24 = vadd.f32 %v2380_v43, %v707_v20  ;;  %v996_v25 = vpop.f32.mrb[6].mxu0  ;;  %v709_v26 = vpop.f32.mrb[7].mxu1  ;;  %v398_v16 = vpack.c.bf16 %v270_v3, %v266_v2  ;;  %v263_v20 = vld [vmem:[%s2816_s0 + $0x7c0] sm:$0xff] }
 0x120   :  { %v998_v28 = vpop.f32.mrb[7].mxu0 }
 0x121   :  { %v1242_v29 = vmax.f32 %v994_v23, 0.0  ;;  %v997_v30 = vadd.f32 %v996_v25, %v708_v24  ;;  %919 = vmatmul.mubr.bf16.gmra.mrb[112].mxu1 %v383_v18  ;;  %v265_v23 = vld [vmem:[%s2816_s0 + $0x7d0] sm:$0xff] }
 0x122   :  { %1208 = vmatmul.mubr.bf16.gmra.mrb[112].mxu0 %v385_v21  ;;  %926 = vmatprep.mubr.bf16.mxu1 %v388_v22  ;;  %v267_v21 = vld [vmem:[%s2816_s0 + $0x7e0] sm:$0xff]  ;;  %v269_v24 = vld [vmem:[%s2816_s0 + $0x7f0] sm:$0xff] }
 0x123   :  { %1307 = vst.msk [vmem:[%s2818_s3 + $0x10] sm:$0xff] %vm1304_vm0, %v1242_v29  ;;  %v1243_v34 = vmax.f32 %v997_v30, 0.0  ;;  %1215 = vmatprep.mubr.bf16.mxu0 %v390_v27  ;;  %v395_v29 = vpack.c.bf16 %v267_v21, %v263_v20  ;;  %v397_v32 = vpack.c.bf16 %v269_v24, %v265_v23 }
 0x124   :  { %v712_v38 = vpop.f32.mrb[8].mxu1 }
 0x125   :  { %1308 = vst.msk [vmem:[%s2818_s3 + $0x18] sm:$0xff] %vm1304_vm0, %v1243_v34  ;;  %v713_v41 = vadd.f32 %v2380_v43, %v712_v38  ;;  %v1001_v42 = vpop.f32.mrb[8].mxu0  ;;  %v714_v44 = vpop.f32.mrb[9].mxu1 }
 0x126   :  { %v1003_v46 = vpop.f32.mrb[9].mxu0  ;;  %v715_v47 = vpop.f32.mrb[10].mxu1 }
 0x127   :  { %v1002_v50 = vadd.f32 %v1001_v42, %v713_v41  ;;  %v716_v51 = vadd.f32 %v2380_v43, %v715_v47  ;;  %v1004_v52 = vpop.f32.mrb[10].mxu0  ;;  %v717_v53 = vpop.f32.mrb[11].mxu1 }
 0x128   :  { %v1006_v55 = vpop.f32.mrb[11].mxu0 }
 0x129   :  { %v1244_v56 = vmax.f32 %v1002_v50, 0.0  ;;  %v1005_v57 = vadd.f32 %v1004_v52, %v716_v51  ;;  %927 = vmatmul.mubr.bf16.gmra.mrb[116].mxu1 %v387_v45 }
 0x12a   :  { %1216 = vmatmul.mubr.bf16.gmra.mrb[116].mxu0 %v389_v48  ;;  %934 = vmatprep.mubr.bf16.mxu1 %v392_v49 }
 0x12b   :  { %1309 = vst.msk [vmem:[%s2818_s3 + $0x20] sm:$0xff] %vm1304_vm0, %v1244_v56  ;;  %v1245_v61 = vmax.f32 %v1005_v57, 0.0  ;;  %1223 = vmatprep.mubr.bf16.mxu0 %v394_v54 }
 0x12c   :  { %v720_v1 = vpop.f32.mrb[12].mxu1 }
 0x12d   :  { %1310 = vst.msk [vmem:[%s2818_s3 + $0x28] sm:$0xff] %vm1304_vm0, %v1245_v61  ;;  %v721_v4 = vadd.f32 %v2380_v43, %v720_v1  ;;  %v1009_v5 = vpop.f32.mrb[12].mxu0  ;;  %v722_v6 = vpop.f32.mrb[13].mxu1 }
 0x12e   :  { %v1011_v8 = vpop.f32.mrb[13].mxu0  ;;  %v723_v9 = vpop.f32.mrb[14].mxu1 }
 0x12f   :  { %v1010_v12 = vadd.f32 %v1009_v5, %v721_v4  ;;  %v724_v13 = vadd.f32 %v2380_v43, %v723_v9  ;;  %v1012_v14 = vpop.f32.mrb[14].mxu0  ;;  %v725_v15 = vpop.f32.mrb[15].mxu1 }
 0x130   :  { %v1014_v17 = vpop.f32.mrb[15].mxu0 }
 0x131   :  { %v1246_v18 = vmax.f32 %v1010_v12, 0.0  ;;  %v1013_v19 = vadd.f32 %v1012_v14, %v724_v13  ;;  %935 = vmatmul.mubr.bf16.gmra.mrb[120].mxu1 %v391_v7 }
 0x132   :  { %1224 = vmatmul.mubr.bf16.gmra.mrb[120].mxu0 %v393_v10  ;;  %942 = vmatprep.mubr.bf16.mxu1 %v396_v11 }
 0x133   :  { %1311 = vst.msk [vmem:[%s2818_s3 + $0x30] sm:$0xff] %vm1304_vm0, %v1246_v18  ;;  %v1247_v22 = vmax.f32 %v1013_v19, 0.0  ;;  %1231 = vmatprep.mubr.bf16.mxu0 %v398_v16 }
 0x134   :  { %v728_v25 = vpop.f32.mrb[16].mxu1 }
 0x135   :  { %1312 = vst.msk [vmem:[%s2818_s3 + $0x38] sm:$0xff] %vm1304_vm0, %v1247_v22  ;;  %v729_v26 = vadd.f32 %v2380_v43, %v728_v25  ;;  %v1017_v27 = vpop.f32.mrb[16].mxu0  ;;  %v730_v28 = vpop.f32.mrb[17].mxu1 }
 0x136   :  { %v1019_v30 = vpop.f32.mrb[17].mxu0  ;;  %v731_v31 = vpop.f32.mrb[18].mxu1 }
 0x137   :  { %v1018_v33 = vadd.f32 %v1017_v27, %v729_v26  ;;  %v732_v34 = vadd.f32 %v2380_v43, %v731_v31  ;;  %v1020_v35 = vpop.f32.mrb[18].mxu0  ;;  %v733_v36 = vpop.f32.mrb[19].mxu1 }
 0x138   :  { %v1022_v37 = vpop.f32.mrb[19].mxu0 }
 0x139   :  { %v1248_v38 = vmax.f32 %v1018_v33, 0.0  ;;  %v1021_v39 = vadd.f32 %v1020_v35, %v732_v34  ;;  %943 = vmatmul.mubr.bf16.gmra.mrb[124].mxu1 %v395_v29 }
 0x13a   :  { %1232 = vmatmul.mubr.bf16.gmra.mrb[124].mxu0 %v397_v32 }
 0x13b   :  { %1313 = vst.msk [vmem:[%s2818_s3 + $0x40] sm:$0xff] %vm1304_vm0, %v1248_v38  ;;  %v1249_v40 = vmax.f32 %v1021_v39, 0.0 }
 0x13c   :  { %v736_v41 = vpop.f32.mrb[20].mxu1 }
 0x13d   :  { %1314 = vst.msk [vmem:[%s2818_s3 + $0x48] sm:$0xff] %vm1304_vm0, %v1249_v40  ;;  %v737_v42 = vadd.f32 %v2380_v43, %v736_v41  ;;  %v1025_v44 = vpop.f32.mrb[20].mxu0  ;;  %v738_v45 = vpop.f32.mrb[21].mxu1 }
 0x13e   :  { %v1027_v46 = vpop.f32.mrb[21].mxu0  ;;  %v739_v47 = vpop.f32.mrb[22].mxu1 }
 0x13f   :  { %v1026_v48 = vadd.f32 %v1025_v44, %v737_v42  ;;  %v740_v49 = vadd.f32 %v2380_v43, %v739_v47  ;;  %v1028_v50 = vpop.f32.mrb[22].mxu0  ;;  %v741_v51 = vpop.f32.mrb[23].mxu1 }
 0x140   :  { %v1030_v52 = vpop.f32.mrb[23].mxu0 }
 0x141   :  { %v1250_v53 = vmax.f32 %v1026_v48, 0.0  ;;  %v1029_v54 = vadd.f32 %v1028_v50, %v740_v49 }
 0x143   :  { %1315 = vst.msk [vmem:[%s2818_s3 + $0x50] sm:$0xff] %vm1304_vm0, %v1250_v53  ;;  %v1251_v55 = vmax.f32 %v1029_v54, 0.0 }
 0x144   :  { %v744_v56 = vpop.f32.mrb[24].mxu1 }
 0x145   :  { %1316 = vst.msk [vmem:[%s2818_s3 + $0x58] sm:$0xff] %vm1304_vm0, %v1251_v55  ;;  %v745_v57 = vadd.f32 %v2380_v43, %v744_v56  ;;  %v1033_v58 = vpop.f32.mrb[24].mxu0  ;;  %v746_v59 = vpop.f32.mrb[25].mxu1 }
 0x146   :  { %v1035_v60 = vpop.f32.mrb[25].mxu0  ;;  %v747_v61 = vpop.f32.mrb[26].mxu1 }
 0x147   :  { %v1034_v62 = vadd.f32 %v1033_v58, %v745_v57  ;;  %v748_v63 = vadd.f32 %v2380_v43, %v747_v61  ;;  %v1036_v0 = vpop.f32.mrb[26].mxu0  ;;  %v749_v1 = vpop.f32.mrb[27].mxu1 }
 0x148   :  { %v1038_v2 = vpop.f32.mrb[27].mxu0 }
 0x149   :  { %v1252_v3 = vmax.f32 %v1034_v62, 0.0  ;;  %v1037_v4 = vadd.f32 %v1036_v0, %v748_v63 }
 0x14b   :  { %1317 = vst.msk [vmem:[%s2818_s3 + $0x60] sm:$0xff] %vm1304_vm0, %v1252_v3  ;;  %v1253_v5 = vmax.f32 %v1037_v4, 0.0 }
 0x14c   :  { %v752_v6 = vpop.f32.mrb[28].mxu1 }
 0x14d   :  { %1318 = vst.msk [vmem:[%s2818_s3 + $0x68] sm:$0xff] %vm1304_vm0, %v1253_v5  ;;  %v753_v7 = vadd.f32 %v2380_v43, %v752_v6  ;;  %v1041_v8 = vpop.f32.mrb[28].mxu0  ;;  %v754_v9 = vpop.f32.mrb[29].mxu1 }
 0x14e   :  { %v1043_v10 = vpop.f32.mrb[29].mxu0  ;;  %v755_v11 = vpop.f32.mrb[30].mxu1 }
 0x14f   :  { %v1042_v12 = vadd.f32 %v1041_v8, %v753_v7  ;;  %v756_v13 = vadd.f32 %v2380_v43, %v755_v11  ;;  %v1044_v14 = vpop.f32.mrb[30].mxu0  ;;  %v757_v15 = vpop.f32.mrb[31].mxu1 }
 0x150   :  { %v1046_v16 = vpop.f32.mrb[31].mxu0 }
 0x151   :  { %v1254_v17 = vmax.f32 %v1042_v12, 0.0  ;;  %v1045_v18 = vadd.f32 %v1044_v14, %v756_v13 }
 0x153   :  { %1319 = vst.msk [vmem:[%s2818_s3 + $0x70] sm:$0xff] %vm1304_vm0, %v1254_v17  ;;  %v1255_v19 = vmax.f32 %v1045_v18, 0.0 }
 0x154   :  { %v760_v20 = vpop.f32.mrb[32].mxu1 }
 0x155   :  { %1320 = vst.msk [vmem:[%s2818_s3 + $0x78] sm:$0xff] %vm1304_vm0, %v1255_v19  ;;  %v761_v21 = vadd.f32 %v2380_v43, %v760_v20  ;;  %v1049_v22 = vpop.f32.mrb[32].mxu0  ;;  %v762_v23 = vpop.f32.mrb[33].mxu1 }
 0x156   :  { %v1051_v24 = vpop.f32.mrb[33].mxu0  ;;  %v763_v25 = vpop.f32.mrb[34].mxu1 }
 0x157   :  { %v1050_v26 = vadd.f32 %v1049_v22, %v761_v21  ;;  %v764_v27 = vadd.f32 %v2380_v43, %v763_v25  ;;  %v1052_v28 = vpop.f32.mrb[34].mxu0  ;;  %v765_v29 = vpop.f32.mrb[35].mxu1 }
 0x158   :  { %v1054_v30 = vpop.f32.mrb[35].mxu0 }
 0x159   :  { %v1256_v31 = vmax.f32 %v1050_v26, 0.0  ;;  %v1053_v32 = vadd.f32 %v1052_v28, %v764_v27 }
 0x15b   :  { %1321 = vst.msk [vmem:[%s2818_s3 + $0x80] sm:$0xff] %vm1304_vm0, %v1256_v31  ;;  %v1257_v33 = vmax.f32 %v1053_v32, 0.0 }
 0x15c   :  { %v768_v34 = vpop.f32.mrb[36].mxu1 }
 0x15d   :  { %1322 = vst.msk [vmem:[%s2818_s3 + $0x88] sm:$0xff] %vm1304_vm0, %v1257_v33  ;;  %v769_v35 = vadd.f32 %v2380_v43, %v768_v34  ;;  %v1057_v36 = vpop.f32.mrb[36].mxu0  ;;  %v770_v37 = vpop.f32.mrb[37].mxu1 }
 0x15e   :  { %v1059_v38 = vpop.f32.mrb[37].mxu0  ;;  %v771_v39 = vpop.f32.mrb[38].mxu1 }
 0x15f   :  { %v1058_v40 = vadd.f32 %v1057_v36, %v769_v35  ;;  %v772_v41 = vadd.f32 %v2380_v43, %v771_v39  ;;  %v1060_v42 = vpop.f32.mrb[38].mxu0  ;;  %v773_v44 = vpop.f32.mrb[39].mxu1 }
 0x160   :  { %v1062_v45 = vpop.f32.mrb[39].mxu0 }
 0x161   :  { %v1258_v46 = vmax.f32 %v1058_v40, 0.0  ;;  %v1061_v47 = vadd.f32 %v1060_v42, %v772_v41 }
 0x163   :  { %1323 = vst.msk [vmem:[%s2818_s3 + $0x90] sm:$0xff] %vm1304_vm0, %v1258_v46  ;;  %v1259_v48 = vmax.f32 %v1061_v47, 0.0 }
 0x164   :  { %v776_v49 = vpop.f32.mrb[40].mxu1 }
 0x165   :  { %1324 = vst.msk [vmem:[%s2818_s3 + $0x98] sm:$0xff] %vm1304_vm0, %v1259_v48  ;;  %v777_v50 = vadd.f32 %v2380_v43, %v776_v49  ;;  %v1065_v51 = vpop.f32.mrb[40].mxu0  ;;  %v778_v52 = vpop.f32.mrb[41].mxu1 }
 0x166   :  { %v1067_v53 = vpop.f32.mrb[41].mxu0  ;;  %v779_v54 = vpop.f32.mrb[42].mxu1 }
 0x167   :  { %v1066_v55 = vadd.f32 %v1065_v51, %v777_v50  ;;  %v780_v56 = vadd.f32 %v2380_v43, %v779_v54  ;;  %v1068_v57 = vpop.f32.mrb[42].mxu0  ;;  %v781_v58 = vpop.f32.mrb[43].mxu1 }
 0x168   :  { %v1070_v59 = vpop.f32.mrb[43].mxu0 }
 0x169   :  { %v1260_v60 = vmax.f32 %v1066_v55, 0.0  ;;  %v1069_v61 = vadd.f32 %v1068_v57, %v780_v56 }
 0x16b   :  { %1325 = vst.msk [vmem:[%s2818_s3 + $0xa0] sm:$0xff] %vm1304_vm0, %v1260_v60  ;;  %v1261_v62 = vmax.f32 %v1069_v61, 0.0 }
 0x16c   :  { %v784_v63 = vpop.f32.mrb[44].mxu1 }
 0x16d   :  { %1326 = vst.msk [vmem:[%s2818_s3 + $0xa8] sm:$0xff] %vm1304_vm0, %v1261_v62  ;;  %v785_v0 = vadd.f32 %v2380_v43, %v784_v63  ;;  %v1073_v1 = vpop.f32.mrb[44].mxu0  ;;  %v786_v2 = vpop.f32.mrb[45].mxu1 }
 0x16e   :  { %v1075_v3 = vpop.f32.mrb[45].mxu0  ;;  %v787_v4 = vpop.f32.mrb[46].mxu1 }
 0x16f   :  { %v1074_v5 = vadd.f32 %v1073_v1, %v785_v0  ;;  %v788_v6 = vadd.f32 %v2380_v43, %v787_v4  ;;  %v1076_v7 = vpop.f32.mrb[46].mxu0  ;;  %v789_v8 = vpop.f32.mrb[47].mxu1 }
 0x170   :  { %v1078_v9 = vpop.f32.mrb[47].mxu0 }
 0x171   :  { %v1262_v10 = vmax.f32 %v1074_v5, 0.0  ;;  %v1077_v11 = vadd.f32 %v1076_v7, %v788_v6 }
 0x173   :  { %1327 = vst.msk [vmem:[%s2818_s3 + $0xb0] sm:$0xff] %vm1304_vm0, %v1262_v10  ;;  %v1263_v12 = vmax.f32 %v1077_v11, 0.0 }
 0x174   :  { %v792_v13 = vpop.f32.mrb[48].mxu1 }
 0x175   :  { %1328 = vst.msk [vmem:[%s2818_s3 + $0xb8] sm:$0xff] %vm1304_vm0, %v1263_v12  ;;  %v793_v14 = vadd.f32 %v2380_v43, %v792_v13  ;;  %v1081_v15 = vpop.f32.mrb[48].mxu0  ;;  %v794_v16 = vpop.f32.mrb[49].mxu1 }
 0x176   :  { %v1083_v17 = vpop.f32.mrb[49].mxu0  ;;  %v795_v18 = vpop.f32.mrb[50].mxu1 }
 0x177   :  { %v1082_v19 = vadd.f32 %v1081_v15, %v793_v14  ;;  %v796_v20 = vadd.f32 %v2380_v43, %v795_v18  ;;  %v1084_v21 = vpop.f32.mrb[50].mxu0  ;;  %v797_v22 = vpop.f32.mrb[51].mxu1 }
 0x178   :  { %v1086_v23 = vpop.f32.mrb[51].mxu0 }
 0x179   :  { %v1264_v24 = vmax.f32 %v1082_v19, 0.0  ;;  %v1085_v25 = vadd.f32 %v1084_v21, %v796_v20 }
 0x17b   :  { %1329 = vst.msk [vmem:[%s2818_s3 + $0xc0] sm:$0xff] %vm1304_vm0, %v1264_v24  ;;  %v1265_v26 = vmax.f32 %v1085_v25, 0.0 }
 0x17c   :  { %v800_v27 = vpop.f32.mrb[52].mxu1 }
 0x17d   :  { %1330 = vst.msk [vmem:[%s2818_s3 + $0xc8] sm:$0xff] %vm1304_vm0, %v1265_v26  ;;  %v801_v28 = vadd.f32 %v2380_v43, %v800_v27  ;;  %v1089_v29 = vpop.f32.mrb[52].mxu0  ;;  %v802_v30 = vpop.f32.mrb[53].mxu1 }
 0x17e   :  { %v1091_v31 = vpop.f32.mrb[53].mxu0  ;;  %v803_v32 = vpop.f32.mrb[54].mxu1 }
 0x17f   :  { %v1090_v33 = vadd.f32 %v1089_v29, %v801_v28  ;;  %v804_v34 = vadd.f32 %v2380_v43, %v803_v32  ;;  %v1092_v35 = vpop.f32.mrb[54].mxu0  ;;  %v805_v36 = vpop.f32.mrb[55].mxu1 }
 0x180   :  { %v1094_v37 = vpop.f32.mrb[55].mxu0 }
 0x181   :  { %v1266_v38 = vmax.f32 %v1090_v33, 0.0  ;;  %v1093_v39 = vadd.f32 %v1092_v35, %v804_v34 }
 0x183   :  { %1331 = vst.msk [vmem:[%s2818_s3 + $0xd0] sm:$0xff] %vm1304_vm0, %v1266_v38  ;;  %v1267_v40 = vmax.f32 %v1093_v39, 0.0 }
 0x184   :  { %v808_v41 = vpop.f32.mrb[56].mxu1 }
 0x185   :  { %1332 = vst.msk [vmem:[%s2818_s3 + $0xd8] sm:$0xff] %vm1304_vm0, %v1267_v40  ;;  %v809_v42 = vadd.f32 %v2380_v43, %v808_v41  ;;  %v1097_v44 = vpop.f32.mrb[56].mxu0  ;;  %v810_v45 = vpop.f32.mrb[57].mxu1 }
 0x186   :  { %v1099_v46 = vpop.f32.mrb[57].mxu0  ;;  %v811_v47 = vpop.f32.mrb[58].mxu1 }
 0x187   :  { %v1098_v48 = vadd.f32 %v1097_v44, %v809_v42  ;;  %v812_v49 = vadd.f32 %v2380_v43, %v811_v47  ;;  %v1100_v50 = vpop.f32.mrb[58].mxu0  ;;  %v813_v51 = vpop.f32.mrb[59].mxu1 }
 0x188   :  { %v1102_v52 = vpop.f32.mrb[59].mxu0 }
 0x189   :  { %v1268_v53 = vmax.f32 %v1098_v48, 0.0  ;;  %v1101_v54 = vadd.f32 %v1100_v50, %v812_v49 }
 0x18b   :  { %1333 = vst.msk [vmem:[%s2818_s3 + $0xe0] sm:$0xff] %vm1304_vm0, %v1268_v53  ;;  %v1269_v55 = vmax.f32 %v1101_v54, 0.0 }
 0x18c   :  { %v816_v56 = vpop.f32.mrb[60].mxu1 }
 0x18d   :  { %1334 = vst.msk [vmem:[%s2818_s3 + $0xe8] sm:$0xff] %vm1304_vm0, %v1269_v55  ;;  %v817_v57 = vadd.f32 %v2380_v43, %v816_v56  ;;  %v1105_v58 = vpop.f32.mrb[60].mxu0  ;;  %v818_v59 = vpop.f32.mrb[61].mxu1 }
 0x18e   :  { %v1107_v60 = vpop.f32.mrb[61].mxu0  ;;  %v819_v61 = vpop.f32.mrb[62].mxu1 }
 0x18f   :  { %v1106_v62 = vadd.f32 %v1105_v58, %v817_v57  ;;  %v820_v63 = vadd.f32 %v2380_v43, %v819_v61  ;;  %v1108_v0 = vpop.f32.mrb[62].mxu0  ;;  %v821_v1 = vpop.f32.mrb[63].mxu1 }
 0x190   :  { %v1110_v2 = vpop.f32.mrb[63].mxu0 }
 0x191   :  { %v1270_v3 = vmax.f32 %v1106_v62, 0.0  ;;  %v1109_v4 = vadd.f32 %v1108_v0, %v820_v63 }
 0x193   :  { %1335 = vst.msk [vmem:[%s2818_s3 + $0xf0] sm:$0xff] %vm1304_vm0, %v1270_v3  ;;  %v1271_v5 = vmax.f32 %v1109_v4, 0.0 }
 0x194   :  { %v824_v6 = vpop.f32.mrb[64].mxu1 }
 0x195   :  { %1336 = vst.msk [vmem:[%s2818_s3 + $0xf8] sm:$0xff] %vm1304_vm0, %v1271_v5  ;;  %v825_v7 = vadd.f32 %v2380_v43, %v824_v6  ;;  %v1113_v8 = vpop.f32.mrb[64].mxu0  ;;  %v826_v9 = vpop.f32.mrb[65].mxu1 }
 0x196   :  { %v1115_v10 = vpop.f32.mrb[65].mxu0  ;;  %v827_v11 = vpop.f32.mrb[66].mxu1 }
 0x197   :  { %v1114_v12 = vadd.f32 %v1113_v8, %v825_v7  ;;  %v828_v13 = vadd.f32 %v2380_v43, %v827_v11  ;;  %v1116_v14 = vpop.f32.mrb[66].mxu0  ;;  %v829_v15 = vpop.f32.mrb[67].mxu1 }
 0x198   :  { %v1118_v16 = vpop.f32.mrb[67].mxu0 }
 0x199   :  { %v1272_v17 = vmax.f32 %v1114_v12, 0.0  ;;  %v1117_v18 = vadd.f32 %v1116_v14, %v828_v13 }
 0x19b   :  { %1337 = vst.msk [vmem:[%s2818_s3 + $0x100] sm:$0xff] %vm1304_vm0, %v1272_v17  ;;  %v1273_v19 = vmax.f32 %v1117_v18, 0.0 }
 0x19c   :  { %v832_v20 = vpop.f32.mrb[68].mxu1 }
 0x19d   :  { %1338 = vst.msk [vmem:[%s2818_s3 + $0x108] sm:$0xff] %vm1304_vm0, %v1273_v19  ;;  %v833_v21 = vadd.f32 %v2380_v43, %v832_v20  ;;  %v1121_v22 = vpop.f32.mrb[68].mxu0  ;;  %v834_v23 = vpop.f32.mrb[69].mxu1 }
 0x19e   :  { %v1123_v24 = vpop.f32.mrb[69].mxu0  ;;  %v835_v25 = vpop.f32.mrb[70].mxu1 }
 0x19f   :  { %v1122_v26 = vadd.f32 %v1121_v22, %v833_v21  ;;  %v836_v27 = vadd.f32 %v2380_v43, %v835_v25  ;;  %v1124_v28 = vpop.f32.mrb[70].mxu0  ;;  %v837_v29 = vpop.f32.mrb[71].mxu1 }
 0x1a0   :  { %v1126_v30 = vpop.f32.mrb[71].mxu0 }
 0x1a1   :  { %v1274_v31 = vmax.f32 %v1122_v26, 0.0  ;;  %v1125_v32 = vadd.f32 %v1124_v28, %v836_v27 }
 0x1a3   :  { %1339 = vst.msk [vmem:[%s2818_s3 + $0x110] sm:$0xff] %vm1304_vm0, %v1274_v31  ;;  %v1275_v33 = vmax.f32 %v1125_v32, 0.0 }
 0x1a4   :  { %v840_v34 = vpop.f32.mrb[72].mxu1 }
 0x1a5   :  { %1340 = vst.msk [vmem:[%s2818_s3 + $0x118] sm:$0xff] %vm1304_vm0, %v1275_v33  ;;  %v841_v35 = vadd.f32 %v2380_v43, %v840_v34  ;;  %v1129_v36 = vpop.f32.mrb[72].mxu0  ;;  %v842_v37 = vpop.f32.mrb[73].mxu1 }
 0x1a6   :  { %v1131_v38 = vpop.f32.mrb[73].mxu0  ;;  %v843_v39 = vpop.f32.mrb[74].mxu1 }
 0x1a7   :  { %v1130_v40 = vadd.f32 %v1129_v36, %v841_v35  ;;  %v844_v41 = vadd.f32 %v2380_v43, %v843_v39  ;;  %v1132_v42 = vpop.f32.mrb[74].mxu0  ;;  %v845_v44 = vpop.f32.mrb[75].mxu1 }
 0x1a8   :  { %v1134_v45 = vpop.f32.mrb[75].mxu0 }
 0x1a9   :  { %v1276_v46 = vmax.f32 %v1130_v40, 0.0  ;;  %v1133_v47 = vadd.f32 %v1132_v42, %v844_v41 }
 0x1ab   :  { %1341 = vst.msk [vmem:[%s2818_s3 + $0x120] sm:$0xff] %vm1304_vm0, %v1276_v46  ;;  %v1277_v48 = vmax.f32 %v1133_v47, 0.0 }
 0x1ac   :  { %v848_v49 = vpop.f32.mrb[76].mxu1 }
 0x1ad   :  { %1342 = vst.msk [vmem:[%s2818_s3 + $0x128] sm:$0xff] %vm1304_vm0, %v1277_v48  ;;  %v849_v50 = vadd.f32 %v2380_v43, %v848_v49  ;;  %v1137_v51 = vpop.f32.mrb[76].mxu0  ;;  %v850_v52 = vpop.f32.mrb[77].mxu1 }
 0x1ae   :  { %v1139_v53 = vpop.f32.mrb[77].mxu0  ;;  %v851_v54 = vpop.f32.mrb[78].mxu1 }
 0x1af   :  { %v1138_v55 = vadd.f32 %v1137_v51, %v849_v50  ;;  %v852_v56 = vadd.f32 %v2380_v43, %v851_v54  ;;  %v1140_v57 = vpop.f32.mrb[78].mxu0  ;;  %v853_v58 = vpop.f32.mrb[79].mxu1 }
 0x1b0   :  { %v1142_v59 = vpop.f32.mrb[79].mxu0 }
 0x1b1   :  { %v1278_v60 = vmax.f32 %v1138_v55, 0.0  ;;  %v1141_v61 = vadd.f32 %v1140_v57, %v852_v56 }
 0x1b3   :  { %1343 = vst.msk [vmem:[%s2818_s3 + $0x130] sm:$0xff] %vm1304_vm0, %v1278_v60  ;;  %v1279_v62 = vmax.f32 %v1141_v61, 0.0 }
 0x1b4   :  { %v856_v63 = vpop.f32.mrb[80].mxu1 }
 0x1b5   :  { %1344 = vst.msk [vmem:[%s2818_s3 + $0x138] sm:$0xff] %vm1304_vm0, %v1279_v62  ;;  %v857_v0 = vadd.f32 %v2380_v43, %v856_v63  ;;  %v1145_v1 = vpop.f32.mrb[80].mxu0  ;;  %v858_v2 = vpop.f32.mrb[81].mxu1 }
 0x1b6   :  { %v1147_v3 = vpop.f32.mrb[81].mxu0  ;;  %v859_v4 = vpop.f32.mrb[82].mxu1 }
 0x1b7   :  { %v1146_v5 = vadd.f32 %v1145_v1, %v857_v0  ;;  %v860_v6 = vadd.f32 %v2380_v43, %v859_v4  ;;  %v1148_v7 = vpop.f32.mrb[82].mxu0  ;;  %v861_v8 = vpop.f32.mrb[83].mxu1 }
 0x1b8   :  { %v1150_v9 = vpop.f32.mrb[83].mxu0 }
 0x1b9   :  { %v1280_v10 = vmax.f32 %v1146_v5, 0.0  ;;  %v1149_v11 = vadd.f32 %v1148_v7, %v860_v6 }
 0x1bb   :  { %1345 = vst.msk [vmem:[%s2818_s3 + $0x140] sm:$0xff] %vm1304_vm0, %v1280_v10  ;;  %v1281_v12 = vmax.f32 %v1149_v11, 0.0 }
 0x1bc   :  { %v864_v13 = vpop.f32.mrb[84].mxu1 }
 0x1bd   :  { %1346 = vst.msk [vmem:[%s2818_s3 + $0x148] sm:$0xff] %vm1304_vm0, %v1281_v12  ;;  %v865_v14 = vadd.f32 %v2380_v43, %v864_v13  ;;  %v1153_v15 = vpop.f32.mrb[84].mxu0  ;;  %v866_v16 = vpop.f32.mrb[85].mxu1 }
 0x1be   :  { %v1155_v17 = vpop.f32.mrb[85].mxu0  ;;  %v867_v18 = vpop.f32.mrb[86].mxu1 }
 0x1bf   :  { %v1154_v19 = vadd.f32 %v1153_v15, %v865_v14  ;;  %v868_v20 = vadd.f32 %v2380_v43, %v867_v18  ;;  %v1156_v21 = vpop.f32.mrb[86].mxu0  ;;  %v869_v22 = vpop.f32.mrb[87].mxu1 }
 0x1c0   :  { %v1158_v23 = vpop.f32.mrb[87].mxu0 }
 0x1c1   :  { %v1282_v24 = vmax.f32 %v1154_v19, 0.0  ;;  %v1157_v25 = vadd.f32 %v1156_v21, %v868_v20 }
 0x1c3   :  { %1347 = vst.msk [vmem:[%s2818_s3 + $0x150] sm:$0xff] %vm1304_vm0, %v1282_v24  ;;  %v1283_v26 = vmax.f32 %v1157_v25, 0.0 }
 0x1c4   :  { %v872_v27 = vpop.f32.mrb[88].mxu1 }
 0x1c5   :  { %1348 = vst.msk [vmem:[%s2818_s3 + $0x158] sm:$0xff] %vm1304_vm0, %v1283_v26  ;;  %v873_v28 = vadd.f32 %v2380_v43, %v872_v27  ;;  %v1161_v29 = vpop.f32.mrb[88].mxu0  ;;  %v874_v30 = vpop.f32.mrb[89].mxu1 }
 0x1c6   :  { %v1163_v31 = vpop.f32.mrb[89].mxu0  ;;  %v875_v32 = vpop.f32.mrb[90].mxu1 }
 0x1c7   :  { %v1162_v33 = vadd.f32 %v1161_v29, %v873_v28  ;;  %v876_v34 = vadd.f32 %v2380_v43, %v875_v32  ;;  %v1164_v35 = vpop.f32.mrb[90].mxu0  ;;  %v877_v36 = vpop.f32.mrb[91].mxu1 }
 0x1c8   :  { %v1166_v37 = vpop.f32.mrb[91].mxu0 }
 0x1c9   :  { %v1284_v38 = vmax.f32 %v1162_v33, 0.0  ;;  %v1165_v39 = vadd.f32 %v1164_v35, %v876_v34 }
 0x1cb   :  { %1349 = vst.msk [vmem:[%s2818_s3 + $0x160] sm:$0xff] %vm1304_vm0, %v1284_v38  ;;  %v1285_v40 = vmax.f32 %v1165_v39, 0.0 }
 0x1cc   :  { %v880_v41 = vpop.f32.mrb[92].mxu1 }
 0x1cd   :  { %1350 = vst.msk [vmem:[%s2818_s3 + $0x168] sm:$0xff] %vm1304_vm0, %v1285_v40  ;;  %v881_v42 = vadd.f32 %v2380_v43, %v880_v41  ;;  %v1169_v44 = vpop.f32.mrb[92].mxu0  ;;  %v882_v45 = vpop.f32.mrb[93].mxu1  ;;  %v2764_v41 = vld [vmem:[%s2817_s2] ss:$0 sm:$0xff] }
 0x1ce   :  { %v1171_v46 = vpop.f32.mrb[93].mxu0  ;;  %v883_v47 = vpop.f32.mrb[94].mxu1 }
 0x1cf   :  { %v1170_v48 = vadd.f32 %v1169_v44, %v881_v42  ;;  %v884_v49 = vadd.f32 %v2380_v43, %v883_v47  ;;  %v1172_v50 = vpop.f32.mrb[94].mxu0  ;;  %v885_v51 = vpop.f32.mrb[95].mxu1 }
 0x1d0   :  { %v1174_v52 = vpop.f32.mrb[95].mxu0 }
 0x1d1   :  { %v1286_v53 = vmax.f32 %v1170_v48, 0.0  ;;  %v1173_v54 = vadd.f32 %v1172_v50, %v884_v49 }
 0x1d3   :  { %1351 = vst.msk [vmem:[%s2818_s3 + $0x170] sm:$0xff] %vm1304_vm0, %v1286_v53  ;;  %v1287_v55 = vmax.f32 %v1173_v54, 0.0 }
 0x1d4   :  { %v888_v56 = vpop.f32.mrb[96].mxu1 }
 0x1d5   :  { %1352 = vst.msk [vmem:[%s2818_s3 + $0x178] sm:$0xff] %vm1304_vm0, %v1287_v55  ;;  %v889_v57 = vadd.f32 %v2380_v43, %v888_v56  ;;  %v1177_v58 = vpop.f32.mrb[96].mxu0  ;;  %v890_v59 = vpop.f32.mrb[97].mxu1 }
 0x1d6   :  { %v1179_v60 = vpop.f32.mrb[97].mxu0  ;;  %v891_v61 = vpop.f32.mrb[98].mxu1 }
 0x1d7   :  { %v1178_v62 = vadd.f32 %v1177_v58, %v889_v57  ;;  %v892_v63 = vadd.f32 %v2380_v43, %v891_v61  ;;  %v1180_v0 = vpop.f32.mrb[98].mxu0  ;;  %v893_v1 = vpop.f32.mrb[99].mxu1 }
 0x1d8   :  { %v1182_v2 = vpop.f32.mrb[99].mxu0 }
 0x1d9   :  { %v1288_v3 = vmax.f32 %v1178_v62, 0.0  ;;  %v1181_v4 = vadd.f32 %v1180_v0, %v892_v63 }
 0x1db   :  { %1353 = vst.msk [vmem:[%s2818_s3 + $0x180] sm:$0xff] %vm1304_vm0, %v1288_v3  ;;  %v1289_v5 = vmax.f32 %v1181_v4, 0.0 }
 0x1dc   :  { %v896_v6 = vpop.f32.mrb[100].mxu1 }
 0x1dd   :  { %1354 = vst.msk [vmem:[%s2818_s3 + $0x188] sm:$0xff] %vm1304_vm0, %v1289_v5  ;;  %v897_v7 = vadd.f32 %v2380_v43, %v896_v6  ;;  %v1185_v8 = vpop.f32.mrb[100].mxu0  ;;  %v898_v9 = vpop.f32.mrb[101].mxu1 }
 0x1de   :  { %v1187_v10 = vpop.f32.mrb[101].mxu0  ;;  %v899_v11 = vpop.f32.mrb[102].mxu1 }
 0x1df   :  { %v1186_v12 = vadd.f32 %v1185_v8, %v897_v7  ;;  %v900_v13 = vadd.f32 %v2380_v43, %v899_v11  ;;  %v1188_v14 = vpop.f32.mrb[102].mxu0  ;;  %v901_v15 = vpop.f32.mrb[103].mxu1 }
 0x1e0   :  { %v1190_v16 = vpop.f32.mrb[103].mxu0 }
 0x1e1   :  { %v1290_v17 = vmax.f32 %v1186_v12, 0.0  ;;  %v1189_v18 = vadd.f32 %v1188_v14, %v900_v13 }
 0x1e3   :  { %1355 = vst.msk [vmem:[%s2818_s3 + $0x190] sm:$0xff] %vm1304_vm0, %v1290_v17  ;;  %v1291_v19 = vmax.f32 %v1189_v18, 0.0 }
 0x1e4   :  { %v904_v20 = vpop.f32.mrb[104].mxu1 }
 0x1e5   :  { %1356 = vst.msk [vmem:[%s2818_s3 + $0x198] sm:$0xff] %vm1304_vm0, %v1291_v19  ;;  %v905_v21 = vadd.f32 %v2380_v43, %v904_v20  ;;  %v1193_v22 = vpop.f32.mrb[104].mxu0  ;;  %v906_v23 = vpop.f32.mrb[105].mxu1 }
 0x1e6   :  { %v1195_v24 = vpop.f32.mrb[105].mxu0  ;;  %v907_v25 = vpop.f32.mrb[106].mxu1 }
 0x1e7   :  { %v1194_v26 = vadd.f32 %v1193_v22, %v905_v21  ;;  %v908_v27 = vadd.f32 %v2380_v43, %v907_v25  ;;  %v1196_v28 = vpop.f32.mrb[106].mxu0  ;;  %v909_v29 = vpop.f32.mrb[107].mxu1 }
 0x1e8   :  { %v1198_v30 = vpop.f32.mrb[107].mxu0 }
 0x1e9   :  { %v1292_v31 = vmax.f32 %v1194_v26, 0.0  ;;  %v1197_v32 = vadd.f32 %v1196_v28, %v908_v27 }
 0x1eb   :  { %1357 = vst.msk [vmem:[%s2818_s3 + $0x1a0] sm:$0xff] %vm1304_vm0, %v1292_v31  ;;  %v1293_v33 = vmax.f32 %v1197_v32, 0.0 }
 0x1ec   :  { %v912_v34 = vpop.f32.mrb[108].mxu1 }
 0x1ed   :  { %1358 = vst.msk [vmem:[%s2818_s3 + $0x1a8] sm:$0xff] %vm1304_vm0, %v1293_v33  ;;  %v913_v35 = vadd.f32 %v2380_v43, %v912_v34  ;;  %v1201_v36 = vpop.f32.mrb[108].mxu0  ;;  %v914_v37 = vpop.f32.mrb[109].mxu1 }
 0x1ee   :  { %v1203_v38 = vpop.f32.mrb[109].mxu0  ;;  %v915_v39 = vpop.f32.mrb[110].mxu1 }
 0x1ef   :  { %v1202_v40 = vadd.f32 %v1201_v36, %v913_v35  ;;  %v916_v42 = vadd.f32 %v2764_v41, %v915_v39  ;;  %v1204_v44 = vpop.f32.mrb[110].mxu0  ;;  %v917_v45 = vpop.f32.mrb[111].mxu1 }
 0x1f0   :  { %v1206_v46 = vpop.f32.mrb[111].mxu0 }
 0x1f1   :  { %v1294_v47 = vmax.f32 %v1202_v40, 0.0  ;;  %v1205_v48 = vadd.f32 %v1204_v44, %v916_v42 }
 0x1f3   :  { %1359 = vst.msk [vmem:[%s2818_s3 + $0x1b0] sm:$0xff] %vm1304_vm0, %v1294_v47  ;;  %v1295_v43 = vmax.f32 %v1205_v48, 0.0 }
 0x1f4   :  { %v920_v49 = vpop.f32.mrb[112].mxu1 }
 0x1f5   :  { %1360 = vst.msk [vmem:[%s2818_s3 + $0x1b8] sm:$0xff] %vm1304_vm0, %v1295_v43  ;;  %v921_v50 = vadd.f32 %v2764_v41, %v920_v49  ;;  %v1209_v51 = vpop.f32.mrb[112].mxu0  ;;  %v922_v52 = vpop.f32.mrb[113].mxu1 }
 0x1f6   :  { %v1211_v53 = vpop.f32.mrb[113].mxu0  ;;  %v923_v54 = vpop.f32.mrb[114].mxu1 }
 0x1f7   :  { %v1210_v55 = vadd.f32 %v1209_v51, %v921_v50  ;;  %v924_v56 = vadd.f32 %v2764_v41, %v923_v54  ;;  %v1212_v57 = vpop.f32.mrb[114].mxu0  ;;  %v925_v58 = vpop.f32.mrb[115].mxu1 }
 0x1f8   :  { %v1214_v59 = vpop.f32.mrb[115].mxu0 }
 0x1f9   :  { %v1296_v60 = vmax.f32 %v1210_v55, 0.0  ;;  %v1213_v61 = vadd.f32 %v1212_v57, %v924_v56 }
 0x1fb   :  { %1361 = vst.msk [vmem:[%s2818_s3 + $0x1c0] sm:$0xff] %vm1304_vm0, %v1296_v60  ;;  %v1297_v62 = vmax.f32 %v1213_v61, 0.0 }
 0x1fc   :  { %v928_v63 = vpop.f32.mrb[116].mxu1 }
 0x1fd   :  { %1362 = vst.msk [vmem:[%s2818_s3 + $0x1c8] sm:$0xff] %vm1304_vm0, %v1297_v62  ;;  %v929_v0 = vadd.f32 %v2764_v41, %v928_v63  ;;  %v1217_v1 = vpop.f32.mrb[116].mxu0  ;;  %v930_v2 = vpop.f32.mrb[117].mxu1 }
 0x1fe   :  { %v1219_v3 = vpop.f32.mrb[117].mxu0  ;;  %v931_v4 = vpop.f32.mrb[118].mxu1 }
 0x1ff   :  { %v1218_v5 = vadd.f32 %v1217_v1, %v929_v0  ;;  %v932_v6 = vadd.f32 %v2764_v41, %v931_v4  ;;  %v1220_v7 = vpop.f32.mrb[118].mxu0  ;;  %v933_v8 = vpop.f32.mrb[119].mxu1 }
 0x200   :  { %v1222_v9 = vpop.f32.mrb[119].mxu0 }
 0x201   :  { %v1298_v10 = vmax.f32 %v1218_v5, 0.0  ;;  %v1221_v11 = vadd.f32 %v1220_v7, %v932_v6 }
 0x203   :  { %1363 = vst.msk [vmem:[%s2818_s3 + $0x1d0] sm:$0xff] %vm1304_vm0, %v1298_v10  ;;  %v1299_v12 = vmax.f32 %v1221_v11, 0.0 }
 0x204   :  { %v936_v13 = vpop.f32.mrb[120].mxu1 }
 0x205   :  { %1364 = vst.msk [vmem:[%s2818_s3 + $0x1d8] sm:$0xff] %vm1304_vm0, %v1299_v12  ;;  %v937_v14 = vadd.f32 %v2764_v41, %v936_v13  ;;  %v1225_v15 = vpop.f32.mrb[120].mxu0  ;;  %v938_v16 = vpop.f32.mrb[121].mxu1 }
 0x206   :  { %v1227_v17 = vpop.f32.mrb[121].mxu0  ;;  %v939_v18 = vpop.f32.mrb[122].mxu1 }
 0x207   :  { %v1226_v19 = vadd.f32 %v1225_v15, %v937_v14  ;;  %v940_v20 = vadd.f32 %v2764_v41, %v939_v18  ;;  %v1228_v21 = vpop.f32.mrb[122].mxu0  ;;  %v941_v22 = vpop.f32.mrb[123].mxu1 }
 0x208   :  { %v1230_v23 = vpop.f32.mrb[123].mxu0 }
 0x209   :  { %v1300_v24 = vmax.f32 %v1226_v19, 0.0  ;;  %v1229_v25 = vadd.f32 %v1228_v21, %v940_v20 }
 0x20b   :  { %1365 = vst.msk [vmem:[%s2818_s3 + $0x1e0] sm:$0xff] %vm1304_vm0, %v1300_v24  ;;  %v1301_v26 = vmax.f32 %v1229_v25, 0.0 }
 0x20c   :  { %v944_v27 = vpop.f32.mrb[124].mxu1 }
 0x20d   :  { %1366 = vst.msk [vmem:[%s2818_s3 + $0x1e8] sm:$0xff] %vm1304_vm0, %v1301_v26  ;;  %v945_v28 = vadd.f32 %v2764_v41, %v944_v27  ;;  %v1233_v29 = vpop.f32.mrb[124].mxu0  ;;  %v946_v30 = vpop.f32.mrb[125].mxu1 }
 0x20e   :  { %v1235_v31 = vpop.f32.mrb[125].mxu0  ;;  %v947_v32 = vpop.f32.mrb[126].mxu1 }
 0x20f   :  { %v1234_v33 = vadd.f32 %v1233_v29, %v945_v28  ;;  %v948_v34 = vadd.f32 %v2764_v41, %v947_v32  ;;  %v1236_v35 = vpop.f32.mrb[126].mxu0  ;;  %v949_v36 = vpop.f32.mrb[127].mxu1 }
 0x210   :  { %v1238_v37 = vpop.f32.mrb[127].mxu0 }
 0x211   :  { %v1302_v38 = vmax.f32 %v1234_v33, 0.0  ;;  %v1237_v39 = vadd.f32 %v1236_v35, %v948_v34 }
 0x213   :  { %1367 = vst.msk [vmem:[%s2818_s3 + $0x1f0] sm:$0xff] %vm1304_vm0, %v1302_v38  ;;  %v1303_v40 = vmax.f32 %v1237_v39, 0.0 }
 0x215   :  { %1368 = vst.msk [vmem:[%s2818_s3 + $0x1f8] sm:$0xff] %vm1304_vm0, %v1303_v40 }

// kernel: forward.8
= control target key start
LH: loop header
LB: loop body
LE: loop exit
PB: predicated region body
PF: predicated region fallthrough
CT: control target
= control target key end

     0   :  { %vm584_vm0 = vcmask 523264   ;;  %s1191_s1 = inlined_call_operand.vmem [shape: bf16[512,64], index: 1, kind: input, shape index: {}]   ;;  %s1192_s0 = inlined_call_operand.vmem [shape: f32[128,512], index: 0, kind: input, shape index: {}]   ;;  %s1193_s2 = inlined_call_operand.vmem [shape: f32[1,64], index: 2, kind: input, shape index: {}]   ;;  %s1194_s3 = inlined_call_operand.vmem [shape: f32[128,64], index: 3, kind: output, shape index: {}]  }
   0x1   :  { %v766_v0 = vld [vmem:[%s1191_s1 + $0x40] sm:$0xff]   ;;  %v770_v4 = vld [vmem:[%s1191_s1 + $0x48] sm:$0xff]   ;;  %v774_v8 = vld [vmem:[%s1191_s1 + $0x50] sm:$0xff]  }
   0x2   :  { %v767_v1 = vld [vmem:[%s1191_s1 + $0xc0] sm:$0xff]   ;;  %638 = vmatprep.subr.bf16.mxu0 %v766_v0  ;;  %v771_v5 = vld [vmem:[%s1191_s1 + $0xc8] sm:$0xff]   ;;  %v775_v9 = vld [vmem:[%s1191_s1 + $0xd0] sm:$0xff]  }
   0x3   :  { %v768_v2 = vld [vmem:[%s1191_s1] sm:$0xff]   ;;  %702 = vmatprep.subr.bf16.mxu1 %v767_v1  ;;  %v772_v6 = vld [vmem:[%s1191_s1 + $0x8] sm:$0xff]   ;;  %v776_v10 = vld [vmem:[%s1191_s1 + $0x10] sm:$0xff]  }
   0x4   :  { %v769_v3 = vld [vmem:[%s1191_s1 + $0x80] sm:$0xff]   ;;  %639 = vmatpush3.bf16.msra.mxu0 %v768_v2  ;;  %v773_v7 = vld [vmem:[%s1191_s1 + $0x88] sm:$0xff]   ;;  %v777_v11 = vld [vmem:[%s1191_s1 + $0x90] sm:$0xff]  }
   0x5   :  { %703 = vmatpush3.bf16.msra.mxu1 %v769_v3  ;;  %640 = vmatprep.subr.bf16.mxu0 %v770_v4  ;;  %v778_v12 = vld [vmem:[%s1191_s1 + $0x58] sm:$0xff]   ;;  %v782_v16 = vld [vmem:[%s1191_s1 + $0x60] sm:$0xff]   ;;  %v786_v20 = vld [vmem:[%s1191_s1 + $0x68] sm:$0xff]  }
   0x6   :  { %704 = vmatprep.subr.bf16.mxu1 %v771_v5  ;;  %v779_v13 = vld [vmem:[%s1191_s1 + $0xd8] sm:$0xff]   ;;  %v783_v17 = vld [vmem:[%s1191_s1 + $0xe0] sm:$0xff]   ;;  %v787_v21 = vld [vmem:[%s1191_s1 + $0xe8] sm:$0xff]  }
   0x7   :  { %v780_v14 = vld [vmem:[%s1191_s1 + $0x18] sm:$0xff]   ;;  %v784_v18 = vld [vmem:[%s1191_s1 + $0x20] sm:$0xff]   ;;  %v788_v22 = vld [vmem:[%s1191_s1 + $0x28] sm:$0xff]  }
   0x8   :  { %641 = vmatpush3.bf16.msra.mxu0 %v772_v6  ;;  %v781_v15 = vld [vmem:[%s1191_s1 + $0x98] sm:$0xff]   ;;  %v785_v19 = vld [vmem:[%s1191_s1 + $0xa0] sm:$0xff]   ;;  %v789_v23 = vld [vmem:[%s1191_s1 + $0xa8] sm:$0xff]  }
   0x9   :  { %705 = vmatpush3.bf16.msra.mxu1 %v773_v7  ;;  %642 = vmatprep.subr.bf16.mxu0 %v774_v8  ;;  %v790_v24 = vld [vmem:[%s1191_s1 + $0x70] sm:$0xff]   ;;  %v794_v28 = vld [vmem:[%s1191_s1 + $0x78] sm:$0xff]   ;;  %v16_v32 = vld [vmem:[%s1192_s0 + $0x8] sm:$0xff] }
   0xa   :  { %706 = vmatprep.subr.bf16.mxu1 %v775_v9  ;;  %v791_v25 = vld [vmem:[%s1191_s1 + $0xf0] sm:$0xff]   ;;  %v795_v29 = vld [vmem:[%s1191_s1 + $0xf8] sm:$0xff]   ;;  %v20_v33 = vld [vmem:[%s1192_s0 + $0x28] sm:$0xff] }
   0xb   :  { %v792_v26 = vld [vmem:[%s1191_s1 + $0x30] sm:$0xff]   ;;  %v796_v30 = vld [vmem:[%s1191_s1 + $0x38] sm:$0xff]   ;;  %v80_v35 = vpack.c.bf16 %v20_v33, %v16_v32  ;;  %v15_v37 = vld [vmem:[%s1192_s0] sm:$0xff] }
   0xc   :  { %643 = vmatpush3.bf16.msra.mxu0 %v776_v10  ;;  %v793_v27 = vld [vmem:[%s1191_s1 + $0xb0] sm:$0xff]   ;;  %v797_v31 = vld [vmem:[%s1191_s1 + $0xb8] sm:$0xff]   ;;  %v19_v38 = vld [vmem:[%s1192_s0 + $0x20] sm:$0xff] }
   0xd   :  { %707 = vmatpush3.bf16.msra.mxu1 %v777_v11  ;;  %644 = vmatprep.subr.bf16.mxu0 %v778_v12  ;;  %v18_v34 = vld [vmem:[%s1192_s0 + $0x18] sm:$0xff]  ;;  %v79_v40 = vpack.c.bf16 %v19_v38, %v15_v37  ;;  %v17_v41 = vld [vmem:[%s1192_s0 + $0x10] sm:$0xff]  ;;  %v24_v43 = vld [vmem:[%s1192_s0 + $0x48] sm:$0xff] }
   0xe   :  { %708 = vmatprep.subr.bf16.mxu1 %v779_v13  ;;  %v22_v36 = vld [vmem:[%s1192_s0 + $0x38] sm:$0xff]  ;;  %v21_v42 = vld [vmem:[%s1192_s0 + $0x30] sm:$0xff]  ;;  %406 = vmatprep.mubr.bf16.mxu0 %v80_v35  ;;  %v28_v45 = vld [vmem:[%s1192_s0 + $0x68] sm:$0xff] }
   0xf   :  { %v82_v39 = vpack.c.bf16 %v22_v36, %v18_v34  ;;  %v81_v44 = vpack.c.bf16 %v21_v42, %v17_v41  ;;  %v26_v46 = vld [vmem:[%s1192_s0 + $0x58] sm:$0xff]  ;;  %v84_v48 = vpack.c.bf16 %v28_v45, %v24_v43  ;;  %v23_v50 = vld [vmem:[%s1192_s0 + $0x40] sm:$0xff]  ;;  %v25_v52 = vld [vmem:[%s1192_s0 + $0x50] sm:$0xff] }
  0x10   :  { %645 = vmatpush3.bf16.msra.mxu0 %v780_v14  ;;  %v30_v47 = vld [vmem:[%s1192_s0 + $0x78] sm:$0xff]  ;;  %v27_v51 = vld [vmem:[%s1192_s0 + $0x60] sm:$0xff]  ;;  %v29_v53 = vld [vmem:[%s1192_s0 + $0x70] sm:$0xff] }
  0x11   :  { %709 = vmatpush3.bf16.msra.mxu1 %v781_v15  ;;  %646 = vmatprep.subr.bf16.mxu0 %v782_v16  ;;  %v86_v49 = vpack.c.bf16 %v30_v47, %v26_v46  ;;  %v32_v54 = vld [vmem:[%s1192_s0 + $0x88] sm:$0xff]  ;;  %v34_v56 = vld [vmem:[%s1192_s0 + $0x98] sm:$0xff]  ;;  %v83_v58 = vpack.c.bf16 %v27_v51, %v23_v50  ;;  %v85_v59 = vpack.c.bf16 %v29_v53, %v25_v52  ;;  %v31_v62 = vld [vmem:[%s1192_s0 + $0x80] sm:$0xff] }
  0x12   :  { %710 = vmatprep.subr.bf16.mxu1 %v783_v17  ;;  %503 = vmatprep.mubr.bf16.mxu1 %v82_v39  ;;  %v36_v55 = vld [vmem:[%s1192_s0 + $0xa8] sm:$0xff]  ;;  %v38_v57 = vld [vmem:[%s1192_s0 + $0xb8] sm:$0xff]  ;;  %v35_v63 = vld [vmem:[%s1192_s0 + $0xa0] sm:$0xff] }
  0x13   :  { %v88_v60 = vpack.c.bf16 %v36_v55, %v32_v54  ;;  %v90_v61 = vpack.c.bf16 %v38_v57, %v34_v56  ;;  %v33_v0 = vld [vmem:[%s1192_s0 + $0x90] sm:$0xff]  ;;  %v40_v2 = vld [vmem:[%s1192_s0 + $0xc8] sm:$0xff]  ;;  %v42_v4 = vld [vmem:[%s1192_s0 + $0xd8] sm:$0xff]  ;;  %v87_v6 = vpack.c.bf16 %v35_v63, %v31_v62 }
  0x14   :  { %647 = vmatpush3.bf16.msra.mxu0 %v784_v18  ;;  %v37_v1 = vld [vmem:[%s1192_s0 + $0xb0] sm:$0xff]  ;;  %v44_v3 = vld [vmem:[%s1192_s0 + $0xe8] sm:$0xff]  ;;  %v46_v5 = vld [vmem:[%s1192_s0 + $0xf8] sm:$0xff] }
  0x15   :  { %711 = vmatpush3.bf16.msra.mxu1 %v785_v19  ;;  %648 = vmatprep.subr.bf16.mxu0 %v786_v20  ;;  %v89_v7 = vpack.c.bf16 %v37_v1, %v33_v0  ;;  %v92_v8 = vpack.c.bf16 %v44_v3, %v40_v2  ;;  %v94_v9 = vpack.c.bf16 %v46_v5, %v42_v4  ;;  %v39_v10 = vld [vmem:[%s1192_s0 + $0xc0] sm:$0xff]  ;;  %v41_v12 = vld [vmem:[%s1192_s0 + $0xd0] sm:$0xff]  ;;  %v48_v14 = vld [vmem:[%s1192_s0 + $0x108] sm:$0xff] }
  0x16   :  { %712 = vmatprep.subr.bf16.mxu1 %v787_v21  ;;  %v43_v11 = vld [vmem:[%s1192_s0 + $0xe0] sm:$0xff]  ;;  %v45_v13 = vld [vmem:[%s1192_s0 + $0xf0] sm:$0xff]  ;;  %v52_v15 = vld [vmem:[%s1192_s0 + $0x128] sm:$0xff] }
  0x17   :  { %v50_v16 = vld [vmem:[%s1192_s0 + $0x118] sm:$0xff]  ;;  %v91_v18 = vpack.c.bf16 %v43_v11, %v39_v10  ;;  %v93_v19 = vpack.c.bf16 %v45_v13, %v41_v12  ;;  %v96_v20 = vpack.c.bf16 %v52_v15, %v48_v14  ;;  %v55_v34 = vld [vmem:[%s1192_s0 + $0x140] sm:$0xff]  ;;  %v57_v36 = vld [vmem:[%s1192_s0 + $0x150] sm:$0xff] }
  0x18   :  { %649 = vmatpush3.bf16.msra.mxu0 %v788_v22  ;;  %v54_v17 = vld [vmem:[%s1192_s0 + $0x138] sm:$0xff]  ;;  %v47_v22 = vld [vmem:[%s1192_s0 + $0x100] sm:$0xff]  ;;  %v61_v37 = vld [vmem:[%s1192_s0 + $0x170] sm:$0xff] }
  0x19   :  { %713 = vmatpush3.bf16.msra.mxu1 %v789_v23  ;;  %650 = vmatprep.subr.bf16.mxu0 %v790_v24  ;;  %v98_v21 = vpack.c.bf16 %v54_v17, %v50_v16  ;;  %v51_v23 = vld [vmem:[%s1192_s0 + $0x120] sm:$0xff]  ;;  %v49_v24 = vld [vmem:[%s1192_s0 + $0x110] sm:$0xff]  ;;  %v64_v38 = vld [vmem:[%s1192_s0 + $0x188] sm:$0xff]  ;;  %v101_v43 = vpack.c.bf16 %v61_v37, %v57_v36 }
  0x1a   :  { %714 = vmatprep.subr.bf16.mxu1 %v791_v25  ;;  %v53_v25 = vld [vmem:[%s1192_s0 + $0x130] sm:$0xff]  ;;  %v59_v35 = vld [vmem:[%s1192_s0 + $0x160] sm:$0xff]  ;;  %v68_v39 = vld [vmem:[%s1192_s0 + $0x1a8] sm:$0xff] }
  0x1b   :  { %v70_v41 = vld [vmem:[%s1192_s0 + $0x1b8] sm:$0xff]  ;;  %v99_v42 = vpack.c.bf16 %v59_v35, %v55_v34  ;;  %v63_v46 = vld [vmem:[%s1192_s0 + $0x180] sm:$0xff]  ;;  %v72_v50 = vld [vmem:[%s1192_s0 + $0x1c8] sm:$0xff] }
  0x1c   :  { %651 = vmatpush3.bf16.msra.mxu0 %v792_v26  ;;  %v56_v26 = vld [vmem:[%s1192_s0 + $0x148] sm:$0xff]  ;;  %v67_v47 = vld [vmem:[%s1192_s0 + $0x1a0] sm:$0xff]  ;;  %v74_v52 = vld [vmem:[%s1192_s0 + $0x1d8] sm:$0xff] }
  0x1d   :  { %715 = vmatpush3.bf16.msra.mxu1 %v793_v27  ;;  %652 = vmatprep.subr.bf16.mxu0 %v794_v28  ;;  %v60_v27 = vld [vmem:[%s1192_s0 + $0x168] sm:$0xff]  ;;  %v58_v28 = vld [vmem:[%s1192_s0 + $0x158] sm:$0xff]  ;;  %v103_v54 = vpack.c.bf16 %v67_v47, %v63_v46  ;;  %v1109_v2 = vld [vmem:[%s1193_s2] ss:$0 sm:$0xff] }
  0x1e   :  { %716 = vmatprep.subr.bf16.mxu1 %v795_v29  ;;  %v62_v29 = vld [vmem:[%s1192_s0 + $0x178] sm:$0xff]  ;;  %v100_v32 = vpack.c.bf16 %v60_v27, %v56_v26  ;;  %v76_v51 = vld [vmem:[%s1192_s0 + $0x1e8] sm:$0xff] }
  0x1f   :  { %v102_v33 = vpack.c.bf16 %v62_v29, %v58_v28  ;;  %v78_v53 = vld [vmem:[%s1192_s0 + $0x1f8] sm:$0xff]  ;;  %v108_v56 = vpack.c.bf16 %v76_v51, %v72_v50 }
  0x20   :  { %653 = vmatpush3.bf16.msra.mxu0 %v796_v30  ;;  %v95_v30 = vpack.c.bf16 %v51_v23, %v47_v22  ;;  %v110_v57 = vpack.c.bf16 %v78_v53, %v74_v52 }
  0x21   :  { %717 = vmatpush3.bf16.msra.mxu1 %v797_v31  ;;  %v97_v31 = vpack.c.bf16 %v53_v25, %v49_v24 }
  0x23   :  { %407 = vmatmul.mubr.bf16.vlgmr.msra.gmra.mrb[0].mxu0 %v79_v40  ;;  %v66_v40 = vld [vmem:[%s1192_s0 + $0x198] sm:$0xff] }
  0x24   :  { %504 = vmatmul.mubr.bf16.vlgmr.msra.gmra.mrb[0].mxu1 %v81_v44  ;;  %414 = vmatprep.mubr.bf16.mxu0 %v84_v48  ;;  %v104_v44 = vpack.c.bf16 %v68_v39, %v64_v38  ;;  %v106_v45 = vpack.c.bf16 %v70_v41, %v66_v40  ;;  %v65_v48 = vld [vmem:[%s1192_s0 + $0x190] sm:$0xff] }
  0x25   :  { %511 = vmatprep.mubr.bf16.mxu1 %v86_v49  ;;  %v69_v49 = vld [vmem:[%s1192_s0 + $0x1b0] sm:$0xff] }
  0x26   :  { %v105_v55 = vpack.c.bf16 %v69_v49, %v65_v48 }
  0x2b   :  { %415 = vmatmul.mubr.bf16.gmra.mrb[4].mxu0 %v83_v58  ;;  %v71_v58 = vld [vmem:[%s1192_s0 + $0x1c0] sm:$0xff] }
  0x2c   :  { %512 = vmatmul.mubr.bf16.gmra.mrb[4].mxu1 %v85_v59  ;;  %422 = vmatprep.mubr.bf16.mxu0 %v88_v60  ;;  %v75_v59 = vld [vmem:[%s1192_s0 + $0x1e0] sm:$0xff]  ;;  %v73_v60 = vld [vmem:[%s1192_s0 + $0x1d0] sm:$0xff] }
  0x2d   :  { %519 = vmatprep.mubr.bf16.mxu1 %v90_v61  ;;  %v77_v61 = vld [vmem:[%s1192_s0 + $0x1f0] sm:$0xff]  ;;  %v107_v62 = vpack.c.bf16 %v75_v59, %v71_v58 }
  0x2e   :  { %v109_v63 = vpack.c.bf16 %v77_v61, %v73_v60 }
  0x33   :  { %423 = vmatmul.mubr.bf16.gmra.mrb[8].mxu0 %v87_v6 }
  0x34   :  { %520 = vmatmul.mubr.bf16.gmra.mrb[8].mxu1 %v89_v7  ;;  %430 = vmatprep.mubr.bf16.mxu0 %v92_v8 }
  0x35   :  { %527 = vmatprep.mubr.bf16.mxu1 %v94_v9 }
  0x3b   :  { %431 = vmatmul.mubr.bf16.gmra.mrb[12].mxu0 %v91_v18 }
  0x3c   :  { %528 = vmatmul.mubr.bf16.gmra.mrb[12].mxu1 %v93_v19  ;;  %438 = vmatprep.mubr.bf16.mxu0 %v96_v20 }
  0x3d   :  { %535 = vmatprep.mubr.bf16.mxu1 %v98_v21 }
  0x43   :  { %439 = vmatmul.mubr.bf16.gmra.mrb[16].mxu0 %v95_v30 }
  0x44   :  { %536 = vmatmul.mubr.bf16.gmra.mrb[16].mxu1 %v97_v31  ;;  %446 = vmatprep.mubr.bf16.mxu0 %v100_v32 }
  0x45   :  { %543 = vmatprep.mubr.bf16.mxu1 %v102_v33 }
  0x4b   :  { %447 = vmatmul.mubr.bf16.gmra.mrb[20].mxu0 %v99_v42 }
  0x4c   :  { %544 = vmatmul.mubr.bf16.gmra.mrb[20].mxu1 %v101_v43  ;;  %454 = vmatprep.mubr.bf16.mxu0 %v104_v44 }
  0x4d   :  { %551 = vmatprep.mubr.bf16.mxu1 %v106_v45 }
  0x53   :  { %455 = vmatmul.mubr.bf16.gmra.mrb[24].mxu0 %v103_v54 }
  0x54   :  { %552 = vmatmul.mubr.bf16.gmra.mrb[24].mxu1 %v105_v55  ;;  %462 = vmatprep.mubr.bf16.mxu0 %v108_v56 }
  0x55   :  { %559 = vmatprep.mubr.bf16.mxu1 %v110_v57 }
  0x5b   :  { %463 = vmatmul.mubr.bf16.gmra.mrb[28].mxu0 %v107_v62 }
  0x5c   :  { %560 = vmatmul.mubr.bf16.gmra.mrb[28].mxu1 %v109_v63 }
  0xf6   :  { %v654_v0 = vpop.f32.mrb[0].mxu0 }
  0xf7   :  { %v718_v1 = vpop.f32.mrb[0].mxu1  ;;  %v655_v3 = vpop.f32.mrb[1].mxu0 }
  0xf8   :  { %v656_v4 = vadd.f32 %v655_v3, %v654_v0  ;;  %v719_v5 = vpop.f32.mrb[1].mxu1  ;;  %v657_v6 = vpop.f32.mrb[2].mxu0 }
  0xf9   :  { %v720_v7 = vadd.f32 %v719_v5, %v718_v1  ;;  %v721_v8 = vpop.f32.mrb[2].mxu1  ;;  %v658_v9 = vpop.f32.mrb[3].mxu0 }
  0xfa   :  { %v409_v10 = vadd.f32 %v656_v4, %v1109_v2  ;;  %v659_v11 = vadd.f32 %v658_v9, %v657_v6  ;;  %v722_v12 = vpop.f32.mrb[3].mxu1 }
  0xfb   :  { %v723_v13 = vadd.f32 %v722_v12, %v721_v8 }
  0xfc   :  { %v506_v14 = vadd.f32 %v720_v7, %v409_v10  ;;  %v412_v15 = vadd.f32 %v659_v11, %v1109_v2 }
  0xfe   :  { %v568_v16 = vmax.f32 %v506_v14, 0.0  ;;  %v509_v17 = vadd.f32 %v723_v13, %v412_v15  ;;  %v660_v18 = vpop.f32.mrb[4].mxu0 }
  0xff   :  { %v724_v19 = vpop.f32.mrb[4].mxu1  ;;  %v661_v20 = vpop.f32.mrb[5].mxu0 }
 0x100   :  { %585 = vst.msk [vmem:[%s1194_s3] sm:$0xff] %vm584_vm0, %v568_v16  ;;  %v569_v21 = vmax.f32 %v509_v17, 0.0  ;;  %v662_v22 = vadd.f32 %v661_v20, %v660_v18  ;;  %v725_v23 = vpop.f32.mrb[5].mxu1  ;;  %v663_v24 = vpop.f32.mrb[6].mxu0 }
 0x101   :  { %v726_v25 = vadd.f32 %v725_v23, %v724_v19  ;;  %v727_v26 = vpop.f32.mrb[6].mxu1  ;;  %v664_v27 = vpop.f32.mrb[7].mxu0 }
 0x102   :  { %586 = vst.msk [vmem:[%s1194_s3 + $0x8] sm:$0xff] %vm584_vm0, %v569_v21  ;;  %v417_v28 = vadd.f32 %v662_v22, %v1109_v2  ;;  %v665_v29 = vadd.f32 %v664_v27, %v663_v24  ;;  %v728_v30 = vpop.f32.mrb[7].mxu1 }
 0x103   :  { %v729_v31 = vadd.f32 %v728_v30, %v727_v26 }
 0x104   :  { %v514_v32 = vadd.f32 %v726_v25, %v417_v28  ;;  %v420_v33 = vadd.f32 %v665_v29, %v1109_v2 }
 0x106   :  { %v570_v34 = vmax.f32 %v514_v32, 0.0  ;;  %v517_v35 = vadd.f32 %v729_v31, %v420_v33  ;;  %v666_v36 = vpop.f32.mrb[8].mxu0 }
 0x107   :  { %v730_v37 = vpop.f32.mrb[8].mxu1  ;;  %v667_v38 = vpop.f32.mrb[9].mxu0 }
 0x108   :  { %587 = vst.msk [vmem:[%s1194_s3 + $0x10] sm:$0xff] %vm584_vm0, %v570_v34  ;;  %v571_v39 = vmax.f32 %v517_v35, 0.0  ;;  %v668_v40 = vadd.f32 %v667_v38, %v666_v36  ;;  %v731_v41 = vpop.f32.mrb[9].mxu1  ;;  %v669_v42 = vpop.f32.mrb[10].mxu0 }
 0x109   :  { %v732_v43 = vadd.f32 %v731_v41, %v730_v37  ;;  %v733_v44 = vpop.f32.mrb[10].mxu1  ;;  %v670_v45 = vpop.f32.mrb[11].mxu0 }
 0x10a   :  { %588 = vst.msk [vmem:[%s1194_s3 + $0x18] sm:$0xff] %vm584_vm0, %v571_v39  ;;  %v425_v46 = vadd.f32 %v668_v40, %v1109_v2  ;;  %v671_v47 = vadd.f32 %v670_v45, %v669_v42  ;;  %v734_v48 = vpop.f32.mrb[11].mxu1 }
 0x10b   :  { %v735_v49 = vadd.f32 %v734_v48, %v733_v44 }
 0x10c   :  { %v522_v50 = vadd.f32 %v732_v43, %v425_v46  ;;  %v428_v51 = vadd.f32 %v671_v47, %v1109_v2 }
 0x10e   :  { %v572_v52 = vmax.f32 %v522_v50, 0.0  ;;  %v525_v53 = vadd.f32 %v735_v49, %v428_v51  ;;  %v672_v54 = vpop.f32.mrb[12].mxu0 }
 0x10f   :  { %v736_v55 = vpop.f32.mrb[12].mxu1  ;;  %v673_v56 = vpop.f32.mrb[13].mxu0 }
 0x110   :  { %589 = vst.msk [vmem:[%s1194_s3 + $0x20] sm:$0xff] %vm584_vm0, %v572_v52  ;;  %v573_v57 = vmax.f32 %v525_v53, 0.0  ;;  %v674_v58 = vadd.f32 %v673_v56, %v672_v54  ;;  %v737_v59 = vpop.f32.mrb[13].mxu1  ;;  %v675_v60 = vpop.f32.mrb[14].mxu0 }
 0x111   :  { %v738_v61 = vadd.f32 %v737_v59, %v736_v55  ;;  %v739_v62 = vpop.f32.mrb[14].mxu1  ;;  %v676_v63 = vpop.f32.mrb[15].mxu0 }
 0x112   :  { %590 = vst.msk [vmem:[%s1194_s3 + $0x28] sm:$0xff] %vm584_vm0, %v573_v57  ;;  %v433_v0 = vadd.f32 %v674_v58, %v1109_v2  ;;  %v677_v1 = vadd.f32 %v676_v63, %v675_v60  ;;  %v740_v3 = vpop.f32.mrb[15].mxu1 }
 0x113   :  { %v741_v4 = vadd.f32 %v740_v3, %v739_v62 }
 0x114   :  { %v530_v5 = vadd.f32 %v738_v61, %v433_v0  ;;  %v436_v6 = vadd.f32 %v677_v1, %v1109_v2 }
 0x116   :  { %v574_v7 = vmax.f32 %v530_v5, 0.0  ;;  %v533_v8 = vadd.f32 %v741_v4, %v436_v6  ;;  %v678_v9 = vpop.f32.mrb[16].mxu0 }
 0x117   :  { %v742_v10 = vpop.f32.mrb[16].mxu1  ;;  %v679_v11 = vpop.f32.mrb[17].mxu0 }
 0x118   :  { %591 = vst.msk [vmem:[%s1194_s3 + $0x30] sm:$0xff] %vm584_vm0, %v574_v7  ;;  %v575_v12 = vmax.f32 %v533_v8, 0.0  ;;  %v680_v13 = vadd.f32 %v679_v11, %v678_v9  ;;  %v743_v14 = vpop.f32.mrb[17].mxu1  ;;  %v681_v15 = vpop.f32.mrb[18].mxu0 }
 0x119   :  { %v744_v16 = vadd.f32 %v743_v14, %v742_v10  ;;  %v745_v17 = vpop.f32.mrb[18].mxu1  ;;  %v682_v18 = vpop.f32.mrb[19].mxu0 }
 0x11a   :  { %592 = vst.msk [vmem:[%s1194_s3 + $0x38] sm:$0xff] %vm584_vm0, %v575_v12  ;;  %v441_v19 = vadd.f32 %v680_v13, %v1109_v2  ;;  %v683_v20 = vadd.f32 %v682_v18, %v681_v15  ;;  %v746_v21 = vpop.f32.mrb[19].mxu1 }
 0x11b   :  { %v747_v22 = vadd.f32 %v746_v21, %v745_v17 }
 0x11c   :  { %v538_v23 = vadd.f32 %v744_v16, %v441_v19  ;;  %v444_v24 = vadd.f32 %v683_v20, %v1109_v2 }
 0x11e   :  { %v576_v25 = vmax.f32 %v538_v23, 0.0  ;;  %v541_v26 = vadd.f32 %v747_v22, %v444_v24  ;;  %v684_v27 = vpop.f32.mrb[20].mxu0 }
 0x11f   :  { %v748_v28 = vpop.f32.mrb[20].mxu1  ;;  %v685_v29 = vpop.f32.mrb[21].mxu0 }
 0x120   :  { %593 = vst.msk [vmem:[%s1194_s3 + $0x40] sm:$0xff] %vm584_vm0, %v576_v25  ;;  %v577_v30 = vmax.f32 %v541_v26, 0.0  ;;  %v686_v31 = vadd.f32 %v685_v29, %v684_v27  ;;  %v749_v32 = vpop.f32.mrb[21].mxu1  ;;  %v687_v33 = vpop.f32.mrb[22].mxu0 }
 0x121   :  { %v750_v34 = vadd.f32 %v749_v32, %v748_v28  ;;  %v751_v35 = vpop.f32.mrb[22].mxu1  ;;  %v688_v36 = vpop.f32.mrb[23].mxu0 }
 0x122   :  { %594 = vst.msk [vmem:[%s1194_s3 + $0x48] sm:$0xff] %vm584_vm0, %v577_v30  ;;  %v449_v37 = vadd.f32 %v686_v31, %v1109_v2  ;;  %v689_v38 = vadd.f32 %v688_v36, %v687_v33  ;;  %v752_v39 = vpop.f32.mrb[23].mxu1 }
 0x123   :  { %v753_v40 = vadd.f32 %v752_v39, %v751_v35 }
 0x124   :  { %v546_v41 = vadd.f32 %v750_v34, %v449_v37  ;;  %v452_v42 = vadd.f32 %v689_v38, %v1109_v2 }
 0x126   :  { %v578_v43 = vmax.f32 %v546_v41, 0.0  ;;  %v549_v44 = vadd.f32 %v753_v40, %v452_v42  ;;  %v690_v45 = vpop.f32.mrb[24].mxu0 }
 0x127   :  { %v754_v46 = vpop.f32.mrb[24].mxu1  ;;  %v691_v47 = vpop.f32.mrb[25].mxu0 }
 0x128   :  { %595 = vst.msk [vmem:[%s1194_s3 + $0x50] sm:$0xff] %vm584_vm0, %v578_v43  ;;  %v579_v48 = vmax.f32 %v549_v44, 0.0  ;;  %v692_v49 = vadd.f32 %v691_v47, %v690_v45  ;;  %v755_v50 = vpop.f32.mrb[25].mxu1  ;;  %v693_v51 = vpop.f32.mrb[26].mxu0 }
 0x129   :  { %v756_v52 = vadd.f32 %v755_v50, %v754_v46  ;;  %v757_v53 = vpop.f32.mrb[26].mxu1  ;;  %v694_v54 = vpop.f32.mrb[27].mxu0 }
 0x12a   :  { %596 = vst.msk [vmem:[%s1194_s3 + $0x58] sm:$0xff] %vm584_vm0, %v579_v48  ;;  %v457_v55 = vadd.f32 %v692_v49, %v1109_v2  ;;  %v695_v56 = vadd.f32 %v694_v54, %v693_v51  ;;  %v758_v57 = vpop.f32.mrb[27].mxu1 }
 0x12b   :  { %v759_v58 = vadd.f32 %v758_v57, %v757_v53 }
 0x12c   :  { %v554_v59 = vadd.f32 %v756_v52, %v457_v55  ;;  %v460_v60 = vadd.f32 %v695_v56, %v1109_v2 }
 0x12e   :  { %v580_v61 = vmax.f32 %v554_v59, 0.0  ;;  %v557_v62 = vadd.f32 %v759_v58, %v460_v60  ;;  %v696_v63 = vpop.f32.mrb[28].mxu0 }
 0x12f   :  { %v760_v0 = vpop.f32.mrb[28].mxu1  ;;  %v697_v1 = vpop.f32.mrb[29].mxu0 }
 0x130   :  { %597 = vst.msk [vmem:[%s1194_s3 + $0x60] sm:$0xff] %vm584_vm0, %v580_v61  ;;  %v581_v3 = vmax.f32 %v557_v62, 0.0  ;;  %v698_v4 = vadd.f32 %v697_v1, %v696_v63  ;;  %v761_v5 = vpop.f32.mrb[29].mxu1  ;;  %v699_v6 = vpop.f32.mrb[30].mxu0 }
 0x131   :  { %v762_v7 = vadd.f32 %v761_v5, %v760_v0  ;;  %v763_v8 = vpop.f32.mrb[30].mxu1  ;;  %v700_v9 = vpop.f32.mrb[31].mxu0 }
 0x132   :  { %598 = vst.msk [vmem:[%s1194_s3 + $0x68] sm:$0xff] %vm584_vm0, %v581_v3  ;;  %v465_v10 = vadd.f32 %v698_v4, %v1109_v2  ;;  %v701_v11 = vadd.f32 %v700_v9, %v699_v6  ;;  %v764_v12 = vpop.f32.mrb[31].mxu1 }
 0x133   :  { %v765_v13 = vadd.f32 %v764_v12, %v763_v8 }
 0x134   :  { %v562_v14 = vadd.f32 %v762_v7, %v465_v10  ;;  %v468_v15 = vadd.f32 %v701_v11, %v1109_v2 }
 0x136   :  { %v582_v16 = vmax.f32 %v562_v14, 0.0  ;;  %v565_v17 = vadd.f32 %v765_v13, %v468_v15 }
 0x138   :  { %599 = vst.msk [vmem:[%s1194_s3 + $0x70] sm:$0xff] %vm584_vm0, %v582_v16  ;;  %v583_v18 = vmax.f32 %v565_v17, 0.0 }
 0x13a   :  { %600 = vst.msk [vmem:[%s1194_s3 + $0x78] sm:$0xff] %vm584_vm0, %v583_v18 }

// kernel: forward.9
= control target key start
LH: loop header
LB: loop body
LE: loop exit
PB: predicated region body
PF: predicated region fallthrough
CT: control target
= control target key end

     0   :  { %s1354_s1 = inlined_call_operand.vmem [shape: bf16[1024,128], index: 1, kind: input, shape index: {}]   ;;  %s1355_s0 = inlined_call_operand.vmem [shape: f32[32,1024], index: 0, kind: input, shape index: {}]   ;;  %s1356_s2 = inlined_call_operand.vmem [shape: f32[1,128], index: 2, kind: input, shape index: {}]   ;;  %s1357_s3 = inlined_call_operand.vmem [shape: f32[32,128], index: 3, kind: output, shape index: {}]  }
   0x1   :  { %v967_v0 = vld [vmem:[%s1354_s1 + $0x40] sm:$0xff]   ;;  %v971_v4 = vld [vmem:[%s1354_s1 + $0x48] sm:$0xff]   ;;  %v975_v8 = vld [vmem:[%s1354_s1 + $0x50] sm:$0xff]  }
   0x2   :  { %v968_v1 = vld [vmem:[%s1354_s1 + $0xc0] sm:$0xff]   ;;  %855 = vmatprep.subr.bf16.mxu0 %v967_v0  ;;  %v972_v5 = vld [vmem:[%s1354_s1 + $0xc8] sm:$0xff]   ;;  %v976_v9 = vld [vmem:[%s1354_s1 + $0xd0] sm:$0xff]  }
   0x3   :  { %v969_v2 = vld [vmem:[%s1354_s1] sm:$0xff]   ;;  %883 = vmatprep.subr.bf16.mxu1 %v968_v1  ;;  %v973_v6 = vld [vmem:[%s1354_s1 + $0x8] sm:$0xff]   ;;  %v977_v10 = vld [vmem:[%s1354_s1 + $0x10] sm:$0xff]  }
   0x4   :  { %v970_v3 = vld [vmem:[%s1354_s1 + $0x80] sm:$0xff]   ;;  %856 = vmatpush3.bf16.msra.mxu0 %v969_v2  ;;  %v974_v7 = vld [vmem:[%s1354_s1 + $0x88] sm:$0xff]   ;;  %v978_v11 = vld [vmem:[%s1354_s1 + $0x90] sm:$0xff]  }
   0x5   :  { %884 = vmatpush3.bf16.msra.mxu1 %v970_v3  ;;  %857 = vmatprep.subr.bf16.mxu0 %v971_v4  ;;  %v979_v12 = vld [vmem:[%s1354_s1 + $0x58] sm:$0xff]   ;;  %v983_v16 = vld [vmem:[%s1354_s1 + $0x60] sm:$0xff]   ;;  %v987_v20 = vld [vmem:[%s1354_s1 + $0x68] sm:$0xff]  }
   0x6   :  { %885 = vmatprep.subr.bf16.mxu1 %v972_v5  ;;  %v980_v13 = vld [vmem:[%s1354_s1 + $0xd8] sm:$0xff]   ;;  %v984_v17 = vld [vmem:[%s1354_s1 + $0xe0] sm:$0xff]   ;;  %v988_v21 = vld [vmem:[%s1354_s1 + $0xe8] sm:$0xff]  }
   0x7   :  { %v981_v14 = vld [vmem:[%s1354_s1 + $0x18] sm:$0xff]   ;;  %v985_v18 = vld [vmem:[%s1354_s1 + $0x20] sm:$0xff]   ;;  %v989_v22 = vld [vmem:[%s1354_s1 + $0x28] sm:$0xff]  }
   0x8   :  { %858 = vmatpush3.bf16.msra.mxu0 %v973_v6  ;;  %v982_v15 = vld [vmem:[%s1354_s1 + $0x98] sm:$0xff]   ;;  %v986_v19 = vld [vmem:[%s1354_s1 + $0xa0] sm:$0xff]   ;;  %v990_v23 = vld [vmem:[%s1354_s1 + $0xa8] sm:$0xff]  }
   0x9   :  { %886 = vmatpush3.bf16.msra.mxu1 %v974_v7  ;;  %859 = vmatprep.subr.bf16.mxu0 %v975_v8  ;;  %v991_v24 = vld [vmem:[%s1354_s1 + $0x70] sm:$0xff]   ;;  %v995_v28 = vld [vmem:[%s1354_s1 + $0x78] sm:$0xff]   ;;  %v16_v32 = vld [vmem:[%s1355_s0 + $0x8] sm:$0xff] }
   0xa   :  { %887 = vmatprep.subr.bf16.mxu1 %v976_v9  ;;  %v992_v25 = vld [vmem:[%s1354_s1 + $0xf0] sm:$0xff]   ;;  %v996_v29 = vld [vmem:[%s1354_s1 + $0xf8] sm:$0xff]   ;;  %v24_v33 = vld [vmem:[%s1355_s0 + $0x48] sm:$0xff] }
   0xb   :  { %v993_v26 = vld [vmem:[%s1354_s1 + $0x30] sm:$0xff]   ;;  %v997_v30 = vld [vmem:[%s1354_s1 + $0x38] sm:$0xff]   ;;  %v48_v35 = vpack.c.bf16 %v24_v33, %v16_v32  ;;  %v15_v37 = vld [vmem:[%s1355_s0] sm:$0xff] }
   0xc   :  { %860 = vmatpush3.bf16.msra.mxu0 %v977_v10  ;;  %v994_v27 = vld [vmem:[%s1354_s1 + $0xb0] sm:$0xff]   ;;  %v998_v31 = vld [vmem:[%s1354_s1 + $0xb8] sm:$0xff]   ;;  %v23_v38 = vld [vmem:[%s1355_s0 + $0x40] sm:$0xff] }
   0xd   :  { %888 = vmatpush3.bf16.msra.mxu1 %v978_v11  ;;  %861 = vmatprep.subr.bf16.mxu0 %v979_v12  ;;  %v18_v34 = vld [vmem:[%s1355_s0 + $0x18] sm:$0xff]  ;;  %v47_v40 = vpack.c.bf16 %v23_v38, %v15_v37  ;;  %v17_v41 = vld [vmem:[%s1355_s0 + $0x10] sm:$0xff]  ;;  %v999_v44 = vld [vmem:[%s1354_s1 + $0x140] sm:$0xff]  }
   0xe   :  { %889 = vmatprep.subr.bf16.mxu1 %v980_v13  ;;  %v26_v36 = vld [vmem:[%s1355_s0 + $0x58] sm:$0xff]  ;;  %v25_v42 = vld [vmem:[%s1355_s0 + $0x50] sm:$0xff]  ;;  %614 = vmatprep.mubr.bf16.mxu0 %v48_v35  ;;  %v1000_v45 = vld [vmem:[%s1354_s1 + $0x1c0] sm:$0xff]  }
   0xf   :  { %v50_v39 = vpack.c.bf16 %v26_v36, %v18_v34  ;;  %v49_v43 = vpack.c.bf16 %v25_v42, %v17_v41  ;;  %v1001_v46 = vld [vmem:[%s1354_s1 + $0x100] sm:$0xff]   ;;  %v1003_v48 = vld [vmem:[%s1354_s1 + $0x148] sm:$0xff]   ;;  %v1007_v52 = vld [vmem:[%s1354_s1 + $0x150] sm:$0xff]  }
  0x10   :  { %862 = vmatpush3.bf16.msra.mxu0 %v981_v14  ;;  %v1002_v47 = vld [vmem:[%s1354_s1 + $0x180] sm:$0xff]   ;;  %v1004_v49 = vld [vmem:[%s1354_s1 + $0x1c8] sm:$0xff]   ;;  %v1008_v53 = vld [vmem:[%s1354_s1 + $0x1d0] sm:$0xff]  }
  0x11   :  { %890 = vmatpush3.bf16.msra.mxu1 %v982_v15  ;;  %863 = vmatprep.subr.bf16.mxu0 %v983_v16  ;;  %v1005_v50 = vld [vmem:[%s1354_s1 + $0x108] sm:$0xff]   ;;  %v1009_v54 = vld [vmem:[%s1354_s1 + $0x110] sm:$0xff]   ;;  %v1011_v56 = vld [vmem:[%s1354_s1 + $0x158] sm:$0xff]  }
  0x12   :  { %891 = vmatprep.subr.bf16.mxu1 %v984_v17  ;;  %663 = vmatprep.mubr.bf16.mxu1 %v50_v39  ;;  %v1006_v51 = vld [vmem:[%s1354_s1 + $0x188] sm:$0xff]   ;;  %v1010_v55 = vld [vmem:[%s1354_s1 + $0x190] sm:$0xff]   ;;  %v1012_v57 = vld [vmem:[%s1354_s1 + $0x1d8] sm:$0xff]  }
  0x13   :  { %v1013_v58 = vld [vmem:[%s1354_s1 + $0x118] sm:$0xff]   ;;  %v1015_v60 = vld [vmem:[%s1354_s1 + $0x160] sm:$0xff]   ;;  %v32_v0 = vld [vmem:[%s1355_s0 + $0x88] sm:$0xff] }
  0x14   :  { %864 = vmatpush3.bf16.msra.mxu0 %v985_v18  ;;  %v1014_v59 = vld [vmem:[%s1354_s1 + $0x198] sm:$0xff]   ;;  %v1016_v61 = vld [vmem:[%s1354_s1 + $0x1e0] sm:$0xff]   ;;  %v40_v1 = vld [vmem:[%s1355_s0 + $0xc8] sm:$0xff] }
  0x15   :  { %892 = vmatpush3.bf16.msra.mxu1 %v986_v19  ;;  %865 = vmatprep.subr.bf16.mxu0 %v987_v20  ;;  %v1017_v62 = vld [vmem:[%s1354_s1 + $0x120] sm:$0xff]   ;;  %v56_v2 = vpack.c.bf16 %v40_v1, %v32_v0  ;;  %v1019_v3 = vld [vmem:[%s1354_s1 + $0x168] sm:$0xff]   ;;  %v34_v10 = vld [vmem:[%s1355_s0 + $0x98] sm:$0xff] }
  0x16   :  { %893 = vmatprep.subr.bf16.mxu1 %v988_v21  ;;  %v1018_v63 = vld [vmem:[%s1354_s1 + $0x1a0] sm:$0xff]   ;;  %v1020_v4 = vld [vmem:[%s1354_s1 + $0x1e8] sm:$0xff]   ;;  %v42_v11 = vld [vmem:[%s1355_s0 + $0xd8] sm:$0xff] }
  0x17   :  { %v31_v5 = vld [vmem:[%s1355_s0 + $0x80] sm:$0xff]  ;;  %v1021_v8 = vld [vmem:[%s1354_s1 + $0x128] sm:$0xff]   ;;  %v33_v12 = vld [vmem:[%s1355_s0 + $0x90] sm:$0xff]  ;;  %v58_v13 = vpack.c.bf16 %v42_v11, %v34_v10 }
  0x18   :  { %866 = vmatpush3.bf16.msra.mxu0 %v989_v22  ;;  %v39_v6 = vld [vmem:[%s1355_s0 + $0xc0] sm:$0xff]  ;;  %v1022_v9 = vld [vmem:[%s1354_s1 + $0x1a8] sm:$0xff]   ;;  %v41_v14 = vld [vmem:[%s1355_s0 + $0xd0] sm:$0xff] }
  0x19   :  { %894 = vmatpush3.bf16.msra.mxu1 %v990_v23  ;;  %867 = vmatprep.subr.bf16.mxu0 %v991_v24  ;;  %v55_v7 = vpack.c.bf16 %v39_v6, %v31_v5  ;;  %v57_v15 = vpack.c.bf16 %v41_v14, %v33_v12  ;;  %v1023_v16 = vld [vmem:[%s1354_s1 + $0x170] sm:$0xff]   ;;  %v1027_v20 = vld [vmem:[%s1354_s1 + $0x178] sm:$0xff]   ;;  %v20_v24 = vld [vmem:[%s1355_s0 + $0x28] sm:$0xff] }
  0x1a   :  { %895 = vmatprep.subr.bf16.mxu1 %v992_v25  ;;  %v1024_v17 = vld [vmem:[%s1354_s1 + $0x1f0] sm:$0xff]   ;;  %v1028_v21 = vld [vmem:[%s1354_s1 + $0x1f8] sm:$0xff]   ;;  %v28_v25 = vld [vmem:[%s1355_s0 + $0x68] sm:$0xff] }
  0x1b   :  { %v1025_v18 = vld [vmem:[%s1354_s1 + $0x130] sm:$0xff]   ;;  %v1029_v22 = vld [vmem:[%s1354_s1 + $0x138] sm:$0xff]   ;;  %v36_v36 = vld [vmem:[%s1355_s0 + $0xa8] sm:$0xff] }
  0x1c   :  { %868 = vmatpush3.bf16.msra.mxu0 %v993_v26  ;;  %v1026_v19 = vld [vmem:[%s1354_s1 + $0x1b0] sm:$0xff]   ;;  %v1030_v23 = vld [vmem:[%s1354_s1 + $0x1b8] sm:$0xff]   ;;  %v52_v26 = vpack.c.bf16 %v28_v25, %v20_v24  ;;  %v44_v37 = vld [vmem:[%s1355_s0 + $0xe8] sm:$0xff] }
  0x1d   :  { %896 = vmatpush3.bf16.msra.mxu1 %v994_v27  ;;  %869 = vmatprep.subr.bf16.mxu0 %v995_v28  ;;  %v22_v27 = vld [vmem:[%s1355_s0 + $0x38] sm:$0xff]  ;;  %v21_v32 = vld [vmem:[%s1355_s0 + $0x30] sm:$0xff]  ;;  %v60_v39 = vpack.c.bf16 %v44_v37, %v36_v36  ;;  %v35_v42 = vld [vmem:[%s1355_s0 + $0xa0] sm:$0xff] }
  0x1e   :  { %897 = vmatprep.subr.bf16.mxu1 %v996_v29  ;;  %v30_v28 = vld [vmem:[%s1355_s0 + $0x78] sm:$0xff]  ;;  %v19_v29 = vld [vmem:[%s1355_s0 + $0x20] sm:$0xff]  ;;  %v29_v33 = vld [vmem:[%s1355_s0 + $0x70] sm:$0xff] }
  0x1f   :  { %v53_v35 = vpack.c.bf16 %v29_v33, %v21_v32  ;;  %v38_v38 = vld [vmem:[%s1355_s0 + $0xb8] sm:$0xff] }
  0x20   :  { %870 = vmatpush3.bf16.msra.mxu0 %v997_v30  ;;  %v54_v30 = vpack.c.bf16 %v30_v28, %v22_v27 }
  0x21   :  { %898 = vmatpush3.bf16.msra.mxu1 %v998_v31  ;;  %911 = vmatprep.subr.bf16.mxu0 %v999_v44  ;;  %v27_v31 = vld [vmem:[%s1355_s0 + $0x60] sm:$0xff]  ;;  %v37_v44 = vld [vmem:[%s1355_s0 + $0xb0] sm:$0xff] }
  0x22   :  { %939 = vmatprep.subr.bf16.mxu1 %v1000_v45  ;;  %v51_v34 = vpack.c.bf16 %v27_v31, %v19_v29  ;;  %v45_v45 = vld [vmem:[%s1355_s0 + $0xf0] sm:$0xff] }
  0x23   :  { %615 = vmatmul.mubr.bf16.vlgmr.msra.gmra.mrb[0].mxu0 %v47_v40  ;;  %v46_v40 = vld [vmem:[%s1355_s0 + $0xf8] sm:$0xff] }
  0x24   :  { %664 = vmatmul.mubr.bf16.vlgmr.msra.gmra.mrb[0].mxu1 %v49_v43  ;;  %912 = vmatpush3.bf16.msra.mxu0 %v1001_v46  ;;  %v62_v41 = vpack.c.bf16 %v46_v40, %v38_v38  ;;  %v43_v43 = vld [vmem:[%s1355_s0 + $0xe0] sm:$0xff] }
  0x25   :  { %940 = vmatpush3.bf16.msra.mxu1 %v1002_v47  ;;  %913 = vmatprep.subr.bf16.mxu0 %v1003_v48  ;;  %v59_v46 = vpack.c.bf16 %v43_v43, %v35_v42  ;;  %v61_v47 = vpack.c.bf16 %v45_v45, %v37_v44 }
  0x26   :  { %941 = vmatprep.subr.bf16.mxu1 %v1004_v49  ;;  %622 = vmatprep.mubr.bf16.mxu0 %v56_v2 }
  0x27   :  { %671 = vmatprep.mubr.bf16.mxu1 %v58_v13 }
  0x28   :  { %914 = vmatpush3.bf16.msra.mxu0 %v1005_v50  ;;  %v790_v50 = vld [vmem:[%s1356_s2] ss:$0 sm:$0xff] }
  0x29   :  { %942 = vmatpush3.bf16.msra.mxu1 %v1006_v51  ;;  %915 = vmatprep.subr.bf16.mxu0 %v1007_v52 }
  0x2a   :  { %943 = vmatprep.subr.bf16.mxu1 %v1008_v53 }
  0x2b   :  { %623 = vmatmul.mubr.bf16.gmra.mrb[4].mxu0 %v55_v7 }
  0x2c   :  { %916 = vmatpush3.bf16.msra.mxu0 %v1009_v54  ;;  %672 = vmatmul.mubr.bf16.gmra.mrb[4].mxu1 %v57_v15 }
  0x2d   :  { %944 = vmatpush3.bf16.msra.mxu1 %v1010_v55  ;;  %917 = vmatprep.subr.bf16.mxu0 %v1011_v56 }
  0x2e   :  { %945 = vmatprep.subr.bf16.mxu1 %v1012_v57  ;;  %712 = vmatprep.mubr.bf16.mxu0 %v52_v26 }
  0x2f   :  { %761 = vmatprep.mubr.bf16.mxu1 %v54_v30 }
  0x30   :  { %918 = vmatpush3.bf16.msra.mxu0 %v1013_v58 }
  0x31   :  { %946 = vmatpush3.bf16.msra.mxu1 %v1014_v59  ;;  %919 = vmatprep.subr.bf16.mxu0 %v1015_v60 }
  0x32   :  { %947 = vmatprep.subr.bf16.mxu1 %v1016_v61 }
  0x34   :  { %920 = vmatpush3.bf16.msra.mxu0 %v1017_v62 }
  0x35   :  { %948 = vmatpush3.bf16.msra.mxu1 %v1018_v63  ;;  %921 = vmatprep.subr.bf16.mxu0 %v1019_v3 }
  0x36   :  { %949 = vmatprep.subr.bf16.mxu1 %v1020_v4 }
  0x38   :  { %922 = vmatpush3.bf16.msra.mxu0 %v1021_v8 }
  0x39   :  { %950 = vmatpush3.bf16.msra.mxu1 %v1022_v9  ;;  %923 = vmatprep.subr.bf16.mxu0 %v1023_v16 }
  0x3a   :  { %951 = vmatprep.subr.bf16.mxu1 %v1024_v17 }
  0x3c   :  { %924 = vmatpush3.bf16.msra.mxu0 %v1025_v18 }
  0x3d   :  { %952 = vmatpush3.bf16.msra.mxu1 %v1026_v19  ;;  %925 = vmatprep.subr.bf16.mxu0 %v1027_v20 }
  0x3e   :  { %953 = vmatprep.subr.bf16.mxu1 %v1028_v21 }
  0x40   :  { %926 = vmatpush3.bf16.msra.mxu0 %v1029_v22 }
  0x41   :  { %954 = vmatpush3.bf16.msra.mxu1 %v1030_v23 }
  0x43   :  { %713 = vmatmul.mubr.bf16.vlgmr.msra.gmra.mrb[8].mxu0 %v51_v34 }
  0x44   :  { %762 = vmatmul.mubr.bf16.vlgmr.msra.gmra.mrb[8].mxu1 %v53_v35  ;;  %720 = vmatprep.mubr.bf16.mxu0 %v60_v39 }
  0x45   :  { %769 = vmatprep.mubr.bf16.mxu1 %v62_v41 }
  0x4b   :  { %721 = vmatmul.mubr.bf16.gmra.mrb[12].mxu0 %v59_v46 }
  0x4c   :  { %770 = vmatmul.mubr.bf16.gmra.mrb[12].mxu1 %v61_v47 }
  0xf6   :  { %v871_v48 = vpop.f32.mrb[0].mxu0 }
  0xf7   :  { %v899_v49 = vpop.f32.mrb[0].mxu1  ;;  %v872_v51 = vpop.f32.mrb[1].mxu0 }
  0xf8   :  { %v873_v52 = vadd.f32 %v872_v51, %v871_v48  ;;  %v900_v53 = vpop.f32.mrb[1].mxu1  ;;  %v874_v54 = vpop.f32.mrb[2].mxu0 }
  0xf9   :  { %v901_v55 = vadd.f32 %v900_v53, %v899_v49  ;;  %v902_v56 = vpop.f32.mrb[2].mxu1  ;;  %v875_v57 = vpop.f32.mrb[3].mxu0 }
  0xfa   :  { %v617_v58 = vadd.f32 %v873_v52, %v790_v50  ;;  %v876_v59 = vadd.f32 %v875_v57, %v874_v54  ;;  %v903_v60 = vpop.f32.mrb[3].mxu1 }
  0xfb   :  { %v904_v61 = vadd.f32 %v903_v60, %v902_v56 }
  0xfc   :  { %v666_v62 = vadd.f32 %v901_v55, %v617_v58  ;;  %v620_v63 = vadd.f32 %v876_v59, %v790_v50 }
  0xfe   :  { %v669_v0 = vadd.f32 %v904_v61, %v620_v63  ;;  %v877_v1 = vpop.f32.mrb[4].mxu0 }
  0xff   :  { %v878_v2 = vpop.f32.mrb[5].mxu0  ;;  %v905_v7 = vpop.f32.mrb[4].mxu1 }
 0x100   :  { %v879_v3 = vadd.f32 %v878_v2, %v877_v1  ;;  %v880_v4 = vpop.f32.mrb[6].mxu0  ;;  %v906_v9 = vpop.f32.mrb[5].mxu1 }
 0x101   :  { %v881_v5 = vpop.f32.mrb[7].mxu0  ;;  %v907_v11 = vadd.f32 %v906_v9, %v905_v7  ;;  %v908_v12 = vpop.f32.mrb[6].mxu1 }
 0x102   :  { %v625_v6 = vadd.f32 %v879_v3, %v790_v50  ;;  %v882_v8 = vadd.f32 %v881_v5, %v880_v4  ;;  %v909_v13 = vpop.f32.mrb[7].mxu1 }
 0x103   :  { %v910_v15 = vadd.f32 %v909_v13, %v908_v12 }
 0x104   :  { %v628_v10 = vadd.f32 %v882_v8, %v790_v50  ;;  %v674_v14 = vadd.f32 %v907_v11, %v625_v6 }
 0x106   :  { %v677_v16 = vadd.f32 %v910_v15, %v628_v10 }
 0x116   :  { %v927_v17 = vpop.f32.mrb[8].mxu0 }
 0x117   :  { %v955_v18 = vpop.f32.mrb[8].mxu1  ;;  %v928_v19 = vpop.f32.mrb[9].mxu0 }
 0x118   :  { %v956_v20 = vpop.f32.mrb[9].mxu1  ;;  %v929_v21 = vadd.f32 %v928_v19, %v927_v17  ;;  %v930_v23 = vpop.f32.mrb[10].mxu0 }
 0x119   :  { %v957_v22 = vadd.f32 %v956_v20, %v955_v18  ;;  %v958_v24 = vpop.f32.mrb[10].mxu1  ;;  %v931_v25 = vpop.f32.mrb[11].mxu0 }
 0x11a   :  { %v959_v26 = vpop.f32.mrb[11].mxu1  ;;  %v715_v27 = vadd.f32 %v929_v21, %v666_v62  ;;  %v932_v28 = vadd.f32 %v931_v25, %v930_v23 }
 0x11b   :  { %v960_v29 = vadd.f32 %v959_v26, %v958_v24 }
 0x11c   :  { %v764_v30 = vadd.f32 %v957_v22, %v715_v27  ;;  %v718_v31 = vadd.f32 %v932_v28, %v669_v0 }
 0x11e   :  { %v778_v32 = vmax.f32 %v764_v30, 0.0  ;;  %v767_v33 = vadd.f32 %v960_v29, %v718_v31  ;;  %v933_v34 = vpop.f32.mrb[12].mxu0 }
 0x11f   :  { %v961_v35 = vpop.f32.mrb[12].mxu1  ;;  %v934_v36 = vpop.f32.mrb[13].mxu0 }
 0x120   :  { %v962_v37 = vpop.f32.mrb[13].mxu1  ;;  %782 = vst [vmem:[%s1357_s3] sm:$0xff] %v778_v32  ;;  %v779_v38 = vmax.f32 %v767_v33, 0.0  ;;  %v935_v39 = vadd.f32 %v934_v36, %v933_v34  ;;  %v936_v41 = vpop.f32.mrb[14].mxu0 }
 0x121   :  { %v963_v40 = vadd.f32 %v962_v37, %v961_v35  ;;  %v964_v42 = vpop.f32.mrb[14].mxu1  ;;  %v937_v43 = vpop.f32.mrb[15].mxu0 }
 0x122   :  { %v965_v44 = vpop.f32.mrb[15].mxu1  ;;  %783 = vst [vmem:[%s1357_s3 + $0x8] sm:$0xff] %v779_v38  ;;  %v723_v45 = vadd.f32 %v935_v39, %v674_v14  ;;  %v938_v46 = vadd.f32 %v937_v43, %v936_v41 }
 0x123   :  { %v966_v47 = vadd.f32 %v965_v44, %v964_v42 }
 0x124   :  { %v772_v48 = vadd.f32 %v963_v40, %v723_v45  ;;  %v726_v49 = vadd.f32 %v938_v46, %v677_v16 }
 0x126   :  { %v780_v50 = vmax.f32 %v772_v48, 0.0  ;;  %v775_v51 = vadd.f32 %v966_v47, %v726_v49 }
 0x128   :  { %784 = vst [vmem:[%s1357_s3 + $0x10] sm:$0xff] %v780_v50  ;;  %v781_v52 = vmax.f32 %v775_v51, 0.0 }
 0x12a   :  { %785 = vst [vmem:[%s1357_s3 + $0x18] sm:$0xff] %v781_v52 }

// kernel: forward.10
= control target key start
LH: loop header
LB: loop body
LE: loop exit
PB: predicated region body
PF: predicated region fallthrough
CT: control target
= control target key end

     0   :  { %s3443_s1 = inlined_call_operand.vmem [shape: bf16[2048,256], index: 1, kind: input, shape index: {}]   ;;  %s3444_s0 = inlined_call_operand.vmem [shape: f32[8,2048], index: 0, kind: input, shape index: {}]   ;;  %s3445_s2 = inlined_call_operand.vmem [shape: f32[1,256], index: 2, kind: input, shape index: {}]   ;;  %s3446_s3 = inlined_call_operand.vmem [shape: f32[8,256], index: 3, kind: output, shape index: {}]  }
   0x1   :  { %v2214_v0 = vld [vmem:[%s3443_s1 + $0x4] ss:$8 sps:$4 sm:$0xff]   ;;  %v2218_v2 = vld [vmem:[%s3443_s1] ss:$8 sps:$4 sm:$0xff]   ;;  %v2220_v4 = vld [vmem:[%s3443_s1 + $0x14] ss:$8 sps:$4 sm:$0xff]  }
   0x2   :  { %v2216_v1 = vld [vmem:[%s3443_s1 + $0x404] ss:$8 sps:$4 sm:$0xff]   ;;  %1594 = vmatprep.subr.bf16.mxu1 %v2214_v0  ;;  %v2219_v3 = vld [vmem:[%s3443_s1 + $0x400] ss:$8 sps:$4 sm:$0xff]   ;;  %v2222_v5 = vld [vmem:[%s3443_s1 + $0x414] ss:$8 sps:$4 sm:$0xff]  }
   0x3   :  { %1758 = vmatprep.subr.bf16.mxu0 %v2216_v1  ;;  %1595 = vmatpush1.bf16.msra.mxu1 %v2218_v2  ;;  %v2224_v6 = vld [vmem:[%s3443_s1 + $0x10] ss:$8 sps:$4 sm:$0xff]   ;;  %v2226_v8 = vld [vmem:[%s3443_s1 + $0x24] ss:$8 sps:$4 sm:$0xff]   ;;  %v2230_v10 = vld [vmem:[%s3443_s1 + $0x20] ss:$8 sps:$4 sm:$0xff]  }
   0x4   :  { %1759 = vmatpush1.bf16.msra.mxu0 %v2219_v3  ;;  %1596 = vmatprep.subr.bf16.mxu1 %v2220_v4  ;;  %v2225_v7 = vld [vmem:[%s3443_s1 + $0x410] ss:$8 sps:$4 sm:$0xff]   ;;  %v2228_v9 = vld [vmem:[%s3443_s1 + $0x424] ss:$8 sps:$4 sm:$0xff]   ;;  %v2231_v11 = vld [vmem:[%s3443_s1 + $0x420] ss:$8 sps:$4 sm:$0xff]  }
   0x5   :  { %1760 = vmatprep.subr.bf16.mxu0 %v2222_v5  ;;  %v2232_v12 = vld [vmem:[%s3443_s1 + $0x34] ss:$8 sps:$4 sm:$0xff]   ;;  %v2236_v14 = vld [vmem:[%s3443_s1 + $0x30] ss:$8 sps:$4 sm:$0xff]   ;;  %v2238_v16 = vld [vmem:[%s3443_s1 + $0x44] ss:$8 sps:$4 sm:$0xff]  }
   0x6   :  { %v2234_v13 = vld [vmem:[%s3443_s1 + $0x434] ss:$8 sps:$4 sm:$0xff]   ;;  %v2237_v15 = vld [vmem:[%s3443_s1 + $0x430] ss:$8 sps:$4 sm:$0xff]   ;;  %v2240_v17 = vld [vmem:[%s3443_s1 + $0x444] ss:$8 sps:$4 sm:$0xff]  }
   0x7   :  { %1597 = vmatpush1.bf16.msra.mxu1 %v2224_v6  ;;  %v2242_v18 = vld [vmem:[%s3443_s1 + $0x40] ss:$8 sps:$4 sm:$0xff]   ;;  %v2244_v20 = vld [vmem:[%s3443_s1 + $0x54] ss:$8 sps:$4 sm:$0xff]   ;;  %v2248_v22 = vld [vmem:[%s3443_s1 + $0x50] ss:$8 sps:$4 sm:$0xff]  }
   0x8   :  { %1761 = vmatpush1.bf16.msra.mxu0 %v2225_v7  ;;  %1598 = vmatprep.subr.bf16.mxu1 %v2226_v8  ;;  %v2243_v19 = vld [vmem:[%s3443_s1 + $0x440] ss:$8 sps:$4 sm:$0xff]   ;;  %v2246_v21 = vld [vmem:[%s3443_s1 + $0x454] ss:$8 sps:$4 sm:$0xff]   ;;  %v2249_v23 = vld [vmem:[%s3443_s1 + $0x450] ss:$8 sps:$4 sm:$0xff]  }
   0x9   :  { %1762 = vmatprep.subr.bf16.mxu0 %v2228_v9  ;;  %v2250_v24 = vld [vmem:[%s3443_s1 + $0x64] ss:$8 sps:$4 sm:$0xff]   ;;  %v2254_v26 = vld [vmem:[%s3443_s1 + $0x60] ss:$8 sps:$4 sm:$0xff]   ;;  %v2256_v28 = vld [vmem:[%s3443_s1 + $0x74] ss:$8 sps:$4 sm:$0xff]  }
   0xa   :  { %v2252_v25 = vld [vmem:[%s3443_s1 + $0x464] ss:$8 sps:$4 sm:$0xff]   ;;  %v2255_v27 = vld [vmem:[%s3443_s1 + $0x460] ss:$8 sps:$4 sm:$0xff]   ;;  %v2258_v29 = vld [vmem:[%s3443_s1 + $0x474] ss:$8 sps:$4 sm:$0xff]  }
   0xb   :  { %1599 = vmatpush1.bf16.msra.mxu1 %v2230_v10  ;;  %v2260_v30 = vld [vmem:[%s3443_s1 + $0x70] ss:$8 sps:$4 sm:$0xff]   ;;  %v2262_v32 = vld [vmem:[%s3443_s1 + $0x84] ss:$8 sps:$4 sm:$0xff]   ;;  %v2266_v34 = vld [vmem:[%s3443_s1 + $0x80] ss:$8 sps:$4 sm:$0xff]  }
   0xc   :  { %1763 = vmatpush1.bf16.msra.mxu0 %v2231_v11  ;;  %1600 = vmatprep.subr.bf16.mxu1 %v2232_v12  ;;  %v2261_v31 = vld [vmem:[%s3443_s1 + $0x470] ss:$8 sps:$4 sm:$0xff]   ;;  %v2264_v33 = vld [vmem:[%s3443_s1 + $0x484] ss:$8 sps:$4 sm:$0xff]   ;;  %v2267_v35 = vld [vmem:[%s3443_s1 + $0x480] ss:$8 sps:$4 sm:$0xff]  }
   0xd   :  { %1764 = vmatprep.subr.bf16.mxu0 %v2234_v13  ;;  %v2268_v36 = vld [vmem:[%s3443_s1 + $0x94] ss:$8 sps:$4 sm:$0xff]   ;;  %v2272_v38 = vld [vmem:[%s3443_s1 + $0x90] ss:$8 sps:$4 sm:$0xff]   ;;  %v2274_v40 = vld [vmem:[%s3443_s1 + $0xa4] ss:$8 sps:$4 sm:$0xff]  }
   0xe   :  { %v2270_v37 = vld [vmem:[%s3443_s1 + $0x494] ss:$8 sps:$4 sm:$0xff]   ;;  %v2273_v39 = vld [vmem:[%s3443_s1 + $0x490] ss:$8 sps:$4 sm:$0xff]   ;;  %v2276_v41 = vld [vmem:[%s3443_s1 + $0x4a4] ss:$8 sps:$4 sm:$0xff]  }
   0xf   :  { %1601 = vmatpush1.bf16.msra.mxu1 %v2236_v14  ;;  %v2278_v42 = vld [vmem:[%s3443_s1 + $0xa0] ss:$8 sps:$4 sm:$0xff]   ;;  %v2280_v44 = vld [vmem:[%s3443_s1 + $0xb4] ss:$8 sps:$4 sm:$0xff]   ;;  %v2284_v47 = vld [vmem:[%s3443_s1 + $0xb0] ss:$8 sps:$4 sm:$0xff]  }
  0x10   :  { %1765 = vmatpush1.bf16.msra.mxu0 %v2237_v15  ;;  %1602 = vmatprep.subr.bf16.mxu1 %v2238_v16  ;;  %v2279_v43 = vld [vmem:[%s3443_s1 + $0x4a0] ss:$8 sps:$4 sm:$0xff]   ;;  %v2282_v45 = vld [vmem:[%s3443_s1 + $0x4b4] ss:$8 sps:$4 sm:$0xff]   ;;  %v2285_v49 = vld [vmem:[%s3443_s1 + $0x4b0] ss:$8 sps:$4 sm:$0xff]  }
  0x11   :  { %1766 = vmatprep.subr.bf16.mxu0 %v2240_v17  ;;  %v15_v46 = vld [vmem:[%s3444_s0 + $0x8] sm:$0xff]  ;;  %v2292_v56 = vld [vmem:[%s3443_s1 + $0xd4] ss:$8 sps:$4 sm:$0xff]   ;;  %v2296_v58 = vld [vmem:[%s3443_s1 + $0xd0] ss:$8 sps:$4 sm:$0xff]  }
  0x12   :  { %v31_v48 = vpack.c.bf16 %v15_v46, %v15_v46  ;;  %v23_v50 = vld [vmem:[%s3444_s0 + $0x48] sm:$0xff]  ;;  %v2294_v57 = vld [vmem:[%s3443_s1 + $0x4d4] ss:$8 sps:$4 sm:$0xff]   ;;  %v2297_v59 = vld [vmem:[%s3443_s1 + $0x4d0] ss:$8 sps:$4 sm:$0xff]  }
  0x13   :  { %1603 = vmatpush1.bf16.msra.mxu1 %v2242_v18  ;;  %v2286_v51 = vld [vmem:[%s3443_s1 + $0xc4] ss:$8 sps:$4 sm:$0xff]   ;;  %v39_v53 = vpack.c.bf16 %v23_v50, %v23_v50  ;;  %v2290_v54 = vld [vmem:[%s3443_s1 + $0xc0] ss:$8 sps:$4 sm:$0xff]   ;;  %v2304_v0 = vld [vmem:[%s3443_s1 + $0xf4] ss:$8 sps:$4 sm:$0xff]  }
  0x14   :  { %1767 = vmatpush1.bf16.msra.mxu0 %v2243_v19  ;;  %1604 = vmatprep.subr.bf16.mxu1 %v2244_v20  ;;  %v2288_v52 = vld [vmem:[%s3443_s1 + $0x4c4] ss:$8 sps:$4 sm:$0xff]   ;;  %v2291_v55 = vld [vmem:[%s3443_s1 + $0x4c0] ss:$8 sps:$4 sm:$0xff]   ;;  %v2306_v1 = vld [vmem:[%s3443_s1 + $0x4f4] ss:$8 sps:$4 sm:$0xff]  }
  0x15   :  { %1768 = vmatprep.subr.bf16.mxu0 %v2246_v21  ;;  %1626 = vmatprep.mubr.bf16.mxu1 %v31_v48  ;;  %v2298_v60 = vld [vmem:[%s3443_s1 + $0xe4] ss:$8 sps:$4 sm:$0xff]   ;;  %v2302_v62 = vld [vmem:[%s3443_s1 + $0xe0] ss:$8 sps:$4 sm:$0xff]   ;;  %v2308_v2 = vld [vmem:[%s3443_s1 + $0xf0] ss:$8 sps:$4 sm:$0xff]  }
  0x16   :  { %1790 = vmatprep.mubr.bf16.mxu0 %v39_v53  ;;  %v2300_v61 = vld [vmem:[%s3443_s1 + $0x4e4] ss:$8 sps:$4 sm:$0xff]   ;;  %v2303_v63 = vld [vmem:[%s3443_s1 + $0x4e0] ss:$8 sps:$4 sm:$0xff]   ;;  %v2309_v3 = vld [vmem:[%s3443_s1 + $0x4f0] ss:$8 sps:$4 sm:$0xff]  }
  0x17   :  { %1605 = vmatpush1.bf16.msra.mxu1 %v2248_v22  ;;  %v2312_v4 = vld [vmem:[%s3443_s1 + $0x104] ss:$8 sps:$4 sm:$0xff]   ;;  %v2310_v8 = vld [vmem:[%s3443_s1 + $0x100] ss:$8 sps:$4 sm:$0xff]   ;;  %v2318_v12 = vld [vmem:[%s3443_s1 + $0x114] ss:$8 sps:$4 sm:$0xff]  }
  0x18   :  { %1769 = vmatpush1.bf16.msra.mxu0 %v2249_v23  ;;  %1606 = vmatprep.subr.bf16.mxu1 %v2250_v24  ;;  %v14_v5 = vld [vmem:[%s3444_s0] sm:$0xff]  ;;  %v2321_v13 = vld [vmem:[%s3443_s1 + $0x514] ss:$8 sps:$4 sm:$0xff]   ;;  %v2316_v14 = vld [vmem:[%s3443_s1 + $0x110] ss:$8 sps:$4 sm:$0xff]  }
  0x19   :  { %1770 = vmatprep.subr.bf16.mxu0 %v2252_v25  ;;  %v22_v6 = vld [vmem:[%s3444_s0 + $0x40] sm:$0xff]  ;;  %v30_v10 = vpack.c.bf16 %v14_v5, %v14_v5  ;;  %v2319_v15 = vld [vmem:[%s3443_s1 + $0x510] ss:$8 sps:$4 sm:$0xff]   ;;  %v2330_v20 = vld [vmem:[%s3443_s1 + $0x134] ss:$8 sps:$4 sm:$0xff]  }
  0x1a   :  { %v2315_v7 = vld [vmem:[%s3443_s1 + $0x504] ss:$8 sps:$4 sm:$0xff]   ;;  %v2313_v9 = vld [vmem:[%s3443_s1 + $0x500] ss:$8 sps:$4 sm:$0xff]   ;;  %v38_v11 = vpack.c.bf16 %v22_v6, %v22_v6  ;;  %v2333_v21 = vld [vmem:[%s3443_s1 + $0x534] ss:$8 sps:$4 sm:$0xff]  }
  0x1b   :  { %1607 = vmatpush1.bf16.msra.mxu1 %v2254_v26  ;;  %v2324_v16 = vld [vmem:[%s3443_s1 + $0x124] ss:$8 sps:$4 sm:$0xff]   ;;  %v2322_v18 = vld [vmem:[%s3443_s1 + $0x120] ss:$8 sps:$4 sm:$0xff]   ;;  %v2328_v22 = vld [vmem:[%s3443_s1 + $0x130] ss:$8 sps:$4 sm:$0xff]  }
  0x1c   :  { %1771 = vmatpush1.bf16.msra.mxu0 %v2255_v27  ;;  %1608 = vmatprep.subr.bf16.mxu1 %v2256_v28  ;;  %v2327_v17 = vld [vmem:[%s3443_s1 + $0x524] ss:$8 sps:$4 sm:$0xff]   ;;  %v2325_v19 = vld [vmem:[%s3443_s1 + $0x520] ss:$8 sps:$4 sm:$0xff]   ;;  %v2331_v23 = vld [vmem:[%s3443_s1 + $0x530] ss:$8 sps:$4 sm:$0xff]  }
  0x1d   :  { %1772 = vmatprep.subr.bf16.mxu0 %v2258_v29  ;;  %v2336_v24 = vld [vmem:[%s3443_s1 + $0x144] ss:$8 sps:$4 sm:$0xff]   ;;  %v2334_v26 = vld [vmem:[%s3443_s1 + $0x140] ss:$8 sps:$4 sm:$0xff]   ;;  %v2342_v28 = vld [vmem:[%s3443_s1 + $0x154] ss:$8 sps:$4 sm:$0xff]  }
  0x1e   :  { %v2339_v25 = vld [vmem:[%s3443_s1 + $0x544] ss:$8 sps:$4 sm:$0xff]   ;;  %v2337_v27 = vld [vmem:[%s3443_s1 + $0x540] ss:$8 sps:$4 sm:$0xff]   ;;  %v2345_v29 = vld [vmem:[%s3443_s1 + $0x554] ss:$8 sps:$4 sm:$0xff]  }
  0x1f   :  { %1609 = vmatpush1.bf16.msra.mxu1 %v2260_v30  ;;  %v2340_v30 = vld [vmem:[%s3443_s1 + $0x150] ss:$8 sps:$4 sm:$0xff]   ;;  %v2358_v46 = vld [vmem:[%s3443_s1 + $0x180] ss:$8 sps:$4 sm:$0xff]   ;;  %v2366_v48 = vld [vmem:[%s3443_s1 + $0x194] ss:$8 sps:$4 sm:$0xff]  }
  0x20   :  { %1773 = vmatpush1.bf16.msra.mxu0 %v2261_v31  ;;  %1610 = vmatprep.subr.bf16.mxu1 %v2262_v32  ;;  %v2343_v31 = vld [vmem:[%s3443_s1 + $0x550] ss:$8 sps:$4 sm:$0xff]   ;;  %v2348_v32 = vld [vmem:[%s3443_s1 + $0x164] ss:$8 sps:$4 sm:$0xff]   ;;  %v2394_v6 = vld [vmem:[%s3443_s1 + $0x1e0] ss:$8 sps:$4 sm:$0xff]  }
  0x21   :  { %1774 = vmatprep.subr.bf16.mxu0 %v2264_v33  ;;  %v2351_v33 = vld [vmem:[%s3443_s1 + $0x564] ss:$8 sps:$4 sm:$0xff]   ;;  %v2364_v50 = vld [vmem:[%s3443_s1 + $0x190] ss:$8 sps:$4 sm:$0xff]  }
  0x22   :  { %v2375_v53 = vld [vmem:[%s3443_s1 + $0x5a4] ss:$8 sps:$4 sm:$0xff]  }
  0x23   :  { %1611 = vmatpush1.bf16.msra.mxu1 %v2266_v34  ;;  %v17_v34 = vld [vmem:[%s3444_s0 + $0x18] sm:$0xff]  ;;  %v2399_v5 = vld [vmem:[%s3443_s1 + $0x5e4] ss:$8 sps:$4 sm:$0xff]  }
  0x24   :  { %1775 = vmatpush1.bf16.msra.mxu0 %v2267_v35  ;;  %1612 = vmatprep.subr.bf16.mxu1 %v2268_v36  ;;  %v2346_v35 = vld [vmem:[%s3443_s1 + $0x160] ss:$8 sps:$4 sm:$0xff]   ;;  %v33_v36 = vpack.c.bf16 %v17_v34, %v17_v34  ;;  %v2424_v34 = vld [vmem:[%s3443_s1 + $0x230] ss:$8 sps:$4 sm:$0xff]  }
  0x25   :  { %1776 = vmatprep.subr.bf16.mxu0 %v2270_v37  ;;  %v2349_v37 = vld [vmem:[%s3443_s1 + $0x560] ss:$8 sps:$4 sm:$0xff]  }
  0x27   :  { %1613 = vmatpush1.bf16.msra.mxu1 %v2272_v38  ;;  %v25_v38 = vld [vmem:[%s3444_s0 + $0x58] sm:$0xff] }
  0x28   :  { %1777 = vmatpush1.bf16.msra.mxu0 %v2273_v39  ;;  %1614 = vmatprep.subr.bf16.mxu1 %v2274_v40  ;;  %v2354_v39 = vld [vmem:[%s3443_s1 + $0x174] ss:$8 sps:$4 sm:$0xff]  }
  0x29   :  { %1778 = vmatprep.subr.bf16.mxu0 %v2276_v41  ;;  %v2357_v40 = vld [vmem:[%s3443_s1 + $0x574] ss:$8 sps:$4 sm:$0xff]   ;;  %v41_v41 = vpack.c.bf16 %v25_v38, %v25_v38  ;;  %v2430_v38 = vld [vmem:[%s3443_s1 + $0x240] ss:$8 sps:$4 sm:$0xff]  }
  0x2b   :  { %1615 = vmatpush1.bf16.msra.mxu1 %v2278_v42  ;;  %v2352_v42 = vld [vmem:[%s3443_s1 + $0x170] ss:$8 sps:$4 sm:$0xff]  }
  0x2c   :  { %1779 = vmatpush1.bf16.msra.mxu0 %v2279_v43  ;;  %1616 = vmatprep.subr.bf16.mxu1 %v2280_v44  ;;  %v2355_v43 = vld [vmem:[%s3443_s1 + $0x570] ss:$8 sps:$4 sm:$0xff]   ;;  %v2360_v44 = vld [vmem:[%s3443_s1 + $0x184] ss:$8 sps:$4 sm:$0xff]  }
  0x2d   :  { %1780 = vmatprep.subr.bf16.mxu0 %v2282_v45  ;;  %v2363_v45 = vld [vmem:[%s3443_s1 + $0x584] ss:$8 sps:$4 sm:$0xff]  }
  0x2f   :  { %1617 = vmatpush1.bf16.msra.mxu1 %v2284_v47  ;;  %v2361_v47 = vld [vmem:[%s3443_s1 + $0x580] ss:$8 sps:$4 sm:$0xff]  }
  0x30   :  { %1781 = vmatpush1.bf16.msra.mxu0 %v2285_v49  ;;  %1618 = vmatprep.subr.bf16.mxu1 %v2286_v51  ;;  %v2369_v49 = vld [vmem:[%s3443_s1 + $0x594] ss:$8 sps:$4 sm:$0xff]   ;;  %v2367_v51 = vld [vmem:[%s3443_s1 + $0x590] ss:$8 sps:$4 sm:$0xff]  }
  0x31   :  { %1782 = vmatprep.subr.bf16.mxu0 %v2288_v52  ;;  %v2372_v52 = vld [vmem:[%s3443_s1 + $0x1a4] ss:$8 sps:$4 sm:$0xff]  }
  0x33   :  { %1619 = vmatpush1.bf16.msra.mxu1 %v2290_v54  ;;  %v2370_v54 = vld [vmem:[%s3443_s1 + $0x1a0] ss:$8 sps:$4 sm:$0xff]  }
  0x34   :  { %1783 = vmatpush1.bf16.msra.mxu0 %v2291_v55  ;;  %1620 = vmatprep.subr.bf16.mxu1 %v2292_v56  ;;  %v2373_v55 = vld [vmem:[%s3443_s1 + $0x5a0] ss:$8 sps:$4 sm:$0xff]   ;;  %v2378_v56 = vld [vmem:[%s3443_s1 + $0x1b4] ss:$8 sps:$4 sm:$0xff]  }
  0x35   :  { %1784 = vmatprep.subr.bf16.mxu0 %v2294_v57  ;;  %v2381_v57 = vld [vmem:[%s3443_s1 + $0x5b4] ss:$8 sps:$4 sm:$0xff]  }
  0x37   :  { %1621 = vmatpush1.bf16.msra.mxu1 %v2296_v58  ;;  %v2376_v58 = vld [vmem:[%s3443_s1 + $0x1b0] ss:$8 sps:$4 sm:$0xff]  }
  0x38   :  { %1785 = vmatpush1.bf16.msra.mxu0 %v2297_v59  ;;  %1622 = vmatprep.subr.bf16.mxu1 %v2298_v60  ;;  %v2379_v59 = vld [vmem:[%s3443_s1 + $0x5b0] ss:$8 sps:$4 sm:$0xff]   ;;  %v2384_v60 = vld [vmem:[%s3443_s1 + $0x1c4] ss:$8 sps:$4 sm:$0xff]  }
  0x39   :  { %1786 = vmatprep.subr.bf16.mxu0 %v2300_v61  ;;  %v2387_v61 = vld [vmem:[%s3443_s1 + $0x5c4] ss:$8 sps:$4 sm:$0xff]  }
  0x3b   :  { %1623 = vmatpush1.bf16.msra.mxu1 %v2302_v62  ;;  %v2382_v62 = vld [vmem:[%s3443_s1 + $0x1c0] ss:$8 sps:$4 sm:$0xff]  }
  0x3c   :  { %1787 = vmatpush1.bf16.msra.mxu0 %v2303_v63  ;;  %1624 = vmatprep.subr.bf16.mxu1 %v2304_v0  ;;  %v2385_v63 = vld [vmem:[%s3443_s1 + $0x5c0] ss:$8 sps:$4 sm:$0xff]   ;;  %v2390_v0 = vld [vmem:[%s3443_s1 + $0x1d4] ss:$8 sps:$4 sm:$0xff]  }
  0x3d   :  { %1788 = vmatprep.subr.bf16.mxu0 %v2306_v1  ;;  %v2393_v1 = vld [vmem:[%s3443_s1 + $0x5d4] ss:$8 sps:$4 sm:$0xff]  }
  0x3f   :  { %1625 = vmatpush1.bf16.msra.mxu1 %v2308_v2  ;;  %v2388_v2 = vld [vmem:[%s3443_s1 + $0x1d0] ss:$8 sps:$4 sm:$0xff]  }
  0x40   :  { %1789 = vmatpush1.bf16.msra.mxu0 %v2309_v3  ;;  %1635 = vmatprep.subr.bf16.mxu1 %v2312_v4  ;;  %v2391_v3 = vld [vmem:[%s3443_s1 + $0x5d0] ss:$8 sps:$4 sm:$0xff]   ;;  %v2396_v4 = vld [vmem:[%s3443_s1 + $0x1e4] ss:$8 sps:$4 sm:$0xff]  }
  0x41   :  { %1799 = vmatprep.subr.bf16.mxu0 %v2315_v7  ;;  %v2397_v7 = vld [vmem:[%s3443_s1 + $0x5e0] ss:$8 sps:$4 sm:$0xff]  }
  0x42   :  { %1627 = vmatmul.mubr.bf16.vlgmr.msra.gmra.mrb[0].mxu1 %v30_v10  ;;  %v2400_v10 = vld [vmem:[%s3443_s1 + $0x1f0] ss:$8 sps:$4 sm:$0xff]  }
  0x43   :  { %1791 = vmatmul.mubr.bf16.vlgmr.msra.gmra.mrb[0].mxu0 %v38_v11  ;;  %1636 = vmatpush1.bf16.msra.mxu1 %v2310_v8  ;;  %v2402_v8 = vld [vmem:[%s3443_s1 + $0x1f4] ss:$8 sps:$4 sm:$0xff]   ;;  %v2403_v11 = vld [vmem:[%s3443_s1 + $0x5f0] ss:$8 sps:$4 sm:$0xff]  }
  0x44   :  { %1800 = vmatpush1.bf16.msra.mxu0 %v2313_v9  ;;  %1637 = vmatprep.subr.bf16.mxu1 %v2318_v12  ;;  %v2405_v9 = vld [vmem:[%s3443_s1 + $0x5f4] ss:$8 sps:$4 sm:$0xff]   ;;  %v2408_v12 = vld [vmem:[%s3443_s1 + $0x204] ss:$8 sps:$4 sm:$0xff]  }
  0x45   :  { %1801 = vmatprep.subr.bf16.mxu0 %v2321_v13  ;;  %1667 = vmatprep.mubr.bf16.mxu1 %v33_v36  ;;  %v16_v13 = vld [vmem:[%s3444_s0 + $0x10] sm:$0xff]  ;;  %v2432_v36 = vld [vmem:[%s3443_s1 + $0x244] ss:$8 sps:$4 sm:$0xff]  }
  0x46   :  { %1831 = vmatprep.mubr.bf16.mxu0 %v41_v41  ;;  %v2441_v41 = vld [vmem:[%s3443_s1 + $0x654] ss:$8 sps:$4 sm:$0xff]  }
  0x47   :  { %1638 = vmatpush1.bf16.msra.mxu1 %v2316_v14  ;;  %v24_v14 = vld [vmem:[%s3444_s0 + $0x50] sm:$0xff] }
  0x48   :  { %1802 = vmatpush1.bf16.msra.mxu0 %v2319_v15  ;;  %1639 = vmatprep.subr.bf16.mxu1 %v2324_v16  ;;  %v2411_v15 = vld [vmem:[%s3443_s1 + $0x604] ss:$8 sps:$4 sm:$0xff]   ;;  %v2406_v16 = vld [vmem:[%s3443_s1 + $0x200] ss:$8 sps:$4 sm:$0xff]  }
  0x49   :  { %1803 = vmatprep.subr.bf16.mxu0 %v2327_v17  ;;  %v2409_v17 = vld [vmem:[%s3443_s1 + $0x600] ss:$8 sps:$4 sm:$0xff]  }
  0x4b   :  { %1640 = vmatpush1.bf16.msra.mxu1 %v2322_v18  ;;  %v32_v18 = vpack.c.bf16 %v16_v13, %v16_v13  ;;  %v2495_v13 = vld [vmem:[%s3443_s1 + $0x6e4] ss:$8 sps:$4 sm:$0xff]  }
  0x4c   :  { %1804 = vmatpush1.bf16.msra.mxu0 %v2325_v19  ;;  %1641 = vmatprep.subr.bf16.mxu1 %v2330_v20  ;;  %v40_v19 = vpack.c.bf16 %v24_v14, %v24_v14  ;;  %v2414_v20 = vld [vmem:[%s3443_s1 + $0x214] ss:$8 sps:$4 sm:$0xff]   ;;  %v2490_v14 = vld [vmem:[%s3443_s1 + $0x2e0] ss:$8 sps:$4 sm:$0xff]  }
  0x4d   :  { %1805 = vmatprep.subr.bf16.mxu0 %v2333_v21  ;;  %v2417_v21 = vld [vmem:[%s3443_s1 + $0x614] ss:$8 sps:$4 sm:$0xff]  }
  0x4f   :  { %1642 = vmatpush1.bf16.msra.mxu1 %v2328_v22  ;;  %v19_v22 = vld [vmem:[%s3444_s0 + $0x28] sm:$0xff] }
  0x50   :  { %1806 = vmatpush1.bf16.msra.mxu0 %v2331_v23  ;;  %1643 = vmatprep.subr.bf16.mxu1 %v2336_v24  ;;  %v2412_v23 = vld [vmem:[%s3443_s1 + $0x210] ss:$8 sps:$4 sm:$0xff]   ;;  %v35_v24 = vpack.c.bf16 %v19_v22, %v19_v22  ;;  %v2504_v22 = vld [vmem:[%s3443_s1 + $0x304] ss:$8 sps:$4 sm:$0xff]  }
  0x51   :  { %1807 = vmatprep.subr.bf16.mxu0 %v2339_v25  ;;  %v2415_v25 = vld [vmem:[%s3443_s1 + $0x610] ss:$8 sps:$4 sm:$0xff]  }
  0x53   :  { %1644 = vmatpush1.bf16.msra.mxu1 %v2334_v26  ;;  %v27_v26 = vld [vmem:[%s3444_s0 + $0x68] sm:$0xff] }
  0x54   :  { %1808 = vmatpush1.bf16.msra.mxu0 %v2337_v27  ;;  %1645 = vmatprep.subr.bf16.mxu1 %v2342_v28  ;;  %v2420_v27 = vld [vmem:[%s3443_s1 + $0x224] ss:$8 sps:$4 sm:$0xff]  }
  0x55   :  { %1809 = vmatprep.subr.bf16.mxu0 %v2345_v29  ;;  %v2423_v28 = vld [vmem:[%s3443_s1 + $0x624] ss:$8 sps:$4 sm:$0xff]   ;;  %v43_v29 = vpack.c.bf16 %v27_v26, %v27_v26  ;;  %v21_v26 = vld [vmem:[%s3444_s0 + $0x38] sm:$0xff] }
  0x57   :  { %1646 = vmatpush1.bf16.msra.mxu1 %v2340_v30  ;;  %v2418_v30 = vld [vmem:[%s3443_s1 + $0x220] ss:$8 sps:$4 sm:$0xff]  }
  0x58   :  { %1810 = vmatpush1.bf16.msra.mxu0 %v2343_v31  ;;  %1647 = vmatprep.subr.bf16.mxu1 %v2348_v32  ;;  %v2421_v31 = vld [vmem:[%s3443_s1 + $0x620] ss:$8 sps:$4 sm:$0xff]   ;;  %v2426_v32 = vld [vmem:[%s3443_s1 + $0x234] ss:$8 sps:$4 sm:$0xff]  }
  0x59   :  { %1811 = vmatprep.subr.bf16.mxu0 %v2351_v33  ;;  %v2429_v33 = vld [vmem:[%s3443_s1 + $0x634] ss:$8 sps:$4 sm:$0xff]  }
  0x5b   :  { %1648 = vmatpush1.bf16.msra.mxu1 %v2346_v35  ;;  %v2427_v35 = vld [vmem:[%s3443_s1 + $0x630] ss:$8 sps:$4 sm:$0xff]  }
  0x5c   :  { %1812 = vmatpush1.bf16.msra.mxu0 %v2349_v37  ;;  %1649 = vmatprep.subr.bf16.mxu1 %v2354_v39  ;;  %v2435_v37 = vld [vmem:[%s3443_s1 + $0x644] ss:$8 sps:$4 sm:$0xff]   ;;  %v2433_v39 = vld [vmem:[%s3443_s1 + $0x640] ss:$8 sps:$4 sm:$0xff]  }
  0x5d   :  { %1813 = vmatprep.subr.bf16.mxu0 %v2357_v40  ;;  %v2438_v40 = vld [vmem:[%s3443_s1 + $0x254] ss:$8 sps:$4 sm:$0xff]  }
  0x5f   :  { %1650 = vmatpush1.bf16.msra.mxu1 %v2352_v42  ;;  %v2436_v42 = vld [vmem:[%s3443_s1 + $0x250] ss:$8 sps:$4 sm:$0xff]  }
  0x60   :  { %1814 = vmatpush1.bf16.msra.mxu0 %v2355_v43  ;;  %1651 = vmatprep.subr.bf16.mxu1 %v2360_v44  ;;  %v2439_v43 = vld [vmem:[%s3443_s1 + $0x650] ss:$8 sps:$4 sm:$0xff]   ;;  %v2444_v44 = vld [vmem:[%s3443_s1 + $0x264] ss:$8 sps:$4 sm:$0xff]  }
  0x61   :  { %1815 = vmatprep.subr.bf16.mxu0 %v2363_v45  ;;  %v2447_v45 = vld [vmem:[%s3443_s1 + $0x664] ss:$8 sps:$4 sm:$0xff]  }
  0x63   :  { %1652 = vmatpush1.bf16.msra.mxu1 %v2358_v46  ;;  %v2442_v46 = vld [vmem:[%s3443_s1 + $0x260] ss:$8 sps:$4 sm:$0xff]  }
  0x64   :  { %1816 = vmatpush1.bf16.msra.mxu0 %v2361_v47  ;;  %1653 = vmatprep.subr.bf16.mxu1 %v2366_v48  ;;  %v2445_v47 = vld [vmem:[%s3443_s1 + $0x660] ss:$8 sps:$4 sm:$0xff]   ;;  %v2450_v48 = vld [vmem:[%s3443_s1 + $0x274] ss:$8 sps:$4 sm:$0xff]  }
  0x65   :  { %1817 = vmatprep.subr.bf16.mxu0 %v2369_v49  ;;  %v2453_v49 = vld [vmem:[%s3443_s1 + $0x674] ss:$8 sps:$4 sm:$0xff]  }
  0x67   :  { %1654 = vmatpush1.bf16.msra.mxu1 %v2364_v50  ;;  %v2448_v50 = vld [vmem:[%s3443_s1 + $0x270] ss:$8 sps:$4 sm:$0xff]  }
  0x68   :  { %1818 = vmatpush1.bf16.msra.mxu0 %v2367_v51  ;;  %1655 = vmatprep.subr.bf16.mxu1 %v2372_v52  ;;  %v2451_v51 = vld [vmem:[%s3443_s1 + $0x670] ss:$8 sps:$4 sm:$0xff]   ;;  %v2456_v52 = vld [vmem:[%s3443_s1 + $0x284] ss:$8 sps:$4 sm:$0xff]  }
  0x69   :  { %1819 = vmatprep.subr.bf16.mxu0 %v2375_v53  ;;  %v2459_v53 = vld [vmem:[%s3443_s1 + $0x684] ss:$8 sps:$4 sm:$0xff]  }
  0x6b   :  { %1656 = vmatpush1.bf16.msra.mxu1 %v2370_v54  ;;  %v2454_v54 = vld [vmem:[%s3443_s1 + $0x280] ss:$8 sps:$4 sm:$0xff]  }
  0x6c   :  { %1820 = vmatpush1.bf16.msra.mxu0 %v2373_v55  ;;  %1657 = vmatprep.subr.bf16.mxu1 %v2378_v56  ;;  %v2457_v55 = vld [vmem:[%s3443_s1 + $0x680] ss:$8 sps:$4 sm:$0xff]   ;;  %v2462_v56 = vld [vmem:[%s3443_s1 + $0x294] ss:$8 sps:$4 sm:$0xff]  }
  0x6d   :  { %1821 = vmatprep.subr.bf16.mxu0 %v2381_v57  ;;  %v2465_v57 = vld [vmem:[%s3443_s1 + $0x694] ss:$8 sps:$4 sm:$0xff]  }
  0x6f   :  { %1658 = vmatpush1.bf16.msra.mxu1 %v2376_v58  ;;  %v2460_v58 = vld [vmem:[%s3443_s1 + $0x290] ss:$8 sps:$4 sm:$0xff]  }
  0x70   :  { %1822 = vmatpush1.bf16.msra.mxu0 %v2379_v59  ;;  %1659 = vmatprep.subr.bf16.mxu1 %v2384_v60  ;;  %v2463_v59 = vld [vmem:[%s3443_s1 + $0x690] ss:$8 sps:$4 sm:$0xff]   ;;  %v2468_v60 = vld [vmem:[%s3443_s1 + $0x2a4] ss:$8 sps:$4 sm:$0xff]  }
  0x71   :  { %1823 = vmatprep.subr.bf16.mxu0 %v2387_v61  ;;  %v2471_v61 = vld [vmem:[%s3443_s1 + $0x6a4] ss:$8 sps:$4 sm:$0xff]  }
  0x73   :  { %1660 = vmatpush1.bf16.msra.mxu1 %v2382_v62  ;;  %v2466_v62 = vld [vmem:[%s3443_s1 + $0x2a0] ss:$8 sps:$4 sm:$0xff]  }
  0x74   :  { %1824 = vmatpush1.bf16.msra.mxu0 %v2385_v63  ;;  %1661 = vmatprep.subr.bf16.mxu1 %v2390_v0  ;;  %v2469_v63 = vld [vmem:[%s3443_s1 + $0x6a0] ss:$8 sps:$4 sm:$0xff]   ;;  %v2474_v0 = vld [vmem:[%s3443_s1 + $0x2b4] ss:$8 sps:$4 sm:$0xff]  }
  0x75   :  { %1825 = vmatprep.subr.bf16.mxu0 %v2393_v1  ;;  %v2477_v1 = vld [vmem:[%s3443_s1 + $0x6b4] ss:$8 sps:$4 sm:$0xff]  }
  0x77   :  { %1662 = vmatpush1.bf16.msra.mxu1 %v2388_v2  ;;  %v2472_v2 = vld [vmem:[%s3443_s1 + $0x2b0] ss:$8 sps:$4 sm:$0xff]  }
  0x78   :  { %1826 = vmatpush1.bf16.msra.mxu0 %v2391_v3  ;;  %1663 = vmatprep.subr.bf16.mxu1 %v2396_v4  ;;  %v2475_v3 = vld [vmem:[%s3443_s1 + $0x6b0] ss:$8 sps:$4 sm:$0xff]   ;;  %v2480_v4 = vld [vmem:[%s3443_s1 + $0x2c4] ss:$8 sps:$4 sm:$0xff]  }
  0x79   :  { %1827 = vmatprep.subr.bf16.mxu0 %v2399_v5  ;;  %v2483_v5 = vld [vmem:[%s3443_s1 + $0x6c4] ss:$8 sps:$4 sm:$0xff]  }
  0x7b   :  { %1664 = vmatpush1.bf16.msra.mxu1 %v2394_v6  ;;  %v2478_v6 = vld [vmem:[%s3443_s1 + $0x2c0] ss:$8 sps:$4 sm:$0xff]  }
  0x7c   :  { %1828 = vmatpush1.bf16.msra.mxu0 %v2397_v7  ;;  %1665 = vmatprep.subr.bf16.mxu1 %v2402_v8  ;;  %v2481_v7 = vld [vmem:[%s3443_s1 + $0x6c0] ss:$8 sps:$4 sm:$0xff]   ;;  %v2486_v8 = vld [vmem:[%s3443_s1 + $0x2d4] ss:$8 sps:$4 sm:$0xff]  }
  0x7d   :  { %1829 = vmatprep.subr.bf16.mxu0 %v2405_v9  ;;  %v2489_v9 = vld [vmem:[%s3443_s1 + $0x6d4] ss:$8 sps:$4 sm:$0xff]  }
  0x7f   :  { %1666 = vmatpush1.bf16.msra.mxu1 %v2400_v10  ;;  %v2484_v10 = vld [vmem:[%s3443_s1 + $0x2d0] ss:$8 sps:$4 sm:$0xff]  }
  0x80   :  { %1830 = vmatpush1.bf16.msra.mxu0 %v2403_v11  ;;  %1676 = vmatprep.subr.bf16.mxu1 %v2408_v12  ;;  %v2487_v11 = vld [vmem:[%s3443_s1 + $0x6d0] ss:$8 sps:$4 sm:$0xff]   ;;  %v2492_v12 = vld [vmem:[%s3443_s1 + $0x2e4] ss:$8 sps:$4 sm:$0xff]  }
  0x81   :  { %1840 = vmatprep.subr.bf16.mxu0 %v2411_v15  ;;  %v2493_v15 = vld [vmem:[%s3443_s1 + $0x6e0] ss:$8 sps:$4 sm:$0xff]  }
  0x82   :  { %1668 = vmatmul.mubr.bf16.vlgmr.msra.gmra.mrb[0].mxu1 %v32_v18  ;;  %v2496_v18 = vld [vmem:[%s3443_s1 + $0x2f0] ss:$8 sps:$4 sm:$0xff]  }
  0x83   :  { %1832 = vmatmul.mubr.bf16.vlgmr.msra.gmra.mrb[0].mxu0 %v40_v19  ;;  %1677 = vmatpush1.bf16.msra.mxu1 %v2406_v16  ;;  %v2498_v16 = vld [vmem:[%s3443_s1 + $0x2f4] ss:$8 sps:$4 sm:$0xff]   ;;  %v2499_v19 = vld [vmem:[%s3443_s1 + $0x6f0] ss:$8 sps:$4 sm:$0xff]  }
  0x84   :  { %1841 = vmatpush1.bf16.msra.mxu0 %v2409_v17  ;;  %1678 = vmatprep.subr.bf16.mxu1 %v2414_v20  ;;  %v2501_v17 = vld [vmem:[%s3443_s1 + $0x6f4] ss:$8 sps:$4 sm:$0xff]   ;;  %v18_v20 = vld [vmem:[%s3444_s0 + $0x20] sm:$0xff] }
  0x85   :  { %1842 = vmatprep.subr.bf16.mxu0 %v2417_v21  ;;  %1708 = vmatprep.mubr.bf16.mxu1 %v35_v24  ;;  %v26_v21 = vld [vmem:[%s3444_s0 + $0x60] sm:$0xff]  ;;  %v34_v24 = vpack.c.bf16 %v18_v20, %v18_v20 }
  0x86   :  { %1872 = vmatprep.mubr.bf16.mxu0 %v43_v29  ;;  %v2505_v29 = vld [vmem:[%s3443_s1 + $0x700] ss:$8 sps:$4 sm:$0xff]   ;;  %v2588_v20 = vld [vmem:[%s3443_s1 + $0x3e4] ss:$8 sps:$4 sm:$0xff]  }
  0x87   :  { %1679 = vmatpush1.bf16.msra.mxu1 %v2412_v23  ;;  %v2507_v23 = vld [vmem:[%s3443_s1 + $0x704] ss:$8 sps:$4 sm:$0xff]  }
  0x88   :  { %1843 = vmatpush1.bf16.msra.mxu0 %v2415_v25  ;;  %1680 = vmatprep.subr.bf16.mxu1 %v2420_v27  ;;  %v42_v25 = vpack.c.bf16 %v26_v21, %v26_v21  ;;  %v29_v27 = vld [vmem:[%s3444_s0 + $0x78] sm:$0xff]  ;;  %v2591_v21 = vld [vmem:[%s3443_s1 + $0x7e4] ss:$8 sps:$4 sm:$0xff]  }
  0x89   :  { %1844 = vmatprep.subr.bf16.mxu0 %v2423_v28  ;;  %v2502_v28 = vld [vmem:[%s3443_s1 + $0x300] ss:$8 sps:$4 sm:$0xff]  }
  0x8b   :  { %1681 = vmatpush1.bf16.msra.mxu1 %v2418_v30  ;;  %v2510_v30 = vld [vmem:[%s3443_s1 + $0x314] ss:$8 sps:$4 sm:$0xff]  }
  0x8c   :  { %1845 = vmatpush1.bf16.msra.mxu0 %v2421_v31  ;;  %1682 = vmatprep.subr.bf16.mxu1 %v2426_v32  ;;  %v2513_v31 = vld [vmem:[%s3443_s1 + $0x714] ss:$8 sps:$4 sm:$0xff]   ;;  %v37_v32 = vpack.c.bf16 %v21_v26, %v21_v26  ;;  %v2592_v26 = vld [vmem:[%s3443_s1 + $0x3f0] ss:$8 sps:$4 sm:$0xff]  }
  0x8d   :  { %1846 = vmatprep.subr.bf16.mxu0 %v2429_v33  ;;  %v45_v33 = vpack.c.bf16 %v29_v27, %v29_v27  ;;  %v2595_v27 = vld [vmem:[%s3443_s1 + $0x7f0] ss:$8 sps:$4 sm:$0xff]  }
  0x8f   :  { %1683 = vmatpush1.bf16.msra.mxu1 %v2424_v34  ;;  %v2508_v34 = vld [vmem:[%s3443_s1 + $0x310] ss:$8 sps:$4 sm:$0xff]  }
  0x90   :  { %1847 = vmatpush1.bf16.msra.mxu0 %v2427_v35  ;;  %1684 = vmatprep.subr.bf16.mxu1 %v2432_v36  ;;  %v2511_v35 = vld [vmem:[%s3443_s1 + $0x710] ss:$8 sps:$4 sm:$0xff]   ;;  %v2516_v36 = vld [vmem:[%s3443_s1 + $0x324] ss:$8 sps:$4 sm:$0xff]  }
  0x91   :  { %1848 = vmatprep.subr.bf16.mxu0 %v2435_v37  ;;  %v2519_v37 = vld [vmem:[%s3443_s1 + $0x724] ss:$8 sps:$4 sm:$0xff]  }
  0x93   :  { %1685 = vmatpush1.bf16.msra.mxu1 %v2430_v38  ;;  %v2514_v38 = vld [vmem:[%s3443_s1 + $0x320] ss:$8 sps:$4 sm:$0xff]  }
  0x94   :  { %1849 = vmatpush1.bf16.msra.mxu0 %v2433_v39  ;;  %1686 = vmatprep.subr.bf16.mxu1 %v2438_v40  ;;  %v2517_v39 = vld [vmem:[%s3443_s1 + $0x720] ss:$8 sps:$4 sm:$0xff]   ;;  %v2522_v40 = vld [vmem:[%s3443_s1 + $0x334] ss:$8 sps:$4 sm:$0xff]  }
  0x95   :  { %1850 = vmatprep.subr.bf16.mxu0 %v2441_v41  ;;  %v2525_v41 = vld [vmem:[%s3443_s1 + $0x734] ss:$8 sps:$4 sm:$0xff]  }
  0x97   :  { %1687 = vmatpush1.bf16.msra.mxu1 %v2436_v42  ;;  %v2520_v42 = vld [vmem:[%s3443_s1 + $0x330] ss:$8 sps:$4 sm:$0xff]  }
  0x98   :  { %1851 = vmatpush1.bf16.msra.mxu0 %v2439_v43  ;;  %1688 = vmatprep.subr.bf16.mxu1 %v2444_v44  ;;  %v2523_v43 = vld [vmem:[%s3443_s1 + $0x730] ss:$8 sps:$4 sm:$0xff]   ;;  %v2528_v44 = vld [vmem:[%s3443_s1 + $0x344] ss:$8 sps:$4 sm:$0xff]  }
  0x99   :  { %1852 = vmatprep.subr.bf16.mxu0 %v2447_v45  ;;  %v2531_v45 = vld [vmem:[%s3443_s1 + $0x744] ss:$8 sps:$4 sm:$0xff]  }
  0x9b   :  { %1689 = vmatpush1.bf16.msra.mxu1 %v2442_v46  ;;  %v2526_v46 = vld [vmem:[%s3443_s1 + $0x340] ss:$8 sps:$4 sm:$0xff]  }
  0x9c   :  { %1853 = vmatpush1.bf16.msra.mxu0 %v2445_v47  ;;  %1690 = vmatprep.subr.bf16.mxu1 %v2450_v48  ;;  %v2529_v47 = vld [vmem:[%s3443_s1 + $0x740] ss:$8 sps:$4 sm:$0xff]   ;;  %v2534_v48 = vld [vmem:[%s3443_s1 + $0x354] ss:$8 sps:$4 sm:$0xff]  }
  0x9d   :  { %1854 = vmatprep.subr.bf16.mxu0 %v2453_v49  ;;  %v2537_v49 = vld [vmem:[%s3443_s1 + $0x754] ss:$8 sps:$4 sm:$0xff]  }
  0x9f   :  { %1691 = vmatpush1.bf16.msra.mxu1 %v2448_v50  ;;  %v2532_v50 = vld [vmem:[%s3443_s1 + $0x350] ss:$8 sps:$4 sm:$0xff]  }
  0xa0   :  { %1855 = vmatpush1.bf16.msra.mxu0 %v2451_v51  ;;  %1692 = vmatprep.subr.bf16.mxu1 %v2456_v52  ;;  %v2535_v51 = vld [vmem:[%s3443_s1 + $0x750] ss:$8 sps:$4 sm:$0xff]   ;;  %v2540_v52 = vld [vmem:[%s3443_s1 + $0x364] ss:$8 sps:$4 sm:$0xff]  }
  0xa1   :  { %1856 = vmatprep.subr.bf16.mxu0 %v2459_v53  ;;  %v2543_v53 = vld [vmem:[%s3443_s1 + $0x764] ss:$8 sps:$4 sm:$0xff]  }
  0xa3   :  { %1693 = vmatpush1.bf16.msra.mxu1 %v2454_v54  ;;  %v2538_v54 = vld [vmem:[%s3443_s1 + $0x360] ss:$8 sps:$4 sm:$0xff]  }
  0xa4   :  { %1857 = vmatpush1.bf16.msra.mxu0 %v2457_v55  ;;  %1694 = vmatprep.subr.bf16.mxu1 %v2462_v56  ;;  %v2541_v55 = vld [vmem:[%s3443_s1 + $0x760] ss:$8 sps:$4 sm:$0xff]   ;;  %v2546_v56 = vld [vmem:[%s3443_s1 + $0x374] ss:$8 sps:$4 sm:$0xff]  }
  0xa5   :  { %1858 = vmatprep.subr.bf16.mxu0 %v2465_v57  ;;  %v2549_v57 = vld [vmem:[%s3443_s1 + $0x774] ss:$8 sps:$4 sm:$0xff]  }
  0xa7   :  { %1695 = vmatpush1.bf16.msra.mxu1 %v2460_v58  ;;  %v2544_v58 = vld [vmem:[%s3443_s1 + $0x370] ss:$8 sps:$4 sm:$0xff]  }
  0xa8   :  { %1859 = vmatpush1.bf16.msra.mxu0 %v2463_v59  ;;  %1696 = vmatprep.subr.bf16.mxu1 %v2468_v60  ;;  %v2547_v59 = vld [vmem:[%s3443_s1 + $0x770] ss:$8 sps:$4 sm:$0xff]   ;;  %v2552_v60 = vld [vmem:[%s3443_s1 + $0x384] ss:$8 sps:$4 sm:$0xff]  }
  0xa9   :  { %1860 = vmatprep.subr.bf16.mxu0 %v2471_v61  ;;  %v2555_v61 = vld [vmem:[%s3443_s1 + $0x784] ss:$8 sps:$4 sm:$0xff]  }
  0xab   :  { %1697 = vmatpush1.bf16.msra.mxu1 %v2466_v62  ;;  %v2550_v62 = vld [vmem:[%s3443_s1 + $0x380] ss:$8 sps:$4 sm:$0xff]  }
  0xac   :  { %1861 = vmatpush1.bf16.msra.mxu0 %v2469_v63  ;;  %1698 = vmatprep.subr.bf16.mxu1 %v2474_v0  ;;  %v2553_v63 = vld [vmem:[%s3443_s1 + $0x780] ss:$8 sps:$4 sm:$0xff]   ;;  %v2558_v0 = vld [vmem:[%s3443_s1 + $0x394] ss:$8 sps:$4 sm:$0xff]  }
  0xad   :  { %1862 = vmatprep.subr.bf16.mxu0 %v2477_v1  ;;  %v2561_v1 = vld [vmem:[%s3443_s1 + $0x794] ss:$8 sps:$4 sm:$0xff]  }
  0xaf   :  { %1699 = vmatpush1.bf16.msra.mxu1 %v2472_v2  ;;  %v2556_v2 = vld [vmem:[%s3443_s1 + $0x390] ss:$8 sps:$4 sm:$0xff]  }
  0xb0   :  { %1863 = vmatpush1.bf16.msra.mxu0 %v2475_v3  ;;  %1700 = vmatprep.subr.bf16.mxu1 %v2480_v4  ;;  %v2559_v3 = vld [vmem:[%s3443_s1 + $0x790] ss:$8 sps:$4 sm:$0xff]   ;;  %v2564_v4 = vld [vmem:[%s3443_s1 + $0x3a4] ss:$8 sps:$4 sm:$0xff]  }
  0xb1   :  { %1864 = vmatprep.subr.bf16.mxu0 %v2483_v5  ;;  %v2567_v5 = vld [vmem:[%s3443_s1 + $0x7a4] ss:$8 sps:$4 sm:$0xff]  }
  0xb3   :  { %1701 = vmatpush1.bf16.msra.mxu1 %v2478_v6  ;;  %v2562_v6 = vld [vmem:[%s3443_s1 + $0x3a0] ss:$8 sps:$4 sm:$0xff]  }
  0xb4   :  { %1865 = vmatpush1.bf16.msra.mxu0 %v2481_v7  ;;  %1702 = vmatprep.subr.bf16.mxu1 %v2486_v8  ;;  %v2565_v7 = vld [vmem:[%s3443_s1 + $0x7a0] ss:$8 sps:$4 sm:$0xff]   ;;  %v2570_v8 = vld [vmem:[%s3443_s1 + $0x3b4] ss:$8 sps:$4 sm:$0xff]  }
  0xb5   :  { %1866 = vmatprep.subr.bf16.mxu0 %v2489_v9  ;;  %v2573_v9 = vld [vmem:[%s3443_s1 + $0x7b4] ss:$8 sps:$4 sm:$0xff]  }
  0xb7   :  { %1703 = vmatpush1.bf16.msra.mxu1 %v2484_v10  ;;  %v2568_v10 = vld [vmem:[%s3443_s1 + $0x3b0] ss:$8 sps:$4 sm:$0xff]  }
  0xb8   :  { %1867 = vmatpush1.bf16.msra.mxu0 %v2487_v11  ;;  %1704 = vmatprep.subr.bf16.mxu1 %v2492_v12  ;;  %v2571_v11 = vld [vmem:[%s3443_s1 + $0x7b0] ss:$8 sps:$4 sm:$0xff]   ;;  %v2576_v12 = vld [vmem:[%s3443_s1 + $0x3c4] ss:$8 sps:$4 sm:$0xff]  }
  0xb9   :  { %1868 = vmatprep.subr.bf16.mxu0 %v2495_v13  ;;  %v2579_v13 = vld [vmem:[%s3443_s1 + $0x7c4] ss:$8 sps:$4 sm:$0xff]  }
  0xbb   :  { %1705 = vmatpush1.bf16.msra.mxu1 %v2490_v14  ;;  %v2574_v14 = vld [vmem:[%s3443_s1 + $0x3c0] ss:$8 sps:$4 sm:$0xff]  }
  0xbc   :  { %1869 = vmatpush1.bf16.msra.mxu0 %v2493_v15  ;;  %1706 = vmatprep.subr.bf16.mxu1 %v2498_v16  ;;  %v2577_v15 = vld [vmem:[%s3443_s1 + $0x7c0] ss:$8 sps:$4 sm:$0xff]   ;;  %v2582_v16 = vld [vmem:[%s3443_s1 + $0x3d4] ss:$8 sps:$4 sm:$0xff]  }
  0xbd   :  { %1870 = vmatprep.subr.bf16.mxu0 %v2501_v17  ;;  %v2585_v17 = vld [vmem:[%s3443_s1 + $0x7d4] ss:$8 sps:$4 sm:$0xff]  }
  0xbf   :  { %1707 = vmatpush1.bf16.msra.mxu1 %v2496_v18  ;;  %v2580_v18 = vld [vmem:[%s3443_s1 + $0x3d0] ss:$8 sps:$4 sm:$0xff]  }
  0xc0   :  { %1871 = vmatpush1.bf16.msra.mxu0 %v2499_v19  ;;  %1717 = vmatprep.subr.bf16.mxu1 %v2504_v22  ;;  %v2583_v19 = vld [vmem:[%s3443_s1 + $0x7d0] ss:$8 sps:$4 sm:$0xff]   ;;  %v2586_v22 = vld [vmem:[%s3443_s1 + $0x3e0] ss:$8 sps:$4 sm:$0xff]  }
  0xc1   :  { %1881 = vmatprep.subr.bf16.mxu0 %v2507_v23  ;;  %v2589_v23 = vld [vmem:[%s3443_s1 + $0x7e0] ss:$8 sps:$4 sm:$0xff]  }
  0xc2   :  { %1709 = vmatmul.mubr.bf16.vlgmr.msra.gmra.mrb[0].mxu1 %v34_v24  ;;  %v2594_v24 = vld [vmem:[%s3443_s1 + $0x3f4] ss:$8 sps:$4 sm:$0xff]  }
  0xc3   :  { %1873 = vmatmul.mubr.bf16.vlgmr.msra.gmra.mrb[0].mxu0 %v42_v25  ;;  %1718 = vmatpush1.bf16.msra.mxu1 %v2502_v28  ;;  %v2597_v25 = vld [vmem:[%s3443_s1 + $0x7f4] ss:$8 sps:$4 sm:$0xff]  }
  0xc4   :  { %1882 = vmatpush1.bf16.msra.mxu0 %v2505_v29  ;;  %1719 = vmatprep.subr.bf16.mxu1 %v2510_v30  ;;  %v20_v28 = vld [vmem:[%s3444_s0 + $0x30] sm:$0xff] }
  0xc5   :  { %1883 = vmatprep.subr.bf16.mxu0 %v2513_v31  ;;  %1749 = vmatprep.mubr.bf16.mxu1 %v37_v32  ;;  %v28_v29 = vld [vmem:[%s3444_s0 + $0x70] sm:$0xff]  ;;  %v36_v30 = vpack.c.bf16 %v20_v28, %v20_v28  ;;  %v304_v32 = vlaneseq }
  0xc6   :  { %1913 = vmatprep.mubr.bf16.mxu0 %v45_v33  ;;  %v44_v31 = vpack.c.bf16 %v28_v29, %v28_v29 }
  0xc7   :  { %1720 = vmatpush1.bf16.msra.mxu1 %v2508_v34  ;;  %v305_v33 = vshrl.u32 %v304_v32, 7 }
  0xc8   :  { %1884 = vmatpush1.bf16.msra.mxu0 %v2511_v35  ;;  %1721 = vmatprep.subr.bf16.mxu1 %v2516_v36  ;;  %v302_v35 = vld [vmem:[%s3445_s2] sm:$0x3] }
  0xc9   :  { %1885 = vmatprep.subr.bf16.mxu0 %v2519_v37  ;;  %v306_v34 = vsub.s32 0, %v305_v33  ;;  %v310_v36 = vsub.s32 1, %v305_v33 }
  0xcb   :  { %1722 = vmatpush1.bf16.msra.mxu1 %v2514_v38  ;;  %v307_v37 = vrot.slane %v302_v35, %v306_v34  ;;  %v311_v38 = vrot.slane %v302_v35, %v310_v36 }
  0xcc   :  { %1886 = vmatpush1.bf16.msra.mxu0 %v2517_v39  ;;  %1723 = vmatprep.subr.bf16.mxu1 %v2522_v40 }
  0xcd   :  { %1887 = vmatprep.subr.bf16.mxu0 %v2525_v41 }
  0xcf   :  { %1724 = vmatpush1.bf16.msra.mxu1 %v2520_v42 }
  0xd0   :  { %1888 = vmatpush1.bf16.msra.mxu0 %v2523_v43  ;;  %1725 = vmatprep.subr.bf16.mxu1 %v2528_v44 }
  0xd1   :  { %1889 = vmatprep.subr.bf16.mxu0 %v2531_v45 }
  0xd3   :  { %1726 = vmatpush1.bf16.msra.mxu1 %v2526_v46 }
  0xd4   :  { %1890 = vmatpush1.bf16.msra.mxu0 %v2529_v47  ;;  %1727 = vmatprep.subr.bf16.mxu1 %v2534_v48 }
  0xd5   :  { %1891 = vmatprep.subr.bf16.mxu0 %v2537_v49 }
  0xd7   :  { %1728 = vmatpush1.bf16.msra.mxu1 %v2532_v50 }
  0xd8   :  { %1892 = vmatpush1.bf16.msra.mxu0 %v2535_v51  ;;  %1729 = vmatprep.subr.bf16.mxu1 %v2540_v52 }
  0xd9   :  { %1893 = vmatprep.subr.bf16.mxu0 %v2543_v53 }
  0xdb   :  { %1730 = vmatpush1.bf16.msra.mxu1 %v2538_v54 }
  0xdc   :  { %1894 = vmatpush1.bf16.msra.mxu0 %v2541_v55  ;;  %1731 = vmatprep.subr.bf16.mxu1 %v2546_v56 }
  0xdd   :  { %1895 = vmatprep.subr.bf16.mxu0 %v2549_v57 }
  0xdf   :  { %1732 = vmatpush1.bf16.msra.mxu1 %v2544_v58 }
  0xe0   :  { %1896 = vmatpush1.bf16.msra.mxu0 %v2547_v59  ;;  %1733 = vmatprep.subr.bf16.mxu1 %v2552_v60 }
  0xe1   :  { %1897 = vmatprep.subr.bf16.mxu0 %v2555_v61 }
  0xe3   :  { %1734 = vmatpush1.bf16.msra.mxu1 %v2550_v62 }
  0xe4   :  { %1898 = vmatpush1.bf16.msra.mxu0 %v2553_v63  ;;  %1735 = vmatprep.subr.bf16.mxu1 %v2558_v0 }
  0xe5   :  { %1899 = vmatprep.subr.bf16.mxu0 %v2561_v1 }
  0xe7   :  { %1736 = vmatpush1.bf16.msra.mxu1 %v2556_v2 }
  0xe8   :  { %1900 = vmatpush1.bf16.msra.mxu0 %v2559_v3  ;;  %1737 = vmatprep.subr.bf16.mxu1 %v2564_v4 }
  0xe9   :  { %1901 = vmatprep.subr.bf16.mxu0 %v2567_v5 }
  0xeb   :  { %1738 = vmatpush1.bf16.msra.mxu1 %v2562_v6 }
  0xec   :  { %1902 = vmatpush1.bf16.msra.mxu0 %v2565_v7  ;;  %1739 = vmatprep.subr.bf16.mxu1 %v2570_v8 }
  0xed   :  { %1903 = vmatprep.subr.bf16.mxu0 %v2573_v9 }
  0xef   :  { %1740 = vmatpush1.bf16.msra.mxu1 %v2568_v10 }
  0xf0   :  { %1904 = vmatpush1.bf16.msra.mxu0 %v2571_v11  ;;  %1741 = vmatprep.subr.bf16.mxu1 %v2576_v12 }
  0xf1   :  { %1905 = vmatprep.subr.bf16.mxu0 %v2579_v13 }
  0xf3   :  { %1742 = vmatpush1.bf16.msra.mxu1 %v2574_v14 }
  0xf4   :  { %1906 = vmatpush1.bf16.msra.mxu0 %v2577_v15  ;;  %1743 = vmatprep.subr.bf16.mxu1 %v2582_v16 }
  0xf5   :  { %1907 = vmatprep.subr.bf16.mxu0 %v2585_v17 }
  0xf7   :  { %1744 = vmatpush1.bf16.msra.mxu1 %v2580_v18 }
  0xf8   :  { %1908 = vmatpush1.bf16.msra.mxu0 %v2583_v19  ;;  %1745 = vmatprep.subr.bf16.mxu1 %v2588_v20 }
  0xf9   :  { %1909 = vmatprep.subr.bf16.mxu0 %v2591_v21 }
  0xfb   :  { %1746 = vmatpush1.bf16.msra.mxu1 %v2586_v22 }
  0xfc   :  { %1910 = vmatpush1.bf16.msra.mxu0 %v2589_v23  ;;  %1747 = vmatprep.subr.bf16.mxu1 %v2594_v24 }
  0xfd   :  { %1911 = vmatprep.subr.bf16.mxu0 %v2597_v25 }
  0xff   :  { %1748 = vmatpush1.bf16.msra.mxu1 %v2592_v26 }
 0x100   :  { %1912 = vmatpush1.bf16.msra.mxu0 %v2595_v27 }
 0x102   :  { %1750 = vmatmul.mubr.bf16.vlgmr.msra.gmra.mrb[0].mxu1 %v36_v30 }
 0x103   :  { %1914 = vmatmul.mubr.bf16.vlgmr.msra.gmra.mrb[0].mxu0 %v44_v31 }
 0x1d5   :  { %v1751_v39 = vpop.f32.mrb[0].mxu1 }
 0x1d6   :  { %v1915_v40 = vpop.f32.mrb[0].mxu0  ;;  %v2186_v41 = vadd.f32 %v1751_v39, %v307_v37  ;;  %v1753_v42 = vpop.f32.mrb[1].mxu1 }
 0x1d7   :  { %v1917_v43 = vpop.f32.mrb[1].mxu0  ;;  %v2188_v44 = vadd.f32 %v1753_v42, %v311_v38  ;;  %v1755_v45 = vpop.f32.mrb[2].mxu1 }
 0x1d8   :  { %v1919_v46 = vpop.f32.mrb[2].mxu0  ;;  %v2187_v47 = vadd.f32 %v2186_v41, %v1915_v40  ;;  %v1756_v48 = vpop.f32.mrb[3].mxu1 }
 0x1d9   :  { %v1920_v49 = vpop.f32.mrb[3].mxu0  ;;  %v2189_v50 = vadd.f32 %v2188_v44, %v1917_v43 }
 0x1da   :  { %v1922_v51 = vmax.f32 %v2187_v47, 0.0 }
 0x1db   :  { %v1923_v52 = vmax.f32 %v2189_v50, 0.0 }
 0x1dc   :  { %1924 = vst [vmem:[%s3446_s3] sm:$0xff] %v1922_v51 }
 0x1dd   :  { %1925 = vst [vmem:[%s3446_s3 + $0x8] sm:$0xff] %v1923_v52 }

// kernel: forward.11
= control target key start
LH: loop header
LB: loop body
LE: loop exit
PB: predicated region body
PF: predicated region fallthrough
CT: control target
= control target key end

     0   :  { %s9823_s1 = inlined_call_operand.vmem [shape: bf16[4096,256], index: 1, kind: input, shape index: {}]   ;;  %s9824_s0 = inlined_call_operand.vmem [shape: f32[8,4096], index: 0, kind: input, shape index: {}]   ;;  %s9825_s2 = inlined_call_operand.vmem [shape: bf16[256,256], index: 2, kind: input, shape index: {}]   ;;  %s9826_s3 = inlined_call_operand.vmem [shape: bf16[256,256], index: 3, kind: input, shape index: {}]   ;;  %s9827_s9 = inlined_call_operand.vmem [shape: f32[1,256], index: 9, kind: input, shape index: {}]   ;;  %s9828_s4 = inlined_call_operand.vmem [shape: bf16[256,256], index: 4, kind: input, shape index: {}]   ;;  %s9829_s10 = inlined_call_operand.vmem [shape: f32[1,256], index: 10, kind: input, shape index: {}]   ;;  %s9830_s5 = inlined_call_operand.vmem [shape: bf16[256,256], index: 5, kind: input, shape index: {}]   ;;  %s9831_s11 = inlined_call_operand.vmem [shape: f32[1,256], index: 11, kind: input, shape index: {}]   ;;  %s9832_s6 = inlined_call_operand.vmem [shape: bf16[256,256], index: 6, kind: input, shape index: {}]   ;;  %s9833_s12 = inlined_call_operand.vmem [shape: f32[1,256], index: 12, kind: input, shape index: {}]   ;;  %s9834_s7 = inlined_call_operand.vmem [shape: bf16[256,256], index: 7, kind: input, shape index: {}]   ;;  %s9835_s13 = inlined_call_operand.vmem [shape: f32[1,256], index: 13, kind: input, shape index: {}]   ;;  %s9836_s8 = inlined_call_operand.vmem [shape: bf16[256,128], index: 8, kind: input, shape index: {}]   ;;  %s9837_s14 = inlined_call_operand.vmem [shape: f32[1,256], index: 14, kind: input, shape index: {}]   ;;  %s9838_s15 = inlined_call_operand.vmem [shape: f32[1,256], index: 15, kind: input, shape index: {}]   ;;  %s9839_s16 = inlined_call_operand.vmem [shape: f32[1,128], index: 16, kind: input, shape index: {}]   ;;  %s9840_s17 = inlined_call_operand.vmem [shape: f32[8,128], index: 17, kind: output, shape index: {}]  }
   0x1   :  { %9843 = sst [smem:[#allocation2_spill]] %s9823_s1 }
   0x2   :  { %9844 = sst [smem:[#allocation3_spill]] %s9824_s0  ;;  %s9845_s26 = sld [smem:[#allocation2_spill]] }
   0x3   :  { %s9846_s24 = sld [smem:[#allocation3_spill]] }
   0x8   :  { %v6354_v0 = vld [vmem:[%s9845_s26 + $0x504] ss:$8 sps:$4 sm:$0xff]   ;;  %v6356_v1 = vld [vmem:[%s9845_s26 + $0x500] ss:$8 sps:$4 sm:$0xff]   ;;  %v6357_v2 = vld [vmem:[%s9845_s26 + $0x514] ss:$8 sps:$4 sm:$0xff]  }
   0x9   :  { %3410 = vmatprep.subr.bf16.mxu0 %v6354_v0  ;;  %v6359_v3 = vld [vmem:[%s9845_s26 + $0x510] ss:$8 sps:$4 sm:$0xff]   ;;  %v6360_v4 = vld [vmem:[%s9845_s26 + $0x524] ss:$8 sps:$4 sm:$0xff]   ;;  %v6362_v5 = vld [vmem:[%s9845_s26 + $0x520] ss:$8 sps:$4 sm:$0xff]  }
   0xa   :  { %3411 = vmatpush1.bf16.msra.mxu0 %v6356_v1  ;;  %v6363_v6 = vld [vmem:[%s9845_s26 + $0x534] ss:$8 sps:$4 sm:$0xff]   ;;  %v6365_v7 = vld [vmem:[%s9845_s26 + $0x530] ss:$8 sps:$4 sm:$0xff]   ;;  %v6366_v8 = vld [vmem:[%s9845_s26 + $0x544] ss:$8 sps:$4 sm:$0xff]  }
   0xb   :  { %3412 = vmatprep.subr.bf16.mxu0 %v6357_v2  ;;  %v6368_v9 = vld [vmem:[%s9845_s26 + $0x540] ss:$8 sps:$4 sm:$0xff]   ;;  %v6369_v10 = vld [vmem:[%s9845_s26 + $0x554] ss:$8 sps:$4 sm:$0xff]   ;;  %v6371_v11 = vld [vmem:[%s9845_s26 + $0x550] ss:$8 sps:$4 sm:$0xff]  }
   0xc   :  { %v6372_v12 = vld [vmem:[%s9845_s26 + $0x564] ss:$8 sps:$4 sm:$0xff]   ;;  %v68_v13 = vld [vmem:[%s9846_s24 + $0x58] sm:$0xff]  ;;  %v6374_v15 = vld [vmem:[%s9845_s26 + $0x560] ss:$8 sps:$4 sm:$0xff]  }
   0xd   :  { %v100_v14 = vpack.c.bf16 %v68_v13, %v68_v13  ;;  %v6375_v16 = vld [vmem:[%s9845_s26 + $0x574] ss:$8 sps:$4 sm:$0xff]   ;;  %v6377_v17 = vld [vmem:[%s9845_s26 + $0x570] ss:$8 sps:$4 sm:$0xff]   ;;  %v6378_v18 = vld [vmem:[%s9845_s26 + $0x584] ss:$8 sps:$4 sm:$0xff]  }
   0xe   :  { %3413 = vmatpush1.bf16.msra.mxu0 %v6359_v3  ;;  %v6380_v19 = vld [vmem:[%s9845_s26 + $0x580] ss:$8 sps:$4 sm:$0xff]   ;;  %v6381_v20 = vld [vmem:[%s9845_s26 + $0x594] ss:$8 sps:$4 sm:$0xff]   ;;  %v6383_v21 = vld [vmem:[%s9845_s26 + $0x590] ss:$8 sps:$4 sm:$0xff]  }
   0xf   :  { %3414 = vmatprep.subr.bf16.mxu0 %v6360_v4  ;;  %3442 = vmatprep.mubr.bf16.mxu0 %v100_v14  ;;  %v6384_v22 = vld [vmem:[%s9845_s26 + $0x5a4] ss:$8 sps:$4 sm:$0xff]   ;;  %v6386_v23 = vld [vmem:[%s9845_s26 + $0x5a0] ss:$8 sps:$4 sm:$0xff]   ;;  %v6387_v24 = vld [vmem:[%s9845_s26 + $0x5b4] ss:$8 sps:$4 sm:$0xff]  }
  0x10   :  { %v6447_v25 = vld [vmem:[%s9845_s26 + $0x4] ss:$8 sps:$4 sm:$0xff]   ;;  %v6389_v26 = vld [vmem:[%s9845_s26 + $0x5b0] ss:$8 sps:$4 sm:$0xff]   ;;  %v6452_v28 = vld [vmem:[%s9845_s26] ss:$8 sps:$4 sm:$0xff]  }
  0x11   :  { %v6390_v27 = vld [vmem:[%s9845_s26 + $0x5c4] ss:$8 sps:$4 sm:$0xff]   ;;  %3205 = vmatprep.subr.bf16.mxu1 %v6447_v25  ;;  %v6453_v29 = vld [vmem:[%s9845_s26 + $0x14] ss:$8 sps:$4 sm:$0xff]   ;;  %v6392_v30 = vld [vmem:[%s9845_s26 + $0x5c0] ss:$8 sps:$4 sm:$0xff]  }
  0x12   :  { %3415 = vmatpush1.bf16.msra.mxu0 %v6362_v5  ;;  %3206 = vmatpush1.bf16.msra.mxu1 %v6452_v28  ;;  %v6393_v31 = vld [vmem:[%s9845_s26 + $0x5d4] ss:$8 sps:$4 sm:$0xff]   ;;  %v6458_v32 = vld [vmem:[%s9845_s26 + $0x10] ss:$8 sps:$4 sm:$0xff]   ;;  %v6459_v33 = vld [vmem:[%s9845_s26 + $0x24] ss:$8 sps:$4 sm:$0xff]  }
  0x13   :  { %3416 = vmatprep.subr.bf16.mxu0 %v6363_v6  ;;  %3207 = vmatprep.subr.bf16.mxu1 %v6453_v29  ;;  %v6395_v34 = vld [vmem:[%s9845_s26 + $0x5d0] ss:$8 sps:$4 sm:$0xff]   ;;  %v6464_v35 = vld [vmem:[%s9845_s26 + $0x20] ss:$8 sps:$4 sm:$0xff]   ;;  %v6465_v36 = vld [vmem:[%s9845_s26 + $0x34] ss:$8 sps:$4 sm:$0xff]  }
  0x14   :  { %v6396_v37 = vld [vmem:[%s9845_s26 + $0x5e4] ss:$8 sps:$4 sm:$0xff]   ;;  %v6470_v38 = vld [vmem:[%s9845_s26 + $0x30] ss:$8 sps:$4 sm:$0xff]   ;;  %v6398_v39 = vld [vmem:[%s9845_s26 + $0x5e0] ss:$8 sps:$4 sm:$0xff]  }
  0x15   :  { %v6471_v40 = vld [vmem:[%s9845_s26 + $0x44] ss:$8 sps:$4 sm:$0xff]   ;;  %v6399_v41 = vld [vmem:[%s9845_s26 + $0x5f4] ss:$8 sps:$4 sm:$0xff]   ;;  %v6401_v42 = vld [vmem:[%s9845_s26 + $0x5f0] ss:$8 sps:$4 sm:$0xff]  }
  0x16   :  { %3417 = vmatpush1.bf16.msra.mxu0 %v6365_v7  ;;  %3208 = vmatpush1.bf16.msra.mxu1 %v6458_v32  ;;  %v67_v43 = vld [vmem:[%s9846_s24 + $0x50] sm:$0xff]  ;;  %v6476_v44 = vld [vmem:[%s9845_s26 + $0x40] ss:$8 sps:$4 sm:$0xff]   ;;  %v6404_v46 = vld [vmem:[%s9845_s26 + $0x604] ss:$8 sps:$4 sm:$0xff]  }
  0x17   :  { %3418 = vmatprep.subr.bf16.mxu0 %v6366_v8  ;;  %3209 = vmatprep.subr.bf16.mxu1 %v6459_v33  ;;  %v6477_v45 = vld [vmem:[%s9845_s26 + $0x54] ss:$8 sps:$4 sm:$0xff]   ;;  %v70_v47 = vld [vmem:[%s9846_s24 + $0x68] sm:$0xff]  ;;  %v99_v48 = vpack.c.bf16 %v67_v43, %v67_v43  ;;  %v6482_v49 = vld [vmem:[%s9845_s26 + $0x50] ss:$8 sps:$4 sm:$0xff]  }
  0x18   :  { %v6402_v50 = vld [vmem:[%s9845_s26 + $0x600] ss:$8 sps:$4 sm:$0xff]   ;;  %v6407_v51 = vld [vmem:[%s9845_s26 + $0x614] ss:$8 sps:$4 sm:$0xff]   ;;  %v102_v52 = vpack.c.bf16 %v70_v47, %v70_v47  ;;  %v6483_v53 = vld [vmem:[%s9845_s26 + $0x64] ss:$8 sps:$4 sm:$0xff]  }
  0x19   :  { %v6405_v54 = vld [vmem:[%s9845_s26 + $0x610] ss:$8 sps:$4 sm:$0xff]   ;;  %v6488_v55 = vld [vmem:[%s9845_s26 + $0x60] ss:$8 sps:$4 sm:$0xff]   ;;  %v6489_v56 = vld [vmem:[%s9845_s26 + $0x74] ss:$8 sps:$4 sm:$0xff]  }
  0x1a   :  { %3419 = vmatpush1.bf16.msra.mxu0 %v6368_v9  ;;  %3210 = vmatpush1.bf16.msra.mxu1 %v6464_v35  ;;  %v6410_v57 = vld [vmem:[%s9845_s26 + $0x624] ss:$8 sps:$4 sm:$0xff]   ;;  %v6494_v58 = vld [vmem:[%s9845_s26 + $0x70] ss:$8 sps:$4 sm:$0xff]   ;;  %v6408_v59 = vld [vmem:[%s9845_s26 + $0x620] ss:$8 sps:$4 sm:$0xff]  }
  0x1b   :  { %3420 = vmatprep.subr.bf16.mxu0 %v6369_v10  ;;  %3211 = vmatprep.subr.bf16.mxu1 %v6465_v36  ;;  %v6495_v60 = vld [vmem:[%s9845_s26 + $0x84] ss:$8 sps:$4 sm:$0xff]   ;;  %v6413_v61 = vld [vmem:[%s9845_s26 + $0x634] ss:$8 sps:$4 sm:$0xff]   ;;  %v6411_v62 = vld [vmem:[%s9845_s26 + $0x630] ss:$8 sps:$4 sm:$0xff]  }
  0x1c   :  { %v6500_v63 = vld [vmem:[%s9845_s26 + $0x80] ss:$8 sps:$4 sm:$0xff]   ;;  %v6501_v0 = vld [vmem:[%s9845_s26 + $0x94] ss:$8 sps:$4 sm:$0xff]   ;;  %v6416_v1 = vld [vmem:[%s9845_s26 + $0x644] ss:$8 sps:$4 sm:$0xff]  }
  0x1d   :  { %v6506_v2 = vld [vmem:[%s9845_s26 + $0x90] ss:$8 sps:$4 sm:$0xff]   ;;  %v6414_v3 = vld [vmem:[%s9845_s26 + $0x640] ss:$8 sps:$4 sm:$0xff]   ;;  %v6507_v4 = vld [vmem:[%s9845_s26 + $0xa4] ss:$8 sps:$4 sm:$0xff]  }
  0x1e   :  { %3421 = vmatpush1.bf16.msra.mxu0 %v6371_v11  ;;  %3212 = vmatpush1.bf16.msra.mxu1 %v6470_v38  ;;  %v6419_v5 = vld [vmem:[%s9845_s26 + $0x654] ss:$8 sps:$4 sm:$0xff]   ;;  %v6417_v6 = vld [vmem:[%s9845_s26 + $0x650] ss:$8 sps:$4 sm:$0xff]   ;;  %v6512_v7 = vld [vmem:[%s9845_s26 + $0xa0] ss:$8 sps:$4 sm:$0xff]  }
  0x1f   :  { %3422 = vmatprep.subr.bf16.mxu0 %v6372_v12  ;;  %3213 = vmatprep.subr.bf16.mxu1 %v6471_v40  ;;  %v6513_v8 = vld [vmem:[%s9845_s26 + $0xb4] ss:$8 sps:$4 sm:$0xff]   ;;  %v6422_v9 = vld [vmem:[%s9845_s26 + $0x664] ss:$8 sps:$4 sm:$0xff]   ;;  %v6420_v11 = vld [vmem:[%s9845_s26 + $0x660] ss:$8 sps:$4 sm:$0xff]  }
  0x20   :  { %v58_v10 = vld [vmem:[%s9846_s24 + $0x8] sm:$0xff]  ;;  %v6518_v12 = vld [vmem:[%s9845_s26 + $0xb0] ss:$8 sps:$4 sm:$0xff]   ;;  %v57_v29 = vld [vmem:[%s9846_s24] sm:$0xff] }
  0x21   :  { %v90_v13 = vpack.c.bf16 %v58_v10, %v58_v10  ;;  %v6519_v14 = vld [vmem:[%s9845_s26 + $0xc4] ss:$8 sps:$4 sm:$0xff]   ;;  %v6429_v25 = vld [vmem:[%s9845_s26 + $0x690] ss:$8 sps:$4 sm:$0xff]   ;;  %v6437_v32 = vld [vmem:[%s9845_s26 + $0x6b4] ss:$8 sps:$4 sm:$0xff]   ;;  %v89_v33 = vpack.c.bf16 %v57_v29, %v57_v29 }
  0x22   :  { %3423 = vmatpush1.bf16.msra.mxu0 %v6374_v15  ;;  %3214 = vmatpush1.bf16.msra.mxu1 %v6476_v44  ;;  %v6425_v15 = vld [vmem:[%s9845_s26 + $0x674] ss:$8 sps:$4 sm:$0xff]   ;;  %v6542_v28 = vld [vmem:[%s9845_s26 + $0xf0] ss:$8 sps:$4 sm:$0xff]   ;;  %v6557_v40 = vld [vmem:[%s9845_s26 + $0x124] ss:$8 sps:$4 sm:$0xff]  }
  0x23   :  { %3424 = vmatprep.subr.bf16.mxu0 %v6375_v16  ;;  %3215 = vmatprep.subr.bf16.mxu1 %v6477_v45  ;;  %v6524_v16 = vld [vmem:[%s9845_s26 + $0xc0] ss:$8 sps:$4 sm:$0xff]   ;;  %v6435_v35 = vld [vmem:[%s9845_s26 + $0x6b0] ss:$8 sps:$4 sm:$0xff]   ;;  %v6551_v36 = vld [vmem:[%s9845_s26 + $0x114] ss:$8 sps:$4 sm:$0xff]  }
  0x24   :  { %3237 = vmatprep.mubr.bf16.mxu1 %v90_v13  ;;  %v6549_v38 = vld [vmem:[%s9845_s26 + $0x110] ss:$8 sps:$4 sm:$0xff]   ;;  %v6563_v44 = vld [vmem:[%s9845_s26 + $0x134] ss:$8 sps:$4 sm:$0xff]   ;;  %v6446_v45 = vld [vmem:[%s9845_s26 + $0x6e4] ss:$8 sps:$4 sm:$0xff]  }
  0x25   :  { %v6441_v43 = vld [vmem:[%s9845_s26 + $0x6d0] ss:$8 sps:$4 sm:$0xff]   ;;  %v6444_v47 = vld [vmem:[%s9845_s26 + $0x6e0] ss:$8 sps:$4 sm:$0xff]   ;;  %v6599_v10 = vld [vmem:[%s9845_s26 + $0x194] ss:$8 sps:$4 sm:$0xff]  }
  0x26   :  { %3425 = vmatpush1.bf16.msra.mxu0 %v6377_v17  ;;  %3216 = vmatpush1.bf16.msra.mxu1 %v6482_v49  ;;  %v6423_v17 = vld [vmem:[%s9845_s26 + $0x670] ss:$8 sps:$4 sm:$0xff]   ;;  %v6451_v49 = vld [vmem:[%s9845_s26 + $0x6f4] ss:$8 sps:$4 sm:$0xff]   ;;  %v6479_v13 = vld [vmem:[%s9845_s26 + $0x740] ss:$8 sps:$4 sm:$0xff]  }
  0x27   :  { %3426 = vmatprep.subr.bf16.mxu0 %v6378_v18  ;;  %3217 = vmatprep.subr.bf16.mxu1 %v6483_v53  ;;  %v6525_v18 = vld [vmem:[%s9845_s26 + $0xd4] ss:$8 sps:$4 sm:$0xff]   ;;  %v69_v53 = vld [vmem:[%s9846_s24 + $0x60] sm:$0xff] }
  0x28   :  { %v6503_v29 = vld [vmem:[%s9845_s26 + $0x780] ss:$8 sps:$4 sm:$0xff]  }
  0x2a   :  { %3427 = vmatpush1.bf16.msra.mxu0 %v6380_v19  ;;  %3218 = vmatpush1.bf16.msra.mxu1 %v6488_v55  ;;  %v6428_v19 = vld [vmem:[%s9845_s26 + $0x684] ss:$8 sps:$4 sm:$0xff]   ;;  %v72_v55 = vld [vmem:[%s9846_s24 + $0x78] sm:$0xff] }
  0x2b   :  { %3428 = vmatprep.subr.bf16.mxu0 %v6381_v20  ;;  %3219 = vmatprep.subr.bf16.mxu1 %v6489_v56  ;;  %v6530_v20 = vld [vmem:[%s9845_s26 + $0xd0] ss:$8 sps:$4 sm:$0xff]   ;;  %v101_v56 = vpack.c.bf16 %v69_v53, %v69_v53  ;;  %v6659_v53 = vld [vmem:[%s9845_s26 + $0x234] ss:$8 sps:$4 sm:$0xff]  }
  0x2e   :  { %3429 = vmatpush1.bf16.msra.mxu0 %v6383_v21  ;;  %3220 = vmatpush1.bf16.msra.mxu1 %v6494_v58  ;;  %v6426_v21 = vld [vmem:[%s9845_s26 + $0x680] ss:$8 sps:$4 sm:$0xff]  }
  0x2f   :  { %3430 = vmatprep.subr.bf16.mxu0 %v6384_v22  ;;  %3221 = vmatprep.subr.bf16.mxu1 %v6495_v60  ;;  %v6531_v22 = vld [vmem:[%s9845_s26 + $0xe4] ss:$8 sps:$4 sm:$0xff]   ;;  %v6455_v58 = vld [vmem:[%s9845_s26 + $0x700] ss:$8 sps:$4 sm:$0xff]   ;;  %v104_v60 = vpack.c.bf16 %v72_v55, %v72_v55 }
  0x30   :  { %v6539_v55 = vld [vmem:[%s9845_s26 + $0x7e0] ss:$8 sps:$4 sm:$0xff]  }
  0x32   :  { %3431 = vmatpush1.bf16.msra.mxu0 %v6386_v23  ;;  %3222 = vmatpush1.bf16.msra.mxu1 %v6500_v63  ;;  %v6431_v23 = vld [vmem:[%s9845_s26 + $0x694] ss:$8 sps:$4 sm:$0xff]   ;;  %v6461_v63 = vld [vmem:[%s9845_s26 + $0x710] ss:$8 sps:$4 sm:$0xff]  }
  0x33   :  { %3432 = vmatprep.subr.bf16.mxu0 %v6387_v24  ;;  %3223 = vmatprep.subr.bf16.mxu1 %v6501_v0  ;;  %v6536_v24 = vld [vmem:[%s9845_s26 + $0xe0] ss:$8 sps:$4 sm:$0xff]  }
  0x34   :  { %v6579_v0 = vld [vmem:[%s9845_s26 + $0x160] ss:$8 sps:$4 sm:$0xff]  }
  0x36   :  { %3433 = vmatpush1.bf16.msra.mxu0 %v6389_v26  ;;  %3224 = vmatpush1.bf16.msra.mxu1 %v6506_v2  ;;  %v6537_v26 = vld [vmem:[%s9845_s26 + $0xf4] ss:$8 sps:$4 sm:$0xff]  }
  0x37   :  { %3434 = vmatprep.subr.bf16.mxu0 %v6390_v27  ;;  %3225 = vmatprep.subr.bf16.mxu1 %v6507_v4  ;;  %v6434_v27 = vld [vmem:[%s9845_s26 + $0x6a4] ss:$8 sps:$4 sm:$0xff]   ;;  %v6587_v2 = vld [vmem:[%s9845_s26 + $0x174] ss:$8 sps:$4 sm:$0xff]   ;;  %v6585_v4 = vld [vmem:[%s9845_s26 + $0x170] ss:$8 sps:$4 sm:$0xff]  }
  0x3a   :  { %3435 = vmatpush1.bf16.msra.mxu0 %v6392_v30  ;;  %3226 = vmatpush1.bf16.msra.mxu1 %v6512_v7  ;;  %v6432_v30 = vld [vmem:[%s9845_s26 + $0x6a0] ss:$8 sps:$4 sm:$0xff]   ;;  %v6475_v7 = vld [vmem:[%s9845_s26 + $0x734] ss:$8 sps:$4 sm:$0xff]  }
  0x3b   :  { %3436 = vmatprep.subr.bf16.mxu0 %v6393_v31  ;;  %3227 = vmatprep.subr.bf16.mxu1 %v6513_v8  ;;  %v6545_v31 = vld [vmem:[%s9845_s26 + $0x104] ss:$8 sps:$4 sm:$0xff]   ;;  %v6591_v8 = vld [vmem:[%s9845_s26 + $0x180] ss:$8 sps:$4 sm:$0xff]  }
  0x3e   :  { %3437 = vmatpush1.bf16.msra.mxu0 %v6395_v34  ;;  %3228 = vmatpush1.bf16.msra.mxu1 %v6518_v12  ;;  %v6543_v34 = vld [vmem:[%s9845_s26 + $0x100] ss:$8 sps:$4 sm:$0xff]   ;;  %v6597_v12 = vld [vmem:[%s9845_s26 + $0x190] ss:$8 sps:$4 sm:$0xff]  }
  0x3f   :  { %3438 = vmatprep.subr.bf16.mxu0 %v6396_v37  ;;  %3229 = vmatprep.subr.bf16.mxu1 %v6519_v14  ;;  %v6440_v37 = vld [vmem:[%s9845_s26 + $0x6c4] ss:$8 sps:$4 sm:$0xff]  }
  0x40   :  { %v6605_v14 = vld [vmem:[%s9845_s26 + $0x1a4] ss:$8 sps:$4 sm:$0xff]  }
  0x42   :  { %3439 = vmatpush1.bf16.msra.mxu0 %v6398_v39  ;;  %3230 = vmatpush1.bf16.msra.mxu1 %v6524_v16  ;;  %v6438_v39 = vld [vmem:[%s9845_s26 + $0x6c0] ss:$8 sps:$4 sm:$0xff]  }
  0x43   :  { %3440 = vmatprep.subr.bf16.mxu0 %v6399_v41  ;;  %3231 = vmatprep.subr.bf16.mxu1 %v6525_v18  ;;  %v6443_v41 = vld [vmem:[%s9845_s26 + $0x6d4] ss:$8 sps:$4 sm:$0xff]   ;;  %v6603_v16 = vld [vmem:[%s9845_s26 + $0x1a0] ss:$8 sps:$4 sm:$0xff]  }
  0x44   :  { %v6611_v18 = vld [vmem:[%s9845_s26 + $0x1b4] ss:$8 sps:$4 sm:$0xff]  }
  0x46   :  { %3441 = vmatpush1.bf16.msra.mxu0 %v6401_v42  ;;  %3232 = vmatpush1.bf16.msra.mxu1 %v6530_v20  ;;  %v6555_v42 = vld [vmem:[%s9845_s26 + $0x120] ss:$8 sps:$4 sm:$0xff]   ;;  %v6609_v20 = vld [vmem:[%s9845_s26 + $0x1b0] ss:$8 sps:$4 sm:$0xff]  }
  0x47   :  { %3451 = vmatprep.subr.bf16.mxu0 %v6404_v46  ;;  %3233 = vmatprep.subr.bf16.mxu1 %v6531_v22  ;;  %v6561_v46 = vld [vmem:[%s9845_s26 + $0x130] ss:$8 sps:$4 sm:$0xff]   ;;  %v6499_v22 = vld [vmem:[%s9845_s26 + $0x774] ss:$8 sps:$4 sm:$0xff]  }
  0x49   :  { %3443 = vmatmul.mubr.bf16.vlgmr.msra.gmra.mrb[0].mxu0 %v99_v48  ;;  %v6569_v48 = vld [vmem:[%s9845_s26 + $0x144] ss:$8 sps:$4 sm:$0xff]  }
  0x4a   :  { %3452 = vmatpush1.bf16.msra.mxu0 %v6402_v50  ;;  %3483 = vmatprep.mubr.bf16.mxu0 %v102_v52  ;;  %v6449_v50 = vld [vmem:[%s9845_s26 + $0x6f0] ss:$8 sps:$4 sm:$0xff]   ;;  %v6567_v52 = vld [vmem:[%s9845_s26 + $0x140] ss:$8 sps:$4 sm:$0xff]  }
  0x4b   :  { %3453 = vmatprep.subr.bf16.mxu0 %v6407_v51  ;;  %3234 = vmatpush1.bf16.msra.mxu1 %v6536_v24  ;;  %v6457_v51 = vld [vmem:[%s9845_s26 + $0x704] ss:$8 sps:$4 sm:$0xff]   ;;  %v6615_v24 = vld [vmem:[%s9845_s26 + $0x1c0] ss:$8 sps:$4 sm:$0xff]  }
  0x4c   :  { %3235 = vmatprep.subr.bf16.mxu1 %v6537_v26  ;;  %v6505_v26 = vld [vmem:[%s9845_s26 + $0x784] ss:$8 sps:$4 sm:$0xff]  }
  0x4e   :  { %3454 = vmatpush1.bf16.msra.mxu0 %v6405_v54  ;;  %v6575_v54 = vld [vmem:[%s9845_s26 + $0x154] ss:$8 sps:$4 sm:$0xff]  }
  0x4f   :  { %3455 = vmatprep.subr.bf16.mxu0 %v6410_v57  ;;  %3236 = vmatpush1.bf16.msra.mxu1 %v6542_v28  ;;  %v6573_v57 = vld [vmem:[%s9845_s26 + $0x150] ss:$8 sps:$4 sm:$0xff]  }
  0x50   :  { %3246 = vmatprep.subr.bf16.mxu1 %v6545_v31  ;;  %v6621_v28 = vld [vmem:[%s9845_s26 + $0x1d0] ss:$8 sps:$4 sm:$0xff]   ;;  %v6629_v31 = vld [vmem:[%s9845_s26 + $0x1e4] ss:$8 sps:$4 sm:$0xff]  }
  0x52   :  { %3456 = vmatpush1.bf16.msra.mxu0 %v6408_v59  ;;  %3238 = vmatmul.mubr.bf16.vlgmr.msra.gmra.mrb[0].mxu1 %v89_v33  ;;  %v6463_v59 = vld [vmem:[%s9845_s26 + $0x714] ss:$8 sps:$4 sm:$0xff]   ;;  %v6509_v33 = vld [vmem:[%s9845_s26 + $0x790] ss:$8 sps:$4 sm:$0xff]  }
  0x53   :  { %3457 = vmatprep.subr.bf16.mxu0 %v6413_v61  ;;  %3247 = vmatpush1.bf16.msra.mxu1 %v6543_v34  ;;  %v6581_v61 = vld [vmem:[%s9845_s26 + $0x164] ss:$8 sps:$4 sm:$0xff]  }
  0x54   :  { %3248 = vmatprep.subr.bf16.mxu1 %v6551_v36  ;;  %v6517_v34 = vld [vmem:[%s9845_s26 + $0x7a4] ss:$8 sps:$4 sm:$0xff]   ;;  %v6633_v36 = vld [vmem:[%s9845_s26 + $0x1f0] ss:$8 sps:$4 sm:$0xff]  }
  0x56   :  { %3458 = vmatpush1.bf16.msra.mxu0 %v6411_v62  ;;  %v60_v62 = vld [vmem:[%s9846_s24 + $0x18] sm:$0xff] }
  0x57   :  { %3459 = vmatprep.subr.bf16.mxu0 %v6416_v1  ;;  %3249 = vmatpush1.bf16.msra.mxu1 %v6549_v38  ;;  %v92_v1 = vpack.c.bf16 %v60_v62, %v60_v62  ;;  %v6515_v38 = vld [vmem:[%s9845_s26 + $0x7a0] ss:$8 sps:$4 sm:$0xff]  }
  0x58   :  { %3250 = vmatprep.subr.bf16.mxu1 %v6557_v40  ;;  %v6641_v40 = vld [vmem:[%s9845_s26 + $0x204] ss:$8 sps:$4 sm:$0xff]  }
  0x59   :  { %3278 = vmatprep.mubr.bf16.mxu1 %v92_v1  ;;  %v62_v62 = vld [vmem:[%s9846_s24 + $0x28] sm:$0xff]  ;;  %v6669_v1 = vld [vmem:[%s9845_s26 + $0x250] ss:$8 sps:$4 sm:$0xff]  }
  0x5a   :  { %3460 = vmatpush1.bf16.msra.mxu0 %v6414_v3  ;;  %v6469_v3 = vld [vmem:[%s9845_s26 + $0x724] ss:$8 sps:$4 sm:$0xff]  }
  0x5b   :  { %3461 = vmatprep.subr.bf16.mxu0 %v6419_v5  ;;  %3251 = vmatpush1.bf16.msra.mxu1 %v6555_v42  ;;  %v6467_v5 = vld [vmem:[%s9845_s26 + $0x720] ss:$8 sps:$4 sm:$0xff]  }
  0x5c   :  { %3252 = vmatprep.subr.bf16.mxu1 %v6563_v44  ;;  %v6529_v44 = vld [vmem:[%s9845_s26 + $0x7c4] ss:$8 sps:$4 sm:$0xff]  }
  0x5e   :  { %3462 = vmatpush1.bf16.msra.mxu0 %v6417_v6  ;;  %v6593_v6 = vld [vmem:[%s9845_s26 + $0x184] ss:$8 sps:$4 sm:$0xff]  }
  0x5f   :  { %3463 = vmatprep.subr.bf16.mxu0 %v6422_v9  ;;  %3253 = vmatpush1.bf16.msra.mxu1 %v6561_v46  ;;  %v6473_v9 = vld [vmem:[%s9845_s26 + $0x730] ss:$8 sps:$4 sm:$0xff]  }
  0x60   :  { %3254 = vmatprep.subr.bf16.mxu1 %v6569_v48  ;;  %v6645_v46 = vld [vmem:[%s9845_s26 + $0x210] ss:$8 sps:$4 sm:$0xff]   ;;  %v6535_v48 = vld [vmem:[%s9845_s26 + $0x7d4] ss:$8 sps:$4 sm:$0xff]  }
  0x62   :  { %3464 = vmatpush1.bf16.msra.mxu0 %v6420_v11  ;;  %v6481_v11 = vld [vmem:[%s9845_s26 + $0x744] ss:$8 sps:$4 sm:$0xff]  }
  0x63   :  { %3465 = vmatprep.subr.bf16.mxu0 %v6425_v15  ;;  %3255 = vmatpush1.bf16.msra.mxu1 %v6567_v52  ;;  %v6487_v15 = vld [vmem:[%s9845_s26 + $0x754] ss:$8 sps:$4 sm:$0xff]   ;;  %v6541_v52 = vld [vmem:[%s9845_s26 + $0x7e4] ss:$8 sps:$4 sm:$0xff]  }
  0x64   :  { %3256 = vmatprep.subr.bf16.mxu1 %v6575_v54  ;;  %v6657_v54 = vld [vmem:[%s9845_s26 + $0x230] ss:$8 sps:$4 sm:$0xff]  }
  0x66   :  { %3466 = vmatpush1.bf16.msra.mxu0 %v6423_v17  ;;  %v6485_v17 = vld [vmem:[%s9845_s26 + $0x750] ss:$8 sps:$4 sm:$0xff]  }
  0x67   :  { %3467 = vmatprep.subr.bf16.mxu0 %v6428_v19  ;;  %3257 = vmatpush1.bf16.msra.mxu1 %v6573_v57  ;;  %v6493_v19 = vld [vmem:[%s9845_s26 + $0x764] ss:$8 sps:$4 sm:$0xff]  }
  0x68   :  { %3258 = vmatprep.subr.bf16.mxu1 %v6581_v61  ;;  %v6665_v57 = vld [vmem:[%s9845_s26 + $0x244] ss:$8 sps:$4 sm:$0xff]   ;;  %v6671_v61 = vld [vmem:[%s9845_s26 + $0x254] ss:$8 sps:$4 sm:$0xff]  }
  0x6a   :  { %3468 = vmatpush1.bf16.msra.mxu0 %v6426_v21  ;;  %v6491_v21 = vld [vmem:[%s9845_s26 + $0x760] ss:$8 sps:$4 sm:$0xff]  }
  0x6b   :  { %3469 = vmatprep.subr.bf16.mxu0 %v6431_v23  ;;  %3259 = vmatpush1.bf16.msra.mxu1 %v6579_v0  ;;  %v6617_v23 = vld [vmem:[%s9845_s26 + $0x1c4] ss:$8 sps:$4 sm:$0xff]  }
  0x6c   :  { %3260 = vmatprep.subr.bf16.mxu1 %v6587_v2  ;;  %v74_v0 = vld [vmem:[%s9846_s24 + $0x88] sm:$0xff]  ;;  %v94_v2 = vpack.c.bf16 %v62_v62, %v62_v62  ;;  %v6753_v62 = vld [vmem:[%s9845_s26 + $0x330] ss:$8 sps:$4 sm:$0xff]  }
  0x6e   :  { %3470 = vmatpush1.bf16.msra.mxu0 %v6429_v25  ;;  %v6497_v25 = vld [vmem:[%s9845_s26 + $0x770] ss:$8 sps:$4 sm:$0xff]  }
  0x6f   :  { %3471 = vmatprep.subr.bf16.mxu0 %v6434_v27  ;;  %3261 = vmatpush1.bf16.msra.mxu1 %v6585_v4  ;;  %v6623_v27 = vld [vmem:[%s9845_s26 + $0x1d4] ss:$8 sps:$4 sm:$0xff]   ;;  %v6552_v4 = vld [vmem:[%s9845_s26 + $0x800] ss:$8 sps:$4 sm:$0xff]  }
  0x70   :  { %3262 = vmatprep.subr.bf16.mxu1 %v6593_v6  ;;  %v6560_v6 = vld [vmem:[%s9845_s26 + $0x814] ss:$8 sps:$4 sm:$0xff]  }
  0x72   :  { %3472 = vmatpush1.bf16.msra.mxu0 %v6432_v30  ;;  %v6511_v30 = vld [vmem:[%s9845_s26 + $0x794] ss:$8 sps:$4 sm:$0xff]  }
  0x73   :  { %3473 = vmatprep.subr.bf16.mxu0 %v6437_v32  ;;  %3263 = vmatpush1.bf16.msra.mxu1 %v6591_v8  ;;  %v6627_v32 = vld [vmem:[%s9845_s26 + $0x1e0] ss:$8 sps:$4 sm:$0xff]   ;;  %v6677_v8 = vld [vmem:[%s9845_s26 + $0x264] ss:$8 sps:$4 sm:$0xff]  }
  0x74   :  { %3264 = vmatprep.subr.bf16.mxu1 %v6599_v10  ;;  %v6566_v10 = vld [vmem:[%s9845_s26 + $0x824] ss:$8 sps:$4 sm:$0xff]  }
  0x76   :  { %3474 = vmatpush1.bf16.msra.mxu0 %v6435_v35  ;;  %v6635_v35 = vld [vmem:[%s9845_s26 + $0x1f4] ss:$8 sps:$4 sm:$0xff]  }
  0x77   :  { %3475 = vmatprep.subr.bf16.mxu0 %v6440_v37  ;;  %3265 = vmatpush1.bf16.msra.mxu1 %v6597_v12  ;;  %v59_v37 = vld [vmem:[%s9846_s24 + $0x10] sm:$0xff] }
  0x78   :  { %3266 = vmatprep.subr.bf16.mxu1 %v6605_v14  ;;  %v91_v42 = vpack.c.bf16 %v59_v37, %v59_v37  ;;  %v6681_v12 = vld [vmem:[%s9845_s26 + $0x270] ss:$8 sps:$4 sm:$0xff]   ;;  %v6572_v14 = vld [vmem:[%s9845_s26 + $0x834] ss:$8 sps:$4 sm:$0xff]   ;;  %v6600_v37 = vld [vmem:[%s9845_s26 + $0x880] ss:$8 sps:$4 sm:$0xff]  }
  0x7a   :  { %3476 = vmatpush1.bf16.msra.mxu0 %v6438_v39  ;;  %v6523_v39 = vld [vmem:[%s9845_s26 + $0x7b4] ss:$8 sps:$4 sm:$0xff]  }
  0x7b   :  { %3477 = vmatprep.subr.bf16.mxu0 %v6443_v41  ;;  %3267 = vmatpush1.bf16.msra.mxu1 %v6603_v16  ;;  %v6639_v41 = vld [vmem:[%s9845_s26 + $0x200] ss:$8 sps:$4 sm:$0xff]  }
  0x7c   :  { %3268 = vmatprep.subr.bf16.mxu1 %v6611_v18  ;;  %v6687_v16 = vld [vmem:[%s9845_s26 + $0x280] ss:$8 sps:$4 sm:$0xff]   ;;  %v6578_v18 = vld [vmem:[%s9845_s26 + $0x844] ss:$8 sps:$4 sm:$0xff]  }
  0x7e   :  { %3478 = vmatpush1.bf16.msra.mxu0 %v6441_v43  ;;  %v6521_v43 = vld [vmem:[%s9845_s26 + $0x7b0] ss:$8 sps:$4 sm:$0xff]  }
  0x7f   :  { %3479 = vmatprep.subr.bf16.mxu0 %v6446_v45  ;;  %3269 = vmatpush1.bf16.msra.mxu1 %v6609_v20  ;;  %v6647_v45 = vld [vmem:[%s9845_s26 + $0x214] ss:$8 sps:$4 sm:$0xff]   ;;  %v6693_v20 = vld [vmem:[%s9845_s26 + $0x290] ss:$8 sps:$4 sm:$0xff]  }
  0x80   :  { %3270 = vmatprep.subr.bf16.mxu1 %v6617_v23  ;;  %v6701_v23 = vld [vmem:[%s9845_s26 + $0x2a4] ss:$8 sps:$4 sm:$0xff]  }
  0x82   :  { %3480 = vmatpush1.bf16.msra.mxu0 %v6444_v47  ;;  %v6527_v47 = vld [vmem:[%s9845_s26 + $0x7c0] ss:$8 sps:$4 sm:$0xff]  }
  0x83   :  { %3481 = vmatprep.subr.bf16.mxu0 %v6451_v49  ;;  %3271 = vmatpush1.bf16.msra.mxu1 %v6615_v24  ;;  %v6653_v49 = vld [vmem:[%s9845_s26 + $0x224] ss:$8 sps:$4 sm:$0xff]   ;;  %v6699_v24 = vld [vmem:[%s9845_s26 + $0x2a0] ss:$8 sps:$4 sm:$0xff]  }
  0x84   :  { %3272 = vmatprep.subr.bf16.mxu1 %v6623_v27  ;;  %v6707_v27 = vld [vmem:[%s9845_s26 + $0x2b4] ss:$8 sps:$4 sm:$0xff]  }
  0x86   :  { %3482 = vmatpush1.bf16.msra.mxu0 %v6449_v50  ;;  %v6651_v50 = vld [vmem:[%s9845_s26 + $0x220] ss:$8 sps:$4 sm:$0xff]  }
  0x87   :  { %3492 = vmatprep.subr.bf16.mxu0 %v6457_v51  ;;  %3273 = vmatpush1.bf16.msra.mxu1 %v6621_v28  ;;  %v6533_v51 = vld [vmem:[%s9845_s26 + $0x7d0] ss:$8 sps:$4 sm:$0xff]  }
  0x88   :  { %3274 = vmatprep.subr.bf16.mxu1 %v6629_v31  ;;  %v6705_v28 = vld [vmem:[%s9845_s26 + $0x2b0] ss:$8 sps:$4 sm:$0xff]   ;;  %v6713_v31 = vld [vmem:[%s9845_s26 + $0x2c4] ss:$8 sps:$4 sm:$0xff]  }
  0x89   :  { %3484 = vmatmul.mubr.bf16.vlgmr.msra.gmra.mrb[0].mxu0 %v101_v56  ;;  %v6548_v56 = vld [vmem:[%s9845_s26 + $0x7f4] ss:$8 sps:$4 sm:$0xff]  }
  0x8a   :  { %3493 = vmatpush1.bf16.msra.mxu0 %v6455_v58  ;;  %3524 = vmatprep.mubr.bf16.mxu0 %v104_v60  ;;  %v6663_v58 = vld [vmem:[%s9845_s26 + $0x240] ss:$8 sps:$4 sm:$0xff]   ;;  %v71_v60 = vld [vmem:[%s9846_s24 + $0x70] sm:$0xff] }
  0x8b   :  { %3494 = vmatprep.subr.bf16.mxu0 %v6463_v59  ;;  %3275 = vmatpush1.bf16.msra.mxu1 %v6627_v32  ;;  %v6546_v59 = vld [vmem:[%s9845_s26 + $0x7f0] ss:$8 sps:$4 sm:$0xff]   ;;  %v6711_v32 = vld [vmem:[%s9845_s26 + $0x2c0] ss:$8 sps:$4 sm:$0xff]  }
  0x8c   :  { %3276 = vmatprep.subr.bf16.mxu1 %v6635_v35  ;;  %v6719_v35 = vld [vmem:[%s9845_s26 + $0x2d4] ss:$8 sps:$4 sm:$0xff]  }
  0x8e   :  { %3495 = vmatpush1.bf16.msra.mxu0 %v6461_v63  ;;  %v6554_v63 = vld [vmem:[%s9845_s26 + $0x804] ss:$8 sps:$4 sm:$0xff]  }
  0x8f   :  { %3496 = vmatprep.subr.bf16.mxu0 %v6469_v3  ;;  %3277 = vmatpush1.bf16.msra.mxu1 %v6633_v36  ;;  %v103_v3 = vpack.c.bf16 %v71_v60, %v71_v60  ;;  %v6717_v36 = vld [vmem:[%s9845_s26 + $0x2d0] ss:$8 sps:$4 sm:$0xff]   ;;  %v6638_v60 = vld [vmem:[%s9845_s26 + $0x8e4] ss:$8 sps:$4 sm:$0xff]  }
  0x90   :  { %3287 = vmatprep.subr.bf16.mxu1 %v6641_v40  ;;  %v6723_v40 = vld [vmem:[%s9845_s26 + $0x2e0] ss:$8 sps:$4 sm:$0xff]  }
  0x92   :  { %3497 = vmatpush1.bf16.msra.mxu0 %v6467_v5  ;;  %3279 = vmatmul.mubr.bf16.vlgmr.msra.gmra.mrb[0].mxu1 %v91_v42  ;;  %v106_v5 = vpack.c.bf16 %v74_v0, %v74_v0  ;;  %v6614_v42 = vld [vmem:[%s9845_s26 + $0x8a4] ss:$8 sps:$4 sm:$0xff]   ;;  %v6644_v0 = vld [vmem:[%s9845_s26 + $0x8f4] ss:$8 sps:$4 sm:$0xff]  }
  0x93   :  { %3498 = vmatprep.subr.bf16.mxu0 %v6475_v7  ;;  %3288 = vmatpush1.bf16.msra.mxu1 %v6639_v41  ;;  %v6675_v7 = vld [vmem:[%s9845_s26 + $0x260] ss:$8 sps:$4 sm:$0xff]   ;;  %v6606_v41 = vld [vmem:[%s9845_s26 + $0x890] ss:$8 sps:$4 sm:$0xff]  }
  0x94   :  { %3289 = vmatprep.subr.bf16.mxu1 %v6647_v45  ;;  %3319 = vmatprep.mubr.bf16.mxu1 %v94_v2  ;;  %v61_v45 = vld [vmem:[%s9846_s24 + $0x20] sm:$0xff] }
  0x95   :  { %v6759_v2 = vld [vmem:[%s9845_s26 + $0x340] ss:$8 sps:$4 sm:$0xff]  }
  0x96   :  { %3499 = vmatpush1.bf16.msra.mxu0 %v6473_v9  ;;  %v6558_v9 = vld [vmem:[%s9845_s26 + $0x810] ss:$8 sps:$4 sm:$0xff]  }
  0x97   :  { %3500 = vmatprep.subr.bf16.mxu0 %v6481_v11  ;;  %3290 = vmatpush1.bf16.msra.mxu1 %v6645_v46  ;;  %v6683_v11 = vld [vmem:[%s9845_s26 + $0x274] ss:$8 sps:$4 sm:$0xff]   ;;  %v6612_v46 = vld [vmem:[%s9845_s26 + $0x8a0] ss:$8 sps:$4 sm:$0xff]  }
  0x98   :  { %3291 = vmatprep.subr.bf16.mxu1 %v6653_v49  ;;  %v6735_v49 = vld [vmem:[%s9845_s26 + $0x300] ss:$8 sps:$4 sm:$0xff]  }
  0x9a   :  { %3501 = vmatpush1.bf16.msra.mxu0 %v6479_v13  ;;  %v6564_v13 = vld [vmem:[%s9845_s26 + $0x820] ss:$8 sps:$4 sm:$0xff]  }
  0x9b   :  { %3502 = vmatprep.subr.bf16.mxu0 %v6487_v15  ;;  %3292 = vmatpush1.bf16.msra.mxu1 %v6651_v50  ;;  %v6689_v15 = vld [vmem:[%s9845_s26 + $0x284] ss:$8 sps:$4 sm:$0xff]   ;;  %v93_v50 = vpack.c.bf16 %v61_v45, %v61_v45  ;;  %v6696_v45 = vld [vmem:[%s9845_s26 + $0x980] ss:$8 sps:$4 sm:$0xff]  }
  0x9c   :  { %3293 = vmatprep.subr.bf16.mxu1 %v6659_v53  ;;  %v6743_v53 = vld [vmem:[%s9845_s26 + $0x314] ss:$8 sps:$4 sm:$0xff]  }
  0x9e   :  { %3503 = vmatpush1.bf16.msra.mxu0 %v6485_v17  ;;  %v6570_v17 = vld [vmem:[%s9845_s26 + $0x830] ss:$8 sps:$4 sm:$0xff]  }
  0x9f   :  { %3504 = vmatprep.subr.bf16.mxu0 %v6493_v19  ;;  %3294 = vmatpush1.bf16.msra.mxu1 %v6657_v54  ;;  %v6695_v19 = vld [vmem:[%s9845_s26 + $0x294] ss:$8 sps:$4 sm:$0xff]   ;;  %v6741_v54 = vld [vmem:[%s9845_s26 + $0x310] ss:$8 sps:$4 sm:$0xff]  }
  0xa0   :  { %3295 = vmatprep.subr.bf16.mxu1 %v6665_v57  ;;  %v6749_v57 = vld [vmem:[%s9845_s26 + $0x324] ss:$8 sps:$4 sm:$0xff]  }
  0xa2   :  { %3505 = vmatpush1.bf16.msra.mxu0 %v6491_v21  ;;  %v6576_v21 = vld [vmem:[%s9845_s26 + $0x840] ss:$8 sps:$4 sm:$0xff]  }
  0xa3   :  { %3506 = vmatprep.subr.bf16.mxu0 %v6499_v22  ;;  %3296 = vmatpush1.bf16.msra.mxu1 %v6663_v58  ;;  %v6584_v22 = vld [vmem:[%s9845_s26 + $0x854] ss:$8 sps:$4 sm:$0xff]   ;;  %v6747_v58 = vld [vmem:[%s9845_s26 + $0x320] ss:$8 sps:$4 sm:$0xff]  }
  0xa4   :  { %3297 = vmatprep.subr.bf16.mxu1 %v6671_v61  ;;  %v6755_v61 = vld [vmem:[%s9845_s26 + $0x334] ss:$8 sps:$4 sm:$0xff]  }
  0xa6   :  { %3507 = vmatpush1.bf16.msra.mxu0 %v6497_v25  ;;  %v6582_v25 = vld [vmem:[%s9845_s26 + $0x850] ss:$8 sps:$4 sm:$0xff]  }
  0xa7   :  { %3508 = vmatprep.subr.bf16.mxu0 %v6505_v26  ;;  %3298 = vmatpush1.bf16.msra.mxu1 %v6669_v1  ;;  %v6590_v26 = vld [vmem:[%s9845_s26 + $0x864] ss:$8 sps:$4 sm:$0xff]  }
  0xa8   :  { %3299 = vmatprep.subr.bf16.mxu1 %v6677_v8  ;;  %v6761_v1 = vld [vmem:[%s9845_s26 + $0x344] ss:$8 sps:$4 sm:$0xff]   ;;  %v76_v8 = vld [vmem:[%s9846_s24 + $0x98] sm:$0xff] }
  0xaa   :  { %3509 = vmatpush1.bf16.msra.mxu0 %v6503_v29  ;;  %v6588_v29 = vld [vmem:[%s9845_s26 + $0x860] ss:$8 sps:$4 sm:$0xff]  }
  0xab   :  { %3510 = vmatprep.subr.bf16.mxu0 %v6511_v30  ;;  %3300 = vmatpush1.bf16.msra.mxu1 %v6675_v7  ;;  %v6596_v30 = vld [vmem:[%s9845_s26 + $0x874] ss:$8 sps:$4 sm:$0xff]   ;;  %v6650_v7 = vld [vmem:[%s9845_s26 + $0x904] ss:$8 sps:$4 sm:$0xff]  }
  0xac   :  { %3301 = vmatprep.subr.bf16.mxu1 %v6683_v11 }
  0xae   :  { %3511 = vmatpush1.bf16.msra.mxu0 %v6509_v33  ;;  %v6594_v33 = vld [vmem:[%s9845_s26 + $0x870] ss:$8 sps:$4 sm:$0xff]  }
  0xaf   :  { %3512 = vmatprep.subr.bf16.mxu0 %v6517_v34  ;;  %3302 = vmatpush1.bf16.msra.mxu1 %v6681_v12  ;;  %v6602_v34 = vld [vmem:[%s9845_s26 + $0x884] ss:$8 sps:$4 sm:$0xff]   ;;  %v6648_v12 = vld [vmem:[%s9845_s26 + $0x900] ss:$8 sps:$4 sm:$0xff]  }
  0xb0   :  { %3303 = vmatprep.subr.bf16.mxu1 %v6689_v15  ;;  %v6771_v15 = vld [vmem:[%s9845_s26 + $0x360] ss:$8 sps:$4 sm:$0xff]  }
  0xb2   :  { %3513 = vmatpush1.bf16.msra.mxu0 %v6515_v38  ;;  %v6608_v38 = vld [vmem:[%s9845_s26 + $0x894] ss:$8 sps:$4 sm:$0xff]  }
  0xb3   :  { %3514 = vmatprep.subr.bf16.mxu0 %v6523_v39  ;;  %3304 = vmatpush1.bf16.msra.mxu1 %v6687_v16  ;;  %v6725_v39 = vld [vmem:[%s9845_s26 + $0x2e4] ss:$8 sps:$4 sm:$0xff]  }
  0xb4   :  { %3305 = vmatprep.subr.bf16.mxu1 %v6695_v19  ;;  %v6773_v16 = vld [vmem:[%s9845_s26 + $0x364] ss:$8 sps:$4 sm:$0xff]   ;;  %v6779_v19 = vld [vmem:[%s9845_s26 + $0x374] ss:$8 sps:$4 sm:$0xff]  }
  0xb6   :  { %3515 = vmatpush1.bf16.msra.mxu0 %v6521_v43  ;;  %v6731_v43 = vld [vmem:[%s9845_s26 + $0x2f4] ss:$8 sps:$4 sm:$0xff]  }
  0xb7   :  { %3516 = vmatprep.subr.bf16.mxu0 %v6529_v44  ;;  %3306 = vmatpush1.bf16.msra.mxu1 %v6693_v20  ;;  %v6729_v44 = vld [vmem:[%s9845_s26 + $0x2f0] ss:$8 sps:$4 sm:$0xff]  }
  0xb8   :  { %3307 = vmatprep.subr.bf16.mxu1 %v6701_v23  ;;  %v6777_v20 = vld [vmem:[%s9845_s26 + $0x370] ss:$8 sps:$4 sm:$0xff]   ;;  %v6785_v23 = vld [vmem:[%s9845_s26 + $0x384] ss:$8 sps:$4 sm:$0xff]  }
  0xba   :  { %3517 = vmatpush1.bf16.msra.mxu0 %v6527_v47  ;;  %v6620_v47 = vld [vmem:[%s9845_s26 + $0x8b4] ss:$8 sps:$4 sm:$0xff]  }
  0xbb   :  { %3518 = vmatprep.subr.bf16.mxu0 %v6535_v48  ;;  %3308 = vmatpush1.bf16.msra.mxu1 %v6699_v24  ;;  %v6737_v48 = vld [vmem:[%s9845_s26 + $0x304] ss:$8 sps:$4 sm:$0xff]   ;;  %v6783_v24 = vld [vmem:[%s9845_s26 + $0x380] ss:$8 sps:$4 sm:$0xff]  }
  0xbc   :  { %3309 = vmatprep.subr.bf16.mxu1 %v6707_v27  ;;  %v6791_v27 = vld [vmem:[%s9845_s26 + $0x394] ss:$8 sps:$4 sm:$0xff]  }
  0xbe   :  { %3519 = vmatpush1.bf16.msra.mxu0 %v6533_v51  ;;  %v6618_v51 = vld [vmem:[%s9845_s26 + $0x8b0] ss:$8 sps:$4 sm:$0xff]  }
  0xbf   :  { %3520 = vmatprep.subr.bf16.mxu0 %v6541_v52  ;;  %3310 = vmatpush1.bf16.msra.mxu1 %v6705_v28  ;;  %v6626_v52 = vld [vmem:[%s9845_s26 + $0x8c4] ss:$8 sps:$4 sm:$0xff]   ;;  %v6789_v28 = vld [vmem:[%s9845_s26 + $0x390] ss:$8 sps:$4 sm:$0xff]  }
  0xc0   :  { %3311 = vmatprep.subr.bf16.mxu1 %v6713_v31  ;;  %v6797_v31 = vld [vmem:[%s9845_s26 + $0x3a4] ss:$8 sps:$4 sm:$0xff]  }
  0xc2   :  { %3521 = vmatpush1.bf16.msra.mxu0 %v6539_v55  ;;  %v6624_v55 = vld [vmem:[%s9845_s26 + $0x8c0] ss:$8 sps:$4 sm:$0xff]  }
  0xc3   :  { %3522 = vmatprep.subr.bf16.mxu0 %v6548_v56  ;;  %3312 = vmatpush1.bf16.msra.mxu1 %v6711_v32  ;;  %v6632_v56 = vld [vmem:[%s9845_s26 + $0x8d4] ss:$8 sps:$4 sm:$0xff]   ;;  %v6795_v32 = vld [vmem:[%s9845_s26 + $0x3a0] ss:$8 sps:$4 sm:$0xff]  }
  0xc4   :  { %3313 = vmatprep.subr.bf16.mxu1 %v6719_v35  ;;  %v6803_v35 = vld [vmem:[%s9845_s26 + $0x3b4] ss:$8 sps:$4 sm:$0xff]  }
  0xc6   :  { %3523 = vmatpush1.bf16.msra.mxu0 %v6546_v59  ;;  %v6630_v59 = vld [vmem:[%s9845_s26 + $0x8d0] ss:$8 sps:$4 sm:$0xff]  }
  0xc7   :  { %3533 = vmatprep.subr.bf16.mxu0 %v6554_v63  ;;  %3314 = vmatpush1.bf16.msra.mxu1 %v6717_v36  ;;  %v6636_v63 = vld [vmem:[%s9845_s26 + $0x8e0] ss:$8 sps:$4 sm:$0xff]   ;;  %v6801_v36 = vld [vmem:[%s9845_s26 + $0x3b0] ss:$8 sps:$4 sm:$0xff]  }
  0xc8   :  { %3315 = vmatprep.subr.bf16.mxu1 %v6725_v39  ;;  %v6809_v39 = vld [vmem:[%s9845_s26 + $0x3c4] ss:$8 sps:$4 sm:$0xff]  }
  0xc9   :  { %3525 = vmatmul.mubr.bf16.vlgmr.msra.gmra.mrb[0].mxu0 %v103_v3  ;;  %v6642_v3 = vld [vmem:[%s9845_s26 + $0x8f0] ss:$8 sps:$4 sm:$0xff]  }
  0xca   :  { %3534 = vmatpush1.bf16.msra.mxu0 %v6552_v4  ;;  %3565 = vmatprep.mubr.bf16.mxu0 %v106_v5  ;;  %v73_v4 = vld [vmem:[%s9846_s24 + $0x80] sm:$0xff]  ;;  %v6767_v5 = vld [vmem:[%s9845_s26 + $0x354] ss:$8 sps:$4 sm:$0xff]  }
  0xcb   :  { %3535 = vmatprep.subr.bf16.mxu0 %v6560_v6  ;;  %3316 = vmatpush1.bf16.msra.mxu1 %v6723_v40  ;;  %v64_v6 = vld [vmem:[%s9846_s24 + $0x38] sm:$0xff]  ;;  %v105_v11 = vpack.c.bf16 %v73_v4, %v73_v4  ;;  %v6807_v40 = vld [vmem:[%s9845_s26 + $0x3c0] ss:$8 sps:$4 sm:$0xff]  }
  0xcc   :  { %3317 = vmatprep.subr.bf16.mxu1 %v6731_v43  ;;  %v6815_v43 = vld [vmem:[%s9845_s26 + $0x3d4] ss:$8 sps:$4 sm:$0xff]  }
  0xcd   :  { %v6851_v4 = vld [vmem:[%s9845_s26 + $0x434] ss:$8 sps:$4 sm:$0xff]  }
  0xce   :  { %3536 = vmatpush1.bf16.msra.mxu0 %v6558_v9  ;;  %v6765_v9 = vld [vmem:[%s9845_s26 + $0x350] ss:$8 sps:$4 sm:$0xff]  }
  0xcf   :  { %3537 = vmatprep.subr.bf16.mxu0 %v6566_v10  ;;  %3318 = vmatpush1.bf16.msra.mxu1 %v6729_v44  ;;  %v96_v10 = vpack.c.bf16 %v64_v6, %v64_v6  ;;  %v6813_v44 = vld [vmem:[%s9845_s26 + $0x3d0] ss:$8 sps:$4 sm:$0xff]  }
  0xd0   :  { %3328 = vmatprep.subr.bf16.mxu1 %v6737_v48  ;;  %v6819_v48 = vld [vmem:[%s9845_s26 + $0x3e0] ss:$8 sps:$4 sm:$0xff]   ;;  %v6849_v6 = vld [vmem:[%s9845_s26 + $0x430] ss:$8 sps:$4 sm:$0xff]  }
  0xd2   :  { %3538 = vmatpush1.bf16.msra.mxu0 %v6564_v13  ;;  %3320 = vmatmul.mubr.bf16.vlgmr.msra.gmra.mrb[0].mxu1 %v93_v50  ;;  %v108_v13 = vpack.c.bf16 %v76_v8, %v76_v8  ;;  %v6710_v50 = vld [vmem:[%s9845_s26 + $0x9a4] ss:$8 sps:$4 sm:$0xff]  }
  0xd3   :  { %3539 = vmatprep.subr.bf16.mxu0 %v6572_v14  ;;  %3329 = vmatpush1.bf16.msra.mxu1 %v6735_v49  ;;  %v6656_v14 = vld [vmem:[%s9845_s26 + $0x914] ss:$8 sps:$4 sm:$0xff]   ;;  %v6702_v49 = vld [vmem:[%s9845_s26 + $0x990] ss:$8 sps:$4 sm:$0xff]   ;;  %v6857_v8 = vld [vmem:[%s9845_s26 + $0x444] ss:$8 sps:$4 sm:$0xff]  }
  0xd4   :  { %3330 = vmatprep.subr.bf16.mxu1 %v6743_v53  ;;  %3360 = vmatprep.mubr.bf16.mxu1 %v96_v10  ;;  %v63_v53 = vld [vmem:[%s9846_s24 + $0x30] sm:$0xff]  ;;  %v6855_v10 = vld [vmem:[%s9845_s26 + $0x440] ss:$8 sps:$4 sm:$0xff]  }
  0xd6   :  { %3540 = vmatpush1.bf16.msra.mxu0 %v6570_v17  ;;  %v6654_v17 = vld [vmem:[%s9845_s26 + $0x910] ss:$8 sps:$4 sm:$0xff]  }
  0xd7   :  { %3541 = vmatprep.subr.bf16.mxu0 %v6578_v18  ;;  %3331 = vmatpush1.bf16.msra.mxu1 %v6741_v54  ;;  %v6662_v18 = vld [vmem:[%s9845_s26 + $0x924] ss:$8 sps:$4 sm:$0xff]   ;;  %v6708_v54 = vld [vmem:[%s9845_s26 + $0x9a0] ss:$8 sps:$4 sm:$0xff]  }
  0xd8   :  { %3332 = vmatprep.subr.bf16.mxu1 %v6749_v57  ;;  %v6831_v57 = vld [vmem:[%s9845_s26 + $0x400] ss:$8 sps:$4 sm:$0xff]  }
  0xda   :  { %3542 = vmatpush1.bf16.msra.mxu0 %v6576_v21  ;;  %v6660_v21 = vld [vmem:[%s9845_s26 + $0x920] ss:$8 sps:$4 sm:$0xff]  }
  0xdb   :  { %3543 = vmatprep.subr.bf16.mxu0 %v6584_v22  ;;  %3333 = vmatpush1.bf16.msra.mxu1 %v6747_v58  ;;  %v6668_v22 = vld [vmem:[%s9845_s26 + $0x934] ss:$8 sps:$4 sm:$0xff]   ;;  %v95_v58 = vpack.c.bf16 %v63_v53, %v63_v53  ;;  %v6792_v53 = vld [vmem:[%s9845_s26 + $0xa80] ss:$8 sps:$4 sm:$0xff]  }
  0xdc   :  { %3334 = vmatprep.subr.bf16.mxu1 %v6755_v61  ;;  %v6722_v61 = vld [vmem:[%s9845_s26 + $0x9c4] ss:$8 sps:$4 sm:$0xff]  }
  0xde   :  { %3544 = vmatpush1.bf16.msra.mxu0 %v6582_v25  ;;  %v6666_v25 = vld [vmem:[%s9845_s26 + $0x930] ss:$8 sps:$4 sm:$0xff]  }
  0xdf   :  { %3545 = vmatprep.subr.bf16.mxu0 %v6590_v26  ;;  %3335 = vmatpush1.bf16.msra.mxu1 %v6753_v62  ;;  %v6674_v26 = vld [vmem:[%s9845_s26 + $0x944] ss:$8 sps:$4 sm:$0xff]   ;;  %v6837_v62 = vld [vmem:[%s9845_s26 + $0x410] ss:$8 sps:$4 sm:$0xff]  }
  0xe0   :  { %3336 = vmatprep.subr.bf16.mxu1 %v6761_v1  ;;  %v6728_v1 = vld [vmem:[%s9845_s26 + $0x9d4] ss:$8 sps:$4 sm:$0xff]  }
  0xe2   :  { %3546 = vmatpush1.bf16.msra.mxu0 %v6588_v29  ;;  %v6672_v29 = vld [vmem:[%s9845_s26 + $0x940] ss:$8 sps:$4 sm:$0xff]  }
  0xe3   :  { %3547 = vmatprep.subr.bf16.mxu0 %v6596_v30  ;;  %3337 = vmatpush1.bf16.msra.mxu1 %v6759_v2  ;;  %v6680_v30 = vld [vmem:[%s9845_s26 + $0x954] ss:$8 sps:$4 sm:$0xff]   ;;  %v6843_v2 = vld [vmem:[%s9845_s26 + $0x420] ss:$8 sps:$4 sm:$0xff]  }
  0xe4   :  { %3338 = vmatprep.subr.bf16.mxu1 %v6767_v5  ;;  %v6734_v5 = vld [vmem:[%s9845_s26 + $0x9e4] ss:$8 sps:$4 sm:$0xff]  }
  0xe6   :  { %3548 = vmatpush1.bf16.msra.mxu0 %v6594_v33  ;;  %v6678_v33 = vld [vmem:[%s9845_s26 + $0x950] ss:$8 sps:$4 sm:$0xff]  }
  0xe7   :  { %3549 = vmatprep.subr.bf16.mxu0 %v6602_v34  ;;  %3339 = vmatpush1.bf16.msra.mxu1 %v6765_v9  ;;  %v6686_v34 = vld [vmem:[%s9845_s26 + $0x964] ss:$8 sps:$4 sm:$0xff]   ;;  %v6740_v9 = vld [vmem:[%s9845_s26 + $0x9f4] ss:$8 sps:$4 sm:$0xff]  }
  0xe8   :  { %3340 = vmatprep.subr.bf16.mxu1 %v6773_v16  ;;  %v6746_v16 = vld [vmem:[%s9845_s26 + $0xa04] ss:$8 sps:$4 sm:$0xff]  }
  0xea   :  { %3550 = vmatpush1.bf16.msra.mxu0 %v6600_v37  ;;  %v6684_v37 = vld [vmem:[%s9845_s26 + $0x960] ss:$8 sps:$4 sm:$0xff]  }
  0xeb   :  { %3551 = vmatprep.subr.bf16.mxu0 %v6608_v38  ;;  %3341 = vmatpush1.bf16.msra.mxu1 %v6771_v15  ;;  %v6692_v38 = vld [vmem:[%s9845_s26 + $0x974] ss:$8 sps:$4 sm:$0xff]  }
  0xec   :  { %3342 = vmatprep.subr.bf16.mxu1 %v6779_v19  ;;  %v6861_v19 = vld [vmem:[%s9845_s26 + $0x450] ss:$8 sps:$4 sm:$0xff]  }
  0xee   :  { %3552 = vmatpush1.bf16.msra.mxu0 %v6606_v41  ;;  %v6690_v41 = vld [vmem:[%s9845_s26 + $0x970] ss:$8 sps:$4 sm:$0xff]  }
  0xef   :  { %3553 = vmatprep.subr.bf16.mxu0 %v6614_v42  ;;  %3343 = vmatpush1.bf16.msra.mxu1 %v6777_v20  ;;  %v6698_v42 = vld [vmem:[%s9845_s26 + $0x984] ss:$8 sps:$4 sm:$0xff]   ;;  %v6744_v20 = vld [vmem:[%s9845_s26 + $0xa00] ss:$8 sps:$4 sm:$0xff]  }
  0xf0   :  { %3344 = vmatprep.subr.bf16.mxu1 %v6785_v23  ;;  %v6869_v23 = vld [vmem:[%s9845_s26 + $0x464] ss:$8 sps:$4 sm:$0xff]  }
  0xf2   :  { %3554 = vmatpush1.bf16.msra.mxu0 %v6612_v46  ;;  %v6704_v46 = vld [vmem:[%s9845_s26 + $0x994] ss:$8 sps:$4 sm:$0xff]  }
  0xf3   :  { %3555 = vmatprep.subr.bf16.mxu0 %v6620_v47  ;;  %3345 = vmatpush1.bf16.msra.mxu1 %v6783_v24  ;;  %v6821_v47 = vld [vmem:[%s9845_s26 + $0x3e4] ss:$8 sps:$4 sm:$0xff]   ;;  %v6867_v24 = vld [vmem:[%s9845_s26 + $0x460] ss:$8 sps:$4 sm:$0xff]  }
  0xf4   :  { %3346 = vmatprep.subr.bf16.mxu1 %v6791_v27  ;;  %v6758_v27 = vld [vmem:[%s9845_s26 + $0xa24] ss:$8 sps:$4 sm:$0xff]  }
  0xf6   :  { %3556 = vmatpush1.bf16.msra.mxu0 %v6618_v51  ;;  %v6827_v51 = vld [vmem:[%s9845_s26 + $0x3f4] ss:$8 sps:$4 sm:$0xff]  }
  0xf7   :  { %3557 = vmatprep.subr.bf16.mxu0 %v6626_v52  ;;  %3347 = vmatpush1.bf16.msra.mxu1 %v6789_v28  ;;  %v6825_v52 = vld [vmem:[%s9845_s26 + $0x3f0] ss:$8 sps:$4 sm:$0xff]  }
  0xf8   :  { %3348 = vmatprep.subr.bf16.mxu1 %v6797_v31  ;;  %v6873_v28 = vld [vmem:[%s9845_s26 + $0x470] ss:$8 sps:$4 sm:$0xff]   ;;  %v6764_v31 = vld [vmem:[%s9845_s26 + $0xa34] ss:$8 sps:$4 sm:$0xff]  }
  0xfa   :  { %3558 = vmatpush1.bf16.msra.mxu0 %v6624_v55  ;;  %v6716_v55 = vld [vmem:[%s9845_s26 + $0x9b4] ss:$8 sps:$4 sm:$0xff]  }
  0xfb   :  { %3559 = vmatprep.subr.bf16.mxu0 %v6632_v56  ;;  %3349 = vmatpush1.bf16.msra.mxu1 %v6795_v32  ;;  %v6833_v56 = vld [vmem:[%s9845_s26 + $0x404] ss:$8 sps:$4 sm:$0xff]   ;;  %v6879_v32 = vld [vmem:[%s9845_s26 + $0x480] ss:$8 sps:$4 sm:$0xff]  }
  0xfc   :  { %3350 = vmatprep.subr.bf16.mxu1 %v6803_v35  ;;  %v6770_v35 = vld [vmem:[%s9845_s26 + $0xa44] ss:$8 sps:$4 sm:$0xff]  }
  0xfe   :  { %3560 = vmatpush1.bf16.msra.mxu0 %v6630_v59  ;;  %v6714_v59 = vld [vmem:[%s9845_s26 + $0x9b0] ss:$8 sps:$4 sm:$0xff]  }
  0xff   :  { %3561 = vmatprep.subr.bf16.mxu0 %v6638_v60  ;;  %3351 = vmatpush1.bf16.msra.mxu1 %v6801_v36  ;;  %v6839_v60 = vld [vmem:[%s9845_s26 + $0x414] ss:$8 sps:$4 sm:$0xff]   ;;  %v6885_v36 = vld [vmem:[%s9845_s26 + $0x490] ss:$8 sps:$4 sm:$0xff]  }
 0x100   :  { %3352 = vmatprep.subr.bf16.mxu1 %v6809_v39  ;;  %v6776_v39 = vld [vmem:[%s9845_s26 + $0xa54] ss:$8 sps:$4 sm:$0xff]  }
 0x102   :  { %3562 = vmatpush1.bf16.msra.mxu0 %v6636_v63  ;;  %v6720_v63 = vld [vmem:[%s9845_s26 + $0x9c0] ss:$8 sps:$4 sm:$0xff]  }
 0x103   :  { %3563 = vmatprep.subr.bf16.mxu0 %v6644_v0  ;;  %3353 = vmatpush1.bf16.msra.mxu1 %v6807_v40  ;;  %v6845_v0 = vld [vmem:[%s9845_s26 + $0x424] ss:$8 sps:$4 sm:$0xff]   ;;  %v6891_v40 = vld [vmem:[%s9845_s26 + $0x4a0] ss:$8 sps:$4 sm:$0xff]  }
 0x104   :  { %3354 = vmatprep.subr.bf16.mxu1 %v6815_v43  ;;  %v6782_v43 = vld [vmem:[%s9845_s26 + $0xa64] ss:$8 sps:$4 sm:$0xff]  }
 0x106   :  { %3564 = vmatpush1.bf16.msra.mxu0 %v6642_v3  ;;  %v6726_v3 = vld [vmem:[%s9845_s26 + $0x9d0] ss:$8 sps:$4 sm:$0xff]  }
 0x107   :  { %3574 = vmatprep.subr.bf16.mxu0 %v6650_v7  ;;  %3355 = vmatpush1.bf16.msra.mxu1 %v6813_v44  ;;  %v6732_v7 = vld [vmem:[%s9845_s26 + $0x9e0] ss:$8 sps:$4 sm:$0xff]   ;;  %v6897_v44 = vld [vmem:[%s9845_s26 + $0x4b0] ss:$8 sps:$4 sm:$0xff]  }
 0x108   :  { %3356 = vmatprep.subr.bf16.mxu1 %v6821_v47  ;;  %v6788_v47 = vld [vmem:[%s9845_s26 + $0xa74] ss:$8 sps:$4 sm:$0xff]  }
 0x109   :  { %3566 = vmatmul.mubr.bf16.vlgmr.msra.gmra.mrb[0].mxu0 %v105_v11  ;;  %v66_v11 = vld [vmem:[%s9846_s24 + $0x48] sm:$0xff] }
 0x10a   :  { %3575 = vmatpush1.bf16.msra.mxu0 %v6648_v12  ;;  %3606 = vmatprep.mubr.bf16.mxu0 %v108_v13  ;;  %v6738_v12 = vld [vmem:[%s9845_s26 + $0x9f0] ss:$8 sps:$4 sm:$0xff]   ;;  %v98_v15 = vpack.c.bf16 %v66_v11, %v66_v11  ;;  %v6842_v11 = vld [vmem:[%s9845_s26 + $0xb04] ss:$8 sps:$4 sm:$0xff]  }
 0x10b   :  { %3576 = vmatprep.subr.bf16.mxu0 %v6656_v14  ;;  %3357 = vmatpush1.bf16.msra.mxu1 %v6819_v48  ;;  %v75_v13 = vld [vmem:[%s9846_s24 + $0x90] sm:$0xff]  ;;  %v6903_v48 = vld [vmem:[%s9845_s26 + $0x4c0] ss:$8 sps:$4 sm:$0xff]  }
 0x10c   :  { %3358 = vmatprep.subr.bf16.mxu1 %v6827_v51  ;;  %v6863_v14 = vld [vmem:[%s9845_s26 + $0x454] ss:$8 sps:$4 sm:$0xff]   ;;  %v6794_v51 = vld [vmem:[%s9845_s26 + $0xa84] ss:$8 sps:$4 sm:$0xff]  }
 0x10e   :  { %3577 = vmatpush1.bf16.msra.mxu0 %v6654_v17  ;;  %v78_v17 = vld [vmem:[%s9846_s24 + $0xa8] sm:$0xff] }
 0x10f   :  { %3578 = vmatprep.subr.bf16.mxu0 %v6662_v18  ;;  %3359 = vmatpush1.bf16.msra.mxu1 %v6825_v52  ;;  %v107_v18 = vpack.c.bf16 %v75_v13, %v75_v13  ;;  %v6909_v52 = vld [vmem:[%s9845_s26 + $0x4d0] ss:$8 sps:$4 sm:$0xff]  }
 0x110   :  { %3369 = vmatprep.subr.bf16.mxu1 %v6833_v56  ;;  %v6915_v56 = vld [vmem:[%s9845_s26 + $0x4e0] ss:$8 sps:$4 sm:$0xff]  }
 0x112   :  { %3579 = vmatpush1.bf16.msra.mxu0 %v6660_v21  ;;  %3361 = vmatmul.mubr.bf16.vlgmr.msra.gmra.mrb[0].mxu1 %v95_v58  ;;  %v110_v21 = vpack.c.bf16 %v78_v17, %v78_v17  ;;  %v6923_v58 = vld [vmem:[%s9845_s26 + $0x4f4] ss:$8 sps:$4 sm:$0xff]   ;;  %v6846_v17 = vld [vmem:[%s9845_s26 + $0xb10] ss:$8 sps:$4 sm:$0xff]  }
 0x113   :  { %3580 = vmatprep.subr.bf16.mxu0 %v6668_v22  ;;  %3370 = vmatpush1.bf16.msra.mxu1 %v6831_v57  ;;  %v6752_v22 = vld [vmem:[%s9845_s26 + $0xa14] ss:$8 sps:$4 sm:$0xff]   ;;  %v6798_v57 = vld [vmem:[%s9845_s26 + $0xa90] ss:$8 sps:$4 sm:$0xff]  }
 0x114   :  { %3371 = vmatprep.subr.bf16.mxu1 %v6839_v60  ;;  %3401 = vmatprep.mubr.bf16.mxu1 %v98_v15  ;;  %v6921_v60 = vld [vmem:[%s9845_s26 + $0x4f0] ss:$8 sps:$4 sm:$0xff]  }
 0x116   :  { %3581 = vmatpush1.bf16.msra.mxu0 %v6666_v25  ;;  %v6750_v25 = vld [vmem:[%s9845_s26 + $0xa10] ss:$8 sps:$4 sm:$0xff]  }
 0x117   :  { %3582 = vmatprep.subr.bf16.mxu0 %v6674_v26  ;;  %3372 = vmatpush1.bf16.msra.mxu1 %v6837_v62  ;;  %v6875_v26 = vld [vmem:[%s9845_s26 + $0x474] ss:$8 sps:$4 sm:$0xff]   ;;  %v6804_v62 = vld [vmem:[%s9845_s26 + $0xaa0] ss:$8 sps:$4 sm:$0xff]  }
 0x118   :  { %3373 = vmatprep.subr.bf16.mxu1 %v6845_v0 }
 0x11a   :  { %3583 = vmatpush1.bf16.msra.mxu0 %v6672_v29  ;;  %v6756_v29 = vld [vmem:[%s9845_s26 + $0xa20] ss:$8 sps:$4 sm:$0xff]  }
 0x11b   :  { %3584 = vmatprep.subr.bf16.mxu0 %v6680_v30  ;;  %3374 = vmatpush1.bf16.msra.mxu1 %v6843_v2  ;;  %v6881_v30 = vld [vmem:[%s9845_s26 + $0x484] ss:$8 sps:$4 sm:$0xff]  }
 0x11c   :  { %3375 = vmatprep.subr.bf16.mxu1 %v6851_v4  ;;  %v6818_v2 = vld [vmem:[%s9845_s26 + $0xac4] ss:$8 sps:$4 sm:$0xff]   ;;  %v6824_v4 = vld [vmem:[%s9845_s26 + $0xad4] ss:$8 sps:$4 sm:$0xff]  }
 0x11e   :  { %3585 = vmatpush1.bf16.msra.mxu0 %v6678_v33  ;;  %v6762_v33 = vld [vmem:[%s9845_s26 + $0xa30] ss:$8 sps:$4 sm:$0xff]  }
 0x11f   :  { %3586 = vmatprep.subr.bf16.mxu0 %v6686_v34  ;;  %3376 = vmatpush1.bf16.msra.mxu1 %v6849_v6  ;;  %v6887_v34 = vld [vmem:[%s9845_s26 + $0x494] ss:$8 sps:$4 sm:$0xff]   ;;  %v6830_v6 = vld [vmem:[%s9845_s26 + $0xae4] ss:$8 sps:$4 sm:$0xff]  }
 0x120   :  { %3377 = vmatprep.subr.bf16.mxu1 %v6857_v8  ;;  %v6836_v8 = vld [vmem:[%s9845_s26 + $0xaf4] ss:$8 sps:$4 sm:$0xff]  }
 0x122   :  { %3587 = vmatpush1.bf16.msra.mxu0 %v6684_v37  ;;  %v6768_v37 = vld [vmem:[%s9845_s26 + $0xa40] ss:$8 sps:$4 sm:$0xff]  }
 0x123   :  { %3588 = vmatprep.subr.bf16.mxu0 %v6692_v38  ;;  %3378 = vmatpush1.bf16.msra.mxu1 %v6855_v10  ;;  %v6893_v38 = vld [vmem:[%s9845_s26 + $0x4a4] ss:$8 sps:$4 sm:$0xff]  }
 0x124   :  { %3379 = vmatprep.subr.bf16.mxu1 %v6863_v14  ;;  %v77_v10 = vld [vmem:[%s9846_s24 + $0xa0] sm:$0xff] }
 0x125   :  { %v109_v13 = vpack.c.bf16 %v77_v10, %v77_v10  ;;  %v6840_v14 = vld [vmem:[%s9845_s26 + $0xb00] ss:$8 sps:$4 sm:$0xff]   ;;  %v6968_v10 = vld [vmem:[%s9845_s26 + $0xcc4] ss:$8 sps:$4 sm:$0xff]  }
 0x126   :  { %3589 = vmatpush1.bf16.msra.mxu0 %v6690_v41  ;;  %v6774_v41 = vld [vmem:[%s9845_s26 + $0xa50] ss:$8 sps:$4 sm:$0xff]  }
 0x127   :  { %3590 = vmatprep.subr.bf16.mxu0 %v6698_v42  ;;  %3380 = vmatpush1.bf16.msra.mxu1 %v6861_v19  ;;  %v6899_v42 = vld [vmem:[%s9845_s26 + $0x4b4] ss:$8 sps:$4 sm:$0xff]   ;;  %v6852_v19 = vld [vmem:[%s9845_s26 + $0xb20] ss:$8 sps:$4 sm:$0xff]  }
 0x128   :  { %3381 = vmatprep.subr.bf16.mxu1 %v6869_v23  ;;  %v6864_v23 = vld [vmem:[%s9845_s26 + $0xb40] ss:$8 sps:$4 sm:$0xff]  }
 0x12a   :  { %3591 = vmatpush1.bf16.msra.mxu0 %v6696_v45  ;;  %v6780_v45 = vld [vmem:[%s9845_s26 + $0xa60] ss:$8 sps:$4 sm:$0xff]  }
 0x12b   :  { %3592 = vmatprep.subr.bf16.mxu0 %v6704_v46  ;;  %3382 = vmatpush1.bf16.msra.mxu1 %v6867_v24  ;;  %v6905_v46 = vld [vmem:[%s9845_s26 + $0x4c4] ss:$8 sps:$4 sm:$0xff]   ;;  %v6872_v24 = vld [vmem:[%s9845_s26 + $0xb54] ss:$8 sps:$4 sm:$0xff]  }
 0x12c   :  { %3383 = vmatprep.subr.bf16.mxu1 %v6875_v26  ;;  %v6878_v26 = vld [vmem:[%s9845_s26 + $0xb64] ss:$8 sps:$4 sm:$0xff]  }
 0x12e   :  { %3593 = vmatpush1.bf16.msra.mxu0 %v6702_v49  ;;  %v6786_v49 = vld [vmem:[%s9845_s26 + $0xa70] ss:$8 sps:$4 sm:$0xff]  }
 0x12f   :  { %3594 = vmatprep.subr.bf16.mxu0 %v6710_v50  ;;  %3384 = vmatpush1.bf16.msra.mxu1 %v6873_v28  ;;  %v6911_v50 = vld [vmem:[%s9845_s26 + $0x4d4] ss:$8 sps:$4 sm:$0xff]  }
 0x130   :  { %3385 = vmatprep.subr.bf16.mxu1 %v6881_v30  ;;  %v6884_v28 = vld [vmem:[%s9845_s26 + $0xb74] ss:$8 sps:$4 sm:$0xff]   ;;  %v6890_v30 = vld [vmem:[%s9845_s26 + $0xb84] ss:$8 sps:$4 sm:$0xff]  }
 0x132   :  { %3595 = vmatpush1.bf16.msra.mxu0 %v6708_v54  ;;  %v6917_v54 = vld [vmem:[%s9845_s26 + $0x4e4] ss:$8 sps:$4 sm:$0xff]  }
 0x133   :  { %3596 = vmatprep.subr.bf16.mxu0 %v6716_v55  ;;  %3386 = vmatpush1.bf16.msra.mxu1 %v6879_v32  ;;  %v6800_v55 = vld [vmem:[%s9845_s26 + $0xa94] ss:$8 sps:$4 sm:$0xff]  }
 0x134   :  { %3387 = vmatprep.subr.bf16.mxu1 %v6887_v34  ;;  %v6896_v32 = vld [vmem:[%s9845_s26 + $0xb94] ss:$8 sps:$4 sm:$0xff]   ;;  %v6902_v34 = vld [vmem:[%s9845_s26 + $0xba4] ss:$8 sps:$4 sm:$0xff]  }
 0x136   :  { %3597 = vmatpush1.bf16.msra.mxu0 %v6714_v59  ;;  %v6806_v59 = vld [vmem:[%s9845_s26 + $0xaa4] ss:$8 sps:$4 sm:$0xff]  }
 0x137   :  { %3598 = vmatprep.subr.bf16.mxu0 %v6722_v61  ;;  %3388 = vmatpush1.bf16.msra.mxu1 %v6885_v36  ;;  %v65_v61 = vld [vmem:[%s9846_s24 + $0x40] sm:$0xff]  ;;  %v6908_v36 = vld [vmem:[%s9845_s26 + $0xbb4] ss:$8 sps:$4 sm:$0xff]  }
 0x138   :  { %3389 = vmatprep.subr.bf16.mxu1 %v6893_v38  ;;  %v97_v0 = vpack.c.bf16 %v65_v61, %v65_v61  ;;  %v6914_v38 = vld [vmem:[%s9845_s26 + $0xbc4] ss:$8 sps:$4 sm:$0xff]   ;;  %v6945_v61 = vld [vmem:[%s9845_s26 + $0xc50] ss:$8 sps:$4 sm:$0xff]  }
 0x13a   :  { %3599 = vmatpush1.bf16.msra.mxu0 %v6720_v63  ;;  %v6812_v63 = vld [vmem:[%s9845_s26 + $0xab4] ss:$8 sps:$4 sm:$0xff]  }
 0x13b   :  { %3600 = vmatprep.subr.bf16.mxu0 %v6728_v1  ;;  %3390 = vmatpush1.bf16.msra.mxu1 %v6891_v40  ;;  %v6810_v1 = vld [vmem:[%s9845_s26 + $0xab0] ss:$8 sps:$4 sm:$0xff]   ;;  %v6920_v40 = vld [vmem:[%s9845_s26 + $0xbd4] ss:$8 sps:$4 sm:$0xff]  }
 0x13c   :  { %3391 = vmatprep.subr.bf16.mxu1 %v6899_v42  ;;  %v6926_v42 = vld [vmem:[%s9845_s26 + $0xbe4] ss:$8 sps:$4 sm:$0xff]  }
 0x13e   :  { %3601 = vmatpush1.bf16.msra.mxu0 %v6726_v3  ;;  %v6816_v3 = vld [vmem:[%s9845_s26 + $0xac0] ss:$8 sps:$4 sm:$0xff]  }
 0x13f   :  { %3602 = vmatprep.subr.bf16.mxu0 %v6734_v5  ;;  %3392 = vmatpush1.bf16.msra.mxu1 %v6897_v44  ;;  %v6822_v5 = vld [vmem:[%s9845_s26 + $0xad0] ss:$8 sps:$4 sm:$0xff]   ;;  %v6929_v44 = vld [vmem:[%s9845_s26 + $0xbf4] ss:$8 sps:$4 sm:$0xff]  }
 0x140   :  { %3393 = vmatprep.subr.bf16.mxu1 %v6905_v46  ;;  %v79_v46 = vld [vmem:[%s9846_s24 + $0xb0] sm:$0xff] }
 0x142   :  { %3603 = vmatpush1.bf16.msra.mxu0 %v6732_v7  ;;  %v6828_v7 = vld [vmem:[%s9845_s26 + $0xae0] ss:$8 sps:$4 sm:$0xff]  }
 0x143   :  { %3604 = vmatprep.subr.bf16.mxu0 %v6740_v9  ;;  %3394 = vmatpush1.bf16.msra.mxu1 %v6903_v48  ;;  %v6834_v9 = vld [vmem:[%s9845_s26 + $0xaf0] ss:$8 sps:$4 sm:$0xff]   ;;  %v82_v48 = vld [vmem:[%s9846_s24 + $0xc8] sm:$0xff] }
 0x144   :  { %3395 = vmatprep.subr.bf16.mxu1 %v6911_v50  ;;  %v6930_v50 = vld [vmem:[%s9845_s26 + $0xc00] ss:$8 sps:$4 sm:$0xff]  }
 0x146   :  { %3605 = vmatpush1.bf16.msra.mxu0 %v6738_v12  ;;  %v80_v12 = vld [vmem:[%s9846_s24 + $0xb8] sm:$0xff] }
 0x147   :  { %3615 = vmatprep.subr.bf16.mxu0 %v6746_v16  ;;  %3396 = vmatpush1.bf16.msra.mxu1 %v6909_v52  ;;  %v112_v15 = vpack.c.bf16 %v80_v12, %v80_v12  ;;  %v6848_v16 = vld [vmem:[%s9845_s26 + $0xb14] ss:$8 sps:$4 sm:$0xff]  }
 0x148   :  { %3397 = vmatprep.subr.bf16.mxu1 %v6917_v54  ;;  %v6935_v52 = vld [vmem:[%s9845_s26 + $0xc14] ss:$8 sps:$4 sm:$0xff]   ;;  %v6938_v54 = vld [vmem:[%s9845_s26 + $0xc24] ss:$8 sps:$4 sm:$0xff]  }
 0x149   :  { %3607 = vmatmul.mubr.bf16.vlgmr.msra.gmra.mrb[0].mxu0 %v107_v18  ;;  %v6854_v18 = vld [vmem:[%s9845_s26 + $0xb24] ss:$8 sps:$4 sm:$0xff]   ;;  %v6971_v12 = vld [vmem:[%s9845_s26 + $0xcd4] ss:$8 sps:$4 sm:$0xff]  }
 0x14a   :  { %3616 = vmatpush1.bf16.msra.mxu0 %v6744_v20  ;;  %3647 = vmatprep.mubr.bf16.mxu0 %v110_v21  ;;  %v6860_v20 = vld [vmem:[%s9845_s26 + $0xb34] ss:$8 sps:$4 sm:$0xff]   ;;  %v6858_v21 = vld [vmem:[%s9845_s26 + $0xb30] ss:$8 sps:$4 sm:$0xff]  }
 0x14b   :  { %3617 = vmatprep.subr.bf16.mxu0 %v6752_v22  ;;  %3398 = vmatpush1.bf16.msra.mxu1 %v6915_v56  ;;  %v6866_v22 = vld [vmem:[%s9845_s26 + $0xb44] ss:$8 sps:$4 sm:$0xff]   ;;  %v6941_v56 = vld [vmem:[%s9845_s26 + $0xc34] ss:$8 sps:$4 sm:$0xff]  }
 0x14c   :  { %3399 = vmatprep.subr.bf16.mxu1 %v6923_v58  ;;  %v6944_v58 = vld [vmem:[%s9845_s26 + $0xc44] ss:$8 sps:$4 sm:$0xff]  }
 0x14e   :  { %3618 = vmatpush1.bf16.msra.mxu0 %v6750_v25  ;;  %v6870_v25 = vld [vmem:[%s9845_s26 + $0xb50] ss:$8 sps:$4 sm:$0xff]  }
 0x14f   :  { %3619 = vmatprep.subr.bf16.mxu0 %v6758_v27  ;;  %3400 = vmatpush1.bf16.msra.mxu1 %v6921_v60  ;;  %v6876_v27 = vld [vmem:[%s9845_s26 + $0xb60] ss:$8 sps:$4 sm:$0xff]   ;;  %v6947_v60 = vld [vmem:[%s9845_s26 + $0xc54] ss:$8 sps:$4 sm:$0xff]  }
 0x152   :  { %3620 = vmatpush1.bf16.msra.mxu0 %v6756_v29  ;;  %3402 = vmatmul.mubr.bf16.vlgmr.msra.gmra.mrb[0].mxu1 %v97_v0  ;;  %v6882_v29 = vld [vmem:[%s9845_s26 + $0xb70] ss:$8 sps:$4 sm:$0xff]   ;;  %v6953_v0 = vld [vmem:[%s9845_s26 + $0xc74] ss:$8 sps:$4 sm:$0xff]  }
 0x153   :  { %3621 = vmatprep.subr.bf16.mxu0 %v6764_v31  ;;  %v6888_v31 = vld [vmem:[%s9845_s26 + $0xb80] ss:$8 sps:$4 sm:$0xff]  }
 0x156   :  { %3622 = vmatpush1.bf16.msra.mxu0 %v6762_v33  ;;  %v6894_v33 = vld [vmem:[%s9845_s26 + $0xb90] ss:$8 sps:$4 sm:$0xff]  }
 0x157   :  { %3623 = vmatprep.subr.bf16.mxu0 %v6770_v35  ;;  %v6900_v35 = vld [vmem:[%s9845_s26 + $0xba0] ss:$8 sps:$4 sm:$0xff]  }
 0x15a   :  { %3624 = vmatpush1.bf16.msra.mxu0 %v6768_v37  ;;  %v6906_v37 = vld [vmem:[%s9845_s26 + $0xbb0] ss:$8 sps:$4 sm:$0xff]  }
 0x15b   :  { %3625 = vmatprep.subr.bf16.mxu0 %v6776_v39  ;;  %v6912_v39 = vld [vmem:[%s9845_s26 + $0xbc0] ss:$8 sps:$4 sm:$0xff]  }
 0x15e   :  { %3626 = vmatpush1.bf16.msra.mxu0 %v6774_v41  ;;  %v6918_v41 = vld [vmem:[%s9845_s26 + $0xbd0] ss:$8 sps:$4 sm:$0xff]  }
 0x15f   :  { %3627 = vmatprep.subr.bf16.mxu0 %v6782_v43  ;;  %v6924_v43 = vld [vmem:[%s9845_s26 + $0xbe0] ss:$8 sps:$4 sm:$0xff]  }
 0x162   :  { %3628 = vmatpush1.bf16.msra.mxu0 %v6780_v45  ;;  %v6927_v45 = vld [vmem:[%s9845_s26 + $0xbf0] ss:$8 sps:$4 sm:$0xff]  }
 0x163   :  { %3629 = vmatprep.subr.bf16.mxu0 %v6788_v47  ;;  %v6932_v47 = vld [vmem:[%s9845_s26 + $0xc04] ss:$8 sps:$4 sm:$0xff]  }
 0x166   :  { %3630 = vmatpush1.bf16.msra.mxu0 %v6786_v49  ;;  %v111_v49 = vpack.c.bf16 %v79_v46, %v79_v46  ;;  %v7016_v46 = vld [vmem:[%s9845_s26 + $0xdc4] ss:$8 sps:$4 sm:$0xff]  }
 0x167   :  { %3631 = vmatprep.subr.bf16.mxu0 %v6794_v51  ;;  %v114_v51 = vpack.c.bf16 %v82_v48, %v82_v48  ;;  %v7019_v48 = vld [vmem:[%s9845_s26 + $0xdd4] ss:$8 sps:$4 sm:$0xff]  }
 0x16a   :  { %3632 = vmatpush1.bf16.msra.mxu0 %v6792_v53  ;;  %v6933_v53 = vld [vmem:[%s9845_s26 + $0xc10] ss:$8 sps:$4 sm:$0xff]  }
 0x16b   :  { %3633 = vmatprep.subr.bf16.mxu0 %v6800_v55  ;;  %v6936_v55 = vld [vmem:[%s9845_s26 + $0xc20] ss:$8 sps:$4 sm:$0xff]  }
 0x16e   :  { %3634 = vmatpush1.bf16.msra.mxu0 %v6798_v57  ;;  %v6939_v57 = vld [vmem:[%s9845_s26 + $0xc30] ss:$8 sps:$4 sm:$0xff]  }
 0x16f   :  { %3635 = vmatprep.subr.bf16.mxu0 %v6806_v59  ;;  %v6942_v59 = vld [vmem:[%s9845_s26 + $0xc40] ss:$8 sps:$4 sm:$0xff]  }
 0x172   :  { %3636 = vmatpush1.bf16.msra.mxu0 %v6804_v62  ;;  %v6950_v62 = vld [vmem:[%s9845_s26 + $0xc64] ss:$8 sps:$4 sm:$0xff]  }
 0x173   :  { %3637 = vmatprep.subr.bf16.mxu0 %v6812_v63  ;;  %v6948_v63 = vld [vmem:[%s9845_s26 + $0xc60] ss:$8 sps:$4 sm:$0xff]  }
 0x176   :  { %3638 = vmatpush1.bf16.msra.mxu0 %v6810_v1  ;;  %v6951_v1 = vld [vmem:[%s9845_s26 + $0xc70] ss:$8 sps:$4 sm:$0xff]  }
 0x177   :  { %3639 = vmatprep.subr.bf16.mxu0 %v6818_v2  ;;  %v6956_v2 = vld [vmem:[%s9845_s26 + $0xc84] ss:$8 sps:$4 sm:$0xff]  }
 0x17a   :  { %3640 = vmatpush1.bf16.msra.mxu0 %v6816_v3  ;;  %v6954_v3 = vld [vmem:[%s9845_s26 + $0xc80] ss:$8 sps:$4 sm:$0xff]  }
 0x17b   :  { %3641 = vmatprep.subr.bf16.mxu0 %v6824_v4  ;;  %v6959_v4 = vld [vmem:[%s9845_s26 + $0xc94] ss:$8 sps:$4 sm:$0xff]  }
 0x17e   :  { %3642 = vmatpush1.bf16.msra.mxu0 %v6822_v5  ;;  %v6957_v5 = vld [vmem:[%s9845_s26 + $0xc90] ss:$8 sps:$4 sm:$0xff]  }
 0x17f   :  { %3643 = vmatprep.subr.bf16.mxu0 %v6830_v6  ;;  %v6962_v6 = vld [vmem:[%s9845_s26 + $0xca4] ss:$8 sps:$4 sm:$0xff]  }
 0x182   :  { %3644 = vmatpush1.bf16.msra.mxu0 %v6828_v7  ;;  %v6960_v7 = vld [vmem:[%s9845_s26 + $0xca0] ss:$8 sps:$4 sm:$0xff]  }
 0x183   :  { %3645 = vmatprep.subr.bf16.mxu0 %v6836_v8  ;;  %v6965_v8 = vld [vmem:[%s9845_s26 + $0xcb4] ss:$8 sps:$4 sm:$0xff]  }
 0x186   :  { %3646 = vmatpush1.bf16.msra.mxu0 %v6834_v9  ;;  %v6963_v9 = vld [vmem:[%s9845_s26 + $0xcb0] ss:$8 sps:$4 sm:$0xff]  }
 0x187   :  { %3656 = vmatprep.subr.bf16.mxu0 %v6842_v11  ;;  %v6966_v11 = vld [vmem:[%s9845_s26 + $0xcc0] ss:$8 sps:$4 sm:$0xff]  }
 0x189   :  { %3648 = vmatmul.mubr.bf16.vlgmr.msra.gmra.mrb[0].mxu0 %v109_v13  ;;  %v6969_v13 = vld [vmem:[%s9845_s26 + $0xcd0] ss:$8 sps:$4 sm:$0xff]  }
 0x18a   :  { %3657 = vmatpush1.bf16.msra.mxu0 %v6840_v14  ;;  %3688 = vmatprep.mubr.bf16.mxu0 %v112_v15  ;;  %v6974_v14 = vld [vmem:[%s9845_s26 + $0xce4] ss:$8 sps:$4 sm:$0xff]   ;;  %v6972_v15 = vld [vmem:[%s9845_s26 + $0xce0] ss:$8 sps:$4 sm:$0xff]  }
 0x18b   :  { %3658 = vmatprep.subr.bf16.mxu0 %v6848_v16  ;;  %v6977_v16 = vld [vmem:[%s9845_s26 + $0xcf4] ss:$8 sps:$4 sm:$0xff]  }
 0x18e   :  { %3659 = vmatpush1.bf16.msra.mxu0 %v6846_v17  ;;  %v6975_v17 = vld [vmem:[%s9845_s26 + $0xcf0] ss:$8 sps:$4 sm:$0xff]  }
 0x18f   :  { %3660 = vmatprep.subr.bf16.mxu0 %v6854_v18  ;;  %v81_v18 = vld [vmem:[%s9846_s24 + $0xc0] sm:$0xff] }
 0x192   :  { %3661 = vmatpush1.bf16.msra.mxu0 %v6852_v19  ;;  %v6980_v19 = vld [vmem:[%s9845_s26 + $0xd04] ss:$8 sps:$4 sm:$0xff]  }
 0x193   :  { %3662 = vmatprep.subr.bf16.mxu0 %v6860_v20  ;;  %v84_v20 = vld [vmem:[%s9846_s24 + $0xd8] sm:$0xff] }
 0x196   :  { %3663 = vmatpush1.bf16.msra.mxu0 %v6858_v21  ;;  %v113_v21 = vpack.c.bf16 %v81_v18, %v81_v18  ;;  %v7041_v18 = vld [vmem:[%s9845_s26 + $0xe50] ss:$8 sps:$4 sm:$0xff]  }
 0x197   :  { %3664 = vmatprep.subr.bf16.mxu0 %v6866_v22  ;;  %v6978_v22 = vld [vmem:[%s9845_s26 + $0xd00] ss:$8 sps:$4 sm:$0xff]  }
 0x19a   :  { %3665 = vmatpush1.bf16.msra.mxu0 %v6864_v23  ;;  %v116_v23 = vpack.c.bf16 %v84_v20, %v84_v20  ;;  %v7134_v20 = vld [vmem:[%s9825_s2 + $0x40] ss:$8 sps:$4 sm:$0xff]  }
 0x19b   :  { %3666 = vmatprep.subr.bf16.mxu0 %v6872_v24  ;;  %v6983_v24 = vld [vmem:[%s9845_s26 + $0xd14] ss:$8 sps:$4 sm:$0xff]  }
 0x19e   :  { %3667 = vmatpush1.bf16.msra.mxu0 %v6870_v25  ;;  %v6981_v25 = vld [vmem:[%s9845_s26 + $0xd10] ss:$8 sps:$4 sm:$0xff]  }
 0x19f   :  { %3668 = vmatprep.subr.bf16.mxu0 %v6878_v26  ;;  %v6986_v26 = vld [vmem:[%s9845_s26 + $0xd24] ss:$8 sps:$4 sm:$0xff]  }
 0x1a2   :  { %3669 = vmatpush1.bf16.msra.mxu0 %v6876_v27  ;;  %v6984_v27 = vld [vmem:[%s9845_s26 + $0xd20] ss:$8 sps:$4 sm:$0xff]  }
 0x1a3   :  { %3670 = vmatprep.subr.bf16.mxu0 %v6884_v28  ;;  %v6989_v28 = vld [vmem:[%s9845_s26 + $0xd34] ss:$8 sps:$4 sm:$0xff]  }
 0x1a6   :  { %3671 = vmatpush1.bf16.msra.mxu0 %v6882_v29  ;;  %v6987_v29 = vld [vmem:[%s9845_s26 + $0xd30] ss:$8 sps:$4 sm:$0xff]  }
 0x1a7   :  { %3672 = vmatprep.subr.bf16.mxu0 %v6890_v30  ;;  %v6992_v30 = vld [vmem:[%s9845_s26 + $0xd44] ss:$8 sps:$4 sm:$0xff]  }
 0x1aa   :  { %3673 = vmatpush1.bf16.msra.mxu0 %v6888_v31  ;;  %v6990_v31 = vld [vmem:[%s9845_s26 + $0xd40] ss:$8 sps:$4 sm:$0xff]  }
 0x1ab   :  { %3674 = vmatprep.subr.bf16.mxu0 %v6896_v32  ;;  %v6995_v32 = vld [vmem:[%s9845_s26 + $0xd54] ss:$8 sps:$4 sm:$0xff]  }
 0x1ae   :  { %3675 = vmatpush1.bf16.msra.mxu0 %v6894_v33  ;;  %v6993_v33 = vld [vmem:[%s9845_s26 + $0xd50] ss:$8 sps:$4 sm:$0xff]  }
 0x1af   :  { %3676 = vmatprep.subr.bf16.mxu0 %v6902_v34  ;;  %v6998_v34 = vld [vmem:[%s9845_s26 + $0xd64] ss:$8 sps:$4 sm:$0xff]  }
 0x1b2   :  { %3677 = vmatpush1.bf16.msra.mxu0 %v6900_v35  ;;  %v6996_v35 = vld [vmem:[%s9845_s26 + $0xd60] ss:$8 sps:$4 sm:$0xff]  }
 0x1b3   :  { %3678 = vmatprep.subr.bf16.mxu0 %v6908_v36  ;;  %v7001_v36 = vld [vmem:[%s9845_s26 + $0xd74] ss:$8 sps:$4 sm:$0xff]  }
 0x1b6   :  { %3679 = vmatpush1.bf16.msra.mxu0 %v6906_v37  ;;  %v6999_v37 = vld [vmem:[%s9845_s26 + $0xd70] ss:$8 sps:$4 sm:$0xff]  }
 0x1b7   :  { %3680 = vmatprep.subr.bf16.mxu0 %v6914_v38  ;;  %v7004_v38 = vld [vmem:[%s9845_s26 + $0xd84] ss:$8 sps:$4 sm:$0xff]  }
 0x1ba   :  { %3681 = vmatpush1.bf16.msra.mxu0 %v6912_v39  ;;  %v7002_v39 = vld [vmem:[%s9845_s26 + $0xd80] ss:$8 sps:$4 sm:$0xff]  }
 0x1bb   :  { %3682 = vmatprep.subr.bf16.mxu0 %v6920_v40  ;;  %v7007_v40 = vld [vmem:[%s9845_s26 + $0xd94] ss:$8 sps:$4 sm:$0xff]  }
 0x1be   :  { %3683 = vmatpush1.bf16.msra.mxu0 %v6918_v41  ;;  %v7005_v41 = vld [vmem:[%s9845_s26 + $0xd90] ss:$8 sps:$4 sm:$0xff]  }
 0x1bf   :  { %3684 = vmatprep.subr.bf16.mxu0 %v6926_v42  ;;  %v7010_v42 = vld [vmem:[%s9845_s26 + $0xda4] ss:$8 sps:$4 sm:$0xff]  }
 0x1c2   :  { %3685 = vmatpush1.bf16.msra.mxu0 %v6924_v43  ;;  %v7008_v43 = vld [vmem:[%s9845_s26 + $0xda0] ss:$8 sps:$4 sm:$0xff]  }
 0x1c3   :  { %3686 = vmatprep.subr.bf16.mxu0 %v6929_v44  ;;  %v7013_v44 = vld [vmem:[%s9845_s26 + $0xdb4] ss:$8 sps:$4 sm:$0xff]  }
 0x1c6   :  { %3687 = vmatpush1.bf16.msra.mxu0 %v6927_v45  ;;  %v7011_v45 = vld [vmem:[%s9845_s26 + $0xdb0] ss:$8 sps:$4 sm:$0xff]  }
 0x1c7   :  { %3697 = vmatprep.subr.bf16.mxu0 %v6932_v47  ;;  %v7014_v47 = vld [vmem:[%s9845_s26 + $0xdc0] ss:$8 sps:$4 sm:$0xff]  }
 0x1c9   :  { %3689 = vmatmul.mubr.bf16.vlgmr.msra.gmra.mrb[0].mxu0 %v111_v49  ;;  %v7017_v49 = vld [vmem:[%s9845_s26 + $0xdd0] ss:$8 sps:$4 sm:$0xff]  }
 0x1ca   :  { %3698 = vmatpush1.bf16.msra.mxu0 %v6930_v50  ;;  %3729 = vmatprep.mubr.bf16.mxu0 %v114_v51  ;;  %v7022_v50 = vld [vmem:[%s9845_s26 + $0xde4] ss:$8 sps:$4 sm:$0xff]   ;;  %v7020_v51 = vld [vmem:[%s9845_s26 + $0xde0] ss:$8 sps:$4 sm:$0xff]  }
 0x1cb   :  { %3699 = vmatprep.subr.bf16.mxu0 %v6935_v52  ;;  %v7025_v52 = vld [vmem:[%s9845_s26 + $0xdf4] ss:$8 sps:$4 sm:$0xff]  }
 0x1ce   :  { %3700 = vmatpush1.bf16.msra.mxu0 %v6933_v53  ;;  %v7023_v53 = vld [vmem:[%s9845_s26 + $0xdf0] ss:$8 sps:$4 sm:$0xff]  }
 0x1cf   :  { %3701 = vmatprep.subr.bf16.mxu0 %v6938_v54  ;;  %v83_v54 = vld [vmem:[%s9846_s24 + $0xd0] sm:$0xff] }
 0x1d2   :  { %3702 = vmatpush1.bf16.msra.mxu0 %v6936_v55  ;;  %v7028_v55 = vld [vmem:[%s9845_s26 + $0xe04] ss:$8 sps:$4 sm:$0xff]  }
 0x1d3   :  { %3703 = vmatprep.subr.bf16.mxu0 %v6941_v56  ;;  %v86_v56 = vld [vmem:[%s9846_s24 + $0xe8] sm:$0xff] }
 0x1d6   :  { %3704 = vmatpush1.bf16.msra.mxu0 %v6939_v57  ;;  %v115_v57 = vpack.c.bf16 %v83_v54, %v83_v54  ;;  %v7068_v54 = vld [vmem:[%s9845_s26 + $0xee0] ss:$8 sps:$4 sm:$0xff]  }
 0x1d7   :  { %3705 = vmatprep.subr.bf16.mxu0 %v6944_v58  ;;  %v7026_v58 = vld [vmem:[%s9845_s26 + $0xe00] ss:$8 sps:$4 sm:$0xff]  }
 0x1da   :  { %3706 = vmatpush1.bf16.msra.mxu0 %v6942_v59  ;;  %v118_v59 = vpack.c.bf16 %v86_v56, %v86_v56  ;;  %v7073_v56 = vld [vmem:[%s9845_s26 + $0xef4] ss:$8 sps:$4 sm:$0xff]  }
 0x1db   :  { %3707 = vmatprep.subr.bf16.mxu0 %v6947_v60  ;;  %v7031_v60 = vld [vmem:[%s9845_s26 + $0xe14] ss:$8 sps:$4 sm:$0xff]  }
 0x1de   :  { %3708 = vmatpush1.bf16.msra.mxu0 %v6945_v61 }
 0x1df   :  { %3709 = vmatprep.subr.bf16.mxu0 %v6950_v62 }
 0x1e2   :  { %3710 = vmatpush1.bf16.msra.mxu0 %v6948_v63  ;;  %v7029_v63 = vld [vmem:[%s9845_s26 + $0xe10] ss:$8 sps:$4 sm:$0xff]  }
 0x1e3   :  { %3711 = vmatprep.subr.bf16.mxu0 %v6953_v0  ;;  %v7034_v0 = vld [vmem:[%s9845_s26 + $0xe24] ss:$8 sps:$4 sm:$0xff]  }
 0x1e6   :  { %3712 = vmatpush1.bf16.msra.mxu0 %v6951_v1 }
 0x1e7   :  { %3713 = vmatprep.subr.bf16.mxu0 %v6956_v2 }
 0x1ea   :  { %3714 = vmatpush1.bf16.msra.mxu0 %v6954_v3  ;;  %v7122_v3 = vld [vmem:[%s9825_s2] ss:$8 sps:$4 sm:$0xff]  }
 0x1eb   :  { %3715 = vmatprep.subr.bf16.mxu0 %v6959_v4  ;;  %v7124_v4 = vld [vmem:[%s9825_s2 + $0x4] ss:$8 sps:$4 sm:$0xff]  }
 0x1ec   :  { %4069 = vmatprep.subr.bf16.mxu1 %v7124_v4  ;;  %v7082_v4 = vld [vmem:[%s9845_s26 + $0xf24] ss:$8 sps:$4 sm:$0xff]  }
 0x1ed   :  { %4070 = vmatpush1.bf16.msra.mxu1 %v7122_v3  ;;  %v7077_v3 = vld [vmem:[%s9845_s26 + $0xf10] ss:$8 sps:$4 sm:$0xff]  }
 0x1ee   :  { %3716 = vmatpush1.bf16.msra.mxu0 %v6957_v5  ;;  %v7127_v5 = vld [vmem:[%s9825_s2 + $0x14] ss:$8 sps:$4 sm:$0xff]  }
 0x1ef   :  { %3717 = vmatprep.subr.bf16.mxu0 %v6962_v6  ;;  %v7032_v6 = vld [vmem:[%s9845_s26 + $0xe20] ss:$8 sps:$4 sm:$0xff]   ;;  %4071 = vmatprep.subr.bf16.mxu1 %v7127_v5 }
 0x1f0   :  { %v7080_v5 = vld [vmem:[%s9845_s26 + $0xf20] ss:$8 sps:$4 sm:$0xff]  }
 0x1f2   :  { %3718 = vmatpush1.bf16.msra.mxu0 %v6960_v7  ;;  %v7037_v7 = vld [vmem:[%s9845_s26 + $0xe34] ss:$8 sps:$4 sm:$0xff]  }
 0x1f3   :  { %3719 = vmatprep.subr.bf16.mxu0 %v6965_v8  ;;  %v7125_v8 = vld [vmem:[%s9825_s2 + $0x10] ss:$8 sps:$4 sm:$0xff]  }
 0x1f4   :  { %4072 = vmatpush1.bf16.msra.mxu1 %v7125_v8  ;;  %v7088_v8 = vld [vmem:[%s9845_s26 + $0xf44] ss:$8 sps:$4 sm:$0xff]  }
 0x1f6   :  { %3720 = vmatpush1.bf16.msra.mxu0 %v6963_v9  ;;  %v7130_v9 = vld [vmem:[%s9825_s2 + $0x24] ss:$8 sps:$4 sm:$0xff]  }
 0x1f7   :  { %3721 = vmatprep.subr.bf16.mxu0 %v6968_v10  ;;  %v7035_v10 = vld [vmem:[%s9845_s26 + $0xe30] ss:$8 sps:$4 sm:$0xff]   ;;  %4073 = vmatprep.subr.bf16.mxu1 %v7130_v9  ;;  %v7086_v9 = vld [vmem:[%s9845_s26 + $0xf40] ss:$8 sps:$4 sm:$0xff]  }
 0x1fa   :  { %3722 = vmatpush1.bf16.msra.mxu0 %v6966_v11  ;;  %v7040_v11 = vld [vmem:[%s9845_s26 + $0xe44] ss:$8 sps:$4 sm:$0xff]  }
 0x1fb   :  { %3723 = vmatprep.subr.bf16.mxu0 %v6971_v12  ;;  %v7128_v12 = vld [vmem:[%s9825_s2 + $0x20] ss:$8 sps:$4 sm:$0xff]  }
 0x1fc   :  { %4074 = vmatpush1.bf16.msra.mxu1 %v7128_v12  ;;  %v7094_v12 = vld [vmem:[%s9845_s26 + $0xf64] ss:$8 sps:$4 sm:$0xff]  }
 0x1fe   :  { %3724 = vmatpush1.bf16.msra.mxu0 %v6969_v13  ;;  %v7133_v13 = vld [vmem:[%s9825_s2 + $0x34] ss:$8 sps:$4 sm:$0xff]  }
 0x1ff   :  { %3725 = vmatprep.subr.bf16.mxu0 %v6974_v14  ;;  %v7038_v14 = vld [vmem:[%s9845_s26 + $0xe40] ss:$8 sps:$4 sm:$0xff]   ;;  %4075 = vmatprep.subr.bf16.mxu1 %v7133_v13 }
 0x200   :  { %v7092_v13 = vld [vmem:[%s9845_s26 + $0xf60] ss:$8 sps:$4 sm:$0xff]  }
 0x202   :  { %3726 = vmatpush1.bf16.msra.mxu0 %v6972_v15  ;;  %v7043_v15 = vld [vmem:[%s9845_s26 + $0xe54] ss:$8 sps:$4 sm:$0xff]  }
 0x203   :  { %3727 = vmatprep.subr.bf16.mxu0 %v6977_v16  ;;  %v7131_v16 = vld [vmem:[%s9825_s2 + $0x30] ss:$8 sps:$4 sm:$0xff]  }
 0x204   :  { %4076 = vmatpush1.bf16.msra.mxu1 %v7131_v16  ;;  %v7100_v16 = vld [vmem:[%s9845_s26 + $0xf84] ss:$8 sps:$4 sm:$0xff]  }
 0x206   :  { %3728 = vmatpush1.bf16.msra.mxu0 %v6975_v17  ;;  %v7136_v17 = vld [vmem:[%s9825_s2 + $0x44] ss:$8 sps:$4 sm:$0xff]  }
 0x207   :  { %3738 = vmatprep.subr.bf16.mxu0 %v6980_v19  ;;  %v7046_v19 = vld [vmem:[%s9845_s26 + $0xe64] ss:$8 sps:$4 sm:$0xff]   ;;  %4077 = vmatprep.subr.bf16.mxu1 %v7136_v17  ;;  %v7098_v17 = vld [vmem:[%s9845_s26 + $0xf80] ss:$8 sps:$4 sm:$0xff]  }
 0x208   :  { %4078 = vmatpush1.bf16.msra.mxu1 %v7134_v20  ;;  %v7106_v20 = vld [vmem:[%s9845_s26 + $0xfa4] ss:$8 sps:$4 sm:$0xff]  }
 0x209   :  { %3730 = vmatmul.mubr.bf16.vlgmr.msra.gmra.mrb[0].mxu0 %v113_v21  ;;  %v7139_v21 = vld [vmem:[%s9825_s2 + $0x54] ss:$8 sps:$4 sm:$0xff]  }
 0x20a   :  { %3739 = vmatpush1.bf16.msra.mxu0 %v6978_v22  ;;  %3770 = vmatprep.mubr.bf16.mxu0 %v116_v23  ;;  %v7044_v22 = vld [vmem:[%s9845_s26 + $0xe60] ss:$8 sps:$4 sm:$0xff]   ;;  %v7137_v23 = vld [vmem:[%s9825_s2 + $0x50] ss:$8 sps:$4 sm:$0xff]  }
 0x20b   :  { %3740 = vmatprep.subr.bf16.mxu0 %v6983_v24  ;;  %v7049_v24 = vld [vmem:[%s9845_s26 + $0xe74] ss:$8 sps:$4 sm:$0xff]   ;;  %4079 = vmatprep.subr.bf16.mxu1 %v7139_v21  ;;  %v7104_v21 = vld [vmem:[%s9845_s26 + $0xfa0] ss:$8 sps:$4 sm:$0xff]  }
 0x20c   :  { %4080 = vmatpush1.bf16.msra.mxu1 %v7137_v23  ;;  %v7107_v23 = vld [vmem:[%s9845_s26 + $0xfb0] ss:$8 sps:$4 sm:$0xff]  }
 0x20e   :  { %3741 = vmatpush1.bf16.msra.mxu0 %v6981_v25  ;;  %v7142_v25 = vld [vmem:[%s9825_s2 + $0x64] ss:$8 sps:$4 sm:$0xff]  }
 0x20f   :  { %3742 = vmatprep.subr.bf16.mxu0 %v6986_v26  ;;  %v7047_v26 = vld [vmem:[%s9845_s26 + $0xe70] ss:$8 sps:$4 sm:$0xff]   ;;  %4081 = vmatprep.subr.bf16.mxu1 %v7142_v25  ;;  %v7110_v25 = vld [vmem:[%s9845_s26 + $0xfc0] ss:$8 sps:$4 sm:$0xff]  }
 0x212   :  { %3743 = vmatpush1.bf16.msra.mxu0 %v6984_v27  ;;  %v7140_v27 = vld [vmem:[%s9825_s2 + $0x60] ss:$8 sps:$4 sm:$0xff]  }
 0x213   :  { %3744 = vmatprep.subr.bf16.mxu0 %v6989_v28  ;;  %v7052_v28 = vld [vmem:[%s9845_s26 + $0xe84] ss:$8 sps:$4 sm:$0xff]   ;;  %4082 = vmatpush1.bf16.msra.mxu1 %v7140_v27  ;;  %v7113_v27 = vld [vmem:[%s9845_s26 + $0xfd0] ss:$8 sps:$4 sm:$0xff]  }
 0x216   :  { %3745 = vmatpush1.bf16.msra.mxu0 %v6987_v29  ;;  %v7145_v29 = vld [vmem:[%s9825_s2 + $0x74] ss:$8 sps:$4 sm:$0xff]  }
 0x217   :  { %3746 = vmatprep.subr.bf16.mxu0 %v6992_v30  ;;  %v7050_v30 = vld [vmem:[%s9845_s26 + $0xe80] ss:$8 sps:$4 sm:$0xff]   ;;  %4083 = vmatprep.subr.bf16.mxu1 %v7145_v29 }
 0x218   :  { %v7116_v29 = vld [vmem:[%s9845_s26 + $0xfe0] ss:$8 sps:$4 sm:$0xff]  }
 0x21a   :  { %3747 = vmatpush1.bf16.msra.mxu0 %v6990_v31  ;;  %v7143_v31 = vld [vmem:[%s9825_s2 + $0x70] ss:$8 sps:$4 sm:$0xff]  }
 0x21b   :  { %3748 = vmatprep.subr.bf16.mxu0 %v6995_v32  ;;  %v7055_v32 = vld [vmem:[%s9845_s26 + $0xe94] ss:$8 sps:$4 sm:$0xff]   ;;  %4084 = vmatpush1.bf16.msra.mxu1 %v7143_v31  ;;  %v7119_v31 = vld [vmem:[%s9845_s26 + $0xff0] ss:$8 sps:$4 sm:$0xff]  }
 0x21e   :  { %3749 = vmatpush1.bf16.msra.mxu0 %v6993_v33  ;;  %v7148_v33 = vld [vmem:[%s9825_s2 + $0x84] ss:$8 sps:$4 sm:$0xff]  }
 0x21f   :  { %3750 = vmatprep.subr.bf16.mxu0 %v6998_v34  ;;  %v7053_v34 = vld [vmem:[%s9845_s26 + $0xe90] ss:$8 sps:$4 sm:$0xff]   ;;  %4085 = vmatprep.subr.bf16.mxu1 %v7148_v33 }
 0x222   :  { %3751 = vmatpush1.bf16.msra.mxu0 %v6996_v35  ;;  %v7146_v35 = vld [vmem:[%s9825_s2 + $0x80] ss:$8 sps:$4 sm:$0xff]  }
 0x223   :  { %3752 = vmatprep.subr.bf16.mxu0 %v7001_v36  ;;  %v7058_v36 = vld [vmem:[%s9845_s26 + $0xea4] ss:$8 sps:$4 sm:$0xff]   ;;  %4086 = vmatpush1.bf16.msra.mxu1 %v7146_v35  ;;  %v7164_v35 = vld [vmem:[%s9825_s2 + $0xe0] ss:$8 sps:$4 sm:$0xff]  }
 0x225   :  { %v8956_v61 = vpop.f32.mrb[0].mxu1 }
 0x226   :  { %3753 = vmatpush1.bf16.msra.mxu0 %v6999_v37  ;;  %v8958_v62 = vpop.f32.mrb[1].mxu1  ;;  %v7151_v37 = vld [vmem:[%s9825_s2 + $0x94] ss:$8 sps:$4 sm:$0xff]  }
 0x227   :  { %3754 = vmatprep.subr.bf16.mxu0 %v7004_v38  ;;  %v3407_v1 = vpop.f32.mrb[2].mxu1  ;;  %v7056_v38 = vld [vmem:[%s9845_s26 + $0xea0] ss:$8 sps:$4 sm:$0xff]   ;;  %4087 = vmatprep.subr.bf16.mxu1 %v7151_v37  ;;  %v7167_v37 = vld [vmem:[%s9825_s2 + $0xf0] ss:$8 sps:$4 sm:$0xff]  }
 0x228   :  { %v3408_v2 = vpop.f32.mrb[3].mxu1 }
 0x229   :  { %v7079_v2 = vld [vmem:[%s9845_s26 + $0xf14] ss:$8 sps:$4 sm:$0xff]  }
 0x22a   :  { %3755 = vmatpush1.bf16.msra.mxu0 %v7002_v39  ;;  %v7149_v39 = vld [vmem:[%s9825_s2 + $0x90] ss:$8 sps:$4 sm:$0xff]  }
 0x22b   :  { %3756 = vmatprep.subr.bf16.mxu0 %v7007_v40  ;;  %v7061_v40 = vld [vmem:[%s9845_s26 + $0xeb4] ss:$8 sps:$4 sm:$0xff]   ;;  %4088 = vmatpush1.bf16.msra.mxu1 %v7149_v39  ;;  %v635_v39 = vlaneseq }
 0x22e   :  { %3757 = vmatpush1.bf16.msra.mxu0 %v7005_v41  ;;  %v7154_v41 = vld [vmem:[%s9825_s2 + $0xa4] ss:$8 sps:$4 sm:$0xff]  }
 0x22f   :  { %3758 = vmatprep.subr.bf16.mxu0 %v7010_v42  ;;  %v7059_v42 = vld [vmem:[%s9845_s26 + $0xeb0] ss:$8 sps:$4 sm:$0xff]   ;;  %4089 = vmatprep.subr.bf16.mxu1 %v7154_v41 }
 0x232   :  { %3759 = vmatpush1.bf16.msra.mxu0 %v7008_v43  ;;  %v7152_v43 = vld [vmem:[%s9825_s2 + $0xa0] ss:$8 sps:$4 sm:$0xff]  }
 0x233   :  { %3760 = vmatprep.subr.bf16.mxu0 %v7013_v44  ;;  %v7064_v44 = vld [vmem:[%s9845_s26 + $0xec4] ss:$8 sps:$4 sm:$0xff]   ;;  %4090 = vmatpush1.bf16.msra.mxu1 %v7152_v43 }
 0x236   :  { %3761 = vmatpush1.bf16.msra.mxu0 %v7011_v45  ;;  %v7157_v45 = vld [vmem:[%s9825_s2 + $0xb4] ss:$8 sps:$4 sm:$0xff]  }
 0x237   :  { %3762 = vmatprep.subr.bf16.mxu0 %v7016_v46  ;;  %v7062_v46 = vld [vmem:[%s9845_s26 + $0xec0] ss:$8 sps:$4 sm:$0xff]   ;;  %4091 = vmatprep.subr.bf16.mxu1 %v7157_v45 }
 0x23a   :  { %3763 = vmatpush1.bf16.msra.mxu0 %v7014_v47  ;;  %v7155_v47 = vld [vmem:[%s9825_s2 + $0xb0] ss:$8 sps:$4 sm:$0xff]  }
 0x23b   :  { %3764 = vmatprep.subr.bf16.mxu0 %v7019_v48  ;;  %v7067_v48 = vld [vmem:[%s9845_s26 + $0xed4] ss:$8 sps:$4 sm:$0xff]   ;;  %4092 = vmatpush1.bf16.msra.mxu1 %v7155_v47 }
 0x23e   :  { %3765 = vmatpush1.bf16.msra.mxu0 %v7017_v49  ;;  %v7160_v49 = vld [vmem:[%s9825_s2 + $0xc4] ss:$8 sps:$4 sm:$0xff]  }
 0x23f   :  { %3766 = vmatprep.subr.bf16.mxu0 %v7022_v50  ;;  %v7065_v50 = vld [vmem:[%s9845_s26 + $0xed0] ss:$8 sps:$4 sm:$0xff]   ;;  %4093 = vmatprep.subr.bf16.mxu1 %v7160_v49 }
 0x242   :  { %3767 = vmatpush1.bf16.msra.mxu0 %v7020_v51  ;;  %v7158_v51 = vld [vmem:[%s9825_s2 + $0xc0] ss:$8 sps:$4 sm:$0xff]  }
 0x243   :  { %3768 = vmatprep.subr.bf16.mxu0 %v7025_v52  ;;  %v7070_v52 = vld [vmem:[%s9845_s26 + $0xee4] ss:$8 sps:$4 sm:$0xff]   ;;  %4094 = vmatpush1.bf16.msra.mxu1 %v7158_v51 }
 0x246   :  { %3769 = vmatpush1.bf16.msra.mxu0 %v7023_v53  ;;  %v7163_v53 = vld [vmem:[%s9825_s2 + $0xd4] ss:$8 sps:$4 sm:$0xff]  }
 0x247   :  { %3779 = vmatprep.subr.bf16.mxu0 %v7028_v55  ;;  %v7161_v55 = vld [vmem:[%s9825_s2 + $0xd0] ss:$8 sps:$4 sm:$0xff]   ;;  %4095 = vmatprep.subr.bf16.mxu1 %v7163_v53 }
 0x248   :  { %4096 = vmatpush1.bf16.msra.mxu1 %v7161_v55 }
 0x249   :  { %3771 = vmatmul.mubr.bf16.vlgmr.msra.gmra.mrb[0].mxu0 %v115_v57  ;;  %v7071_v57 = vld [vmem:[%s9845_s26 + $0xef0] ss:$8 sps:$4 sm:$0xff]  }
 0x24a   :  { %3780 = vmatpush1.bf16.msra.mxu0 %v7026_v58  ;;  %3811 = vmatprep.mubr.bf16.mxu0 %v118_v59  ;;  %v85_v58 = vld [vmem:[%s9846_s24 + $0xe0] sm:$0xff] }
 0x24b   :  { %3781 = vmatprep.subr.bf16.mxu0 %v7031_v60  ;;  %v7076_v59 = vld [vmem:[%s9845_s26 + $0xf04] ss:$8 sps:$4 sm:$0xff]   ;;  %v88_v60 = vld [vmem:[%s9846_s24 + $0xf8] sm:$0xff] }
 0x24c   :  { %v120_v1 = vpack.c.bf16 %v88_v60, %v88_v60  ;;  %v7176_v60 = vld [vmem:[%s9826_s3 + $0x20] ss:$8 sps:$4 sm:$0xff]  }
 0x24e   :  { %3782 = vmatpush1.bf16.msra.mxu0 %v7029_v63  ;;  %v117_v63 = vpack.c.bf16 %v85_v58, %v85_v58 }
 0x24f   :  { %3783 = vmatprep.subr.bf16.mxu0 %v7034_v0  ;;  %v7074_v0 = vld [vmem:[%s9845_s26 + $0xf00] ss:$8 sps:$4 sm:$0xff]  }
 0x252   :  { %3784 = vmatpush1.bf16.msra.mxu0 %v7032_v6  ;;  %v7085_v6 = vld [vmem:[%s9845_s26 + $0xf34] ss:$8 sps:$4 sm:$0xff]  }
 0x253   :  { %3785 = vmatprep.subr.bf16.mxu0 %v7037_v7  ;;  %v7083_v7 = vld [vmem:[%s9845_s26 + $0xf30] ss:$8 sps:$4 sm:$0xff]  }
 0x256   :  { %3786 = vmatpush1.bf16.msra.mxu0 %v7035_v10  ;;  %v7091_v10 = vld [vmem:[%s9845_s26 + $0xf54] ss:$8 sps:$4 sm:$0xff]  }
 0x257   :  { %3787 = vmatprep.subr.bf16.mxu0 %v7040_v11  ;;  %v7089_v11 = vld [vmem:[%s9845_s26 + $0xf50] ss:$8 sps:$4 sm:$0xff]  }
 0x25a   :  { %3788 = vmatpush1.bf16.msra.mxu0 %v7038_v14  ;;  %v7097_v14 = vld [vmem:[%s9845_s26 + $0xf74] ss:$8 sps:$4 sm:$0xff]  }
 0x25b   :  { %3789 = vmatprep.subr.bf16.mxu0 %v7043_v15  ;;  %v7095_v15 = vld [vmem:[%s9845_s26 + $0xf70] ss:$8 sps:$4 sm:$0xff]  }
 0x25e   :  { %3790 = vmatpush1.bf16.msra.mxu0 %v7041_v18  ;;  %v7103_v18 = vld [vmem:[%s9845_s26 + $0xf94] ss:$8 sps:$4 sm:$0xff]  }
 0x25f   :  { %3791 = vmatprep.subr.bf16.mxu0 %v7046_v19  ;;  %v7101_v19 = vld [vmem:[%s9845_s26 + $0xf90] ss:$8 sps:$4 sm:$0xff]  }
 0x262   :  { %3792 = vmatpush1.bf16.msra.mxu0 %v7044_v22  ;;  %v7109_v22 = vld [vmem:[%s9845_s26 + $0xfb4] ss:$8 sps:$4 sm:$0xff]  }
 0x263   :  { %3793 = vmatprep.subr.bf16.mxu0 %v7049_v24  ;;  %v7112_v24 = vld [vmem:[%s9845_s26 + $0xfc4] ss:$8 sps:$4 sm:$0xff]  }
 0x266   :  { %3794 = vmatpush1.bf16.msra.mxu0 %v7047_v26  ;;  %v7115_v26 = vld [vmem:[%s9845_s26 + $0xfd4] ss:$8 sps:$4 sm:$0xff]  }
 0x267   :  { %3795 = vmatprep.subr.bf16.mxu0 %v7052_v28  ;;  %v7118_v28 = vld [vmem:[%s9845_s26 + $0xfe4] ss:$8 sps:$4 sm:$0xff]  }
 0x26a   :  { %3796 = vmatpush1.bf16.msra.mxu0 %v7050_v30  ;;  %v7121_v30 = vld [vmem:[%s9845_s26 + $0xff4] ss:$8 sps:$4 sm:$0xff]  }
 0x26b   :  { %3797 = vmatprep.subr.bf16.mxu0 %v7055_v32  ;;  %v87_v32 = vld [vmem:[%s9846_s24 + $0xf0] sm:$0xff] }
 0x26c   :  { %v119_v33 = vpack.c.bf16 %v87_v32, %v87_v32 }
 0x26e   :  { %3798 = vmatpush1.bf16.msra.mxu0 %v7053_v34  ;;  %v7166_v34 = vld [vmem:[%s9825_s2 + $0xe4] ss:$8 sps:$4 sm:$0xff]  }
 0x26f   :  { %3799 = vmatprep.subr.bf16.mxu0 %v7058_v36  ;;  %4097 = vmatprep.subr.bf16.mxu1 %v7166_v34  ;;  %v7169_v36 = vld [vmem:[%s9825_s2 + $0xf4] ss:$8 sps:$4 sm:$0xff]  }
 0x270   :  { %4098 = vmatpush1.bf16.msra.mxu1 %v7164_v35 }
 0x271   :  { %4099 = vmatprep.subr.bf16.mxu1 %v7169_v36 }
 0x272   :  { %3800 = vmatpush1.bf16.msra.mxu0 %v7056_v38  ;;  %v7172_v38 = vld [vmem:[%s9826_s3 + $0x4] ss:$8 sps:$4 sm:$0xff]  }
 0x273   :  { %3801 = vmatprep.subr.bf16.mxu0 %v7061_v40  ;;  %v636_v40 = vshrl.u32 %v635_v39, 7 }
 0x274   :  { %4100 = vmatpush1.bf16.msra.mxu1 %v7167_v37 }
 0x275   :  { %4320 = vmatprep.subr.bf16.mxu1 %v7172_v38  ;;  %v9251_v41 = vsub.s32 0, %v636_v40  ;;  %v9256_v43 = vsub.s32 1, %v636_v40  ;;  %v7218_v40 = vld [vmem:[%s9828_s4] ss:$8 sps:$4 sm:$0xff]  }
 0x276   :  { %3802 = vmatpush1.bf16.msra.mxu0 %v7059_v42  ;;  %v633_v42 = vld [vmem:[%s9827_s9] sm:$0x3] }
 0x277   :  { %3803 = vmatprep.subr.bf16.mxu0 %v7064_v44  ;;  %v638_v44 = vrot.slane %v633_v42, %v9251_v41  ;;  %v642_v45 = vrot.slane %v633_v42, %v9256_v43 }
 0x279   :  { %v6296_v47 = vadd.f32 %v8958_v62, %v642_v45  ;;  %v7173_v62 = vld [vmem:[%s9826_s3 + $0x10] ss:$8 sps:$4 sm:$0xff]  }
 0x27a   :  { %3804 = vmatpush1.bf16.msra.mxu0 %v7062_v46  ;;  %v6294_v46 = vadd.f32 %v8956_v61, %v638_v44  ;;  %v7175_v61 = vld [vmem:[%s9826_s3 + $0x14] ss:$8 sps:$4 sm:$0xff]   ;;  %v7221_v45 = vld [vmem:[%s9828_s4 + $0x10] ss:$8 sps:$4 sm:$0xff]  }
 0x27b   :  { %3805 = vmatprep.subr.bf16.mxu0 %v7067_v48  ;;  %v7223_v44 = vld [vmem:[%s9828_s4 + $0x14] ss:$8 sps:$4 sm:$0xff]  }
 0x27e   :  { %3806 = vmatpush1.bf16.msra.mxu0 %v7065_v50 }
 0x27f   :  { %3807 = vmatprep.subr.bf16.mxu0 %v7070_v52 }
 0x282   :  { %3808 = vmatpush1.bf16.msra.mxu0 %v7068_v54 }
 0x283   :  { %3809 = vmatprep.subr.bf16.mxu0 %v7073_v56 }
 0x286   :  { %3810 = vmatpush1.bf16.msra.mxu0 %v7071_v57  ;;  %v7170_v57 = vld [vmem:[%s9826_s3] ss:$8 sps:$4 sm:$0xff]  }
 0x287   :  { %3820 = vmatprep.subr.bf16.mxu0 %v7076_v59  ;;  %v7178_v59 = vld [vmem:[%s9826_s3 + $0x24] ss:$8 sps:$4 sm:$0xff]  }
 0x289   :  { %3812 = vmatmul.mubr.bf16.vlgmr.msra.gmra.mrb[0].mxu0 %v117_v63  ;;  %v7181_v63 = vld [vmem:[%s9826_s3 + $0x34] ss:$8 sps:$4 sm:$0xff]  }
 0x28a   :  { %3821 = vmatpush1.bf16.msra.mxu0 %v7074_v0  ;;  %3852 = vmatprep.mubr.bf16.mxu0 %v120_v1  ;;  %v7179_v0 = vld [vmem:[%s9826_s3 + $0x30] ss:$8 sps:$4 sm:$0xff]   ;;  %v7184_v1 = vld [vmem:[%s9826_s3 + $0x44] ss:$8 sps:$4 sm:$0xff]  }
 0x28b   :  { %3822 = vmatprep.subr.bf16.mxu0 %v7079_v2  ;;  %v7182_v2 = vld [vmem:[%s9826_s3 + $0x40] ss:$8 sps:$4 sm:$0xff]  }
 0x28e   :  { %3823 = vmatpush1.bf16.msra.mxu0 %v7077_v3  ;;  %v7187_v3 = vld [vmem:[%s9826_s3 + $0x54] ss:$8 sps:$4 sm:$0xff]  }
 0x28f   :  { %3824 = vmatprep.subr.bf16.mxu0 %v7082_v4  ;;  %v7185_v4 = vld [vmem:[%s9826_s3 + $0x50] ss:$8 sps:$4 sm:$0xff]  }
 0x292   :  { %3825 = vmatpush1.bf16.msra.mxu0 %v7080_v5  ;;  %v7190_v5 = vld [vmem:[%s9826_s3 + $0x64] ss:$8 sps:$4 sm:$0xff]  }
 0x293   :  { %3826 = vmatprep.subr.bf16.mxu0 %v7085_v6  ;;  %v7188_v6 = vld [vmem:[%s9826_s3 + $0x60] ss:$8 sps:$4 sm:$0xff]  }
 0x296   :  { %3827 = vmatpush1.bf16.msra.mxu0 %v7083_v7  ;;  %v7193_v7 = vld [vmem:[%s9826_s3 + $0x74] ss:$8 sps:$4 sm:$0xff]  }
 0x297   :  { %3828 = vmatprep.subr.bf16.mxu0 %v7088_v8  ;;  %v7191_v8 = vld [vmem:[%s9826_s3 + $0x70] ss:$8 sps:$4 sm:$0xff]  }
 0x29a   :  { %3829 = vmatpush1.bf16.msra.mxu0 %v7086_v9  ;;  %v7196_v9 = vld [vmem:[%s9826_s3 + $0x84] ss:$8 sps:$4 sm:$0xff]  }
 0x29b   :  { %3830 = vmatprep.subr.bf16.mxu0 %v7091_v10  ;;  %v7194_v10 = vld [vmem:[%s9826_s3 + $0x80] ss:$8 sps:$4 sm:$0xff]  }
 0x29e   :  { %3831 = vmatpush1.bf16.msra.mxu0 %v7089_v11  ;;  %v7199_v11 = vld [vmem:[%s9826_s3 + $0x94] ss:$8 sps:$4 sm:$0xff]  }
 0x29f   :  { %3832 = vmatprep.subr.bf16.mxu0 %v7094_v12  ;;  %v7197_v12 = vld [vmem:[%s9826_s3 + $0x90] ss:$8 sps:$4 sm:$0xff]  }
 0x2a2   :  { %3833 = vmatpush1.bf16.msra.mxu0 %v7092_v13  ;;  %v7202_v13 = vld [vmem:[%s9826_s3 + $0xa4] ss:$8 sps:$4 sm:$0xff]  }
 0x2a3   :  { %3834 = vmatprep.subr.bf16.mxu0 %v7097_v14  ;;  %v7200_v14 = vld [vmem:[%s9826_s3 + $0xa0] ss:$8 sps:$4 sm:$0xff]  }
 0x2a6   :  { %3835 = vmatpush1.bf16.msra.mxu0 %v7095_v15  ;;  %v7205_v15 = vld [vmem:[%s9826_s3 + $0xb4] ss:$8 sps:$4 sm:$0xff]  }
 0x2a7   :  { %3836 = vmatprep.subr.bf16.mxu0 %v7100_v16  ;;  %v7203_v16 = vld [vmem:[%s9826_s3 + $0xb0] ss:$8 sps:$4 sm:$0xff]  }
 0x2aa   :  { %3837 = vmatpush1.bf16.msra.mxu0 %v7098_v17  ;;  %v7208_v17 = vld [vmem:[%s9826_s3 + $0xc4] ss:$8 sps:$4 sm:$0xff]  }
 0x2ab   :  { %3838 = vmatprep.subr.bf16.mxu0 %v7103_v18  ;;  %v7206_v18 = vld [vmem:[%s9826_s3 + $0xc0] ss:$8 sps:$4 sm:$0xff]  }
 0x2ae   :  { %3839 = vmatpush1.bf16.msra.mxu0 %v7101_v19  ;;  %v7211_v19 = vld [vmem:[%s9826_s3 + $0xd4] ss:$8 sps:$4 sm:$0xff]  }
 0x2af   :  { %3840 = vmatprep.subr.bf16.mxu0 %v7106_v20  ;;  %v7209_v20 = vld [vmem:[%s9826_s3 + $0xd0] ss:$8 sps:$4 sm:$0xff]  }
 0x2b2   :  { %3841 = vmatpush1.bf16.msra.mxu0 %v7104_v21  ;;  %v7214_v21 = vld [vmem:[%s9826_s3 + $0xe4] ss:$8 sps:$4 sm:$0xff]  }
 0x2b3   :  { %3842 = vmatprep.subr.bf16.mxu0 %v7109_v22  ;;  %v7212_v22 = vld [vmem:[%s9826_s3 + $0xe0] ss:$8 sps:$4 sm:$0xff]  }
 0x2b6   :  { %3843 = vmatpush1.bf16.msra.mxu0 %v7107_v23  ;;  %v7217_v23 = vld [vmem:[%s9826_s3 + $0xf4] ss:$8 sps:$4 sm:$0xff]  }
 0x2b7   :  { %3844 = vmatprep.subr.bf16.mxu0 %v7112_v24  ;;  %v7215_v24 = vld [vmem:[%s9826_s3 + $0xf0] ss:$8 sps:$4 sm:$0xff]  }
 0x2ba   :  { %3845 = vmatpush1.bf16.msra.mxu0 %v7110_v25  ;;  %v7220_v25 = vld [vmem:[%s9828_s4 + $0x4] ss:$8 sps:$4 sm:$0xff]  }
 0x2bb   :  { %3846 = vmatprep.subr.bf16.mxu0 %v7115_v26  ;;  %v3897_v26 = vld [vmem:[%s9829_s10] sm:$0x3] }
 0x2be   :  { %3847 = vmatpush1.bf16.msra.mxu0 %v7113_v27  ;;  %v3902_v27 = vrot.slane %v3897_v26, %v9251_v41 }
 0x2bf   :  { %3848 = vmatprep.subr.bf16.mxu0 %v7118_v28  ;;  %v3906_v28 = vrot.slane %v3897_v26, %v9256_v43 }
 0x2c2   :  { %3849 = vmatpush1.bf16.msra.mxu0 %v7116_v29 }
 0x2c3   :  { %3850 = vmatprep.subr.bf16.mxu0 %v7121_v30 }
 0x2c6   :  { %3851 = vmatpush1.bf16.msra.mxu0 %v7119_v31 }
 0x2c9   :  { %3853 = vmatmul.mubr.bf16.vlgmr.msra.gmra.mrb[0].mxu0 %v119_v33 }
 0x39c   :  { %v3854_v48 = vpop.f32.mrb[0].mxu0 }
 0x39d   :  { %v6295_v49 = vadd.f32 %v6294_v46, %v3854_v48  ;;  %v3856_v50 = vpop.f32.mrb[1].mxu0  ;;  %v7226_v46 = vld [vmem:[%s9828_s4 + $0x24] ss:$8 sps:$4 sm:$0xff]   ;;  %v7229_v48 = vld [vmem:[%s9828_s4 + $0x34] ss:$8 sps:$4 sm:$0xff]  }
 0x39e   :  { %v6297_v51 = vadd.f32 %v6296_v47, %v3856_v50  ;;  %v3858_v52 = vpop.f32.mrb[2].mxu0  ;;  %v7224_v47 = vld [vmem:[%s9828_s4 + $0x20] ss:$8 sps:$4 sm:$0xff]   ;;  %v7232_v50 = vld [vmem:[%s9828_s4 + $0x44] ss:$8 sps:$4 sm:$0xff]  }
 0x39f   :  { %v3861_v53 = vmax.f32 %v6295_v49, 0.0  ;;  %v3859_v54 = vpop.f32.mrb[3].mxu0  ;;  %v7227_v49 = vld [vmem:[%s9828_s4 + $0x30] ss:$8 sps:$4 sm:$0xff]   ;;  %v7235_v52 = vld [vmem:[%s9828_s4 + $0x54] ss:$8 sps:$4 sm:$0xff]  }
 0x3a0   :  { %v3862_v55 = vmax.f32 %v6297_v51, 0.0  ;;  %v7230_v51 = vld [vmem:[%s9828_s4 + $0x40] ss:$8 sps:$4 sm:$0xff]   ;;  %v7238_v54 = vld [vmem:[%s9828_s4 + $0x64] ss:$8 sps:$4 sm:$0xff]  }
 0x3a1   :  { %v3863_v58 = vpack.c.bf16 %v3861_v53, %v3861_v53  ;;  %v7233_v53 = vld [vmem:[%s9828_s4 + $0x50] ss:$8 sps:$4 sm:$0xff]  }
 0x3a2   :  { %v3864_v56 = vpack.c.bf16 %v3862_v55, %v3862_v55  ;;  %v7236_v55 = vld [vmem:[%s9828_s4 + $0x60] ss:$8 sps:$4 sm:$0xff]  }
 0x3a4   :  { %4101 = vmatprep.mubr.bf16.mxu1 %v3864_v56  ;;  %v7241_v56 = vld [vmem:[%s9828_s4 + $0x74] ss:$8 sps:$4 sm:$0xff]  }
 0x3a5   :  { %4102 = vmatmul.mubr.bf16.vlgmr.msra.gmra.mrb[4].mxu1 %v3863_v58  ;;  %v7244_v58 = vld [vmem:[%s9828_s4 + $0x84] ss:$8 sps:$4 sm:$0xff]  }
 0x3a6   :  { %4321 = vmatpush1.bf16.msra.mxu1 %v7170_v57  ;;  %v7239_v57 = vld [vmem:[%s9828_s4 + $0x70] ss:$8 sps:$4 sm:$0xff]  }
 0x3a7   :  { %4322 = vmatprep.subr.bf16.mxu1 %v7175_v61  ;;  %v7242_v61 = vld [vmem:[%s9828_s4 + $0x80] ss:$8 sps:$4 sm:$0xff]  }
 0x3aa   :  { %4323 = vmatpush1.bf16.msra.mxu1 %v7173_v62  ;;  %v7247_v62 = vld [vmem:[%s9828_s4 + $0x94] ss:$8 sps:$4 sm:$0xff]  }
 0x3ab   :  { %4324 = vmatprep.subr.bf16.mxu1 %v7178_v59  ;;  %v7245_v59 = vld [vmem:[%s9828_s4 + $0x90] ss:$8 sps:$4 sm:$0xff]  }
 0x3ae   :  { %4325 = vmatpush1.bf16.msra.mxu1 %v7176_v60  ;;  %v7250_v60 = vld [vmem:[%s9828_s4 + $0xa4] ss:$8 sps:$4 sm:$0xff]  }
 0x3af   :  { %4326 = vmatprep.subr.bf16.mxu1 %v7181_v63  ;;  %v7248_v63 = vld [vmem:[%s9828_s4 + $0xa0] ss:$8 sps:$4 sm:$0xff]  }
 0x3b2   :  { %4327 = vmatpush1.bf16.msra.mxu1 %v7179_v0  ;;  %v7253_v0 = vld [vmem:[%s9828_s4 + $0xb4] ss:$8 sps:$4 sm:$0xff]  }
 0x3b3   :  { %4328 = vmatprep.subr.bf16.mxu1 %v7184_v1  ;;  %v7251_v1 = vld [vmem:[%s9828_s4 + $0xb0] ss:$8 sps:$4 sm:$0xff]  }
 0x3b6   :  { %4329 = vmatpush1.bf16.msra.mxu1 %v7182_v2  ;;  %v7256_v2 = vld [vmem:[%s9828_s4 + $0xc4] ss:$8 sps:$4 sm:$0xff]  }
 0x3b7   :  { %4330 = vmatprep.subr.bf16.mxu1 %v7187_v3  ;;  %v7254_v3 = vld [vmem:[%s9828_s4 + $0xc0] ss:$8 sps:$4 sm:$0xff]  }
 0x3ba   :  { %4331 = vmatpush1.bf16.msra.mxu1 %v7185_v4  ;;  %v7259_v4 = vld [vmem:[%s9828_s4 + $0xd4] ss:$8 sps:$4 sm:$0xff]  }
 0x3bb   :  { %4332 = vmatprep.subr.bf16.mxu1 %v7190_v5  ;;  %v7257_v5 = vld [vmem:[%s9828_s4 + $0xd0] ss:$8 sps:$4 sm:$0xff]  }
 0x3be   :  { %4333 = vmatpush1.bf16.msra.mxu1 %v7188_v6  ;;  %v7262_v6 = vld [vmem:[%s9828_s4 + $0xe4] ss:$8 sps:$4 sm:$0xff]  }
 0x3bf   :  { %4334 = vmatprep.subr.bf16.mxu1 %v7193_v7  ;;  %v7260_v7 = vld [vmem:[%s9828_s4 + $0xe0] ss:$8 sps:$4 sm:$0xff]  }
 0x3c2   :  { %4335 = vmatpush1.bf16.msra.mxu1 %v7191_v8  ;;  %v7265_v8 = vld [vmem:[%s9828_s4 + $0xf4] ss:$8 sps:$4 sm:$0xff]  }
 0x3c3   :  { %4336 = vmatprep.subr.bf16.mxu1 %v7196_v9  ;;  %v7263_v9 = vld [vmem:[%s9828_s4 + $0xf0] ss:$8 sps:$4 sm:$0xff]  }
 0x3c6   :  { %4337 = vmatpush1.bf16.msra.mxu1 %v7194_v10  ;;  %v7268_v10 = vld [vmem:[%s9830_s5 + $0x4] ss:$8 sps:$4 sm:$0xff]  }
 0x3c7   :  { %4338 = vmatprep.subr.bf16.mxu1 %v7199_v11  ;;  %v4148_v11 = vld [vmem:[%s9831_s11] sm:$0x3] }
 0x3ca   :  { %4339 = vmatpush1.bf16.msra.mxu1 %v7197_v12  ;;  %v4153_v12 = vrot.slane %v4148_v11, %v9251_v41 }
 0x3cb   :  { %4340 = vmatprep.subr.bf16.mxu1 %v7202_v13  ;;  %v4157_v13 = vrot.slane %v4148_v11, %v9256_v43 }
 0x3ce   :  { %4341 = vmatpush1.bf16.msra.mxu1 %v7200_v14 }
 0x3cf   :  { %4342 = vmatprep.subr.bf16.mxu1 %v7205_v15 }
 0x3d2   :  { %4343 = vmatpush1.bf16.msra.mxu1 %v7203_v16 }
 0x3d3   :  { %4344 = vmatprep.subr.bf16.mxu1 %v7208_v17 }
 0x3d6   :  { %4345 = vmatpush1.bf16.msra.mxu1 %v7206_v18 }
 0x3d7   :  { %4346 = vmatprep.subr.bf16.mxu1 %v7211_v19 }
 0x3da   :  { %4347 = vmatpush1.bf16.msra.mxu1 %v7209_v20 }
 0x3db   :  { %4348 = vmatprep.subr.bf16.mxu1 %v7214_v21 }
 0x3de   :  { %4349 = vmatpush1.bf16.msra.mxu1 %v7212_v22 }
 0x3df   :  { %4350 = vmatprep.subr.bf16.mxu1 %v7217_v23 }
 0x3e2   :  { %4351 = vmatpush1.bf16.msra.mxu1 %v7215_v24 }
 0x3e3   :  { %4571 = vmatprep.subr.bf16.mxu1 %v7220_v25  ;;  %v7266_v25 = vld [vmem:[%s9830_s5] ss:$8 sps:$4 sm:$0xff]  }
 0x478   :  { %v4103_v29 = vpop.f32.mrb[4].mxu1 }
 0x479   :  { %v4104_v30 = vadd.f32 %v4103_v29, %v3902_v27  ;;  %v4105_v31 = vpop.f32.mrb[5].mxu1  ;;  %v7271_v27 = vld [vmem:[%s9830_s5 + $0x14] ss:$8 sps:$4 sm:$0xff]   ;;  %v7274_v29 = vld [vmem:[%s9830_s5 + $0x24] ss:$8 sps:$4 sm:$0xff]  }
 0x47a   :  { %v4106_v32 = vadd.f32 %v4105_v31, %v3906_v28  ;;  %v4107_v33 = vpop.f32.mrb[6].mxu1  ;;  %v7269_v28 = vld [vmem:[%s9830_s5 + $0x10] ss:$8 sps:$4 sm:$0xff]   ;;  %v7277_v31 = vld [vmem:[%s9830_s5 + $0x34] ss:$8 sps:$4 sm:$0xff]  }
 0x47b   :  { %v4110_v34 = vmul.f32 0.2, %v4104_v30  ;;  %v4108_v35 = vpop.f32.mrb[7].mxu1  ;;  %v7280_v33 = vld [vmem:[%s9830_s5 + $0x44] ss:$8 sps:$4 sm:$0xff]  }
 0x47c   :  { %v4111_v36 = vmul.f32 0.2, %v4106_v32  ;;  %v7283_v35 = vld [vmem:[%s9830_s5 + $0x54] ss:$8 sps:$4 sm:$0xff]  }
 0x47d   :  { %v4112_v37 = vmax.f32 %v4104_v30, %v4110_v34  ;;  %v7272_v30 = vld [vmem:[%s9830_s5 + $0x20] ss:$8 sps:$4 sm:$0xff]  }
 0x47e   :  { %v4113_v38 = vmax.f32 %v4106_v32, %v4111_v36  ;;  %v7275_v32 = vld [vmem:[%s9830_s5 + $0x30] ss:$8 sps:$4 sm:$0xff]   ;;  %v7278_v34 = vld [vmem:[%s9830_s5 + $0x40] ss:$8 sps:$4 sm:$0xff]  }
 0x47f   :  { %v4114_v42 = vpack.c.bf16 %v4112_v37, %v4112_v37  ;;  %v7281_v36 = vld [vmem:[%s9830_s5 + $0x50] ss:$8 sps:$4 sm:$0xff]   ;;  %v7286_v37 = vld [vmem:[%s9830_s5 + $0x64] ss:$8 sps:$4 sm:$0xff]  }
 0x480   :  { %v4115_v39 = vpack.c.bf16 %v4113_v38, %v4113_v38  ;;  %v7284_v38 = vld [vmem:[%s9830_s5 + $0x60] ss:$8 sps:$4 sm:$0xff]  }
 0x482   :  { %4352 = vmatprep.mubr.bf16.mxu1 %v4115_v39  ;;  %v7289_v39 = vld [vmem:[%s9830_s5 + $0x74] ss:$8 sps:$4 sm:$0xff]  }
 0x483   :  { %4353 = vmatmul.mubr.bf16.vlgmr.msra.gmra.mrb[8].mxu1 %v4114_v42  ;;  %v7292_v42 = vld [vmem:[%s9830_s5 + $0x84] ss:$8 sps:$4 sm:$0xff]  }
 0x484   :  { %4572 = vmatpush1.bf16.msra.mxu1 %v7218_v40  ;;  %v7287_v40 = vld [vmem:[%s9830_s5 + $0x70] ss:$8 sps:$4 sm:$0xff]  }
 0x485   :  { %4573 = vmatprep.subr.bf16.mxu1 %v7223_v44  ;;  %v7290_v44 = vld [vmem:[%s9830_s5 + $0x80] ss:$8 sps:$4 sm:$0xff]  }
 0x488   :  { %4574 = vmatpush1.bf16.msra.mxu1 %v7221_v45  ;;  %v7295_v45 = vld [vmem:[%s9830_s5 + $0x94] ss:$8 sps:$4 sm:$0xff]  }
 0x489   :  { %4575 = vmatprep.subr.bf16.mxu1 %v7226_v46  ;;  %v7293_v46 = vld [vmem:[%s9830_s5 + $0x90] ss:$8 sps:$4 sm:$0xff]  }
 0x48c   :  { %4576 = vmatpush1.bf16.msra.mxu1 %v7224_v47  ;;  %v7298_v47 = vld [vmem:[%s9830_s5 + $0xa4] ss:$8 sps:$4 sm:$0xff]  }
 0x48d   :  { %4577 = vmatprep.subr.bf16.mxu1 %v7229_v48  ;;  %v7296_v48 = vld [vmem:[%s9830_s5 + $0xa0] ss:$8 sps:$4 sm:$0xff]  }
 0x490   :  { %4578 = vmatpush1.bf16.msra.mxu1 %v7227_v49  ;;  %v7301_v49 = vld [vmem:[%s9830_s5 + $0xb4] ss:$8 sps:$4 sm:$0xff]  }
 0x491   :  { %4579 = vmatprep.subr.bf16.mxu1 %v7232_v50  ;;  %v7299_v50 = vld [vmem:[%s9830_s5 + $0xb0] ss:$8 sps:$4 sm:$0xff]  }
 0x494   :  { %4580 = vmatpush1.bf16.msra.mxu1 %v7230_v51  ;;  %v7304_v51 = vld [vmem:[%s9830_s5 + $0xc4] ss:$8 sps:$4 sm:$0xff]  }
 0x495   :  { %4581 = vmatprep.subr.bf16.mxu1 %v7235_v52  ;;  %v7302_v52 = vld [vmem:[%s9830_s5 + $0xc0] ss:$8 sps:$4 sm:$0xff]  }
 0x498   :  { %4582 = vmatpush1.bf16.msra.mxu1 %v7233_v53  ;;  %v7307_v53 = vld [vmem:[%s9830_s5 + $0xd4] ss:$8 sps:$4 sm:$0xff]  }
 0x499   :  { %4583 = vmatprep.subr.bf16.mxu1 %v7238_v54  ;;  %v7305_v54 = vld [vmem:[%s9830_s5 + $0xd0] ss:$8 sps:$4 sm:$0xff]  }
 0x49c   :  { %4584 = vmatpush1.bf16.msra.mxu1 %v7236_v55  ;;  %v7310_v55 = vld [vmem:[%s9830_s5 + $0xe4] ss:$8 sps:$4 sm:$0xff]  }
 0x49d   :  { %4585 = vmatprep.subr.bf16.mxu1 %v7241_v56  ;;  %v7308_v56 = vld [vmem:[%s9830_s5 + $0xe0] ss:$8 sps:$4 sm:$0xff]  }
 0x4a0   :  { %4586 = vmatpush1.bf16.msra.mxu1 %v7239_v57  ;;  %v7313_v57 = vld [vmem:[%s9830_s5 + $0xf4] ss:$8 sps:$4 sm:$0xff]  }
 0x4a1   :  { %4587 = vmatprep.subr.bf16.mxu1 %v7244_v58  ;;  %v7311_v58 = vld [vmem:[%s9830_s5 + $0xf0] ss:$8 sps:$4 sm:$0xff]  }
 0x4a4   :  { %4588 = vmatpush1.bf16.msra.mxu1 %v7242_v61  ;;  %v7316_v61 = vld [vmem:[%s9832_s6 + $0x4] ss:$8 sps:$4 sm:$0xff]  }
 0x4a5   :  { %4589 = vmatprep.subr.bf16.mxu1 %v7247_v62  ;;  %v4399_v62 = vld [vmem:[%s9833_s12] sm:$0x3] }
 0x4a8   :  { %4590 = vmatpush1.bf16.msra.mxu1 %v7245_v59  ;;  %v4404_v59 = vrot.slane %v4399_v62, %v9251_v41 }
 0x4a9   :  { %4591 = vmatprep.subr.bf16.mxu1 %v7250_v60  ;;  %v4408_v60 = vrot.slane %v4399_v62, %v9256_v43 }
 0x4ac   :  { %4592 = vmatpush1.bf16.msra.mxu1 %v7248_v63 }
 0x4ad   :  { %4593 = vmatprep.subr.bf16.mxu1 %v7253_v0 }
 0x4b0   :  { %4594 = vmatpush1.bf16.msra.mxu1 %v7251_v1 }
 0x4b1   :  { %4595 = vmatprep.subr.bf16.mxu1 %v7256_v2 }
 0x4b4   :  { %4596 = vmatpush1.bf16.msra.mxu1 %v7254_v3 }
 0x4b5   :  { %4597 = vmatprep.subr.bf16.mxu1 %v7259_v4 }
 0x4b8   :  { %4598 = vmatpush1.bf16.msra.mxu1 %v7257_v5 }
 0x4b9   :  { %4599 = vmatprep.subr.bf16.mxu1 %v7262_v6 }
 0x4bc   :  { %4600 = vmatpush1.bf16.msra.mxu1 %v7260_v7 }
 0x4bd   :  { %4601 = vmatprep.subr.bf16.mxu1 %v7265_v8 }
 0x4c0   :  { %4602 = vmatpush1.bf16.msra.mxu1 %v7263_v9 }
 0x4c1   :  { %4822 = vmatprep.subr.bf16.mxu1 %v7268_v10  ;;  %v7314_v10 = vld [vmem:[%s9832_s6] ss:$8 sps:$4 sm:$0xff]  }
 0x556   :  { %v4354_v14 = vpop.f32.mrb[8].mxu1 }
 0x557   :  { %v4355_v15 = vadd.f32 %v4354_v14, %v4153_v12  ;;  %v4356_v16 = vpop.f32.mrb[9].mxu1  ;;  %v7319_v12 = vld [vmem:[%s9832_s6 + $0x14] ss:$8 sps:$4 sm:$0xff]   ;;  %v7322_v14 = vld [vmem:[%s9832_s6 + $0x24] ss:$8 sps:$4 sm:$0xff]  }
 0x558   :  { %v4357_v17 = vadd.f32 %v4356_v16, %v4157_v13  ;;  %v4358_v18 = vpop.f32.mrb[10].mxu1  ;;  %v7317_v13 = vld [vmem:[%s9832_s6 + $0x10] ss:$8 sps:$4 sm:$0xff]   ;;  %v7325_v16 = vld [vmem:[%s9832_s6 + $0x34] ss:$8 sps:$4 sm:$0xff]  }
 0x559   :  { %v4361_v19 = vmul.f32 0.2, %v4355_v15  ;;  %v4359_v20 = vpop.f32.mrb[11].mxu1  ;;  %v7328_v18 = vld [vmem:[%s9832_s6 + $0x44] ss:$8 sps:$4 sm:$0xff]  }
 0x55a   :  { %v4362_v21 = vmul.f32 0.2, %v4357_v17  ;;  %v7331_v20 = vld [vmem:[%s9832_s6 + $0x54] ss:$8 sps:$4 sm:$0xff]  }
 0x55b   :  { %v4363_v22 = vmax.f32 %v4355_v15, %v4361_v19  ;;  %v7320_v15 = vld [vmem:[%s9832_s6 + $0x20] ss:$8 sps:$4 sm:$0xff]  }
 0x55c   :  { %v4364_v23 = vmax.f32 %v4357_v17, %v4362_v21  ;;  %v7323_v17 = vld [vmem:[%s9832_s6 + $0x30] ss:$8 sps:$4 sm:$0xff]   ;;  %v7326_v19 = vld [vmem:[%s9832_s6 + $0x40] ss:$8 sps:$4 sm:$0xff]  }
 0x55d   :  { %v4365_v26 = vpack.c.bf16 %v4363_v22, %v4363_v22  ;;  %v7329_v21 = vld [vmem:[%s9832_s6 + $0x50] ss:$8 sps:$4 sm:$0xff]   ;;  %v7334_v22 = vld [vmem:[%s9832_s6 + $0x64] ss:$8 sps:$4 sm:$0xff]  }
 0x55e   :  { %v4366_v24 = vpack.c.bf16 %v4364_v23, %v4364_v23  ;;  %v7332_v23 = vld [vmem:[%s9832_s6 + $0x60] ss:$8 sps:$4 sm:$0xff]  }
 0x560   :  { %4603 = vmatprep.mubr.bf16.mxu1 %v4366_v24  ;;  %v7337_v24 = vld [vmem:[%s9832_s6 + $0x74] ss:$8 sps:$4 sm:$0xff]  }
 0x561   :  { %4604 = vmatmul.mubr.bf16.vlgmr.msra.gmra.mrb[12].mxu1 %v4365_v26  ;;  %v7340_v26 = vld [vmem:[%s9832_s6 + $0x84] ss:$8 sps:$4 sm:$0xff]  }
 0x562   :  { %4823 = vmatpush1.bf16.msra.mxu1 %v7266_v25  ;;  %v7335_v25 = vld [vmem:[%s9832_s6 + $0x70] ss:$8 sps:$4 sm:$0xff]  }
 0x563   :  { %4824 = vmatprep.subr.bf16.mxu1 %v7271_v27  ;;  %v7338_v27 = vld [vmem:[%s9832_s6 + $0x80] ss:$8 sps:$4 sm:$0xff]  }
 0x566   :  { %4825 = vmatpush1.bf16.msra.mxu1 %v7269_v28  ;;  %v7343_v28 = vld [vmem:[%s9832_s6 + $0x94] ss:$8 sps:$4 sm:$0xff]  }
 0x567   :  { %4826 = vmatprep.subr.bf16.mxu1 %v7274_v29  ;;  %v7341_v29 = vld [vmem:[%s9832_s6 + $0x90] ss:$8 sps:$4 sm:$0xff]  }
 0x56a   :  { %4827 = vmatpush1.bf16.msra.mxu1 %v7272_v30  ;;  %v7346_v30 = vld [vmem:[%s9832_s6 + $0xa4] ss:$8 sps:$4 sm:$0xff]  }
 0x56b   :  { %4828 = vmatprep.subr.bf16.mxu1 %v7277_v31  ;;  %v7344_v31 = vld [vmem:[%s9832_s6 + $0xa0] ss:$8 sps:$4 sm:$0xff]  }
 0x56e   :  { %4829 = vmatpush1.bf16.msra.mxu1 %v7275_v32  ;;  %v7349_v32 = vld [vmem:[%s9832_s6 + $0xb4] ss:$8 sps:$4 sm:$0xff]  }
 0x56f   :  { %4830 = vmatprep.subr.bf16.mxu1 %v7280_v33  ;;  %v7347_v33 = vld [vmem:[%s9832_s6 + $0xb0] ss:$8 sps:$4 sm:$0xff]  }
 0x572   :  { %4831 = vmatpush1.bf16.msra.mxu1 %v7278_v34  ;;  %v7352_v34 = vld [vmem:[%s9832_s6 + $0xc4] ss:$8 sps:$4 sm:$0xff]  }
 0x573   :  { %4832 = vmatprep.subr.bf16.mxu1 %v7283_v35  ;;  %v7350_v35 = vld [vmem:[%s9832_s6 + $0xc0] ss:$8 sps:$4 sm:$0xff]  }
 0x576   :  { %4833 = vmatpush1.bf16.msra.mxu1 %v7281_v36  ;;  %v7355_v36 = vld [vmem:[%s9832_s6 + $0xd4] ss:$8 sps:$4 sm:$0xff]  }
 0x577   :  { %4834 = vmatprep.subr.bf16.mxu1 %v7286_v37  ;;  %v7353_v37 = vld [vmem:[%s9832_s6 + $0xd0] ss:$8 sps:$4 sm:$0xff]  }
 0x57a   :  { %4835 = vmatpush1.bf16.msra.mxu1 %v7284_v38  ;;  %v7358_v38 = vld [vmem:[%s9832_s6 + $0xe4] ss:$8 sps:$4 sm:$0xff]  }
 0x57b   :  { %4836 = vmatprep.subr.bf16.mxu1 %v7289_v39  ;;  %v7356_v39 = vld [vmem:[%s9832_s6 + $0xe0] ss:$8 sps:$4 sm:$0xff]  }
 0x57e   :  { %4837 = vmatpush1.bf16.msra.mxu1 %v7287_v40  ;;  %v7361_v40 = vld [vmem:[%s9832_s6 + $0xf4] ss:$8 sps:$4 sm:$0xff]  }
 0x57f   :  { %4838 = vmatprep.subr.bf16.mxu1 %v7292_v42  ;;  %v7359_v42 = vld [vmem:[%s9832_s6 + $0xf0] ss:$8 sps:$4 sm:$0xff]  }
 0x582   :  { %4839 = vmatpush1.bf16.msra.mxu1 %v7290_v44  ;;  %v7364_v44 = vld [vmem:[%s9834_s7 + $0x4] ss:$8 sps:$4 sm:$0xff]  }
 0x583   :  { %4840 = vmatprep.subr.bf16.mxu1 %v7295_v45  ;;  %v4650_v45 = vld [vmem:[%s9835_s13] sm:$0x3] }
 0x586   :  { %4841 = vmatpush1.bf16.msra.mxu1 %v7293_v46  ;;  %v4655_v46 = vrot.slane %v4650_v45, %v9251_v41 }
 0x587   :  { %4842 = vmatprep.subr.bf16.mxu1 %v7298_v47  ;;  %v4659_v47 = vrot.slane %v4650_v45, %v9256_v43 }
 0x58a   :  { %4843 = vmatpush1.bf16.msra.mxu1 %v7296_v48 }
 0x58b   :  { %4844 = vmatprep.subr.bf16.mxu1 %v7301_v49 }
 0x58e   :  { %4845 = vmatpush1.bf16.msra.mxu1 %v7299_v50 }
 0x58f   :  { %4846 = vmatprep.subr.bf16.mxu1 %v7304_v51 }
 0x592   :  { %4847 = vmatpush1.bf16.msra.mxu1 %v7302_v52 }
 0x593   :  { %4848 = vmatprep.subr.bf16.mxu1 %v7307_v53 }
 0x596   :  { %4849 = vmatpush1.bf16.msra.mxu1 %v7305_v54 }
 0x597   :  { %4850 = vmatprep.subr.bf16.mxu1 %v7310_v55 }
 0x59a   :  { %4851 = vmatpush1.bf16.msra.mxu1 %v7308_v56 }
 0x59b   :  { %4852 = vmatprep.subr.bf16.mxu1 %v7313_v57 }
 0x59e   :  { %4853 = vmatpush1.bf16.msra.mxu1 %v7311_v58 }
 0x59f   :  { %5073 = vmatprep.subr.bf16.mxu1 %v7316_v61  ;;  %v7362_v61 = vld [vmem:[%s9834_s7] ss:$8 sps:$4 sm:$0xff]  }
 0x634   :  { %v4605_v63 = vpop.f32.mrb[12].mxu1 }
 0x635   :  { %v4606_v0 = vadd.f32 %v4605_v63, %v4404_v59  ;;  %v4607_v1 = vpop.f32.mrb[13].mxu1  ;;  %v7367_v59 = vld [vmem:[%s9834_s7 + $0x14] ss:$8 sps:$4 sm:$0xff]   ;;  %v7370_v63 = vld [vmem:[%s9834_s7 + $0x24] ss:$8 sps:$4 sm:$0xff]  }
 0x636   :  { %v4608_v2 = vadd.f32 %v4607_v1, %v4408_v60  ;;  %v4609_v3 = vpop.f32.mrb[14].mxu1  ;;  %v7365_v60 = vld [vmem:[%s9834_s7 + $0x10] ss:$8 sps:$4 sm:$0xff]   ;;  %v7373_v1 = vld [vmem:[%s9834_s7 + $0x34] ss:$8 sps:$4 sm:$0xff]  }
 0x637   :  { %v4612_v4 = vmul.f32 0.2, %v4606_v0  ;;  %v4610_v5 = vpop.f32.mrb[15].mxu1  ;;  %v7376_v3 = vld [vmem:[%s9834_s7 + $0x44] ss:$8 sps:$4 sm:$0xff]  }
 0x638   :  { %v4613_v6 = vmul.f32 0.2, %v4608_v2  ;;  %v7379_v5 = vld [vmem:[%s9834_s7 + $0x54] ss:$8 sps:$4 sm:$0xff]  }
 0x639   :  { %v4614_v7 = vmax.f32 %v4606_v0, %v4612_v4  ;;  %v7368_v0 = vld [vmem:[%s9834_s7 + $0x20] ss:$8 sps:$4 sm:$0xff]  }
 0x63a   :  { %v4615_v8 = vmax.f32 %v4608_v2, %v4613_v6  ;;  %v7371_v2 = vld [vmem:[%s9834_s7 + $0x30] ss:$8 sps:$4 sm:$0xff]   ;;  %v7374_v4 = vld [vmem:[%s9834_s7 + $0x40] ss:$8 sps:$4 sm:$0xff]  }
 0x63b   :  { %v4616_v11 = vpack.c.bf16 %v4614_v7, %v4614_v7  ;;  %v7377_v6 = vld [vmem:[%s9834_s7 + $0x50] ss:$8 sps:$4 sm:$0xff]   ;;  %v7382_v7 = vld [vmem:[%s9834_s7 + $0x64] ss:$8 sps:$4 sm:$0xff]  }
 0x63c   :  { %v4617_v9 = vpack.c.bf16 %v4615_v8, %v4615_v8  ;;  %v7380_v8 = vld [vmem:[%s9834_s7 + $0x60] ss:$8 sps:$4 sm:$0xff]  }
 0x63e   :  { %4854 = vmatprep.mubr.bf16.mxu1 %v4617_v9  ;;  %v7385_v9 = vld [vmem:[%s9834_s7 + $0x74] ss:$8 sps:$4 sm:$0xff]  }
 0x63f   :  { %4855 = vmatmul.mubr.bf16.vlgmr.msra.gmra.mrb[16].mxu1 %v4616_v11  ;;  %v7388_v11 = vld [vmem:[%s9834_s7 + $0x84] ss:$8 sps:$4 sm:$0xff]  }
 0x640   :  { %5074 = vmatpush1.bf16.msra.mxu1 %v7314_v10  ;;  %v7383_v10 = vld [vmem:[%s9834_s7 + $0x70] ss:$8 sps:$4 sm:$0xff]  }
 0x641   :  { %5075 = vmatprep.subr.bf16.mxu1 %v7319_v12  ;;  %v7386_v12 = vld [vmem:[%s9834_s7 + $0x80] ss:$8 sps:$4 sm:$0xff]  }
 0x644   :  { %5076 = vmatpush1.bf16.msra.mxu1 %v7317_v13  ;;  %v7391_v13 = vld [vmem:[%s9834_s7 + $0x94] ss:$8 sps:$4 sm:$0xff]  }
 0x645   :  { %5077 = vmatprep.subr.bf16.mxu1 %v7322_v14  ;;  %v7389_v14 = vld [vmem:[%s9834_s7 + $0x90] ss:$8 sps:$4 sm:$0xff]  }
 0x648   :  { %5078 = vmatpush1.bf16.msra.mxu1 %v7320_v15  ;;  %v7394_v15 = vld [vmem:[%s9834_s7 + $0xa4] ss:$8 sps:$4 sm:$0xff]  }
 0x649   :  { %5079 = vmatprep.subr.bf16.mxu1 %v7325_v16  ;;  %v7392_v16 = vld [vmem:[%s9834_s7 + $0xa0] ss:$8 sps:$4 sm:$0xff]  }
 0x64c   :  { %5080 = vmatpush1.bf16.msra.mxu1 %v7323_v17  ;;  %v7397_v17 = vld [vmem:[%s9834_s7 + $0xb4] ss:$8 sps:$4 sm:$0xff]  }
 0x64d   :  { %5081 = vmatprep.subr.bf16.mxu1 %v7328_v18  ;;  %v7395_v18 = vld [vmem:[%s9834_s7 + $0xb0] ss:$8 sps:$4 sm:$0xff]  }
 0x650   :  { %5082 = vmatpush1.bf16.msra.mxu1 %v7326_v19  ;;  %v7400_v19 = vld [vmem:[%s9834_s7 + $0xc4] ss:$8 sps:$4 sm:$0xff]  }
 0x651   :  { %5083 = vmatprep.subr.bf16.mxu1 %v7331_v20  ;;  %v7398_v20 = vld [vmem:[%s9834_s7 + $0xc0] ss:$8 sps:$4 sm:$0xff]  }
 0x654   :  { %5084 = vmatpush1.bf16.msra.mxu1 %v7329_v21  ;;  %v7403_v21 = vld [vmem:[%s9834_s7 + $0xd4] ss:$8 sps:$4 sm:$0xff]  }
 0x655   :  { %5085 = vmatprep.subr.bf16.mxu1 %v7334_v22  ;;  %v7401_v22 = vld [vmem:[%s9834_s7 + $0xd0] ss:$8 sps:$4 sm:$0xff]  }
 0x658   :  { %5086 = vmatpush1.bf16.msra.mxu1 %v7332_v23  ;;  %v7406_v23 = vld [vmem:[%s9834_s7 + $0xe4] ss:$8 sps:$4 sm:$0xff]  }
 0x659   :  { %5087 = vmatprep.subr.bf16.mxu1 %v7337_v24  ;;  %v7404_v24 = vld [vmem:[%s9834_s7 + $0xe0] ss:$8 sps:$4 sm:$0xff]  }
 0x65c   :  { %5088 = vmatpush1.bf16.msra.mxu1 %v7335_v25  ;;  %v7409_v25 = vld [vmem:[%s9834_s7 + $0xf4] ss:$8 sps:$4 sm:$0xff]  }
 0x65d   :  { %5089 = vmatprep.subr.bf16.mxu1 %v7340_v26  ;;  %v7407_v26 = vld [vmem:[%s9834_s7 + $0xf0] ss:$8 sps:$4 sm:$0xff]  }
 0x660   :  { %5090 = vmatpush1.bf16.msra.mxu1 %v7338_v27  ;;  %v7410_v27 = vld [vmem:[%s9836_s8 + $0x40] sm:$0xff]  }
 0x661   :  { %5091 = vmatprep.subr.bf16.mxu1 %v7343_v28  ;;  %v4901_v28 = vld [vmem:[%s9837_s14] sm:$0x3] }
 0x664   :  { %5092 = vmatpush1.bf16.msra.mxu1 %v7341_v29  ;;  %v4906_v29 = vrot.slane %v4901_v28, %v9251_v41 }
 0x665   :  { %5093 = vmatprep.subr.bf16.mxu1 %v7346_v30  ;;  %v4910_v30 = vrot.slane %v4901_v28, %v9256_v43 }
 0x668   :  { %5094 = vmatpush1.bf16.msra.mxu1 %v7344_v31 }
 0x669   :  { %5095 = vmatprep.subr.bf16.mxu1 %v7349_v32 }
 0x66c   :  { %5096 = vmatpush1.bf16.msra.mxu1 %v7347_v33 }
 0x66d   :  { %5097 = vmatprep.subr.bf16.mxu1 %v7352_v34 }
 0x670   :  { %5098 = vmatpush1.bf16.msra.mxu1 %v7350_v35 }
 0x671   :  { %5099 = vmatprep.subr.bf16.mxu1 %v7355_v36 }
 0x674   :  { %5100 = vmatpush1.bf16.msra.mxu1 %v7353_v37 }
 0x675   :  { %5101 = vmatprep.subr.bf16.mxu1 %v7358_v38 }
 0x678   :  { %5102 = vmatpush1.bf16.msra.mxu1 %v7356_v39 }
 0x679   :  { %5103 = vmatprep.subr.bf16.mxu1 %v7361_v40 }
 0x67c   :  { %5104 = vmatpush1.bf16.msra.mxu1 %v7359_v42 }
 0x67d   :  { %5324 = vmatprep.subr.bf16.mxu1 %v7364_v44  ;;  %v7411_v44 = vld [vmem:[%s9836_s8] sm:$0xff]  }
 0x712   :  { %v4856_v48 = vpop.f32.mrb[16].mxu1 }
 0x713   :  { %v4857_v49 = vadd.f32 %v4856_v48, %v4655_v46  ;;  %v4858_v50 = vpop.f32.mrb[17].mxu1  ;;  %v7412_v46 = vld [vmem:[%s9836_s8 + $0x48] sm:$0xff]   ;;  %v7414_v48 = vld [vmem:[%s9836_s8 + $0x50] sm:$0xff]  }
 0x714   :  { %v4859_v51 = vadd.f32 %v4858_v50, %v4659_v47  ;;  %v4860_v52 = vpop.f32.mrb[18].mxu1  ;;  %v7413_v47 = vld [vmem:[%s9836_s8 + $0x8] sm:$0xff]   ;;  %v7416_v50 = vld [vmem:[%s9836_s8 + $0x58] sm:$0xff]  }
 0x715   :  { %v4863_v53 = vmul.f32 0.2, %v4857_v49  ;;  %v4861_v54 = vpop.f32.mrb[19].mxu1  ;;  %v7418_v52 = vld [vmem:[%s9836_s8 + $0x60] sm:$0xff]  }
 0x716   :  { %v4864_v55 = vmul.f32 0.2, %v4859_v51  ;;  %v7420_v54 = vld [vmem:[%s9836_s8 + $0x68] sm:$0xff]  }
 0x717   :  { %v4865_v56 = vmax.f32 %v4857_v49, %v4863_v53  ;;  %v7415_v49 = vld [vmem:[%s9836_s8 + $0x10] sm:$0xff]   ;;  %v7419_v53 = vld [vmem:[%s9836_s8 + $0x20] sm:$0xff]  }
 0x718   :  { %v4866_v57 = vmax.f32 %v4859_v51, %v4864_v55  ;;  %v7417_v51 = vld [vmem:[%s9836_s8 + $0x18] sm:$0xff]   ;;  %v7421_v55 = vld [vmem:[%s9836_s8 + $0x28] sm:$0xff]  }
 0x719   :  { %v4867_v62 = vpack.c.bf16 %v4865_v56, %v4865_v56  ;;  %v7422_v56 = vld [vmem:[%s9836_s8 + $0x70] sm:$0xff]  }
 0x71a   :  { %v4868_v58 = vpack.c.bf16 %v4866_v57, %v4866_v57  ;;  %v7423_v57 = vld [vmem:[%s9836_s8 + $0x30] sm:$0xff]  }
 0x71c   :  { %5105 = vmatprep.mubr.bf16.mxu1 %v4868_v58  ;;  %v7424_v58 = vld [vmem:[%s9836_s8 + $0x78] sm:$0xff]  }
 0x71d   :  { %5106 = vmatmul.mubr.bf16.vlgmr.msra.gmra.mrb[20].mxu1 %v4867_v62  ;;  %v5152_v62 = vld [vmem:[%s9838_s15] sm:$0x3] }
 0x71e   :  { %5325 = vmatpush1.bf16.msra.mxu1 %v7362_v61  ;;  %v7425_v61 = vld [vmem:[%s9836_s8 + $0x38] sm:$0xff]  }
 0x71f   :  { %5326 = vmatprep.subr.bf16.mxu1 %v7367_v59  ;;  %v5157_v59 = vrot.slane %v5152_v62, %v9251_v41  ;;  %v6255_v41 = vld [vmem:[%s9839_s16] ss:$0 sm:$0xff] }
 0x722   :  { %5327 = vmatpush1.bf16.msra.mxu1 %v7365_v60  ;;  %v5161_v60 = vrot.slane %v5152_v62, %v9256_v43 }
 0x723   :  { %5328 = vmatprep.subr.bf16.mxu1 %v7370_v63 }
 0x726   :  { %5329 = vmatpush1.bf16.msra.mxu1 %v7368_v0 }
 0x727   :  { %5330 = vmatprep.subr.bf16.mxu1 %v7373_v1 }
 0x72a   :  { %5331 = vmatpush1.bf16.msra.mxu1 %v7371_v2 }
 0x72b   :  { %5332 = vmatprep.subr.bf16.mxu1 %v7376_v3 }
 0x72e   :  { %5333 = vmatpush1.bf16.msra.mxu1 %v7374_v4 }
 0x72f   :  { %5334 = vmatprep.subr.bf16.mxu1 %v7379_v5 }
 0x732   :  { %5335 = vmatpush1.bf16.msra.mxu1 %v7377_v6 }
 0x733   :  { %5336 = vmatprep.subr.bf16.mxu1 %v7382_v7 }
 0x736   :  { %5337 = vmatpush1.bf16.msra.mxu1 %v7380_v8 }
 0x737   :  { %5338 = vmatprep.subr.bf16.mxu1 %v7385_v9 }
 0x73a   :  { %5339 = vmatpush1.bf16.msra.mxu1 %v7383_v10 }
 0x73b   :  { %5340 = vmatprep.subr.bf16.mxu1 %v7388_v11 }
 0x73e   :  { %5341 = vmatpush1.bf16.msra.mxu1 %v7386_v12 }
 0x73f   :  { %5342 = vmatprep.subr.bf16.mxu1 %v7391_v13 }
 0x742   :  { %5343 = vmatpush1.bf16.msra.mxu1 %v7389_v14 }
 0x743   :  { %5344 = vmatprep.subr.bf16.mxu1 %v7394_v15 }
 0x746   :  { %5345 = vmatpush1.bf16.msra.mxu1 %v7392_v16 }
 0x747   :  { %5346 = vmatprep.subr.bf16.mxu1 %v7397_v17 }
 0x74a   :  { %5347 = vmatpush1.bf16.msra.mxu1 %v7395_v18 }
 0x74b   :  { %5348 = vmatprep.subr.bf16.mxu1 %v7400_v19 }
 0x74e   :  { %5349 = vmatpush1.bf16.msra.mxu1 %v7398_v20 }
 0x74f   :  { %5350 = vmatprep.subr.bf16.mxu1 %v7403_v21 }
 0x752   :  { %5351 = vmatpush1.bf16.msra.mxu1 %v7401_v22 }
 0x753   :  { %5352 = vmatprep.subr.bf16.mxu1 %v7406_v23 }
 0x756   :  { %5353 = vmatpush1.bf16.msra.mxu1 %v7404_v24 }
 0x757   :  { %5354 = vmatprep.subr.bf16.mxu1 %v7409_v25 }
 0x75a   :  { %5355 = vmatpush1.bf16.msra.mxu1 %v7407_v26 }
 0x75b   :  { %6272 = vmatprep.subr.bf16.mxu1 %v7410_v27 }
 0x7f0   :  { %v5107_v31 = vpop.f32.mrb[20].mxu1 }
 0x7f1   :  { %v5108_v32 = vadd.f32 %v5107_v31, %v4906_v29  ;;  %v5109_v33 = vpop.f32.mrb[21].mxu1 }
 0x7f2   :  { %v5110_v34 = vadd.f32 %v5109_v33, %v4910_v30  ;;  %v5111_v35 = vpop.f32.mrb[22].mxu1 }
 0x7f3   :  { %v5114_v36 = vmul.f32 0.2, %v5108_v32  ;;  %v5112_v37 = vpop.f32.mrb[23].mxu1 }
 0x7f4   :  { %v5115_v38 = vmul.f32 0.2, %v5110_v34 }
 0x7f5   :  { %v5116_v39 = vmax.f32 %v5108_v32, %v5114_v36 }
 0x7f6   :  { %v5117_v40 = vmax.f32 %v5110_v34, %v5115_v38 }
 0x7f7   :  { %v5118_v45 = vpack.c.bf16 %v5116_v39, %v5116_v39 }
 0x7f8   :  { %v5119_v42 = vpack.c.bf16 %v5117_v40, %v5117_v40 }
 0x7fa   :  { %5356 = vmatprep.mubr.bf16.mxu1 %v5119_v42 }
 0x7fb   :  { %5357 = vmatmul.mubr.bf16.vlgmr.msra.gmra.mrb[24].mxu1 %v5118_v45 }
 0x7fc   :  { %6273 = vmatpush3.bf16.msra.mxu1 %v7411_v44 }
 0x7fd   :  { %6274 = vmatprep.subr.bf16.mxu1 %v7412_v46 }
 0x800   :  { %6275 = vmatpush3.bf16.msra.mxu1 %v7413_v47 }
 0x801   :  { %6276 = vmatprep.subr.bf16.mxu1 %v7414_v48 }
 0x804   :  { %6277 = vmatpush3.bf16.msra.mxu1 %v7415_v49 }
 0x805   :  { %6278 = vmatprep.subr.bf16.mxu1 %v7416_v50 }
 0x808   :  { %6279 = vmatpush3.bf16.msra.mxu1 %v7417_v51 }
 0x809   :  { %6280 = vmatprep.subr.bf16.mxu1 %v7418_v52 }
 0x80c   :  { %6281 = vmatpush3.bf16.msra.mxu1 %v7419_v53 }
 0x80d   :  { %6282 = vmatprep.subr.bf16.mxu1 %v7420_v54 }
 0x810   :  { %6283 = vmatpush3.bf16.msra.mxu1 %v7421_v55 }
 0x811   :  { %6284 = vmatprep.subr.bf16.mxu1 %v7422_v56 }
 0x814   :  { %6285 = vmatpush3.bf16.msra.mxu1 %v7423_v57 }
 0x815   :  { %6286 = vmatprep.subr.bf16.mxu1 %v7424_v58 }
 0x818   :  { %6287 = vmatpush3.bf16.msra.mxu1 %v7425_v61 }
 0x8ce   :  { %v5358_v63 = vpop.f32.mrb[24].mxu1 }
 0x8cf   :  { %v5359_v0 = vadd.f32 %v5358_v63, %v5157_v59  ;;  %v5360_v1 = vpop.f32.mrb[25].mxu1 }
 0x8d0   :  { %v5361_v2 = vadd.f32 %v5360_v1, %v5161_v60  ;;  %v5362_v3 = vpop.f32.mrb[26].mxu1 }
 0x8d1   :  { %v5365_v4 = vmul.f32 0.2, %v5359_v0  ;;  %v5363_v5 = vpop.f32.mrb[27].mxu1 }
 0x8d2   :  { %v5366_v6 = vmul.f32 0.2, %v5361_v2 }
 0x8d3   :  { %v5367_v7 = vmax.f32 %v5359_v0, %v5365_v4 }
 0x8d4   :  { %v5368_v8 = vmax.f32 %v5361_v2, %v5366_v6 }
 0x8d5   :  { %v5369_v10 = vpack.c.bf16 %v5367_v7, %v5367_v7 }
 0x8d6   :  { %v5370_v9 = vpack.c.bf16 %v5368_v8, %v5368_v8 }
 0x8d8   :  { %5538 = vmatprep.mubr.bf16.mxu1 %v5370_v9 }
 0x8d9   :  { %5539 = vmatmul.mubr.bf16.vlgmr.msra.gmra.mrb[28].mxu1 %v5369_v10 }
 0x9ac   :  { %v6288_v11 = vpop.f32.mrb[28].mxu1 }
 0x9ad   :  { %v6289_v43 = vpop.f32.mrb[29].mxu1 }
 0x9ae   :  { %v6290_v12 = vadd.f32 %v6289_v43, %v6288_v11  ;;  %v6291_v13 = vpop.f32.mrb[30].mxu1 }
 0x9af   :  { %v6292_v14 = vpop.f32.mrb[31].mxu1 }
 0x9b0   :  { %v5541_v15 = vadd.f32 %v6290_v12, %v6255_v41 }
 0x9b2   :  { %5546 = vst [vmem:[%s9840_s17] sm:$0xff] %v5541_v15 }

</bundles_post_ra>
